<compile_context>
chip_gen: v5e
topology: v5e:2x2
jax: 0.10.0
libtpu: 0.0.40
codegen_flags: <defaults>
</compile_context>

<pallas_src>
import functools
import math

import jax
import jax.numpy as jnp
from jax.experimental import pallas as pl
from jax.experimental.pallas import tpu as pltpu


def _round_up(n, m):
    return ((n + m - 1) // m) * m


def _device_kind():
    try:
        return jax.devices()[0].device_kind.lower()
    except Exception:
        return ""


# -----------------------------------------------------------------------------
# Kernel: one (block_n, D) row tile of the SGRU cell.
#
#   x_ref, h_ref : (block_n, D)  bf16   activations
#   w_ref        : (2D, 5D)      bf16   combined gateW weight ([x,h] @ W + bW)
#   bw_ref       : (1, 5D)       f32
#   u_ref        : (2D, D)       bf16   combined gateU weight
#   bu_ref       : (1, D)        f32
#   out_ref      : (block_n, D)  bf16
#
# fuse_k=True  -> one K=2D dot per matmul (fills the 256-deep MXU, v6e/v7x)
# fuse_k=False -> two K=D dots summed in the f32 accumulator (v5e 128x128 MXU)
# -----------------------------------------------------------------------------
def sgru_kernel(x_ref, h_ref, w_ref, bw_ref, u_ref, bu_ref, out_ref, *, dim,
                fuse_k):
    D = dim
    xb = x_ref[...]                      # bf16 MXU operands straight from HBM
    hb = h_ref[...]
    x = xb.astype(jnp.float32)           # f32 copies for the elementwise tail
    h = hb.astype(jnp.float32)

    # ---- fused gate matmul: gates = [x, h] @ W + bW  -> (block_n, 5D) f32 ---
    if fuse_k:
        xh = jnp.concatenate([xb, hb], axis=1)            # (bn, 2D) bf16
        gates = jnp.dot(xh, w_ref[...], preferred_element_type=jnp.float32)
    else:
        gates = (jnp.dot(xb, w_ref[:D], preferred_element_type=jnp.float32)
                 + jnp.dot(hb, w_ref[D:], preferred_element_type=jnp.float32))
    gates = gates + bw_ref[...]          # single (1, 5D) broadcast bias add

    # Per-gate slices sit at multiples of D (=128) lanes -> lane-aligned.
    g0 = gates[:, 0 * D:1 * D]
    g1 = gates[:, 1 * D:2 * D]
    g2 = gates[:, 2 * D:3 * D]
    g3 = gates[:, 3 * D:4 * D]
    g4 = gates[:, 4 * D:5 * D]

    # sigmoid via exp + approximate reciprocal (EUP vrcp slot).
    rx = pl.reciprocal(1.0 + jnp.exp(-g0), approx=True)
    rh = pl.reciprocal(1.0 + jnp.exp(-g1), approx=True)

    # softmax over the 3 z-gates, per (row, feature)
    m = jnp.maximum(jnp.maximum(g2, g3), g4)
    e2 = jnp.exp(g2 - m)
    e3 = jnp.exp(g3 - m)
    e4 = jnp.exp(g4 - m)
    inv_den = pl.reciprocal(e2 + e3 + e4, approx=True)

    # ---- u = tanh([x*rx, h*rh] @ U + bU) ----
    xr = (x * rx).astype(jnp.bfloat16)
    hr = (h * rh).astype(jnp.bfloat16)
    if fuse_k:
        xhr = jnp.concatenate([xr, hr], axis=1)           # (bn, 2D) bf16
        u_pre = jnp.dot(xhr, u_ref[...], preferred_element_type=jnp.float32)
    else:
        u_pre = (jnp.dot(xr, u_ref[:D], preferred_element_type=jnp.float32)
                 + jnp.dot(hr, u_ref[D:], preferred_element_type=jnp.float32))
    u = jnp.tanh(u_pre + bu_ref[...])

    # h_new = x*z0 + h*z1 + u*z2  (z = softmax over the 3 z-gates)
    out_ref[...] = ((x * e2 + h * e3 + u * e4) * inv_den).astype(out_ref.dtype)


def sgru_pallas(x, h, kparams, *, block_n=None, fuse_k=None):
    """SGRUCell.forward.  x, h: (N, D) -> (N, D) bf16."""
    N, D = x.shape
    w5, bw5 = kparams["w5"], kparams["bw5"]
    u2, bu = kparams["u2"], kparams["bu"]

    kind = _device_kind()
    if fuse_k is None:
        # v5e MXU is 128x128: K=D already fills it; skip the concat there.
        fuse_k = "v5" not in kind
    if block_n is None:
        # v7x has 2 TCs: want >=2 grid steps per core so x/h/out DMA overlaps
        # compute.  Single-TC v5e/v6e: bigger tiles amortize per-step overhead
        # and make each DMA >=128 KiB.
        block_n = 128 if "v7" in kind else 512

    x = x.astype(jnp.bfloat16)
    h = h.astype(jnp.bfloat16)

    # Row-tile the batch axis; pad to a multiple of the tile if needed.
    block_n = min(block_n, _round_up(N, 8))
    Np = _round_up(N, block_n)
    if Np != N:
        # Padded rows produce junk (finite) values that are sliced off below;
        # never consume out[N:].
        x = jnp.pad(x, ((0, Np - N), (0, 0)))
        h = jnp.pad(h, ((0, Np - N), (0, 0)))
    grid = (Np // block_n,)

    bytes_io = (3 * Np * D * 2                       # x, h, out in bf16
                + w5.size * 2 + u2.size * 2          # bf16 weights
                + bw5.size * 4 + bu.size * 4)        # f32 biases
    cost = pl.CostEstimate(flops=2 * Np * (2 * D) * (6 * D),
                           transcendentals=9 * Np * D,
                           bytes_accessed=bytes_io)

    kernel = functools.partial(sgru_kernel, dim=D, fuse_k=fuse_k)
    out = pl.pallas_call(
        kernel,
        grid=grid,
        in_specs=[
            pl.BlockSpec((block_n, D), lambda i: (i, 0)),       # x
            pl.BlockSpec((block_n, D), lambda i: (i, 0)),       # h
            # Weights/biases: constant index_map -> VMEM-resident across steps.
            pl.BlockSpec((2 * D, 5 * D), lambda i: (0, 0)),     # W  (gateW)
            pl.BlockSpec((1, 5 * D), lambda i: (0, 0)),         # bW
            pl.BlockSpec((2 * D, D), lambda i: (0, 0)),         # U  (gateU)
            pl.BlockSpec((1, D), lambda i: (0, 0)),             # bU
        ],
        out_specs=pl.BlockSpec((block_n, D), lambda i: (i, 0)),
        out_shape=jax.ShapeDtypeStruct((Np, D), jnp.bfloat16),
        compiler_params=pltpu.CompilerParams(
            dimension_semantics=("parallel",)),      # row tiles shard over TCs
        cost_estimate=cost,
    )(x, h, w5, bw5, u2, bu)
    return out[:N]


# -----------------------------------------------------------------------------
# Parameter prep.  Layout convention (matches the torch module):
#   W  : (2D, 5D)  so that gates = [x, h] @ W + bW   (== torch gateW.weight.T)
#   U  : (2D, D)   so that u_pre = [x*rx, h*rh] @ U + bU
# Weights are stored bf16 (MXU operands), biases f32.
# -----------------------------------------------------------------------------
def prep_kernel_params(W, bW, U, bU, *, mxu_dtype=jnp.bfloat16):
    return {
        "w5": jnp.asarray(W, mxu_dtype),
        "bw5": jnp.asarray(bW, jnp.float32).reshape(1, -1),
        "u2": jnp.asarray(U, mxu_dtype),
        "bu": jnp.asarray(bU, jnp.float32).reshape(1, -1),
    }


# -----------------------------------------------------------------------------
# Pure-JAX reference (direct port of torch SGRUCell.forward, dropout p=0)
# -----------------------------------------------------------------------------
def sgru_reference(x, h, W, bW, U, bU):
    D = x.shape[1]
    inp = jnp.concatenate([x, h], axis=1)
    gates = inp @ W + bW
    g = [gates[:, k * D:(k + 1) * D] for k in range(5)]
    rx = jax.nn.sigmoid(g[0])
    rh = jax.nn.sigmoid(g[1])
    z = jax.nn.softmax(jnp.stack(g[2:5], axis=2), axis=-1)      # (N, D, 3)
    inp2 = jnp.concatenate([x * rx, h * rh], axis=1)
    u = jnp.tanh(inp2 @ U + bU)
    return (jnp.stack([x, h, u], axis=2) * z).sum(-1)


if __name__ == "__main__":
    # SGRUCell operates on flattened (batch*seq, hidden) rows.
    N, D = 512, 128            # e.g. batch=64, seq=8, hidden=128
    key = jax.random.PRNGKey(0)
    kx, kh, kw, kb, ku = jax.random.split(key, 5)
    x = jax.random.normal(kx, (N, D), jnp.float32)
    h = jax.random.normal(kh, (N, D), jnp.float32)
    W = jax.random.normal(kw, (2 * D, 5 * D), jnp.float32) / math.sqrt(2 * D)
    bW = 0.1 * jax.random.normal(kb, (5 * D,), jnp.float32)
    U = jax.random.normal(ku, (2 * D, D), jnp.float32) / math.sqrt(2 * D)
    bU = jnp.zeros((D,), jnp.float32)

    kparams = prep_kernel_params(W, bW, U, bU)

    # block_n / K-fusion auto-selected per TPU generation (see sgru_pallas).
    out = sgru_pallas(x, h, kparams)
    out = jax.block_until_ready(out)

    # f32 reference; bf16 I/O + bf16 weights + approx reciprocal bound the
    # error (eval-quality).
    ref = sgru_reference(x, h, W, bW, U, bU)
    diff = jnp.abs(out.astype(jnp.float32) - ref)
    err_max = float(jnp.max(diff))
    err_mean = float(jnp.mean(diff))
    assert out.shape == (N, D)
    assert err_max < 1e-1 and err_mean < 1e-2, (
        f"err vs reference: max={err_max} mean={err_mean}")
    print("KERNEL_OK")
</pallas_src>

<mosaic_0001>
module attributes {stable_mosaic.version = 11 : i64} {
  func.func @sgru_kernel(%arg0: i32, %arg1: memref<512x128xbf16, #tpu.memory_space<vmem>>, %arg2: memref<512x128xbf16, #tpu.memory_space<vmem>>, %arg3: memref<256x640xbf16, #tpu.memory_space<vmem>>, %arg4: memref<1x640xf32, #tpu.memory_space<vmem>>, %arg5: memref<256x128xbf16, #tpu.memory_space<vmem>>, %arg6: memref<1x128xf32, #tpu.memory_space<vmem>>, %arg7: memref<512x128xbf16, #tpu.memory_space<vmem>>) attributes {dimension_semantics = [#tpu.dimension_semantics<parallel>], iteration_bounds = array<i64: 1>, scalar_prefetch = 0 : i64, scratch_operands = 0 : i64, tpu.core_type = #tpu.core_type<tc>, window_params = [{transform_indices = @transform_0, window_bounds = array<i64: 512, 128>}, {transform_indices = @transform_1, window_bounds = array<i64: 512, 128>}, {pipeline_mode = #tpu.pipeline_mode<synchronous>, transform_indices = @transform_2, window_bounds = array<i64: 256, 640>}, {pipeline_mode = #tpu.pipeline_mode<synchronous>, transform_indices = @transform_3, window_bounds = array<i64: 1, 640>}, {pipeline_mode = #tpu.pipeline_mode<synchronous>, transform_indices = @transform_4, window_bounds = array<i64: 256, 128>}, {pipeline_mode = #tpu.pipeline_mode<synchronous>, transform_indices = @transform_5, window_bounds = array<i64: 1, 128>}, {transform_indices = @transform_6, window_bounds = array<i64: 512, 128>}]} {
    %c0 = arith.constant 0 : index
    %c0_0 = arith.constant 0 : index
    %0 = vector.load %arg1[%c0, %c0_0] : memref<512x128xbf16, #tpu.memory_space<vmem>>, vector<512x128xbf16>
    %c0_1 = arith.constant 0 : index
    %c0_2 = arith.constant 0 : index
    %1 = vector.load %arg2[%c0_1, %c0_2] : memref<512x128xbf16, #tpu.memory_space<vmem>>, vector<512x128xbf16>
    %2 = arith.extf %0 : vector<512x128xbf16> to vector<512x128xf32>
    %3 = arith.extf %1 : vector<512x128xbf16> to vector<512x128xf32>
    %4 = tpu.concatenate %0, %1 in 1 : vector<512x128xbf16>, vector<512x128xbf16> -> vector<512x256xbf16>
    %c0_3 = arith.constant 0 : index
    %c0_4 = arith.constant 0 : index
    %5 = vector.load %arg3[%c0_3, %c0_4] : memref<256x640xbf16, #tpu.memory_space<vmem>>, vector<256x640xbf16>
    %cst = arith.constant dense<0.000000e+00> : vector<512x640xf32>
    %6 = tpu.matmul %4, %5, %cst {dimension_numbers = #tpu.dot_dimension_numbers<[1], [0], [0], [1], [0, 0, 1, 1], [], []>} : vector<512x256xbf16>, vector<256x640xbf16>, vector<512x640xf32> -> vector<512x640xf32>
    %c0_5 = arith.constant 0 : index
    %c0_6 = arith.constant 0 : index
    %7 = vector.load %arg4[%c0_5, %c0_6] : memref<1x640xf32, #tpu.memory_space<vmem>>, vector<1x640xf32>
    %8 = vector.broadcast %7 : vector<1x640xf32> to vector<512x640xf32>
    %9 = arith.addf %6, %8 : vector<512x640xf32>
    %10 = vector.extract_strided_slice %9 {offsets = [0, 0], sizes = [512, 128], strides = [1, 1]} : vector<512x640xf32> to vector<512x128xf32>
    %11 = vector.extract_strided_slice %9 {offsets = [0, 128], sizes = [512, 128], strides = [1, 1]} : vector<512x640xf32> to vector<512x128xf32>
    %12 = vector.extract_strided_slice %9 {offsets = [0, 256], sizes = [512, 128], strides = [1, 1]} : vector<512x640xf32> to vector<512x128xf32>
    %13 = vector.extract_strided_slice %9 {offsets = [0, 384], sizes = [512, 128], strides = [1, 1]} : vector<512x640xf32> to vector<512x128xf32>
    %14 = vector.extract_strided_slice %9 {offsets = [0, 512], sizes = [512, 128], strides = [1, 1]} : vector<512x640xf32> to vector<512x128xf32>
    %cst_7 = arith.constant 0.000000e+00 : f32
    %15 = vector.broadcast %cst_7 : f32 to vector<512x128xf32>
    %16 = arith.subf %15, %10 : vector<512x128xf32>
    %17 = math.exp %16 : vector<512x128xf32>
    %cst_8 = arith.constant 1.000000e+00 : f32
    %18 = vector.broadcast %cst_8 : f32 to vector<512x128xf32>
    %19 = arith.addf %18, %17 : vector<512x128xf32>
    %20 = tpu.reciprocal %19 {approx = true} : vector<512x128xf32> -> vector<512x128xf32>
    %cst_9 = arith.constant 0.000000e+00 : f32
    %21 = vector.broadcast %cst_9 : f32 to vector<512x128xf32>
    %22 = arith.subf %21, %11 : vector<512x128xf32>
    %23 = math.exp %22 : vector<512x128xf32>
    %cst_10 = arith.constant 1.000000e+00 : f32
    %24 = vector.broadcast %cst_10 : f32 to vector<512x128xf32>
    %25 = arith.addf %24, %23 : vector<512x128xf32>
    %26 = tpu.reciprocal %25 {approx = true} : vector<512x128xf32> -> vector<512x128xf32>
    %27 = arith.maximumf %12, %13 : vector<512x128xf32>
    %28 = arith.maximumf %27, %14 : vector<512x128xf32>
    %29 = arith.subf %12, %28 : vector<512x128xf32>
    %30 = math.exp %29 : vector<512x128xf32>
    %31 = arith.subf %13, %28 : vector<512x128xf32>
    %32 = math.exp %31 : vector<512x128xf32>
    %33 = arith.subf %14, %28 : vector<512x128xf32>
    %34 = math.exp %33 : vector<512x128xf32>
    %35 = arith.addf %30, %32 : vector<512x128xf32>
    %36 = arith.addf %35, %34 : vector<512x128xf32>
    %37 = tpu.reciprocal %36 {approx = true} : vector<512x128xf32> -> vector<512x128xf32>
    %38 = arith.mulf %2, %20 : vector<512x128xf32>
    %39 = arith.truncf %38 : vector<512x128xf32> to vector<512x128xbf16>
    %40 = arith.mulf %3, %26 : vector<512x128xf32>
    %41 = arith.truncf %40 : vector<512x128xf32> to vector<512x128xbf16>
    %42 = tpu.concatenate %39, %41 in 1 : vector<512x128xbf16>, vector<512x128xbf16> -> vector<512x256xbf16>
    %c0_11 = arith.constant 0 : index
    %c0_12 = arith.constant 0 : index
    %43 = vector.load %arg5[%c0_11, %c0_12] : memref<256x128xbf16, #tpu.memory_space<vmem>>, vector<256x128xbf16>
    %cst_13 = arith.constant dense<0.000000e+00> : vector<512x128xf32>
    %44 = tpu.matmul %42, %43, %cst_13 {dimension_numbers = #tpu.dot_dimension_numbers<[1], [0], [0], [1], [0, 0, 1, 1], [], []>} : vector<512x256xbf16>, vector<256x128xbf16>, vector<512x128xf32> -> vector<512x128xf32>
    %c0_14 = arith.constant 0 : index
    %c0_15 = arith.constant 0 : index
    %45 = vector.load %arg6[%c0_14, %c0_15] : memref<1x128xf32, #tpu.memory_space<vmem>>, vector<1x128xf32>
    %46 = vector.broadcast %45 : vector<1x128xf32> to vector<512x128xf32>
    %47 = arith.addf %44, %46 : vector<512x128xf32>
    %48 = math.tanh %47 : vector<512x128xf32>
    %49 = arith.mulf %2, %30 : vector<512x128xf32>
    %50 = arith.mulf %3, %32 : vector<512x128xf32>
    %51 = arith.addf %49, %50 : vector<512x128xf32>
    %52 = arith.mulf %48, %34 : vector<512x128xf32>
    %53 = arith.addf %51, %52 : vector<512x128xf32>
    %54 = arith.mulf %53, %37 : vector<512x128xf32>
    %55 = arith.truncf %54 : vector<512x128xf32> to vector<512x128xbf16>
    %c0_16 = arith.constant 0 : index
    %c0_17 = arith.constant 0 : index
    %56 = vector.load %arg7[%c0_16, %c0_17] : memref<512x128xbf16, #tpu.memory_space<vmem>>, vector<512x128xbf16>
    tpu.vector_store %arg7[%c0_16, %c0_17], %55 {strides = array<i32>} : memref<512x128xbf16, #tpu.memory_space<vmem>>, vector<512x128xbf16>,
    return
  }
  func.func @transform_0(%arg0: i32) -> (i32, i32) {
    %c0_i32 = arith.constant 0 : i32
    %c0_i32_0 = arith.constant 0 : i32
    return %arg0, %c0_i32 : i32, i32
  }
  func.func @transform_1(%arg0: i32) -> (i32, i32) {
    %c0_i32 = arith.constant 0 : i32
    %c0_i32_0 = arith.constant 0 : i32
    return %arg0, %c0_i32 : i32, i32
  }
  func.func @transform_2(%arg0: i32) -> (i32, i32) {
    %c0_i32 = arith.constant 0 : i32
    %c0_i32_0 = arith.constant 0 : i32
    %c0_i32_1 = arith.constant 0 : i32
    return %c0_i32, %c0_i32_0 : i32, i32
  }
  func.func @transform_3(%arg0: i32) -> (i32, i32) {
    %c0_i32 = arith.constant 0 : i32
    %c0_i32_0 = arith.constant 0 : i32
    %c0_i32_1 = arith.constant 0 : i32
    return %c0_i32, %c0_i32_0 : i32, i32
  }
  func.func @transform_4(%arg0: i32) -> (i32, i32) {
    %c0_i32 = arith.constant 0 : i32
    %c0_i32_0 = arith.constant 0 : i32
    %c0_i32_1 = arith.constant 0 : i32
    return %c0_i32, %c0_i32_0 : i32, i32
  }
  func.func @transform_5(%arg0: i32) -> (i32, i32) {
    %c0_i32 = arith.constant 0 : i32
    %c0_i32_0 = arith.constant 0 : i32
    %c0_i32_1 = arith.constant 0 : i32
    return %c0_i32, %c0_i32_0 : i32, i32
  }
  func.func @transform_6(%arg0: i32) -> (i32, i32) {
    %c0_i32 = arith.constant 0 : i32
    %c0_i32_0 = arith.constant 0 : i32
    return %arg0, %c0_i32 : i32, i32
  }
}

</mosaic_0001>

<bundles_post_ra>
// kernel: tpu_custom_call.1
= control target key start
LH: loop header
LB: loop body
LE: loop exit
PB: predicated region body
PF: predicated region fallthrough
CT: control target
= control target key end

     0   :  { %11 = vsyncpa [#allocation3], 0  ;;  %s11179_s0 = inlined_call_operand.hbm [shape: bf16[512,128], index: 0, kind: input, shape index: {}]   ;;  %s11180_s1 = inlined_call_operand.hbm [shape: bf16[512,128], index: 1, kind: input, shape index: {}]   ;;  %s11181_s2 = inlined_call_operand.hbm [shape: bf16[256,640], index: 2, kind: input, shape index: {}]   ;;  %s11182_s3 = inlined_call_operand.hbm [shape: f32[1,640], index: 3, kind: input, shape index: {}]   ;;  %s11183_s4 = inlined_call_operand.hbm [shape: bf16[256,128], index: 4, kind: input, shape index: {}]   ;;  %s11184_s5 = inlined_call_operand.vmem [shape: f32[1,128], index: 5, kind: input, shape index: {}]   ;;  %s11185_s6 = inlined_call_operand.hbm [shape: bf16[512,128], index: 6, kind: output, shape index: {}]  }
   0x1   :  { %12 = vsyncpa [#allocation6], 0 }
   0x2   :  { %13 = vsyncpa [#allocation9], 0 }
   0x3   :  { %14 = vsyncpa [#allocation4], 0  ;;  %s32_s23 = sshll.u32 %s11180_s1, 4  ;;  %s8637_s24 = smov [#allocation5]   ;;  %s33_s23 = int_to_ptr.hbm [resolvable:$true] %s32_s23 }
   0x4   :  { %s34_s25 = sshll.u32 %s8637_s24, 4  ;;  %s59_s28 = sshll.u32 %s11182_s3, 4  ;;  %s35_s25 = int_to_ptr.vmem [resolvable:$true] %s34_s25  ;;  %s60_s28 = int_to_ptr.hbm [resolvable:$true] %s59_s28 }
   0x5   :  { %s8638_s29 = smov 64   ;;  %s8639_s30 = smov 4  }
   0x6   :  { %40 = dma.hbm_to_vmem [thread:$0]  %s33_s23, 4096, %s35_s25, [#allocation6], %s8638_s29, %s8638_s29, %s8639_s30  }
   0x7   :  { %s8640_s7 = smov [#allocation8]   ;;  %s19_s1 = sshll.u32 %s11179_s0, 4  ;;  %s20_s1 = int_to_ptr.hbm [resolvable:$true] %s19_s1 }
   0x8   :  { %s61_s8 = sshll.u32 %s8640_s7, 4  ;;  %s45_s3 = sshll.u32 %s11181_s2, 4  ;;  %s62_s8 = int_to_ptr.vmem [resolvable:$true] %s61_s8  ;;  %s46_s3 = int_to_ptr.hbm [resolvable:$true] %s45_s3 }
   0x9   :  { %64 = dma.hbm_to_vmem [thread:$0]  %s60_s28, 80, %s62_s8, [#allocation9]  }
   0xa   :  { %s8641_s13 = smov [#allocation2]   ;;  %s8642_s15 = smov [#allocation7]  }
   0xb   :  { %s21_s14 = sshll.u32 %s8641_s13, 4  ;;  %s47_s16 = sshll.u32 %s8642_s15, 4  ;;  %s22_s14 = int_to_ptr.vmem [resolvable:$true] %s21_s14  ;;  %s48_s16 = int_to_ptr.vmem [resolvable:$true] %s47_s16 }
   0xc   :  { %27 = dma.hbm_to_vmem [thread:$0]  %s20_s1, 4096, %s22_s14, [#allocation3], %s8638_s29, %s8638_s29, %s8639_s30  }
   0xd   :  { %s8643_s17 = smov 320   ;;  %s8644_s0 = smov 20  }
   0xe   :  { %53 = dma.hbm_to_vmem [thread:$0]  %s46_s3, 10240, %s48_s16, [#allocation6], %s8643_s17, %s8643_s17, %s8644_s0  }
   0xf   :  { %s69_s20 = sshll.u32 %s11183_s4, 4  ;;  %s8645_s2 = smov [#allocation10]   ;;  %s70_s20 = int_to_ptr.hbm [resolvable:$true] %s69_s20 }
  0x10   :  { %s71_s21 = sshll.u32 %s8645_s2, 4  ;;  %s72_s21 = int_to_ptr.vmem [resolvable:$true] %s71_s21 }
  0x11   :  { %77 = dma.hbm_to_vmem [thread:$0]  %s70_s20, 2048, %s72_s21, [#allocation9], %s8638_s29, %s8638_s29, %s8639_s30  }
  0x12   :  { %8629 = dma.done.wait [#allocation3], 4096  }
  0x13   :  { %8630 = vsyncadd [#allocation3], 4294963200 }
  0x14   :  { %8631 = dma.done.wait [#allocation6], 14336  }
  0x15   :  { %8632 = vsyncadd [#allocation6], 4294952960 }
  0x16   :  { %8633 = dma.done.wait [#allocation9], 2128  }
  0x17   :  { %8634 = vsyncadd [#allocation9], 4294965168  ;;  %v6595_v0 = vld [vmem:[#allocation7 + $0x118] sm:$0xf]  ;;  %v6938_v1 = vld [vmem:[#allocation7 + $0x128] sm:$0xf0] }
  0x18   :  { %v6755_v2 = vld [vmem:[#allocation7 + $0x258] sm:$0xf]  ;;  %v6596_v3 = vor.u32 %v6938_v1, %v6595_v0  ;;  %v6978_v4 = vld [vmem:[#allocation7 + $0x268] sm:$0xf0]  ;;  %v6936_v5 = vld [vmem:[#allocation7 + $0x11c] sm:$0xf] }
  0x19   :  { %v6597_v6 = vld [vmem:[#allocation7 + $0x12c] sm:$0xf0]  ;;  %v6756_v7 = vor.u32 %v6978_v4, %v6755_v2  ;;  %v6976_v9 = vld [vmem:[#allocation7 + $0x25c] sm:$0xf]  ;;  %v6933_v13 = vld [vmem:[#allocation7 + $0x100] sm:$0xf0] }
  0x1a   :  { %v6600_v8 = vor.u32 %v6936_v5, %v6597_v6  ;;  %v6757_v10 = vld [vmem:[#allocation7 + $0x26c] sm:$0xf0]  ;;  %1264 = vmatpush.bf16.msra.mxu0 %v6596_v3  ;;  %v6973_v15 = vld [vmem:[#allocation7 + $0x240] sm:$0xf0]  ;;  %v6931_v18 = vld [vmem:[#allocation7 + $0xf4] sm:$0xf] }
  0x1b   :  { %v6575_v11 = vld [vmem:[#allocation7 + $0xf0] sm:$0xf]  ;;  %v6760_v12 = vor.u32 %v6976_v9, %v6757_v10  ;;  %1433 = vmatpush.bf16.msra.mxu1 %v6756_v7  ;;  %v6577_v19 = vld [vmem:[#allocation7 + $0x104] sm:$0xf0]  ;;  %v6971_v20 = vld [vmem:[#allocation7 + $0x234] sm:$0xf] }
  0x1c   :  { %v6735_v14 = vld [vmem:[#allocation7 + $0x230] sm:$0xf]  ;;  %1602 = vmatpush.bf16.msra.mxu2 %v6600_v8  ;;  %v6576_v16 = vor.u32 %v6933_v13, %v6575_v11  ;;  %v6580_v21 = vor.u32 %v6931_v18, %v6577_v19  ;;  %v6737_v22 = vld [vmem:[#allocation7 + $0x244] sm:$0xf0]  ;;  %v6928_v24 = vld [vmem:[#allocation7 + $0xd8] sm:$0xf0] }
  0x1d   :  { %v6736_v17 = vor.u32 %v6973_v15, %v6735_v14  ;;  %1771 = vmatpush.bf16.msra.mxu3 %v6760_v12  ;;  %v6555_v23 = vld [vmem:[#allocation7 + $0xc8] sm:$0xf]  ;;  %v6740_v25 = vor.u32 %v6971_v20, %v6737_v22  ;;  %v6968_v27 = vld [vmem:[#allocation7 + $0x218] sm:$0xf0]  ;;  %v6926_v28 = vld [vmem:[#allocation7 + $0xcc] sm:$0xf] }
  0x1e   :  { %v6715_v26 = vld [vmem:[#allocation7 + $0x208] sm:$0xf]  ;;  %1265 = vmatpush.bf16.msra.mxu0 %v6576_v16  ;;  %v6556_v29 = vor.u32 %v6928_v24, %v6555_v23  ;;  %v6557_v30 = vld [vmem:[#allocation7 + $0xdc] sm:$0xf0]  ;;  %v6966_v31 = vld [vmem:[#allocation7 + $0x20c] sm:$0xf] }
  0x1f   :  { %v6717_v32 = vld [vmem:[#allocation7 + $0x21c] sm:$0xf0]  ;;  %1434 = vmatpush.bf16.msra.mxu1 %v6736_v17  ;;  %v6716_v33 = vor.u32 %v6968_v27, %v6715_v26  ;;  %v6560_v34 = vor.u32 %v6926_v28, %v6557_v30  ;;  %v6923_v36 = vld [vmem:[#allocation7 + $0xb0] sm:$0xf0]  ;;  %v6921_v40 = vld [vmem:[#allocation7 + $0xa4] sm:$0xf] }
  0x20   :  { %1603 = vmatpush.bf16.msra.mxu2 %v6580_v21  ;;  %v6535_v35 = vld [vmem:[#allocation7 + $0xa0] sm:$0xf]  ;;  %v6720_v38 = vor.u32 %v6966_v31, %v6717_v32  ;;  %v6963_v39 = vld [vmem:[#allocation7 + $0x1f0] sm:$0xf0]  ;;  %v6537_v41 = vld [vmem:[#allocation7 + $0xb4] sm:$0xf0] }
  0x21   :  { %v6695_v37 = vld [vmem:[#allocation7 + $0x1e0] sm:$0xf]  ;;  %1772 = vmatpush.bf16.msra.mxu3 %v6740_v25  ;;  %v6961_v42 = vld [vmem:[#allocation7 + $0x1e4] sm:$0xf]  ;;  %v6697_v43 = vld [vmem:[#allocation7 + $0x1f4] sm:$0xf0]  ;;  %v6536_v44 = vor.u32 %v6923_v36, %v6535_v35  ;;  %v6540_v46 = vor.u32 %v6921_v40, %v6537_v41 }
  0x22   :  { %1266 = vmatpush.bf16.msra.mxu0 %v6556_v29  ;;  %v6696_v45 = vor.u32 %v6963_v39, %v6695_v37  ;;  %v6515_v47 = vld [vmem:[#allocation7 + $0x78] sm:$0xf]  ;;  %v6918_v48 = vld [vmem:[#allocation7 + $0x88] sm:$0xf0]  ;;  %v6700_v50 = vor.u32 %v6961_v42, %v6697_v43  ;;  %v6916_v52 = vld [vmem:[#allocation7 + $0x7c] sm:$0xf] }
  0x23   :  { %1435 = vmatpush.bf16.msra.mxu1 %v6716_v33  ;;  %v6675_v49 = vld [vmem:[#allocation7 + $0x1b8] sm:$0xf]  ;;  %v6958_v51 = vld [vmem:[#allocation7 + $0x1c8] sm:$0xf0]  ;;  %v6517_v53 = vld [vmem:[#allocation7 + $0x8c] sm:$0xf0]  ;;  %v6516_v56 = vor.u32 %v6918_v48, %v6515_v47 }
  0x24   :  { %1604 = vmatpush.bf16.msra.mxu2 %v6560_v34  ;;  %v6956_v54 = vld [vmem:[#allocation7 + $0x1bc] sm:$0xf]  ;;  %v6677_v55 = vld [vmem:[#allocation7 + $0x1cc] sm:$0xf0]  ;;  %v6676_v57 = vor.u32 %v6958_v51, %v6675_v49  ;;  %v6520_v58 = vor.u32 %v6916_v52, %v6517_v53  ;;  %v6913_v60 = vld [vmem:[#allocation7 + $0x60] sm:$0xf0] }
  0x25   :  { %1773 = vmatpush.bf16.msra.mxu3 %v6720_v38  ;;  %v6495_v59 = vld [vmem:[#allocation7 + $0x50] sm:$0xf]  ;;  %v6680_v62 = vor.u32 %v6956_v54, %v6677_v55  ;;  %v6953_v63 = vld [vmem:[#allocation7 + $0x1a0] sm:$0xf0]  ;;  %v6911_v0 = vld [vmem:[#allocation7 + $0x54] sm:$0xf] }
  0x26   :  { %1267 = vmatpush.bf16.msra.mxu0 %v6536_v44  ;;  %v6655_v61 = vld [vmem:[#allocation7 + $0x190] sm:$0xf]  ;;  %v6497_v1 = vld [vmem:[#allocation7 + $0x64] sm:$0xf0]  ;;  %v6951_v2 = vld [vmem:[#allocation7 + $0x194] sm:$0xf]  ;;  %v6496_v4 = vor.u32 %v6913_v60, %v6495_v59 }
  0x27   :  { %1436 = vmatpush.bf16.msra.mxu1 %v6696_v45  ;;  %v6657_v3 = vld [vmem:[#allocation7 + $0x1a4] sm:$0xf0]  ;;  %v6656_v5 = vor.u32 %v6953_v63, %v6655_v61  ;;  %v6500_v6 = vor.u32 %v6911_v0, %v6497_v1  ;;  %v6908_v8 = vld [vmem:[#allocation7 + $0x38] sm:$0xf0]  ;;  %v6906_v12 = vld [vmem:[#allocation7 + $0x2c] sm:$0xf] }
  0x28   :  { %1605 = vmatpush.bf16.msra.mxu2 %v6540_v46  ;;  %v6475_v7 = vld [vmem:[#allocation7 + $0x28] sm:$0xf]  ;;  %v6660_v10 = vor.u32 %v6951_v2, %v6657_v3  ;;  %v6948_v11 = vld [vmem:[#allocation7 + $0x178] sm:$0xf0]  ;;  %v6477_v13 = vld [vmem:[#allocation7 + $0x3c] sm:$0xf0] }
  0x29   :  { %1774 = vmatpush.bf16.msra.mxu3 %v6700_v50  ;;  %v6635_v9 = vld [vmem:[#allocation7 + $0x168] sm:$0xf]  ;;  %v6946_v14 = vld [vmem:[#allocation7 + $0x16c] sm:$0xf]  ;;  %v6637_v15 = vld [vmem:[#allocation7 + $0x17c] sm:$0xf0]  ;;  %v6476_v16 = vor.u32 %v6908_v8, %v6475_v7  ;;  %v6480_v20 = vor.u32 %v6906_v12, %v6477_v13 }
  0x2a   :  { %1268 = vmatpush.bf16.msra.mxu0 %v6516_v56  ;;  %v6455_v17 = vld [vmem:[#allocation7] sm:$0xf]  ;;  %v6903_v18 = vld [vmem:[#allocation7 + $0x10] sm:$0xf0]  ;;  %v6636_v19 = vor.u32 %v6948_v11, %v6635_v9  ;;  %v6901_v23 = vld [vmem:[#allocation7 + $0x4] sm:$0xf]  ;;  %v6640_v24 = vor.u32 %v6946_v14, %v6637_v15 }
  0x2b   :  { %1437 = vmatpush.bf16.msra.mxu1 %v6676_v57  ;;  %v6615_v21 = vld [vmem:[#allocation7 + $0x140] sm:$0xf]  ;;  %v6943_v22 = vld [vmem:[#allocation7 + $0x150] sm:$0xf0]  ;;  %v6457_v25 = vld [vmem:[#allocation7 + $0x14] sm:$0xf0]  ;;  %v6456_v30 = vor.u32 %v6903_v18, %v6455_v17 }
  0x2c   :  { %1606 = vmatpush.bf16.msra.mxu2 %v6520_v58  ;;  %v6941_v26 = vld [vmem:[#allocation7 + $0x144] sm:$0xf]  ;;  %v6617_v27 = vld [vmem:[#allocation7 + $0x154] sm:$0xf0]  ;;  %v6603_v28 = vld [vmem:[#allocation7 + $0x120] sm:$0xf]  ;;  %v6616_v33 = vor.u32 %v6943_v22, %v6615_v21  ;;  %v6460_v34 = vor.u32 %v6901_v23, %v6457_v25 }
  0x2d   :  { %1775 = vmatpush.bf16.msra.mxu3 %v6680_v62  ;;  %v6939_v29 = vld [vmem:[#allocation7 + $0x130] sm:$0xf0]  ;;  %v6763_v31 = vld [vmem:[#allocation7 + $0x260] sm:$0xf]  ;;  %v6620_v35 = vor.u32 %v6941_v26, %v6617_v27  ;;  %v6937_v37 = vld [vmem:[#allocation7 + $0x124] sm:$0xf] }
  0x2e   :  { %1269 = vmatpush.bf16.msra.mxu0 %v6496_v4  ;;  %v6979_v32 = vld [vmem:[#allocation7 + $0x270] sm:$0xf0]  ;;  %v6604_v36 = vor.u32 %v6939_v29, %v6603_v28  ;;  %v6605_v38 = vld [vmem:[#allocation7 + $0x134] sm:$0xf0]  ;;  %v6837_v39 = vld [vmem:[#allocation2] sm:$0xff]  ;;  %s6182_s11 = sshll.u32 %s11185_s6, 4  ;;  %s6183_s11 = int_to_ptr.hbm [resolvable:$true] %s6182_s11 }
  0x2f   :  { %1438 = vmatpush.bf16.msra.mxu1 %v6656_v5  ;;  %v6764_v40 = vor.u32 %v6979_v32, %v6763_v31  ;;  %v6977_v41 = vld [vmem:[#allocation7 + $0x264] sm:$0xf]  ;;  %v6765_v42 = vld [vmem:[#allocation7 + $0x274] sm:$0xf0]  ;;  %v6608_v44 = vor.u32 %v6937_v37, %v6605_v38  ;;  %v6838_v46 = vld [vmem:[#allocation2 + $0x8] sm:$0xff] }
  0x30   :  { %1607 = vmatpush.bf16.msra.mxu2 %v6500_v6  ;;  %v6869_v43 = vld [vmem:[#allocation5] sm:$0xff]  ;;  %v6768_v45 = vor.u32 %v6977_v41, %v6765_v42  ;;  %v6870_v47 = vld [vmem:[#allocation5 + $0x8] sm:$0xff]  ;;  %v6839_v48 = vld [vmem:[#allocation2 + $0x10] sm:$0xff] }
  0x31   :  { %1776 = vmatpush.bf16.msra.mxu3 %v6660_v10  ;;  %v6871_v49 = vld [vmem:[#allocation5 + $0x10] sm:$0xff]  ;;  %v6583_v50 = vld [vmem:[#allocation7 + $0xf8] sm:$0xf]  ;;  %v6934_v51 = vld [vmem:[#allocation7 + $0x108] sm:$0xf0] }
  0x32   :  { %1270 = vmatpush.bf16.msra.mxu0 %v6476_v16  ;;  %v6743_v52 = vld [vmem:[#allocation7 + $0x238] sm:$0xf]  ;;  %v6584_v53 = vor.u32 %v6934_v51, %v6583_v50  ;;  %v6974_v54 = vld [vmem:[#allocation7 + $0x248] sm:$0xf0]  ;;  %v6932_v55 = vld [vmem:[#allocation7 + $0xfc] sm:$0xf] }
  0x33   :  { %1439 = vmatpush.bf16.msra.mxu1 %v6636_v19  ;;  %v6585_v56 = vld [vmem:[#allocation7 + $0x10c] sm:$0xf0]  ;;  %v6744_v57 = vor.u32 %v6974_v54, %v6743_v52  ;;  %v6972_v59 = vld [vmem:[#allocation7 + $0x23c] sm:$0xf]  ;;  %v6841_v0 = vld [vmem:[#allocation2 + $0x20] sm:$0xff] }
  0x34   :  { %1608 = vmatpush.bf16.msra.mxu2 %v6480_v20  ;;  %v6588_v58 = vor.u32 %v6932_v55, %v6585_v56  ;;  %v6745_v60 = vld [vmem:[#allocation7 + $0x24c] sm:$0xf0]  ;;  %v6840_v62 = vld [vmem:[#allocation2 + $0x18] sm:$0xff]  ;;  %v6873_v1 = vld [vmem:[#allocation5 + $0x20] sm:$0xff] }
  0x35   :  { %1777 = vmatpush.bf16.msra.mxu3 %v6640_v24  ;;  %v6748_v61 = vor.u32 %v6972_v59, %v6745_v60  ;;  %v6872_v63 = vld [vmem:[#allocation5 + $0x18] sm:$0xff]  ;;  %v6842_v2 = vld [vmem:[#allocation2 + $0x28] sm:$0xff]  ;;  %v6843_v4 = vld [vmem:[#allocation2 + $0x30] sm:$0xff] }
  0x36   :  { %1271 = vmatpush.bf16.msra.mxu0 %v6456_v30  ;;  %v6874_v3 = vld [vmem:[#allocation5 + $0x28] sm:$0xff]  ;;  %v6875_v5 = vld [vmem:[#allocation5 + $0x30] sm:$0xff]  ;;  %v6844_v6 = vld [vmem:[#allocation2 + $0x38] sm:$0xff] }
  0x37   :  { %1440 = vmatpush.bf16.msra.mxu1 %v6616_v33  ;;  %v6876_v7 = vld [vmem:[#allocation5 + $0x38] sm:$0xff]  ;;  %v836_v8 = vld [vmem:[#allocation8] sm:$0x1f]  ;;  %v6563_v10 = vld [vmem:[#allocation7 + $0xd0] sm:$0xf] }
  0x38   :  { %1609 = vmatpush.bf16.msra.mxu2 %v6460_v34  ;;  %v8706_v9 = vperm.slane %v836_v8, 0  ;;  %v6929_v11 = vld [vmem:[#allocation7 + $0xe0] sm:$0xf0]  ;;  %v6723_v12 = vld [vmem:[#allocation7 + $0x210] sm:$0xf]  ;;  %v8709_v22 = vperm.slane %v836_v8, 1 }
  0x39   :  { %1778 = vmatpush.bf16.msra.mxu3 %v6620_v35  ;;  %1272 = vmatmul.bf16.vlgmr.msra.gmra.mxu0 %v6837_v39  ;;  %v6564_v13 = vor.u32 %v6929_v11, %v6563_v10  ;;  %v6969_v14 = vld [vmem:[#allocation7 + $0x220] sm:$0xf0]  ;;  %v6927_v24 = vld [vmem:[#allocation7 + $0xd4] sm:$0xf]  ;;  %v6565_v25 = vld [vmem:[#allocation7 + $0xe4] sm:$0xf0] }
  0x3a   :  { %1940 = vmatpush.bf16.msrb.mxu0 %v6604_v36  ;;  %1441 = vmatmul.bf16.vlgmr.msra.gmra.mxu1 %v6869_v43  ;;  %v6845_v15 = vld [vmem:[#allocation2 + $0x40] sm:$0xff]  ;;  %v6724_v16 = vor.u32 %v6969_v14, %v6723_v12  ;;  %v6568_v26 = vor.u32 %v6927_v24, %v6565_v25  ;;  %v6967_v27 = vld [vmem:[#allocation7 + $0x214] sm:$0xf]  ;;  %v6725_v28 = vld [vmem:[#allocation7 + $0x224] sm:$0xf0] }
  0x3b   :  { %2109 = vmatpush.bf16.msrb.mxu1 %v6764_v40  ;;  %1610 = vmatmul.bf16.vlgmr.msra.gmra.mxu2 %v6837_v39  ;;  %v6877_v18 = vld [vmem:[#allocation5 + $0x40] sm:$0xff]  ;;  %v6728_v31 = vor.u32 %v6967_v27, %v6725_v28  ;;  %v6878_v50 = vld [vmem:[#allocation5 + $0x48] sm:$0xff]  ;;  %v6847_v24 = vld [vmem:[#allocation2 + $0x50] sm:$0xff] }
  0x3c   :  { %1779 = vmatmul.bf16.vlgmr.msra.gmra.mxu3 %v6869_v43  ;;  %2278 = vmatpush.bf16.msrb.mxu2 %v6608_v44  ;;  %v8720_v10 = vld [vmem:[#allocation5] sm:$0xff]  }
  0x3d   :  { %2447 = vmatpush.bf16.msrb.mxu3 %v6768_v45  ;;  %v6846_v45 = vld [vmem:[#allocation2 + $0x48] sm:$0xff]  ;;  %11658 = vst [vmem:[#allocation17_spill] sm:$0xff] %v8720_v10 }
  0x3e   :  { %1941 = vmatpush.bf16.msrb.mxu0 %v6584_v53 }
  0x3f   :  { %2110 = vmatpush.bf16.msrb.mxu1 %v6744_v57 }
  0x40   :  { %2279 = vmatpush.bf16.msrb.mxu2 %v6588_v58  ;;  %v8715_v58 = vld [vmem:[#allocation2] sm:$0xff]  }
  0x41   :  { %2448 = vmatpush.bf16.msrb.mxu3 %v6748_v61  ;;  %11657 = vst [vmem:[#allocation16_spill] sm:$0xff] %v8715_v58  ;;  %v11202_v14 = vunpack.c.h.bf16 %v8715_v58 }
  0x42   :  { %1942 = vmatpush.bf16.msrb.mxu0 %v6564_v13 }
  0x43   :  { %2111 = vmatpush.bf16.msrb.mxu1 %v6724_v16 }
  0x44   :  { %2280 = vmatpush.bf16.msrb.mxu2 %v6568_v26 }
  0x45   :  { %2449 = vmatpush.bf16.msrb.mxu3 %v6728_v31 }
  0x49   :  { %1277 = vmatmul.bf16.gmra.mxu0 %v6838_v46 }
  0x4a   :  { %1446 = vmatmul.bf16.gmra.mxu1 %v6870_v47 }
  0x4b   :  { %1615 = vmatmul.bf16.gmra.mxu2 %v6838_v46 }
  0x4c   :  { %1784 = vmatmul.bf16.gmra.mxu3 %v6870_v47 }
  0x59   :  { %1282 = vmatmul.bf16.gmra.mxu0 %v6839_v48 }
  0x5a   :  { %1451 = vmatmul.bf16.gmra.mxu1 %v6871_v49 }
  0x5b   :  { %1620 = vmatmul.bf16.gmra.mxu2 %v6839_v48 }
  0x5c   :  { %1789 = vmatmul.bf16.gmra.mxu3 %v6871_v49 }
  0x69   :  { %1287 = vmatmul.bf16.gmra.mxu0 %v6840_v62 }
  0x6a   :  { %1456 = vmatmul.bf16.gmra.mxu1 %v6872_v63 }
  0x6b   :  { %1625 = vmatmul.bf16.gmra.mxu2 %v6840_v62 }
  0x6c   :  { %1794 = vmatmul.bf16.gmra.mxu3 %v6872_v63 }
  0x79   :  { %1292 = vmatmul.bf16.gmra.mxu0 %v6841_v0 }
  0x7a   :  { %1461 = vmatmul.bf16.gmra.mxu1 %v6873_v1 }
  0x7b   :  { %1630 = vmatmul.bf16.gmra.mxu2 %v6841_v0 }
  0x7c   :  { %1799 = vmatmul.bf16.gmra.mxu3 %v6873_v1 }
  0x89   :  { %1297 = vmatmul.bf16.gmra.mxu0 %v6842_v2 }
  0x8a   :  { %1466 = vmatmul.bf16.gmra.mxu1 %v6874_v3 }
  0x8b   :  { %1635 = vmatmul.bf16.gmra.mxu2 %v6842_v2 }
  0x8c   :  { %1804 = vmatmul.bf16.gmra.mxu3 %v6874_v3 }
  0x99   :  { %1302 = vmatmul.bf16.gmra.mxu0 %v6843_v4 }
  0x9a   :  { %1471 = vmatmul.bf16.gmra.mxu1 %v6875_v5 }
  0x9b   :  { %1640 = vmatmul.bf16.gmra.mxu2 %v6843_v4  ;;  %v11206_v4 = vunpack.c.l.bf16 %v8715_v58  ;;  %v6663_v58 = vld [vmem:[#allocation7 + $0x198] sm:$0xf] }
  0x9c   :  { %1809 = vmatmul.bf16.gmra.mxu3 %v6875_v5 }
  0xa9   :  { %1307 = vmatmul.bf16.gmra.mxu0 %v6844_v6 }
  0xaa   :  { %1476 = vmatmul.bf16.gmra.mxu1 %v6876_v7 }
  0xab   :  { %1645 = vmatmul.bf16.gmra.mxu2 %v6844_v6 }
  0xac   :  { %1814 = vmatmul.bf16.gmra.mxu3 %v6876_v7 }
  0xb6   :  { %v1273_v17 = vpop.f32.mrf.mxu0 }
  0xb7   :  { %v1274_v19 = vadd.f32 %v1273_v17, %v8706_v9  ;;  %v1442_v20 = vpop.f32.mrf.mxu1  ;;  %v11205_v17 = vunpack.c.l.bf16 %v8720_v10 }
  0xb9   :  { %v1443_v21 = vadd.f32 %v1442_v20, %v1274_v19  ;;  %1312 = vmatmul.bf16.gmra.mxu0 %v6845_v15 }
  0xba   :  { %1481 = vmatmul.bf16.gmra.mxu1 %v6877_v18 }
  0xbb   :  { %1650 = vmatmul.bf16.gmra.mxu2 %v6845_v15  ;;  %v2954_v23 = vsub.f32 0.0, %v1443_v21 }
  0xbc   :  { %1819 = vmatmul.bf16.gmra.mxu3 %v6877_v18 }
  0xbd   :  { %v3018_v29 = vmul.f32 1.442695, %v2954_v23 }
  0xbe   :  { %v1611_v30 = vpop.f32.mrf.mxu2  ;;  %v1275_v34 = vpop.f32.mrf.mxu0 }
  0xbf   :  { %v1612_v32 = vadd.f32 %v1611_v30, %v8709_v22  ;;  %v1780_v33 = vpop.f32.mrf.mxu3  ;;  %7199 = vpow2.f32 %v3018_v29  ;;  %v1276_v35 = vadd.f32 %v1275_v34, %v8706_v9  ;;  %v1444_v36 = vpop.f32.mrf.mxu1  ;;  %v6879_v29 = vld [vmem:[#allocation5 + $0x50] sm:$0xff] }
  0xc1   :  { %v1781_v37 = vadd.f32 %v1780_v33, %v1612_v32  ;;  %v1445_v38 = vadd.f32 %v1444_v36, %v1276_v35 }
  0xc3   :  { %v3274_v39 = vsub.f32 0.0, %v1781_v37  ;;  %v2955_v40 = vsub.f32 0.0, %v1445_v38 }
  0xc5   :  { %v3338_v41 = vmul.f32 1.442695, %v3274_v39  ;;  %v7200_v42 = vpop.eup %7199  ;;  %v3020_v43 = vmul.f32 1.442695, %v2955_v40  ;;  %v11201_v40 = vunpack.c.h.bf16 %v8720_v10  ;;  %v6914_v10 = vld [vmem:[#allocation7 + $0x68] sm:$0xf0] }
  0xc6   :  { %v1613_v44 = vpop.f32.mrf.mxu2  ;;  %v3146_v46 = vadd.f32 1.0, %v7200_v42  ;;  %v1278_v49 = vpop.f32.mrf.mxu0 }
  0xc7   :  { %7201 = vpow2.f32 %v3338_v41  ;;  %v1614_v47 = vadd.f32 %v1613_v44, %v8709_v22  ;;  %v1782_v48 = vpop.f32.mrf.mxu3  ;;  %v1279_v51 = vadd.f32 %v1278_v49, %v8706_v9  ;;  %v1447_v52 = vpop.f32.mrf.mxu1 }
  0xc8   :  { %7203 = vpow2.f32 %v3020_v43 }
  0xc9   :  { %v1783_v53 = vadd.f32 %v1782_v48, %v1614_v47  ;;  %v1448_v54 = vadd.f32 %v1447_v52, %v1279_v51  ;;  %1317 = vmatmul.bf16.gmra.mxu0 %v6846_v45  ;;  %7205 = vrcp.f32 %v3146_v46  ;;  %v8737_v48 = vld [vmem:[#allocation2 + $0x8] sm:$0xff]  }
  0xca   :  { %1486 = vmatmul.bf16.gmra.mxu1 %v6878_v50  ;;  %11659 = vst [vmem:[#allocation18_spill] sm:$0xff] %v8737_v48 }
  0xcb   :  { %v3275_v55 = vsub.f32 0.0, %v1783_v53  ;;  %1655 = vmatmul.bf16.gmra.mxu2 %v6846_v45  ;;  %v2956_v56 = vsub.f32 0.0, %v1448_v54  ;;  %v8940_v53 = vld [vmem:[#allocation5 + $0x38] sm:$0xff]  }
  0xcc   :  { %1824 = vmatmul.bf16.gmra.mxu3 %v6878_v50  ;;  %11672 = vst [vmem:[#allocation31_spill] sm:$0xff] %v8940_v53 }
  0xcd   :  { %v7202_v57 = vpop.eup %7201  ;;  %v3340_v59 = vmul.f32 1.442695, %v3275_v55  ;;  %v3022_v62 = vmul.f32 1.442695, %v2956_v56 }
  0xce   :  { %v7204_v60 = vpop.eup %7203  ;;  %v3466_v61 = vadd.f32 1.0, %v7202_v57  ;;  %v1616_v63 = vpop.f32.mrf.mxu2 }
  0xcf   :  { %v3147_v0 = vadd.f32 1.0, %v7204_v60  ;;  %7207 = vpow2.f32 %v3340_v59  ;;  %v1617_v1 = vadd.f32 %v1616_v63, %v8709_v22  ;;  %v1785_v2 = vpop.f32.mrf.mxu3  ;;  %v1280_v3 = vpop.f32.mrf.mxu0  ;;  %v11200_v63 = vunpack.c.l.bf16 %v8737_v48 }
  0xd0   :  { %7209 = vrcp.f32 %v3466_v61  ;;  %v1281_v5 = vadd.f32 %v1280_v3, %v8706_v9  ;;  %v1449_v6 = vpop.f32.mrf.mxu1  ;;  %v7206_v7 = vpop.eup %7205 }
  0xd1   :  { %7211 = vrcp.f32 %v3147_v0  ;;  %v1786_v8 = vadd.f32 %v1785_v2, %v1617_v1  ;;  %v4490_v13 = vmul.f32 %v7206_v7, %v11206_v4 }
  0xd2   :  { %7213 = vpow2.f32 %v3022_v62  ;;  %v1450_v11 = vadd.f32 %v1449_v6, %v1281_v5  ;;  %v8748_v6 = vld [vmem:[#allocation5 + $0x8] sm:$0xff]  }
  0xd3   :  { %v3276_v12 = vsub.f32 0.0, %v1786_v8  ;;  %v4554_v31 = vpack.c.bf16 %v4490_v13, %v4490_v13  ;;  %11660 = vst [vmem:[#allocation19_spill] sm:$0xff] %v8748_v6 }
  0xd4   :  { %v2957_v15 = vsub.f32 0.0, %v1450_v11 }
  0xd5   :  { %v7208_v16 = vpop.eup %7207  ;;  %v3342_v18 = vmul.f32 1.442695, %v3276_v12  ;;  %v8733_v42 = vunpack.c.l.b16 %v4554_v31 }
  0xd6   :  { %v7210_v19 = vpop.eup %7209  ;;  %v3467_v20 = vadd.f32 1.0, %v7208_v16  ;;  %v3024_v21 = vmul.f32 1.442695, %v2957_v15  ;;  %v1618_v23 = vpop.f32.mrf.mxu2 }
  0xd7   :  { %v7212_v25 = vpop.eup %7211  ;;  %7215 = vpow2.f32 %v3342_v18  ;;  %v1619_v26 = vadd.f32 %v1618_v23, %v8709_v22  ;;  %v1787_v27 = vpop.f32.mrf.mxu3  ;;  %v4618_v35 = vmul.f32 %v7210_v19, %v11205_v17  ;;  %v11196_v18 = vunpack.c.h.bf16 %v8737_v48 }
  0xd8   :  { %v1283_v28 = vpop.f32.mrf.mxu0  ;;  %v7214_v30 = vpop.eup %7213  ;;  %v4491_v32 = vmul.f32 %v7212_v25, %v11202_v14  ;;  %7217 = vrcp.f32 %v3467_v20  ;;  %v11199_v19 = vunpack.c.l.bf16 %v8748_v6  ;;  %v6848_v25 = vld [vmem:[#allocation2 + $0x58] sm:$0xff] }
  0xd9   :  { %v1284_v33 = vadd.f32 %v1283_v28, %v8706_v9  ;;  %v1452_v34 = vpop.f32.mrf.mxu1  ;;  %v3148_v36 = vadd.f32 1.0, %v7214_v30  ;;  %7219 = vpow2.f32 %v3024_v21  ;;  %v1788_v37 = vadd.f32 %v1787_v27, %v1619_v26  ;;  %1322 = vmatmul.bf16.gmra.mxu0 %v6847_v24  ;;  %v6880_v30 = vld [vmem:[#allocation5 + $0x58] sm:$0xff] }
  0xda   :  { %v4555_v38 = vpack.c.bf16 %v4491_v32, %v4491_v32  ;;  %1491 = vmatmul.bf16.gmra.mxu1 %v6879_v29  ;;  %v4682_v46 = vpack.c.bf16 %v4618_v35, %v4618_v35 }
  0xdb   :  { %v1453_v39 = vadd.f32 %v1452_v34, %v1284_v33  ;;  %7221 = vrcp.f32 %v3148_v36  ;;  %v3277_v41 = vsub.f32 0.0, %v1788_v37  ;;  %1660 = vmatmul.bf16.gmra.mxu2 %v6847_v24 }
  0xdc   :  { %v8735_v43 = vunpack.c.l.b16 %v4555_v38  ;;  %1829 = vmatmul.bf16.gmra.mxu3 %v6879_v29  ;;  %v8746_v1 = vunpack.c.l.b16 %v4682_v46  ;;  %v11195_v46 = vunpack.c.h.bf16 %v8748_v6 }
  0xdd   :  { %v2958_v44 = vsub.f32 0.0, %v1453_v39  ;;  %v7216_v45 = vpop.eup %7215  ;;  %v3344_v47 = vmul.f32 1.442695, %v3277_v41  ;;  %v6543_v41 = vld [vmem:[#allocation7 + $0xa8] sm:$0xf] }
  0xde   :  { %v7218_v49 = vpop.eup %7217  ;;  %v3468_v50 = vadd.f32 1.0, %v7216_v45  ;;  %v1621_v52 = vpop.f32.mrf.mxu2  ;;  %v6703_v45 = vld [vmem:[#allocation7 + $0x1e8] sm:$0xf] }
  0xdf   :  { %v3026_v51 = vmul.f32 1.442695, %v2958_v44  ;;  %v7220_v54 = vpop.eup %7219  ;;  %v4619_v55 = vmul.f32 %v7218_v49, %v11201_v40  ;;  %7223 = vpow2.f32 %v3344_v47  ;;  %v1622_v56 = vadd.f32 %v1621_v52, %v8709_v22  ;;  %v1790_v57 = vpop.f32.mrf.mxu3  ;;  %v6924_v44 = vld [vmem:[#allocation7 + $0xb8] sm:$0xf0] }
  0xe0   :  { %v1285_v59 = vpop.f32.mrf.mxu0  ;;  %7225 = vrcp.f32 %v3468_v50  ;;  %v3149_v60 = vadd.f32 1.0, %v7220_v54  ;;  %v6544_v49 = vor.u32 %v6924_v44, %v6543_v41  ;;  %v6964_v50 = vld [vmem:[#allocation7 + $0x1f8] sm:$0xf0] }
  0xe1   :  { %v1286_v61 = vadd.f32 %v1285_v59, %v8706_v9  ;;  %v1454_v62 = vpop.f32.mrf.mxu1  ;;  %v7222_v0 = vpop.eup %7221  ;;  %v4683_v2 = vpack.c.bf16 %v4619_v55, %v4619_v55  ;;  %7227 = vpow2.f32 %v3026_v51  ;;  %v1791_v3 = vadd.f32 %v1790_v57, %v1622_v56 }
  0xe2   :  { %7229 = vrcp.f32 %v3149_v60  ;;  %v4492_v12 = vmul.f32 %v7222_v0, %v11200_v63  ;;  %v6704_v54 = vor.u32 %v6964_v50, %v6703_v45  ;;  %1943 = vmatpush.bf16.msrb.mxu0 %v6544_v49  ;;  %v8876_v63 = vld [vmem:[#allocation5 + $0x28] sm:$0xff]  }
  0xe3   :  { %v1455_v5 = vadd.f32 %v1454_v62, %v1286_v61  ;;  %v8750_v7 = vunpack.c.l.b16 %v4683_v2  ;;  %v3278_v8 = vsub.f32 0.0, %v1791_v3  ;;  %v8769_v61 = vld [vmem:[#allocation2 + $0x10] sm:$0xff]   ;;  %11668 = vst [vmem:[#allocation27_spill] sm:$0xff] %v8876_v63 }
  0xe4   :  { %v4556_v35 = vpack.c.bf16 %v4492_v12, %v4492_v12  ;;  %11661 = vst [vmem:[#allocation20_spill] sm:$0xff] %v8769_v61  ;;  %2112 = vmatpush.bf16.msrb.mxu1 %v6704_v54  ;;  %v11190_v49 = vunpack.c.h.bf16 %v8769_v61 }
  0xe5   :  { %v2959_v11 = vsub.f32 0.0, %v1455_v5  ;;  %v7224_v13 = vpop.eup %7223  ;;  %v3346_v15 = vmul.f32 1.442695, %v3278_v8 }
  0xe6   :  { %v7226_v20 = vpop.eup %7225  ;;  %v3469_v21 = vadd.f32 1.0, %v7224_v13  ;;  %v1623_v24 = vpop.f32.mrf.mxu2  ;;  %v8765_v57 = vunpack.c.l.b16 %v4556_v35 }
  0xe7   :  { %v3028_v23 = vmul.f32 1.442695, %v2959_v11  ;;  %v7228_v26 = vpop.eup %7227  ;;  %7231 = vpow2.f32 %v3346_v15  ;;  %v1624_v27 = vadd.f32 %v1623_v24, %v8709_v22  ;;  %v1792_v28 = vpop.f32.mrf.mxu3  ;;  %v4620_v38 = vmul.f32 %v7226_v20, %v11199_v19 }
  0xe8   :  { %v1288_v29 = vpop.f32.mrf.mxu0  ;;  %v7230_v31 = vpop.eup %7229  ;;  %7233 = vrcp.f32 %v3469_v21  ;;  %v3150_v32 = vadd.f32 1.0, %v7228_v26  ;;  %v11194_v24 = vunpack.c.l.bf16 %v8769_v61 }
  0xe9   :  { %v1289_v33 = vadd.f32 %v1288_v29, %v8706_v9  ;;  %v1457_v34 = vpop.f32.mrf.mxu1  ;;  %7235 = vpow2.f32 %v3028_v23  ;;  %v1793_v36 = vadd.f32 %v1792_v28, %v1624_v27  ;;  %v4493_v37 = vmul.f32 %v7230_v31, %v11196_v18  ;;  %1327 = vmatmul.bf16.gmra.mxu0 %v6848_v25  ;;  %v8780_v29 = vld [vmem:[#allocation5 + $0x10] sm:$0xff]   ;;  %v6922_v31 = vld [vmem:[#allocation7 + $0xac] sm:$0xf] }
  0xea   :  { %7237 = vrcp.f32 %v3150_v32  ;;  %1496 = vmatmul.bf16.gmra.mxu1 %v6880_v30  ;;  %v4684_v60 = vpack.c.bf16 %v4620_v38, %v4620_v38  ;;  %11662 = vst [vmem:[#allocation21_spill] sm:$0xff] %v8780_v29  ;;  %v6545_v32 = vld [vmem:[#allocation7 + $0xbc] sm:$0xf0]  ;;  %v11193_v50 = vunpack.c.l.bf16 %v8780_v29 }
  0xeb   :  { %v1458_v39 = vadd.f32 %v1457_v34, %v1289_v33  ;;  %v3279_v47 = vsub.f32 0.0, %v1793_v36  ;;  %1665 = vmatmul.bf16.gmra.mxu2 %v6848_v25  ;;  %v4557_v51 = vpack.c.bf16 %v4493_v37, %v4493_v37  ;;  %v6962_v33 = vld [vmem:[#allocation7 + $0x1ec] sm:$0xf]  ;;  %v6548_v35 = vor.u32 %v6922_v31, %v6545_v32  ;;  %v6705_v36 = vld [vmem:[#allocation7 + $0x1fc] sm:$0xf0] }
  0xec   :  { %1834 = vmatmul.bf16.gmra.mxu3 %v6880_v30  ;;  %v8778_v28 = vunpack.c.l.b16 %v4684_v60 }
  0xed   :  { %v2960_v52 = vsub.f32 0.0, %v1458_v39  ;;  %v7232_v55 = vpop.eup %7231  ;;  %v3348_v56 = vmul.f32 1.442695, %v3279_v47  ;;  %v8767_v59 = vunpack.c.l.b16 %v4557_v51  ;;  %v6708_v39 = vor.u32 %v6962_v33, %v6705_v36  ;;  %2281 = vmatpush.bf16.msrb.mxu2 %v6548_v35 }
  0xee   :  { %v7234_v62 = vpop.eup %7233  ;;  %v3470_v0 = vadd.f32 1.0, %v7232_v55  ;;  %v1626_v3 = vpop.f32.mrf.mxu2 }
  0xef   :  { %v3030_v2 = vmul.f32 1.442695, %v2960_v52  ;;  %v7236_v5 = vpop.eup %7235  ;;  %7239 = vpow2.f32 %v3348_v56  ;;  %v1627_v8 = vadd.f32 %v1626_v3, %v8709_v22  ;;  %v1795_v11 = vpop.f32.mrf.mxu3  ;;  %v4621_v15 = vmul.f32 %v7234_v62, %v11195_v46  ;;  %v6849_v56 = vld [vmem:[#allocation2 + $0x60] sm:$0xff]  ;;  %2450 = vmatpush.bf16.msrb.mxu3 %v6708_v39 }
  0xf0   :  { %v1290_v12 = vpop.f32.mrf.mxu0  ;;  %7241 = vrcp.f32 %v3470_v0  ;;  %v3151_v20 = vadd.f32 1.0, %v7236_v5  ;;  %v7238_v25 = vpop.eup %7237  ;;  %v6881_v3 = vld [vmem:[#allocation5 + $0x60] sm:$0xff] }
  0xf1   :  { %v1291_v21 = vadd.f32 %v1290_v12, %v8706_v9  ;;  %v1459_v23 = vpop.f32.mrf.mxu1  ;;  %7243 = vpow2.f32 %v3030_v2  ;;  %v1796_v26 = vadd.f32 %v1795_v11, %v1627_v8  ;;  %v4685_v27 = vpack.c.bf16 %v4621_v15, %v4621_v15 }
  0xf2   :  { %7245 = vrcp.f32 %v3151_v20  ;;  %v4494_v41 = vmul.f32 %v7238_v25, %v11194_v24 }
  0xf3   :  { %v1460_v30 = vadd.f32 %v1459_v23, %v1291_v21  ;;  %v3280_v34 = vsub.f32 0.0, %v1796_v26  ;;  %v8782_v37 = vunpack.c.l.b16 %v4685_v27 }
  0xf4   :  { %v4558_v15 = vpack.c.bf16 %v4494_v41, %v4494_v41 }
  0xf5   :  { %v2961_v38 = vsub.f32 0.0, %v1460_v30  ;;  %v7240_v44 = vpop.eup %7239  ;;  %v3350_v45 = vmul.f32 1.442695, %v3280_v34  ;;  %v11189_v30 = vunpack.c.h.bf16 %v8780_v29  ;;  %v9004_v29 = vld [vmem:[#allocation5 + $0x48] sm:$0xff]  }
  0xf6   :  { %v7242_v51 = vpop.eup %7241  ;;  %v3471_v52 = vadd.f32 1.0, %v7240_v44  ;;  %v1628_v55 = vpop.f32.mrf.mxu2  ;;  %v8797_v34 = vunpack.c.l.b16 %v4558_v15  ;;  %11681 = vst [vmem:[#allocation36_spill] sm:$0xff] %v9004_v29  ;;  %v11684_v6 = vunpack.c.l.bf16 %v9004_v29 }
  0xf7   :  { %v3032_v54 = vmul.f32 1.442695, %v2961_v38  ;;  %v7244_v60 = vpop.eup %7243  ;;  %7247 = vpow2.f32 %v3350_v45  ;;  %v1629_v62 = vadd.f32 %v1628_v55, %v8709_v22  ;;  %v1797_v0 = vpop.f32.mrf.mxu3  ;;  %v4622_v23 = vmul.f32 %v7242_v51, %v11193_v50  ;;  %v8801_v38 = vld [vmem:[#allocation2 + $0x18] sm:$0xff]  }
  0xf8   :  { %v1293_v2 = vpop.f32.mrf.mxu0  ;;  %v7246_v5 = vpop.eup %7245  ;;  %7249 = vrcp.f32 %v3471_v52  ;;  %v3152_v8 = vadd.f32 1.0, %v7244_v60  ;;  %11663 = vst [vmem:[#allocation22_spill] sm:$0xff] %v8801_v38 }
  0xf9   :  { %v1294_v11 = vadd.f32 %v1293_v2, %v8706_v9  ;;  %v1462_v12 = vpop.f32.mrf.mxu1  ;;  %7251 = vpow2.f32 %v3032_v54  ;;  %v1798_v20 = vadd.f32 %v1797_v0, %v1629_v62  ;;  %v4495_v21 = vmul.f32 %v7246_v5, %v11190_v49  ;;  %1332 = vmatmul.bf16.gmra.mxu0 %v6849_v56 }
  0xfa   :  { %7253 = vrcp.f32 %v3152_v8  ;;  %1501 = vmatmul.bf16.gmra.mxu1 %v6881_v3  ;;  %v4686_v36 = vpack.c.bf16 %v4622_v23, %v4622_v23 }
  0xfb   :  { %v1463_v25 = vadd.f32 %v1462_v12, %v1294_v11  ;;  %v3281_v26 = vsub.f32 0.0, %v1798_v20  ;;  %1670 = vmatmul.bf16.gmra.mxu2 %v6849_v56  ;;  %v4559_v27 = vpack.c.bf16 %v4495_v21, %v4495_v21  ;;  %v8812_v20 = vld [vmem:[#allocation5 + $0x18] sm:$0xff]  }
  0xfc   :  { %1839 = vmatmul.bf16.gmra.mxu3 %v6881_v3  ;;  %v11188_v3 = vunpack.c.l.bf16 %v8801_v38  ;;  %v8810_v12 = vunpack.c.l.b16 %v4686_v36  ;;  %11664 = vst [vmem:[#allocation23_spill] sm:$0xff] %v8812_v20  ;;  %v11187_v36 = vunpack.c.l.bf16 %v8812_v20 }
  0xfd   :  { %v2962_v31 = vsub.f32 0.0, %v1463_v25  ;;  %v7248_v32 = vpop.eup %7247  ;;  %v3352_v33 = vmul.f32 1.442695, %v3281_v26  ;;  %v8799_v35 = vunpack.c.l.b16 %v4559_v27 }
  0xfe   :  { %v7250_v39 = vpop.eup %7249  ;;  %v3472_v41 = vadd.f32 1.0, %v7248_v32  ;;  %v1631_v45 = vpop.f32.mrf.mxu2 }
  0xff   :  { %v3034_v44 = vmul.f32 1.442695, %v2962_v31  ;;  %v7252_v51 = vpop.eup %7251  ;;  %7255 = vpow2.f32 %v3352_v33  ;;  %v1632_v52 = vadd.f32 %v1631_v45, %v8709_v22  ;;  %v1800_v54 = vpop.f32.mrf.mxu3  ;;  %v4623_v60 = vmul.f32 %v7250_v39, %v11189_v30 }
 0x100   :  { %v1295_v55 = vpop.f32.mrf.mxu0  ;;  %7257 = vrcp.f32 %v3472_v41  ;;  %v3153_v62 = vadd.f32 1.0, %v7252_v51  ;;  %v7254_v5 = vpop.eup %7253  ;;  %v11186_v33 = vunpack.c.h.bf16 %v8801_v38  ;;  %v6850_v51 = vld [vmem:[#allocation2 + $0x68] sm:$0xff] }
 0x101   :  { %v1296_v0 = vadd.f32 %v1295_v55, %v8706_v9  ;;  %v1464_v2 = vpop.f32.mrf.mxu1  ;;  %7259 = vpow2.f32 %v3034_v44  ;;  %v1801_v8 = vadd.f32 %v1800_v54, %v1632_v52  ;;  %v4687_v11 = vpack.c.bf16 %v4623_v60, %v4623_v60 }
 0x102   :  { %7261 = vrcp.f32 %v3153_v62  ;;  %v4496_v26 = vmul.f32 %v7254_v5, %v11188_v3  ;;  %v6882_v62 = vld [vmem:[#allocation5 + $0x68] sm:$0xff]  ;;  %v8844_v3 = vld [vmem:[#allocation5 + $0x20] sm:$0xff]  }
 0x103   :  { %v1465_v15 = vadd.f32 %v1464_v2, %v1296_v0  ;;  %v3282_v21 = vsub.f32 0.0, %v1801_v8  ;;  %v8814_v23 = vunpack.c.l.b16 %v4687_v11  ;;  %11666 = vst [vmem:[#allocation25_spill] sm:$0xff] %v8844_v3 }
 0x104   :  { %v4560_v11 = vpack.c.bf16 %v4496_v26, %v4496_v26 }
 0x105   :  { %v2963_v25 = vsub.f32 0.0, %v1465_v15  ;;  %v7256_v27 = vpop.eup %7255  ;;  %v3354_v31 = vmul.f32 1.442695, %v3282_v21 }
 0x106   :  { %v7258_v39 = vpop.eup %7257  ;;  %v3473_v41 = vadd.f32 1.0, %v7256_v27  ;;  %v1633_v45 = vpop.f32.mrf.mxu2 }
 0x107   :  { %v3036_v44 = vmul.f32 1.442695, %v2963_v25  ;;  %v7260_v52 = vpop.eup %7259  ;;  %7263 = vpow2.f32 %v3354_v31  ;;  %v1634_v54 = vadd.f32 %v1633_v45, %v8709_v22  ;;  %v1802_v55 = vpop.f32.mrf.mxu3  ;;  %v4624_v25 = vmul.f32 %v7258_v39, %v11187_v36 }
 0x108   :  { %v1298_v60 = vpop.f32.mrf.mxu0  ;;  %v7262_v0 = vpop.eup %7261  ;;  %7265 = vrcp.f32 %v3473_v41  ;;  %v3154_v2 = vadd.f32 1.0, %v7260_v52  ;;  %v11192_v45 = vunpack.c.h.bf16 %v8812_v20 }
 0x109   :  { %v1299_v5 = vadd.f32 %v1298_v60, %v8706_v9  ;;  %v1467_v8 = vpop.f32.mrf.mxu1  ;;  %7267 = vpow2.f32 %v3036_v44  ;;  %v1803_v15 = vadd.f32 %v1802_v55, %v1634_v54  ;;  %v4497_v21 = vmul.f32 %v7262_v0, %v11186_v33  ;;  %1337 = vmatmul.bf16.gmra.mxu0 %v6850_v51  ;;  %v8833_v0 = vld [vmem:[#allocation2 + $0x20] sm:$0xff]  }
 0x10a   :  { %7269 = vrcp.f32 %v3154_v2  ;;  %1506 = vmatmul.bf16.gmra.mxu1 %v6882_v62  ;;  %v8829_v54 = vunpack.c.l.b16 %v4560_v11  ;;  %v4688_v60 = vpack.c.bf16 %v4624_v25, %v4624_v25  ;;  %11665 = vst [vmem:[#allocation24_spill] sm:$0xff] %v8833_v0 }
 0x10b   :  { %v1468_v27 = vadd.f32 %v1467_v8, %v1299_v5  ;;  %v3283_v31 = vsub.f32 0.0, %v1803_v15  ;;  %1675 = vmatmul.bf16.gmra.mxu2 %v6850_v51  ;;  %v4561_v41 = vpack.c.bf16 %v4497_v21, %v4497_v21 }
 0x10c   :  { %1844 = vmatmul.bf16.gmra.mxu3 %v6882_v62  ;;  %v6683_v62 = vld [vmem:[#allocation7 + $0x1c0] sm:$0xf] }
 0x10d   :  { %v2964_v52 = vsub.f32 0.0, %v1468_v27  ;;  %v7264_v26 = vpop.eup %7263  ;;  %v3356_v44 = vmul.f32 1.442695, %v3283_v31  ;;  %v8831_v55 = vunpack.c.l.b16 %v4561_v41 }
 0x10e   :  { %v7266_v39 = vpop.eup %7265  ;;  %v3474_v5 = vadd.f32 1.0, %v7264_v26  ;;  %v1636_v8 = vpop.f32.mrf.mxu2 }
 0x10f   :  { %v3038_v2 = vmul.f32 1.442695, %v2964_v52  ;;  %v7268_v15 = vpop.eup %7267  ;;  %7271 = vpow2.f32 %v3356_v44  ;;  %v1637_v51 = vadd.f32 %v1636_v8, %v8709_v22  ;;  %v1805_v21 = vpop.f32.mrf.mxu3  ;;  %v4625_v11 = vmul.f32 %v7266_v39, %v11192_v45 }
 0x110   :  { %v1300_v27 = vpop.f32.mrf.mxu0  ;;  %7273 = vrcp.f32 %v3474_v5  ;;  %v3155_v25 = vadd.f32 1.0, %v7268_v15  ;;  %v11191_v52 = vunpack.c.l.bf16 %v8833_v0  ;;  %v7270_v26 = vpop.eup %7269  ;;  %v8842_v8 = vunpack.c.l.b16 %v4688_v60 }
 0x111   :  { %v1301_v31 = vadd.f32 %v1300_v27, %v8706_v9  ;;  %v1469_v41 = vpop.f32.mrf.mxu1  ;;  %7275 = vpow2.f32 %v3038_v2  ;;  %v1806_v44 = vadd.f32 %v1805_v21, %v1637_v51  ;;  %v4689_v33 = vpack.c.bf16 %v4625_v11, %v4625_v11  ;;  %v6919_v2 = vld [vmem:[#allocation7 + $0x90] sm:$0xf0] }
 0x112   :  { %7277 = vrcp.f32 %v3155_v25  ;;  %v4498_v5 = vmul.f32 %v7270_v26, %v11191_v52  ;;  %v11197_v51 = vunpack.c.h.bf16 %v8833_v0  ;;  %v11198_v60 = vunpack.c.l.bf16 %v8844_v3  ;;  %v6883_v52 = vld [vmem:[#allocation5 + $0x70] sm:$0xff] }
 0x113   :  { %v1470_v36 = vadd.f32 %v1469_v41, %v1301_v31  ;;  %v3284_v30 = vsub.f32 0.0, %v1806_v44  ;;  %v8846_v49 = vunpack.c.l.b16 %v4689_v33  ;;  %v6851_v41 = vld [vmem:[#allocation2 + $0x70] sm:$0xff] }
 0x114   :  { %v4562_v46 = vpack.c.bf16 %v4498_v5, %v4498_v5 }
 0x115   :  { %v2965_v39 = vsub.f32 0.0, %v1470_v36  ;;  %v7272_v15 = vpop.eup %7271  ;;  %v3358_v27 = vmul.f32 1.442695, %v3284_v30 }
 0x116   :  { %v7274_v21 = vpop.eup %7273  ;;  %v3475_v11 = vadd.f32 1.0, %v7272_v15  ;;  %v1638_v31 = vpop.f32.mrf.mxu2 }
 0x117   :  { %v3040_v25 = vmul.f32 1.442695, %v2965_v39  ;;  %v7276_v33 = vpop.eup %7275  ;;  %7279 = vpow2.f32 %v3358_v27  ;;  %v1639_v36 = vadd.f32 %v1638_v31, %v8709_v22  ;;  %v1807_v44 = vpop.f32.mrf.mxu3  ;;  %v4626_v15 = vmul.f32 %v7274_v21, %v11198_v60 }
 0x118   :  { %v1303_v26 = vpop.f32.mrf.mxu0  ;;  %v7278_v30 = vpop.eup %7277  ;;  %7281 = vrcp.f32 %v3475_v11  ;;  %v3156_v45 = vadd.f32 1.0, %v7276_v33  ;;  %v11204_v33 = vunpack.c.h.bf16 %v8844_v3  ;;  %v8972_v3 = vld [vmem:[#allocation5 + $0x40] sm:$0xff]  }
 0x119   :  { %v1304_v50 = vadd.f32 %v1303_v26, %v8706_v9  ;;  %v1472_v24 = vpop.f32.mrf.mxu1  ;;  %7283 = vpow2.f32 %v3040_v25  ;;  %v1808_v18 = vadd.f32 %v1807_v44, %v1639_v36  ;;  %v4499_v39 = vmul.f32 %v7278_v30, %v11197_v51  ;;  %1342 = vmatmul.bf16.gmra.mxu0 %v6851_v41  ;;  %v8865_v51 = vld [vmem:[#allocation2 + $0x28] sm:$0xff]   ;;  %11676 = vst [vmem:[#allocation33_spill] sm:$0xff] %v8972_v3 }
 0x11a   :  { %7285 = vrcp.f32 %v3156_v45  ;;  %1511 = vmatmul.bf16.gmra.mxu1 %v6883_v52  ;;  %v8861_v36 = vunpack.c.l.b16 %v4562_v46  ;;  %v4690_v30 = vpack.c.bf16 %v4626_v15, %v4626_v15  ;;  %11667 = vst [vmem:[#allocation26_spill] sm:$0xff] %v8865_v51  ;;  %v11678_v20 = vunpack.c.l.bf16 %v8972_v3 }
 0x11b   :  { %v1473_v27 = vadd.f32 %v1472_v24, %v1304_v50  ;;  %v3285_v31 = vsub.f32 0.0, %v1808_v18  ;;  %1680 = vmatmul.bf16.gmra.mxu2 %v6851_v41  ;;  %v4563_v11 = vpack.c.bf16 %v4499_v39, %v4499_v39 }
 0x11c   :  { %1849 = vmatmul.bf16.gmra.mxu3 %v6883_v52 }
 0x11d   :  { %v2966_v26 = vsub.f32 0.0, %v1473_v27  ;;  %v7280_v5 = vpop.eup %7279  ;;  %v3360_v25 = vmul.f32 1.442695, %v3285_v31  ;;  %v8863_v44 = vunpack.c.l.b16 %v4563_v11 }
 0x11e   :  { %v7282_v24 = vpop.eup %7281  ;;  %v3476_v50 = vadd.f32 1.0, %v7280_v5  ;;  %v1641_v18 = vpop.f32.mrf.mxu2 }
 0x11f   :  { %v3042_v45 = vmul.f32 1.442695, %v2966_v26  ;;  %v7284_v21 = vpop.eup %7283  ;;  %7287 = vpow2.f32 %v3360_v25  ;;  %v1642_v41 = vadd.f32 %v1641_v18, %v8709_v22  ;;  %v1810_v39 = vpop.f32.mrf.mxu3  ;;  %v4627_v46 = vmul.f32 %v7282_v24, %v11204_v33 }
 0x120   :  { %v1305_v27 = vpop.f32.mrf.mxu0  ;;  %7289 = vrcp.f32 %v3476_v50  ;;  %v3157_v15 = vadd.f32 1.0, %v7284_v21  ;;  %v11203_v26 = vunpack.c.l.bf16 %v8865_v51  ;;  %v7286_v5 = vpop.eup %7285  ;;  %v8874_v18 = vunpack.c.l.b16 %v4690_v30 }
 0x121   :  { %v1306_v31 = vadd.f32 %v1305_v27, %v8706_v9  ;;  %v1474_v11 = vpop.f32.mrf.mxu1  ;;  %7291 = vpow2.f32 %v3042_v45  ;;  %v1811_v25 = vadd.f32 %v1810_v39, %v1642_v41  ;;  %v4691_v60 = vpack.c.bf16 %v4627_v46, %v4627_v46 }
 0x122   :  { %7293 = vrcp.f32 %v3157_v15  ;;  %v4500_v50 = vmul.f32 %v7286_v5, %v11203_v26  ;;  %v11207_v41 = vunpack.c.h.bf16 %v8865_v51  ;;  %v11208_v30 = vunpack.c.l.bf16 %v8876_v63  ;;  %v6884_v26 = vld [vmem:[#allocation5 + $0x78] sm:$0xff] }
 0x123   :  { %v1475_v19 = vadd.f32 %v1474_v11, %v1306_v31  ;;  %v3286_v40 = vsub.f32 0.0, %v1811_v25  ;;  %v8878_v14 = vunpack.c.l.b16 %v4691_v60  ;;  %v6852_v11 = vld [vmem:[#allocation2 + $0x78] sm:$0xff] }
 0x124   :  { %v4564_v45 = vpack.c.bf16 %v4500_v50, %v4500_v50 }
 0x125   :  { %v2967_v24 = vsub.f32 0.0, %v1475_v19  ;;  %v7288_v21 = vpop.eup %7287  ;;  %v3362_v27 = vmul.f32 1.442695, %v3286_v40 }
 0x126   :  { %v7290_v39 = vpop.eup %7289  ;;  %v3477_v46 = vadd.f32 1.0, %v7288_v21  ;;  %v1643_v31 = vpop.f32.mrf.mxu2 }
 0x127   :  { %v3044_v15 = vmul.f32 1.442695, %v2967_v24  ;;  %v7292_v60 = vpop.eup %7291  ;;  %7295 = vpow2.f32 %v3362_v27  ;;  %v1644_v19 = vadd.f32 %v1643_v31, %v8709_v22  ;;  %v1812_v25 = vpop.f32.mrf.mxu3  ;;  %v4628_v21 = vmul.f32 %v7290_v39, %v11208_v30  ;;  %v6523_v31 = vld [vmem:[#allocation7 + $0x80] sm:$0xf]  ;;  %v8897_v30 = vld [vmem:[#allocation2 + $0x30] sm:$0xff]  }
 0x128   :  { %v1308_v5 = vpop.f32.mrf.mxu0  ;;  %v7294_v40 = vpop.eup %7293  ;;  %7297 = vrcp.f32 %v3477_v46  ;;  %v3158_v33 = vadd.f32 1.0, %v7292_v60  ;;  %v11209_v46 = vunpack.c.h.bf16 %v8876_v63  ;;  %v6524_v50 = vor.u32 %v6919_v2, %v6523_v31  ;;  %11669 = vst [vmem:[#allocation28_spill] sm:$0xff] %v8897_v30 }
 0x129   :  { %v1309_v17 = vadd.f32 %v1308_v5, %v8706_v9  ;;  %v1477_v4 = vpop.f32.mrf.mxu1  ;;  %7299 = vpow2.f32 %v3044_v15  ;;  %v1813_v52 = vadd.f32 %v1812_v25, %v1644_v19  ;;  %v4501_v24 = vmul.f32 %v7294_v40, %v11207_v41  ;;  %1347 = vmatmul.bf16.gmra.mxu0 %v6852_v11  ;;  %v6959_v15 = vld [vmem:[#allocation7 + $0x1d0] sm:$0xf0] }
 0x12a   :  { %7301 = vrcp.f32 %v3158_v33  ;;  %1516 = vmatmul.bf16.gmra.mxu1 %v6884_v26  ;;  %v6684_v5 = vor.u32 %v6959_v15, %v6683_v62  ;;  %1944 = vmatpush.bf16.msrb.mxu0 %v6524_v50  ;;  %v4692_v39 = vpack.c.bf16 %v4628_v21, %v4628_v21  ;;  %v11210_v50 = vunpack.c.l.bf16 %v8897_v30 }
 0x12b   :  { %v1478_v27 = vadd.f32 %v1477_v4, %v1309_v17  ;;  %v3287_v60 = vsub.f32 0.0, %v1813_v52  ;;  %1685 = vmatmul.bf16.gmra.mxu2 %v6852_v11  ;;  %v4565_v19 = vpack.c.bf16 %v4501_v24, %v4501_v24  ;;  %v8893_v4 = vunpack.c.l.b16 %v4564_v45  ;;  %v6525_v45 = vld [vmem:[#allocation7 + $0x94] sm:$0xf0] }
 0x12c   :  { %1854 = vmatmul.bf16.gmra.mxu3 %v6884_v26  ;;  %2113 = vmatpush.bf16.msrb.mxu1 %v6684_v5  ;;  %v8908_v5 = vld [vmem:[#allocation5 + $0x30] sm:$0xff]   ;;  %v11674_v63 = vunpack.c.l.bf16 %v8940_v53 }
 0x12d   :  { %v2968_v25 = vsub.f32 0.0, %v1478_v27  ;;  %v7296_v40 = vpop.eup %7295  ;;  %v3364_v41 = vmul.f32 1.442695, %v3287_v60  ;;  %v8895_v17 = vunpack.c.l.b16 %v4565_v19  ;;  %11670 = vst [vmem:[#allocation29_spill] sm:$0xff] %v8908_v5 }
 0x12e   :  { %v7298_v33 = vpop.eup %7297  ;;  %v3478_v52 = vadd.f32 1.0, %v7296_v40  ;;  %v1646_v11 = vpop.f32.mrf.mxu2 }
 0x12f   :  { %v3046_v32 = vmul.f32 1.442695, %v2968_v25  ;;  %v7300_v2 = vpop.eup %7299  ;;  %7303 = vpow2.f32 %v3364_v41  ;;  %v1647_v26 = vadd.f32 %v1646_v11, %v8709_v22  ;;  %v1815_v62 = vpop.f32.mrf.mxu3  ;;  %v4629_v27 = vmul.f32 %v7298_v33, %v11209_v46  ;;  %v6917_v11 = vld [vmem:[#allocation7 + $0x84] sm:$0xf]  ;;  %v6685_v46 = vld [vmem:[#allocation7 + $0x1d4] sm:$0xf0] }
 0x130   :  { %v1310_v24 = vpop.f32.mrf.mxu0  ;;  %7305 = vrcp.f32 %v3478_v52  ;;  %v3159_v21 = vadd.f32 1.0, %v7300_v2  ;;  %v7302_v15 = vpop.eup %7301  ;;  %v8906_v25 = vunpack.c.l.b16 %v4692_v39  ;;  %v6957_v33 = vld [vmem:[#allocation7 + $0x1c4] sm:$0xf]  ;;  %v6528_v2 = vor.u32 %v6917_v11, %v6525_v45 }
 0x131   :  { %v1311_v31 = vadd.f32 %v1310_v24, %v8706_v9  ;;  %v1479_v60 = vpop.f32.mrf.mxu1  ;;  %7307 = vpow2.f32 %v3046_v32  ;;  %v1816_v41 = vadd.f32 %v1815_v62, %v1647_v26  ;;  %v4693_v19 = vpack.c.bf16 %v4629_v27, %v4629_v27 }
 0x132   :  { %7309 = vrcp.f32 %v3159_v21  ;;  %v6688_v47 = vor.u32 %v6957_v33, %v6685_v46  ;;  %v4502_v32 = vmul.f32 %v7302_v15, %v11210_v50  ;;  %2282 = vmatpush.bf16.msrb.mxu2 %v6528_v2  ;;  %v11211_v27 = vunpack.c.h.bf16 %v8897_v30  ;;  %v6885_v33 = vld [vmem:[#allocation5 + $0x80] sm:$0xff] }
 0x133   :  { %v1480_v40 = vadd.f32 %v1479_v60, %v1311_v31  ;;  %v3288_v52 = vsub.f32 0.0, %v1816_v41  ;;  %v8910_v24 = vunpack.c.l.b16 %v4693_v19  ;;  %v11212_v21 = vunpack.c.l.bf16 %v8908_v5  ;;  %v6853_v19 = vld [vmem:[#allocation2 + $0x80] sm:$0xff] }
 0x134   :  { %2451 = vmatpush.bf16.msrb.mxu3 %v6688_v47  ;;  %v4566_v13 = vpack.c.bf16 %v4502_v32, %v4502_v32 }
 0x135   :  { %v2969_v56 = vsub.f32 0.0, %v1480_v40  ;;  %v7304_v26 = vpop.eup %7303  ;;  %v3366_v39 = vmul.f32 1.442695, %v3288_v52 }
 0x136   :  { %v7306_v31 = vpop.eup %7305  ;;  %v3479_v45 = vadd.f32 1.0, %v7304_v26  ;;  %v1648_v41 = vpop.f32.mrf.mxu2 }
 0x137   :  { %v3048_v60 = vmul.f32 1.442695, %v2969_v56  ;;  %v7308_v46 = vpop.eup %7307  ;;  %7311 = vpow2.f32 %v3366_v39  ;;  %v1649_v15 = vadd.f32 %v1648_v41, %v8709_v22  ;;  %v1817_v40 = vpop.f32.mrf.mxu3  ;;  %v4630_v47 = vmul.f32 %v7306_v31, %v11212_v21 }
 0x138   :  { %v1313_v11 = vpop.f32.mrf.mxu0  ;;  %v7310_v52 = vpop.eup %7309  ;;  %7313 = vrcp.f32 %v3479_v45  ;;  %v3160_v2 = vadd.f32 1.0, %v7308_v46  ;;  %v11216_v46 = vunpack.c.h.bf16 %v8908_v5 }
 0x139   :  { %v1314_v50 = vadd.f32 %v1313_v11, %v8706_v9  ;;  %v1482_v62 = vpop.f32.mrf.mxu1  ;;  %7315 = vpow2.f32 %v3048_v60  ;;  %v1818_v26 = vadd.f32 %v1817_v40, %v1649_v15  ;;  %v4503_v56 = vmul.f32 %v7310_v52, %v11211_v27  ;;  %1352 = vmatmul.bf16.gmra.mxu0 %v6853_v19  ;;  %v8929_v27 = vld [vmem:[#allocation2 + $0x38] sm:$0xff]  }
 0x13a   :  { %7317 = vrcp.f32 %v3160_v2  ;;  %1521 = vmatmul.bf16.gmra.mxu1 %v6885_v33  ;;  %v8925_v15 = vunpack.c.l.b16 %v4566_v13  ;;  %v4694_v52 = vpack.c.bf16 %v4630_v47, %v4630_v47  ;;  %11671 = vst [vmem:[#allocation30_spill] sm:$0xff] %v8929_v27 }
 0x13b   :  { %v1483_v39 = vadd.f32 %v1482_v62, %v1314_v50  ;;  %v3289_v41 = vsub.f32 0.0, %v1818_v26  ;;  %1690 = vmatmul.bf16.gmra.mxu2 %v6853_v19  ;;  %v4567_v45 = vpack.c.bf16 %v4503_v56, %v4503_v56 }
 0x13c   :  { %1859 = vmatmul.bf16.gmra.mxu3 %v6885_v33 }
 0x13d   :  { %v2970_v11 = vsub.f32 0.0, %v1483_v39  ;;  %v7312_v32 = vpop.eup %7311  ;;  %v3368_v60 = vmul.f32 1.442695, %v3289_v41  ;;  %v8927_v40 = vunpack.c.l.b16 %v4567_v45 }
 0x13e   :  { %v7314_v50 = vpop.eup %7313  ;;  %v3480_v62 = vadd.f32 1.0, %v7312_v32  ;;  %v1651_v2 = vpop.f32.mrf.mxu2 }
 0x13f   :  { %v3050_v31 = vmul.f32 1.442695, %v2970_v11  ;;  %v7316_v26 = vpop.eup %7315  ;;  %7319 = vpow2.f32 %v3368_v60  ;;  %v1652_v19 = vadd.f32 %v1651_v2, %v8709_v22  ;;  %v1820_v56 = vpop.f32.mrf.mxu3  ;;  %v4631_v13 = vmul.f32 %v7314_v50, %v11216_v46 }
 0x140   :  { %v1315_v39 = vpop.f32.mrf.mxu0  ;;  %7321 = vrcp.f32 %v3480_v62  ;;  %v3161_v47 = vadd.f32 1.0, %v7316_v26  ;;  %v11215_v11 = vunpack.c.l.bf16 %v8929_v27  ;;  %v7318_v32 = vpop.eup %7317  ;;  %v8938_v2 = vunpack.c.l.b16 %v4694_v52 }
 0x141   :  { %v1316_v41 = vadd.f32 %v1315_v39, %v8706_v9  ;;  %v1484_v45 = vpop.f32.mrf.mxu1  ;;  %7323 = vpow2.f32 %v3050_v31  ;;  %v1821_v60 = vadd.f32 %v1820_v56, %v1652_v19  ;;  %v4695_v21 = vpack.c.bf16 %v4631_v13, %v4631_v13 }
 0x142   :  { %7325 = vrcp.f32 %v3161_v47  ;;  %v4504_v62 = vmul.f32 %v7318_v32, %v11215_v11  ;;  %v6886_v11 = vld [vmem:[#allocation5 + $0x88] sm:$0xff] }
 0x143   :  { %v1485_v16 = vadd.f32 %v1484_v45, %v1316_v41  ;;  %v3290_v33 = vsub.f32 0.0, %v1821_v60  ;;  %v8942_v5 = vunpack.c.l.b16 %v4695_v21  ;;  %v6854_v45 = vld [vmem:[#allocation2 + $0x88] sm:$0xff] }
 0x144   :  { %v4568_v30 = vpack.c.bf16 %v4504_v62, %v4504_v62 }
 0x145   :  { %v2971_v50 = vsub.f32 0.0, %v1485_v16  ;;  %v7320_v26 = vpop.eup %7319  ;;  %v3370_v39 = vmul.f32 1.442695, %v3290_v33 }
 0x146   :  { %v7322_v56 = vpop.eup %7321  ;;  %v3481_v13 = vadd.f32 1.0, %v7320_v26  ;;  %v1653_v41 = vpop.f32.mrf.mxu2 }
 0x147   :  { %v3052_v47 = vmul.f32 1.442695, %v2971_v50  ;;  %v7324_v21 = vpop.eup %7323  ;;  %7327 = vpow2.f32 %v3370_v39  ;;  %v1654_v16 = vadd.f32 %v1653_v41, %v8709_v22  ;;  %v1822_v60 = vpop.f32.mrf.mxu3  ;;  %v11673_v50 = vunpack.c.h.bf16 %v8929_v27 }
 0x148   :  { %v1318_v32 = vpop.f32.mrf.mxu0  ;;  %v7326_v33 = vpop.eup %7325  ;;  %7329 = vrcp.f32 %v3481_v13  ;;  %v3162_v46 = vadd.f32 1.0, %v7324_v21  ;;  %v4632_v39 = vmul.f32 %v7322_v56, %v11674_v63  ;;  %v11230_v21 = vunpack.c.h.bf16 %v8940_v53 }
 0x149   :  { %v1319_v31 = vadd.f32 %v1318_v32, %v8706_v9  ;;  %v1487_v19 = vpop.f32.mrf.mxu1  ;;  %7331 = vpow2.f32 %v3052_v47  ;;  %v1823_v52 = vadd.f32 %v1822_v60, %v1654_v16  ;;  %v4505_v26 = vmul.f32 %v7326_v33, %v11673_v50  ;;  %1357 = vmatmul.bf16.gmra.mxu0 %v6854_v45  ;;  %v8961_v50 = vld [vmem:[#allocation2 + $0x40] sm:$0xff]  }
 0x14a   :  { %7333 = vrcp.f32 %v3162_v46  ;;  %1526 = vmatmul.bf16.gmra.mxu1 %v6886_v11  ;;  %v8957_v16 = vunpack.c.l.b16 %v4568_v30  ;;  %v4696_v33 = vpack.c.bf16 %v4632_v39, %v4632_v39  ;;  %11675 = vst [vmem:[#allocation32_spill] sm:$0xff] %v8961_v50 }
 0x14b   :  { %v1488_v51 = vadd.f32 %v1487_v19, %v1319_v31  ;;  %v3291_v41 = vsub.f32 0.0, %v1823_v52  ;;  %1695 = vmatmul.bf16.gmra.mxu2 %v6854_v45  ;;  %v4569_v13 = vpack.c.bf16 %v4505_v26, %v4505_v26 }
 0x14c   :  { %1864 = vmatmul.bf16.gmra.mxu3 %v6886_v11 }
 0x14d   :  { %v2972_v32 = vsub.f32 0.0, %v1488_v51  ;;  %v7328_v62 = vpop.eup %7327  ;;  %v3372_v47 = vmul.f32 1.442695, %v3291_v41  ;;  %v8959_v60 = vunpack.c.l.b16 %v4569_v13  ;;  %v11229_v13 = vunpack.c.l.bf16 %v8961_v50 }
 0x14e   :  { %v7330_v63 = vpop.eup %7329  ;;  %v3482_v31 = vadd.f32 1.0, %v7328_v62  ;;  %v1656_v19 = vpop.f32.mrf.mxu2 }
 0x14f   :  { %v3054_v46 = vmul.f32 1.442695, %v2972_v32  ;;  %v7332_v52 = vpop.eup %7331  ;;  %7335 = vpow2.f32 %v3372_v47  ;;  %v1657_v56 = vadd.f32 %v1656_v19, %v8709_v22  ;;  %v1825_v45 = vpop.f32.mrf.mxu3  ;;  %v4633_v30 = vmul.f32 %v7330_v63, %v11230_v21 }
 0x150   :  { %v1320_v51 = vpop.f32.mrf.mxu0  ;;  %7337 = vrcp.f32 %v3482_v31  ;;  %v3163_v26 = vadd.f32 1.0, %v7332_v52  ;;  %v7334_v32 = vpop.eup %7333  ;;  %v8970_v19 = vunpack.c.l.b16 %v4696_v33 }
 0x151   :  { %v1321_v39 = vadd.f32 %v1320_v51, %v8706_v9  ;;  %v1489_v41 = vpop.f32.mrf.mxu1  ;;  %7339 = vpow2.f32 %v3054_v46  ;;  %v1826_v62 = vadd.f32 %v1825_v45, %v1657_v56  ;;  %v4697_v47 = vpack.c.bf16 %v4633_v30, %v4633_v30 }
 0x152   :  { %7341 = vrcp.f32 %v3163_v26  ;;  %v4506_v31 = vmul.f32 %v7334_v32, %v11229_v13  ;;  %v6887_v13 = vld [vmem:[#allocation5 + $0x90] sm:$0xff] }
 0x153   :  { %v1490_v27 = vadd.f32 %v1489_v41, %v1321_v39  ;;  %v3292_v11 = vsub.f32 0.0, %v1826_v62  ;;  %v8974_v53 = vunpack.c.l.b16 %v4697_v47  ;;  %v6855_v41 = vld [vmem:[#allocation2 + $0x90] sm:$0xff] }
 0x154   :  { %v4570_v0 = vpack.c.bf16 %v4506_v31, %v4506_v31 }
 0x155   :  { %v2973_v63 = vsub.f32 0.0, %v1490_v27  ;;  %v7336_v52 = vpop.eup %7335  ;;  %v3374_v51 = vmul.f32 1.442695, %v3292_v11 }
 0x156   :  { %v7338_v45 = vpop.eup %7337  ;;  %v3483_v30 = vadd.f32 1.0, %v7336_v52  ;;  %v1658_v39 = vpop.f32.mrf.mxu2 }
 0x157   :  { %v3056_v26 = vmul.f32 1.442695, %v2973_v63  ;;  %v7340_v62 = vpop.eup %7339  ;;  %7343 = vpow2.f32 %v3374_v51  ;;  %v1659_v27 = vadd.f32 %v1658_v39, %v8709_v22  ;;  %v1827_v47 = vpop.f32.mrf.mxu3  ;;  %v11677_v63 = vunpack.c.h.bf16 %v8961_v50 }
 0x158   :  { %v1323_v32 = vpop.f32.mrf.mxu0  ;;  %v7342_v11 = vpop.eup %7341  ;;  %7345 = vrcp.f32 %v3483_v30  ;;  %v3164_v21 = vadd.f32 1.0, %v7340_v62  ;;  %v4634_v51 = vmul.f32 %v7338_v45, %v11678_v20  ;;  %v11244_v62 = vunpack.c.h.bf16 %v8972_v3 }
 0x159   :  { %v1324_v46 = vadd.f32 %v1323_v32, %v8706_v9  ;;  %v1492_v56 = vpop.f32.mrf.mxu1  ;;  %7347 = vpow2.f32 %v3056_v26  ;;  %v1828_v33 = vadd.f32 %v1827_v47, %v1659_v27  ;;  %v4507_v52 = vmul.f32 %v7342_v11, %v11677_v63  ;;  %1362 = vmatmul.bf16.gmra.mxu0 %v6855_v41  ;;  %v8993_v63 = vld [vmem:[#allocation2 + $0x48] sm:$0xff]  }
 0x15a   :  { %7349 = vrcp.f32 %v3164_v21  ;;  %1531 = vmatmul.bf16.gmra.mxu1 %v6887_v13  ;;  %v8989_v27 = vunpack.c.l.b16 %v4570_v0  ;;  %v4698_v11 = vpack.c.bf16 %v4634_v51, %v4634_v51  ;;  %11679 = vst [vmem:[#allocation34_spill] sm:$0xff] %v8993_v63 }
 0x15b   :  { %v1493_v38 = vadd.f32 %v1492_v56, %v1324_v46  ;;  %v3293_v39 = vsub.f32 0.0, %v1828_v33  ;;  %1700 = vmatmul.bf16.gmra.mxu2 %v6855_v41  ;;  %v4571_v30 = vpack.c.bf16 %v4507_v52, %v4507_v52 }
 0x15c   :  { %1869 = vmatmul.bf16.gmra.mxu3 %v6887_v13 }
 0x15d   :  { %v2974_v32 = vsub.f32 0.0, %v1493_v38  ;;  %v7344_v31 = vpop.eup %7343  ;;  %v3376_v26 = vmul.f32 1.442695, %v3293_v39  ;;  %v8991_v47 = vunpack.c.l.b16 %v4571_v30  ;;  %v11243_v30 = vunpack.c.l.bf16 %v8993_v63 }
 0x15e   :  { %v7346_v20 = vpop.eup %7345  ;;  %v3484_v46 = vadd.f32 1.0, %v7344_v31  ;;  %v1661_v56 = vpop.f32.mrf.mxu2 }
 0x15f   :  { %v3058_v21 = vmul.f32 1.442695, %v2974_v32  ;;  %v7348_v33 = vpop.eup %7347  ;;  %7351 = vpow2.f32 %v3376_v26  ;;  %v1662_v45 = vadd.f32 %v1661_v56, %v8709_v22  ;;  %v1830_v41 = vpop.f32.mrf.mxu3  ;;  %v4635_v0 = vmul.f32 %v7346_v20, %v11244_v62 }
 0x160   :  { %v1325_v38 = vpop.f32.mrf.mxu0  ;;  %7353 = vrcp.f32 %v3484_v46  ;;  %v3165_v52 = vadd.f32 1.0, %v7348_v33  ;;  %v7350_v32 = vpop.eup %7349  ;;  %v9002_v56 = vunpack.c.l.b16 %v4698_v11 }
 0x161   :  { %v1326_v51 = vadd.f32 %v1325_v38, %v8706_v9  ;;  %v1494_v39 = vpop.f32.mrf.mxu1  ;;  %7355 = vpow2.f32 %v3058_v21  ;;  %v1831_v31 = vadd.f32 %v1830_v41, %v1662_v45  ;;  %v4699_v26 = vpack.c.bf16 %v4635_v0, %v4635_v0 }
 0x162   :  { %11680 = vst [vmem:[#allocation35_spill] sm:$0xff] %v9002_v56  ;;  %7357 = vrcp.f32 %v3165_v52  ;;  %v4508_v46 = vmul.f32 %v7350_v32, %v11243_v30  ;;  %v6888_v30 = vld [vmem:[#allocation5 + $0x98] sm:$0xff] }
 0x163   :  { %v1495_v50 = vadd.f32 %v1494_v39, %v1326_v51  ;;  %v3294_v13 = vsub.f32 0.0, %v1831_v31  ;;  %v9006_v3 = vunpack.c.l.b16 %v4699_v26  ;;  %v6856_v39 = vld [vmem:[#allocation2 + $0x98] sm:$0xff] }
 0x164   :  { %v4572_v61 = vpack.c.bf16 %v4508_v46, %v4508_v46 }
 0x165   :  { %11682 = vst [vmem:[#allocation37_spill] sm:$0xff] %v9006_v3  ;;  %v2975_v20 = vsub.f32 0.0, %v1495_v50  ;;  %v7352_v33 = vpop.eup %7351  ;;  %v3378_v38 = vmul.f32 1.442695, %v3294_v13  ;;  %v8366_v3 = vld [vmem:[#allocation5 + $0x38] sm:$0xff] }
 0x166   :  { %v7354_v41 = vpop.eup %7353  ;;  %v3485_v0 = vadd.f32 1.0, %v7352_v33  ;;  %v1663_v51 = vpop.f32.mrf.mxu2 }
 0x167   :  { %v3060_v52 = vmul.f32 1.442695, %v2975_v20  ;;  %v7356_v31 = vpop.eup %7355  ;;  %7359 = vpow2.f32 %v3378_v38  ;;  %v1664_v50 = vadd.f32 %v1663_v51, %v8709_v22  ;;  %v1832_v26 = vpop.f32.mrf.mxu3  ;;  %v11683_v20 = vunpack.c.h.bf16 %v8993_v63  ;;  %v6503_v51 = vld [vmem:[#allocation7 + $0x58] sm:$0xf] }
 0x168   :  { %v1328_v32 = vpop.f32.mrf.mxu0  ;;  %v7358_v13 = vpop.eup %7357  ;;  %7361 = vrcp.f32 %v3485_v0  ;;  %v3166_v62 = vadd.f32 1.0, %v7356_v31  ;;  %v4636_v38 = vmul.f32 %v7354_v41, %v11684_v6  ;;  %v6504_v46 = vor.u32 %v6914_v10, %v6503_v51  ;;  %v9025_v41 = vld [vmem:[#allocation2 + $0x50] sm:$0xff]  }
 0x169   :  { %v1329_v21 = vadd.f32 %v1328_v32, %v8706_v9  ;;  %v1497_v45 = vpop.f32.mrf.mxu1  ;;  %7363 = vpow2.f32 %v3060_v52  ;;  %v1833_v11 = vadd.f32 %v1832_v26, %v1664_v50  ;;  %v4509_v33 = vmul.f32 %v7358_v13, %v11683_v20  ;;  %1367 = vmatmul.bf16.gmra.mxu0 %v6856_v39  ;;  %v6954_v52 = vld [vmem:[#allocation7 + $0x1a8] sm:$0xf0]  ;;  %11687 = vst [vmem:[#allocation40_spill] sm:$0xff] %v9025_v41 }
 0x16a   :  { %7365 = vrcp.f32 %v3166_v62  ;;  %1536 = vmatmul.bf16.gmra.mxu1 %v6888_v30  ;;  %v6664_v32 = vor.u32 %v6954_v52, %v6663_v58  ;;  %1945 = vmatpush.bf16.msrb.mxu0 %v6504_v46  ;;  %v9021_v6 = vunpack.c.l.b16 %v4572_v61  ;;  %v6912_v61 = vld [vmem:[#allocation7 + $0x5c] sm:$0xf] }
 0x16b   :  { %v1498_v48 = vadd.f32 %v1497_v45, %v1329_v21  ;;  %v3295_v31 = vsub.f32 0.0, %v1833_v11  ;;  %1705 = vmatmul.bf16.gmra.mxu2 %v6856_v39  ;;  %v4573_v50 = vpack.c.bf16 %v4509_v33, %v4509_v33  ;;  %v4700_v45 = vpack.c.bf16 %v4636_v38, %v4636_v38 }
 0x16c   :  { %1874 = vmatmul.bf16.gmra.mxu3 %v6888_v30  ;;  %11685 = vst [vmem:[#allocation38_spill] sm:$0xff] %v9021_v6  ;;  %2114 = vmatpush.bf16.msrb.mxu1 %v6664_v32  ;;  %v11688_v33 = vunpack.c.h.bf16 %v9004_v29  ;;  %v6505_v29 = vld [vmem:[#allocation7 + $0x6c] sm:$0xf0]  ;;  %v9068_v6 = vld [vmem:[#allocation5 + $0x58] sm:$0xff]  }
 0x16d   :  { %v2976_v26 = vsub.f32 0.0, %v1498_v48  ;;  %v7360_v13 = vpop.eup %7359  ;;  %v3380_v20 = vmul.f32 1.442695, %v3295_v31  ;;  %v9023_v21 = vunpack.c.l.b16 %v4573_v50  ;;  %11699 = vst [vmem:[#allocation48_spill] sm:$0xff] %v9068_v6 }
 0x16e   :  { %v7362_v62 = vpop.eup %7361  ;;  %v3486_v11 = vadd.f32 1.0, %v7360_v13  ;;  %v1666_v39 = vpop.f32.mrf.mxu2  ;;  %v9034_v13 = vunpack.c.l.b16 %v4700_v45 }
 0x16f   :  { %11686 = vst [vmem:[#allocation39_spill] sm:$0xff] %v9023_v21  ;;  %v3062_v0 = vmul.f32 1.442695, %v2976_v26  ;;  %v7364_v10 = vpop.eup %7363  ;;  %7367 = vpow2.f32 %v3380_v20  ;;  %v1667_v48 = vadd.f32 %v1666_v39, %v8709_v22  ;;  %v1835_v58 = vpop.f32.mrf.mxu3  ;;  %v4637_v51 = vmul.f32 %v7362_v62, %v11688_v33  ;;  %v9036_v20 = vld [vmem:[#allocation5 + $0x50] sm:$0xff]   ;;  %v6952_v62 = vld [vmem:[#allocation7 + $0x19c] sm:$0xf] }
 0x170   :  { %v1330_v30 = vpop.f32.mrf.mxu0  ;;  %7369 = vrcp.f32 %v3486_v11  ;;  %v3167_v38 = vadd.f32 1.0, %v7364_v10  ;;  %v7366_v50 = vpop.eup %7365  ;;  %11689 = vst [vmem:[#allocation41_spill] sm:$0xff] %v9034_v13  ;;  %v6508_v10 = vor.u32 %v6912_v61, %v6505_v29  ;;  %v6665_v33 = vld [vmem:[#allocation7 + $0x1ac] sm:$0xf0] }
 0x171   :  { %v1331_v31 = vadd.f32 %v1330_v30, %v8706_v9  ;;  %v1499_v46 = vpop.f32.mrf.mxu1  ;;  %7371 = vpow2.f32 %v3062_v0  ;;  %v1836_v26 = vadd.f32 %v1835_v58, %v1667_v48  ;;  %v4701_v32 = vpack.c.bf16 %v4637_v51, %v4637_v51  ;;  %11690 = vst [vmem:[#allocation42_spill] sm:$0xff] %v9036_v20  ;;  %v6643_v21 = vld [vmem:[#allocation7 + $0x170] sm:$0xf] }
 0x172   :  { %7373 = vrcp.f32 %v3167_v38  ;;  %v6668_v52 = vor.u32 %v6952_v62, %v6665_v33  ;;  %v11692_v0 = vunpack.c.l.bf16 %v9025_v41  ;;  %2283 = vmatpush.bf16.msrb.mxu2 %v6508_v10  ;;  %v6889_v10 = vld [vmem:[#allocation5 + $0xa0] sm:$0xff] }
 0x173   :  { %v1500_v39 = vadd.f32 %v1499_v46, %v1331_v31  ;;  %v3296_v11 = vsub.f32 0.0, %v1836_v26  ;;  %v9038_v30 = vunpack.c.l.b16 %v4701_v32  ;;  %v6857_v32 = vld [vmem:[#allocation2 + $0xa0] sm:$0xff] }
 0x174   :  { %v4510_v48 = vmul.f32 %v7366_v50, %v11692_v0  ;;  %2452 = vmatpush.bf16.msrb.mxu3 %v6668_v52  ;;  %v11694_v52 = vunpack.c.l.bf16 %v9036_v20 }
 0x175   :  { %11691 = vst [vmem:[#allocation43_spill] sm:$0xff] %v9038_v30  ;;  %v2977_v63 = vsub.f32 0.0, %v1500_v39  ;;  %v7368_v58 = vpop.eup %7367  ;;  %v3382_v45 = vmul.f32 1.442695, %v3296_v11 }
 0x176   :  { %v7370_v46 = vpop.eup %7369  ;;  %v3487_v29 = vadd.f32 1.0, %v7368_v58  ;;  %v1668_v26 = vpop.f32.mrf.mxu2  ;;  %v4574_v31 = vpack.c.bf16 %v4510_v48, %v4510_v48 }
 0x177   :  { %v3064_v61 = vmul.f32 1.442695, %v2977_v63  ;;  %v7372_v39 = vpop.eup %7371  ;;  %7375 = vpow2.f32 %v3382_v45  ;;  %v1669_v50 = vadd.f32 %v1668_v26, %v8709_v22  ;;  %v1837_v62 = vpop.f32.mrf.mxu3  ;;  %v11693_v63 = vunpack.c.h.bf16 %v9025_v41 }
 0x178   :  { %v1333_v11 = vpop.f32.mrf.mxu0  ;;  %v7374_v33 = vpop.eup %7373  ;;  %7377 = vrcp.f32 %v3487_v29  ;;  %v3168_v0 = vadd.f32 1.0, %v7372_v39  ;;  %v4638_v45 = vmul.f32 %v7370_v46, %v11694_v52  ;;  %v11267_v39 = vunpack.c.h.bf16 %v9036_v20 }
 0x179   :  { %v1334_v51 = vadd.f32 %v1333_v11, %v8706_v9  ;;  %v1502_v38 = vpop.f32.mrf.mxu1  ;;  %7379 = vpow2.f32 %v3064_v61  ;;  %v1838_v58 = vadd.f32 %v1837_v62, %v1669_v50  ;;  %v4511_v13 = vmul.f32 %v7374_v33, %v11693_v63  ;;  %1372 = vmatmul.bf16.gmra.mxu0 %v6857_v32  ;;  %v9057_v63 = vld [vmem:[#allocation2 + $0x58] sm:$0xff]  }
 0x17a   :  { %7381 = vrcp.f32 %v3168_v0  ;;  %1541 = vmatmul.bf16.gmra.mxu1 %v6889_v10  ;;  %v9053_v50 = vunpack.c.l.b16 %v4574_v31  ;;  %v4702_v33 = vpack.c.bf16 %v4638_v45, %v4638_v45  ;;  %11697 = vst [vmem:[#allocation46_spill] sm:$0xff] %v9057_v63 }
 0x17b   :  { %v1503_v30 = vadd.f32 %v1502_v38, %v1334_v51  ;;  %v3297_v26 = vsub.f32 0.0, %v1838_v58  ;;  %1710 = vmatmul.bf16.gmra.mxu2 %v6857_v32  ;;  %v4575_v29 = vpack.c.bf16 %v4511_v13, %v4511_v13 }
 0x17c   :  { %1879 = vmatmul.bf16.gmra.mxu3 %v6889_v10  ;;  %11695 = vst [vmem:[#allocation44_spill] sm:$0xff] %v9053_v50 }
 0x17d   :  { %v2978_v11 = vsub.f32 0.0, %v1503_v30  ;;  %v7376_v48 = vpop.eup %7375  ;;  %v3384_v61 = vmul.f32 1.442695, %v3297_v26  ;;  %v9055_v62 = vunpack.c.l.b16 %v4575_v29  ;;  %v11266_v29 = vunpack.c.l.bf16 %v9057_v63 }
 0x17e   :  { %v7378_v51 = vpop.eup %7377  ;;  %v3488_v38 = vadd.f32 1.0, %v7376_v48  ;;  %v1671_v0 = vpop.f32.mrf.mxu2 }
 0x17f   :  { %11696 = vst [vmem:[#allocation45_spill] sm:$0xff] %v9055_v62  ;;  %v3066_v46 = vmul.f32 1.442695, %v2978_v11  ;;  %v7380_v58 = vpop.eup %7379  ;;  %7383 = vpow2.f32 %v3384_v61  ;;  %v1672_v13 = vadd.f32 %v1671_v0, %v8709_v22  ;;  %v1840_v32 = vpop.f32.mrf.mxu3  ;;  %v4639_v31 = vmul.f32 %v7378_v51, %v11267_v39  ;;  %v9100_v62 = vld [vmem:[#allocation5 + $0x60] sm:$0xff]  }
 0x180   :  { %v1335_v30 = vpop.f32.mrf.mxu0  ;;  %7385 = vrcp.f32 %v3488_v38  ;;  %v3169_v52 = vadd.f32 1.0, %v7380_v58  ;;  %v7382_v11 = vpop.eup %7381  ;;  %v9066_v0 = vunpack.c.l.b16 %v4702_v33  ;;  %11707 = vst [vmem:[#allocation54_spill] sm:$0xff] %v9100_v62 }
 0x181   :  { %v1336_v45 = vadd.f32 %v1335_v30, %v8706_v9  ;;  %v1504_v26 = vpop.f32.mrf.mxu1  ;;  %7387 = vpow2.f32 %v3066_v46  ;;  %v1841_v48 = vadd.f32 %v1840_v32, %v1672_v13  ;;  %v4703_v61 = vpack.c.bf16 %v4639_v31, %v4639_v31 }
 0x182   :  { %11698 = vst [vmem:[#allocation47_spill] sm:$0xff] %v9066_v0  ;;  %7389 = vrcp.f32 %v3169_v52  ;;  %v4512_v38 = vmul.f32 %v7382_v11, %v11266_v29  ;;  %v6890_v29 = vld [vmem:[#allocation5 + $0xa8] sm:$0xff] }
 0x183   :  { %v1505_v41 = vadd.f32 %v1504_v26, %v1336_v45  ;;  %v3298_v10 = vsub.f32 0.0, %v1841_v48  ;;  %v9070_v20 = vunpack.c.l.b16 %v4703_v61  ;;  %v6858_v26 = vld [vmem:[#allocation2 + $0xa8] sm:$0xff] }
 0x184   :  { %v4576_v0 = vpack.c.bf16 %v4512_v38, %v4512_v38 }
 0x185   :  { %11700 = vst [vmem:[#allocation49_spill] sm:$0xff] %v9070_v20  ;;  %v2979_v51 = vsub.f32 0.0, %v1505_v41  ;;  %v7384_v58 = vpop.eup %7383  ;;  %v3386_v30 = vmul.f32 1.442695, %v3298_v10  ;;  %v11702_v20 = vunpack.c.l.bf16 %v9068_v6 }
 0x186   :  { %v7386_v32 = vpop.eup %7385  ;;  %v3489_v31 = vadd.f32 1.0, %v7384_v58  ;;  %v1673_v45 = vpop.f32.mrf.mxu2 }
 0x187   :  { %v3068_v52 = vmul.f32 1.442695, %v2979_v51  ;;  %v7388_v48 = vpop.eup %7387  ;;  %7391 = vpow2.f32 %v3386_v30  ;;  %v1674_v41 = vadd.f32 %v1673_v45, %v8709_v22  ;;  %v1842_v61 = vpop.f32.mrf.mxu3  ;;  %v11701_v51 = vunpack.c.h.bf16 %v9057_v63 }
 0x188   :  { %v1338_v11 = vpop.f32.mrf.mxu0  ;;  %v7390_v10 = vpop.eup %7389  ;;  %7393 = vrcp.f32 %v3489_v31  ;;  %v3170_v39 = vadd.f32 1.0, %v7388_v48  ;;  %v4640_v30 = vmul.f32 %v7386_v32, %v11702_v20  ;;  %v11277_v48 = vunpack.c.h.bf16 %v9068_v6 }
 0x189   :  { %v1339_v46 = vadd.f32 %v1338_v11, %v8706_v9  ;;  %v1507_v13 = vpop.f32.mrf.mxu1  ;;  %7395 = vpow2.f32 %v3068_v52  ;;  %v1843_v33 = vadd.f32 %v1842_v61, %v1674_v41  ;;  %v4513_v58 = vmul.f32 %v7390_v10, %v11701_v51  ;;  %1377 = vmatmul.bf16.gmra.mxu0 %v6858_v26  ;;  %v9089_v51 = vld [vmem:[#allocation2 + $0x60] sm:$0xff]  }
 0x18a   :  { %7397 = vrcp.f32 %v3170_v39  ;;  %1546 = vmatmul.bf16.gmra.mxu1 %v6890_v29  ;;  %v9085_v41 = vunpack.c.l.b16 %v4576_v0  ;;  %v4704_v10 = vpack.c.bf16 %v4640_v30, %v4640_v30  ;;  %11705 = vst [vmem:[#allocation52_spill] sm:$0xff] %v9089_v51 }
 0x18b   :  { %v1508_v50 = vadd.f32 %v1507_v13, %v1339_v46  ;;  %v3299_v45 = vsub.f32 0.0, %v1843_v33  ;;  %1715 = vmatmul.bf16.gmra.mxu2 %v6858_v26  ;;  %v4577_v31 = vpack.c.bf16 %v4513_v58, %v4513_v58 }
 0x18c   :  { %1884 = vmatmul.bf16.gmra.mxu3 %v6890_v29  ;;  %11703 = vst [vmem:[#allocation50_spill] sm:$0xff] %v9085_v41 }
 0x18d   :  { %v2980_v11 = vsub.f32 0.0, %v1508_v50  ;;  %v7392_v38 = vpop.eup %7391  ;;  %v3388_v52 = vmul.f32 1.442695, %v3299_v45  ;;  %v9087_v61 = vunpack.c.l.b16 %v4577_v31  ;;  %v11276_v31 = vunpack.c.l.bf16 %v9089_v51 }
 0x18e   :  { %v7394_v20 = vpop.eup %7393  ;;  %v3490_v46 = vadd.f32 1.0, %v7392_v38  ;;  %v1676_v13 = vpop.f32.mrf.mxu2 }
 0x18f   :  { %11704 = vst [vmem:[#allocation51_spill] sm:$0xff] %v9087_v61  ;;  %v3070_v39 = vmul.f32 1.442695, %v2980_v11  ;;  %v7396_v33 = vpop.eup %7395  ;;  %7399 = vpow2.f32 %v3388_v52  ;;  %v1677_v32 = vadd.f32 %v1676_v13, %v8709_v22  ;;  %v1845_v26 = vpop.f32.mrf.mxu3  ;;  %v4641_v0 = vmul.f32 %v7394_v20, %v11277_v48  ;;  %v9132_v61 = vld [vmem:[#allocation5 + $0x68] sm:$0xff]  }
 0x190   :  { %v1340_v50 = vpop.f32.mrf.mxu0  ;;  %7401 = vrcp.f32 %v3490_v46  ;;  %v3171_v58 = vadd.f32 1.0, %v7396_v33  ;;  %v7398_v11 = vpop.eup %7397  ;;  %v9098_v13 = vunpack.c.l.b16 %v4704_v10  ;;  %11715 = vst [vmem:[#allocation60_spill] sm:$0xff] %v9132_v61 }
 0x191   :  { %v1341_v30 = vadd.f32 %v1340_v50, %v8706_v9  ;;  %v1509_v45 = vpop.f32.mrf.mxu1  ;;  %7403 = vpow2.f32 %v3070_v39  ;;  %v1846_v38 = vadd.f32 %v1845_v26, %v1677_v32  ;;  %v4705_v52 = vpack.c.bf16 %v4641_v0, %v4641_v0 }
 0x192   :  { %11706 = vst [vmem:[#allocation53_spill] sm:$0xff] %v9098_v13  ;;  %7405 = vrcp.f32 %v3171_v58  ;;  %v4514_v46 = vmul.f32 %v7398_v11, %v11276_v31  ;;  %v6891_v31 = vld [vmem:[#allocation5 + $0xb0] sm:$0xff] }
 0x193   :  { %v1510_v63 = vadd.f32 %v1509_v45, %v1341_v30  ;;  %v3300_v29 = vsub.f32 0.0, %v1846_v38  ;;  %v9102_v6 = vunpack.c.l.b16 %v4705_v52  ;;  %v6859_v45 = vld [vmem:[#allocation2 + $0xb0] sm:$0xff] }
 0x194   :  { %v4578_v13 = vpack.c.bf16 %v4514_v46, %v4514_v46 }
 0x195   :  { %11708 = vst [vmem:[#allocation55_spill] sm:$0xff] %v9102_v6  ;;  %v2981_v20 = vsub.f32 0.0, %v1510_v63  ;;  %v7400_v33 = vpop.eup %7399  ;;  %v3390_v50 = vmul.f32 1.442695, %v3300_v29  ;;  %v11710_v6 = vunpack.c.l.bf16 %v9100_v62 }
 0x196   :  { %v7402_v26 = vpop.eup %7401  ;;  %v3491_v0 = vadd.f32 1.0, %v7400_v33  ;;  %v1678_v30 = vpop.f32.mrf.mxu2 }
 0x197   :  { %v3072_v58 = vmul.f32 1.442695, %v2981_v20  ;;  %v7404_v38 = vpop.eup %7403  ;;  %7407 = vpow2.f32 %v3390_v50  ;;  %v1679_v63 = vadd.f32 %v1678_v30, %v8709_v22  ;;  %v1847_v52 = vpop.f32.mrf.mxu3  ;;  %v11709_v20 = vunpack.c.h.bf16 %v9089_v51 }
 0x198   :  { %v1343_v11 = vpop.f32.mrf.mxu0  ;;  %v7406_v29 = vpop.eup %7405  ;;  %7409 = vrcp.f32 %v3491_v0  ;;  %v3172_v48 = vadd.f32 1.0, %v7404_v38  ;;  %v4642_v50 = vmul.f32 %v7402_v26, %v11710_v6  ;;  %v11287_v38 = vunpack.c.h.bf16 %v9100_v62 }
 0x199   :  { %v1344_v39 = vadd.f32 %v1343_v11, %v8706_v9  ;;  %v1512_v32 = vpop.f32.mrf.mxu1  ;;  %7411 = vpow2.f32 %v3072_v58  ;;  %v1848_v10 = vadd.f32 %v1847_v52, %v1679_v63  ;;  %v4515_v33 = vmul.f32 %v7406_v29, %v11709_v20  ;;  %1382 = vmatmul.bf16.gmra.mxu0 %v6859_v45  ;;  %v9121_v20 = vld [vmem:[#allocation2 + $0x68] sm:$0xff]  }
 0x19a   :  { %7413 = vrcp.f32 %v3172_v48  ;;  %1551 = vmatmul.bf16.gmra.mxu1 %v6891_v31  ;;  %v9117_v63 = vunpack.c.l.b16 %v4578_v13  ;;  %v4706_v29 = vpack.c.bf16 %v4642_v50, %v4642_v50  ;;  %11713 = vst [vmem:[#allocation58_spill] sm:$0xff] %v9121_v20 }
 0x19b   :  { %v1513_v41 = vadd.f32 %v1512_v32, %v1344_v39  ;;  %v3301_v30 = vsub.f32 0.0, %v1848_v10  ;;  %1720 = vmatmul.bf16.gmra.mxu2 %v6859_v45  ;;  %v4579_v0 = vpack.c.bf16 %v4515_v33, %v4515_v33 }
 0x19c   :  { %1889 = vmatmul.bf16.gmra.mxu3 %v6891_v31  ;;  %11711 = vst [vmem:[#allocation56_spill] sm:$0xff] %v9117_v63 }
 0x19d   :  { %v2982_v11 = vsub.f32 0.0, %v1513_v41  ;;  %v7408_v46 = vpop.eup %7407  ;;  %v3392_v58 = vmul.f32 1.442695, %v3301_v30  ;;  %v9119_v52 = vunpack.c.l.b16 %v4579_v0  ;;  %v11286_v0 = vunpack.c.l.bf16 %v9121_v20 }
 0x19e   :  { %v7410_v6 = vpop.eup %7409  ;;  %v3492_v39 = vadd.f32 1.0, %v7408_v46  ;;  %v1681_v32 = vpop.f32.mrf.mxu2 }
 0x19f   :  { %11712 = vst [vmem:[#allocation57_spill] sm:$0xff] %v9119_v52  ;;  %v3074_v48 = vmul.f32 1.442695, %v2982_v11  ;;  %v7412_v10 = vpop.eup %7411  ;;  %7415 = vpow2.f32 %v3392_v58  ;;  %v1682_v26 = vadd.f32 %v1681_v32, %v8709_v22  ;;  %v1850_v45 = vpop.f32.mrf.mxu3  ;;  %v4643_v13 = vmul.f32 %v7410_v6, %v11287_v38  ;;  %v6909_v52 = vld [vmem:[#allocation7 + $0x40] sm:$0xf0] }
 0x1a0   :  { %v1345_v41 = vpop.f32.mrf.mxu0  ;;  %7417 = vrcp.f32 %v3492_v39  ;;  %v3173_v33 = vadd.f32 1.0, %v7412_v10  ;;  %v7414_v11 = vpop.eup %7413  ;;  %v9130_v32 = vunpack.c.l.b16 %v4706_v29 }
 0x1a1   :  { %v1346_v50 = vadd.f32 %v1345_v41, %v8706_v9  ;;  %v1514_v30 = vpop.f32.mrf.mxu1  ;;  %7419 = vpow2.f32 %v3074_v48  ;;  %v1851_v46 = vadd.f32 %v1850_v45, %v1682_v26  ;;  %v4707_v58 = vpack.c.bf16 %v4643_v13, %v4643_v13 }
 0x1a2   :  { %11714 = vst [vmem:[#allocation59_spill] sm:$0xff] %v9130_v32  ;;  %7421 = vrcp.f32 %v3173_v33  ;;  %v4516_v39 = vmul.f32 %v7414_v11, %v11286_v0  ;;  %v6892_v0 = vld [vmem:[#allocation5 + $0xb8] sm:$0xff] }
 0x1a3   :  { %v1515_v51 = vadd.f32 %v1514_v30, %v1346_v50  ;;  %v3302_v31 = vsub.f32 0.0, %v1851_v46  ;;  %v9134_v62 = vunpack.c.l.b16 %v4707_v58  ;;  %v6860_v30 = vld [vmem:[#allocation2 + $0xb8] sm:$0xff] }
 0x1a4   :  { %v4580_v32 = vpack.c.bf16 %v4516_v39, %v4516_v39 }
 0x1a5   :  { %11716 = vst [vmem:[#allocation61_spill] sm:$0xff] %v9134_v62  ;;  %v2983_v6 = vsub.f32 0.0, %v1515_v51  ;;  %v7416_v10 = vpop.eup %7415  ;;  %v3394_v41 = vmul.f32 1.442695, %v3302_v31  ;;  %v11718_v62 = vunpack.c.l.bf16 %v9132_v61 }
 0x1a6   :  { %v7418_v45 = vpop.eup %7417  ;;  %v3493_v13 = vadd.f32 1.0, %v7416_v10  ;;  %v1683_v50 = vpop.f32.mrf.mxu2 }
 0x1a7   :  { %v3076_v33 = vmul.f32 1.442695, %v2983_v6  ;;  %v7420_v46 = vpop.eup %7419  ;;  %7423 = vpow2.f32 %v3394_v41  ;;  %v1684_v51 = vadd.f32 %v1683_v50, %v8709_v22  ;;  %v1852_v58 = vpop.f32.mrf.mxu3  ;;  %v11717_v6 = vunpack.c.h.bf16 %v9121_v20  ;;  %v6483_v50 = vld [vmem:[#allocation7 + $0x30] sm:$0xf] }
 0x1a8   :  { %v1348_v11 = vpop.f32.mrf.mxu0  ;;  %v7422_v31 = vpop.eup %7421  ;;  %7425 = vrcp.f32 %v3493_v13  ;;  %v3174_v38 = vadd.f32 1.0, %v7420_v46  ;;  %v4644_v41 = vmul.f32 %v7418_v45, %v11718_v62  ;;  %v6484_v39 = vor.u32 %v6909_v52, %v6483_v50  ;;  %v9153_v45 = vld [vmem:[#allocation2 + $0x70] sm:$0xff]  }
 0x1a9   :  { %v1349_v48 = vadd.f32 %v1348_v11, %v8706_v9  ;;  %v1517_v26 = vpop.f32.mrf.mxu1  ;;  %7427 = vpow2.f32 %v3076_v33  ;;  %v1853_v29 = vadd.f32 %v1852_v58, %v1684_v51  ;;  %v4517_v10 = vmul.f32 %v7422_v31, %v11717_v6  ;;  %1387 = vmatmul.bf16.gmra.mxu0 %v6860_v30  ;;  %v6949_v33 = vld [vmem:[#allocation7 + $0x180] sm:$0xf0]  ;;  %11721 = vst [vmem:[#allocation64_spill] sm:$0xff] %v9153_v45 }
 0x1aa   :  { %7429 = vrcp.f32 %v3174_v38  ;;  %1556 = vmatmul.bf16.gmra.mxu1 %v6892_v0  ;;  %v6644_v11 = vor.u32 %v6949_v33, %v6643_v21  ;;  %1946 = vmatpush.bf16.msrb.mxu0 %v6484_v39  ;;  %v9149_v62 = vunpack.c.l.b16 %v4580_v32  ;;  %v6907_v32 = vld [vmem:[#allocation7 + $0x34] sm:$0xf] }
 0x1ab   :  { %v1518_v63 = vadd.f32 %v1517_v26, %v1349_v48  ;;  %v3303_v46 = vsub.f32 0.0, %v1853_v29  ;;  %1725 = vmatmul.bf16.gmra.mxu2 %v6860_v30  ;;  %v4581_v51 = vpack.c.bf16 %v4517_v10, %v4517_v10  ;;  %v4708_v26 = vpack.c.bf16 %v4644_v41, %v4644_v41 }
 0x1ac   :  { %1894 = vmatmul.bf16.gmra.mxu3 %v6892_v0  ;;  %11719 = vst [vmem:[#allocation62_spill] sm:$0xff] %v9149_v62  ;;  %2115 = vmatpush.bf16.msrb.mxu1 %v6644_v11  ;;  %v11722_v10 = vunpack.c.h.bf16 %v9132_v61  ;;  %v6485_v61 = vld [vmem:[#allocation7 + $0x44] sm:$0xf0]  ;;  %v9196_v62 = vld [vmem:[#allocation5 + $0x78] sm:$0xff]  }
 0x1ad   :  { %v2984_v58 = vsub.f32 0.0, %v1518_v63  ;;  %v7424_v31 = vpop.eup %7423  ;;  %v3396_v6 = vmul.f32 1.442695, %v3303_v46  ;;  %v9151_v48 = vunpack.c.l.b16 %v4581_v51  ;;  %11733 = vst [vmem:[#allocation72_spill] sm:$0xff] %v9196_v62 }
 0x1ae   :  { %v7426_v38 = vpop.eup %7425  ;;  %v3494_v29 = vadd.f32 1.0, %v7424_v31  ;;  %v1686_v30 = vpop.f32.mrf.mxu2  ;;  %v9162_v31 = vunpack.c.l.b16 %v4708_v26 }
 0x1af   :  { %11720 = vst [vmem:[#allocation63_spill] sm:$0xff] %v9151_v48  ;;  %v3078_v13 = vmul.f32 1.442695, %v2984_v58  ;;  %v7428_v52 = vpop.eup %7427  ;;  %7431 = vpow2.f32 %v3396_v6  ;;  %v1687_v63 = vadd.f32 %v1686_v30, %v8709_v22  ;;  %v1855_v21 = vpop.f32.mrf.mxu3  ;;  %v4645_v50 = vmul.f32 %v7426_v38, %v11722_v10  ;;  %v9164_v6 = vld [vmem:[#allocation5 + $0x70] sm:$0xff]   ;;  %v6645_v10 = vld [vmem:[#allocation7 + $0x184] sm:$0xf0] }
 0x1b0   :  { %v1350_v0 = vpop.f32.mrf.mxu0  ;;  %7433 = vrcp.f32 %v3494_v29  ;;  %v3175_v41 = vadd.f32 1.0, %v7428_v52  ;;  %v7430_v51 = vpop.eup %7429  ;;  %11723 = vst [vmem:[#allocation65_spill] sm:$0xff] %v9162_v31  ;;  %v6947_v38 = vld [vmem:[#allocation7 + $0x174] sm:$0xf]  ;;  %v6488_v52 = vor.u32 %v6907_v32, %v6485_v61  ;;  %v6623_v48 = vld [vmem:[#allocation7 + $0x148] sm:$0xf] }
 0x1b1   :  { %v1351_v46 = vadd.f32 %v1350_v0, %v8706_v9  ;;  %v1519_v39 = vpop.f32.mrf.mxu1  ;;  %7435 = vpow2.f32 %v3078_v13  ;;  %v1856_v58 = vadd.f32 %v1855_v21, %v1687_v63  ;;  %v4709_v11 = vpack.c.bf16 %v4645_v50, %v4645_v50  ;;  %11724 = vst [vmem:[#allocation66_spill] sm:$0xff] %v9164_v6 }
 0x1b2   :  { %7437 = vrcp.f32 %v3175_v41  ;;  %v6648_v33 = vor.u32 %v6947_v38, %v6645_v10  ;;  %v11726_v13 = vunpack.c.l.bf16 %v9153_v45  ;;  %2284 = vmatpush.bf16.msrb.mxu2 %v6488_v52  ;;  %v6893_v52 = vld [vmem:[#allocation5 + $0xc0] sm:$0xff] }
 0x1b3   :  { %v1520_v30 = vadd.f32 %v1519_v39, %v1351_v46  ;;  %v3304_v29 = vsub.f32 0.0, %v1856_v58  ;;  %v9166_v0 = vunpack.c.l.b16 %v4709_v11  ;;  %v6861_v11 = vld [vmem:[#allocation2 + $0xc0] sm:$0xff] }
 0x1b4   :  { %v4518_v63 = vmul.f32 %v7430_v51, %v11726_v13  ;;  %2453 = vmatpush.bf16.msrb.mxu3 %v6648_v33  ;;  %v11728_v33 = vunpack.c.l.bf16 %v9164_v6 }
 0x1b5   :  { %11725 = vst [vmem:[#allocation67_spill] sm:$0xff] %v9166_v0  ;;  %v2985_v20 = vsub.f32 0.0, %v1520_v30  ;;  %v7432_v21 = vpop.eup %7431  ;;  %v3398_v26 = vmul.f32 1.442695, %v3304_v29 }
 0x1b6   :  { %v7434_v39 = vpop.eup %7433  ;;  %v3495_v61 = vadd.f32 1.0, %v7432_v21  ;;  %v1688_v58 = vpop.f32.mrf.mxu2  ;;  %v4582_v46 = vpack.c.bf16 %v4518_v63, %v4518_v63 }
 0x1b7   :  { %v3080_v32 = vmul.f32 1.442695, %v2985_v20  ;;  %v7436_v30 = vpop.eup %7435  ;;  %7439 = vpow2.f32 %v3398_v26  ;;  %v1689_v51 = vadd.f32 %v1688_v58, %v8709_v22  ;;  %v1857_v38 = vpop.f32.mrf.mxu3  ;;  %v11727_v20 = vunpack.c.h.bf16 %v9153_v45 }
 0x1b8   :  { %v1353_v29 = vpop.f32.mrf.mxu0  ;;  %v7438_v10 = vpop.eup %7437  ;;  %7441 = vrcp.f32 %v3495_v61  ;;  %v3176_v13 = vadd.f32 1.0, %v7436_v30  ;;  %v4646_v26 = vmul.f32 %v7434_v39, %v11728_v33  ;;  %v11305_v30 = vunpack.c.h.bf16 %v9164_v6 }
 0x1b9   :  { %v1354_v50 = vadd.f32 %v1353_v29, %v8706_v9  ;;  %v1522_v41 = vpop.f32.mrf.mxu1  ;;  %7443 = vpow2.f32 %v3080_v32  ;;  %v1858_v21 = vadd.f32 %v1857_v38, %v1689_v51  ;;  %v4519_v31 = vmul.f32 %v7438_v10, %v11727_v20  ;;  %1392 = vmatmul.bf16.gmra.mxu0 %v6861_v11  ;;  %v9185_v20 = vld [vmem:[#allocation2 + $0x78] sm:$0xff]  }
 0x1ba   :  { %7445 = vrcp.f32 %v3176_v13  ;;  %1561 = vmatmul.bf16.gmra.mxu1 %v6893_v52  ;;  %v9181_v51 = vunpack.c.l.b16 %v4582_v46  ;;  %v4710_v10 = vpack.c.bf16 %v4646_v26, %v4646_v26  ;;  %11731 = vst [vmem:[#allocation70_spill] sm:$0xff] %v9185_v20 }
 0x1bb   :  { %v1523_v0 = vadd.f32 %v1522_v41, %v1354_v50  ;;  %v3305_v58 = vsub.f32 0.0, %v1858_v21  ;;  %1730 = vmatmul.bf16.gmra.mxu2 %v6861_v11  ;;  %v4583_v61 = vpack.c.bf16 %v4519_v31, %v4519_v31 }
 0x1bc   :  { %1899 = vmatmul.bf16.gmra.mxu3 %v6893_v52  ;;  %11729 = vst [vmem:[#allocation68_spill] sm:$0xff] %v9181_v51 }
 0x1bd   :  { %v2986_v29 = vsub.f32 0.0, %v1523_v0  ;;  %v7440_v63 = vpop.eup %7439  ;;  %v3400_v32 = vmul.f32 1.442695, %v3305_v58  ;;  %v9183_v38 = vunpack.c.l.b16 %v4583_v61  ;;  %v11304_v61 = vunpack.c.l.bf16 %v9185_v20 }
 0x1be   :  { %v7442_v50 = vpop.eup %7441  ;;  %v3496_v41 = vadd.f32 1.0, %v7440_v63  ;;  %v1691_v13 = vpop.f32.mrf.mxu2 }
 0x1bf   :  { %11730 = vst [vmem:[#allocation69_spill] sm:$0xff] %v9183_v38  ;;  %v3082_v39 = vmul.f32 1.442695, %v2986_v29  ;;  %v7444_v21 = vpop.eup %7443  ;;  %7447 = vpow2.f32 %v3400_v32  ;;  %v1692_v31 = vadd.f32 %v1691_v13, %v8709_v22  ;;  %v1860_v11 = vpop.f32.mrf.mxu3  ;;  %v4647_v46 = vmul.f32 %v7442_v50, %v11305_v30  ;;  %v9228_v38 = vld [vmem:[#allocation5 + $0x80] sm:$0xff]  }
 0x1c0   :  { %v1355_v0 = vpop.f32.mrf.mxu0  ;;  %7449 = vrcp.f32 %v3496_v41  ;;  %v3177_v33 = vadd.f32 1.0, %v7444_v21  ;;  %v7446_v29 = vpop.eup %7445  ;;  %v9194_v13 = vunpack.c.l.b16 %v4710_v10  ;;  %11741 = vst [vmem:[#allocation78_spill] sm:$0xff] %v9228_v38 }
 0x1c1   :  { %v1356_v26 = vadd.f32 %v1355_v0, %v8706_v9  ;;  %v1524_v58 = vpop.f32.mrf.mxu1  ;;  %7451 = vpow2.f32 %v3082_v39  ;;  %v1861_v63 = vadd.f32 %v1860_v11, %v1692_v31  ;;  %v4711_v32 = vpack.c.bf16 %v4647_v46, %v4647_v46 }
 0x1c2   :  { %11732 = vst [vmem:[#allocation71_spill] sm:$0xff] %v9194_v13  ;;  %7453 = vrcp.f32 %v3177_v33  ;;  %v4520_v41 = vmul.f32 %v7446_v29, %v11304_v61  ;;  %v6894_v61 = vld [vmem:[#allocation5 + $0xc8] sm:$0xff] }
 0x1c3   :  { %v1525_v45 = vadd.f32 %v1524_v58, %v1356_v26  ;;  %v3306_v52 = vsub.f32 0.0, %v1861_v63  ;;  %v9198_v6 = vunpack.c.l.b16 %v4711_v32  ;;  %v6862_v58 = vld [vmem:[#allocation2 + $0xc8] sm:$0xff] }
 0x1c4   :  { %v4584_v13 = vpack.c.bf16 %v4520_v41, %v4520_v41 }
 0x1c5   :  { %11734 = vst [vmem:[#allocation73_spill] sm:$0xff] %v9198_v6  ;;  %v2987_v50 = vsub.f32 0.0, %v1525_v45  ;;  %v7448_v21 = vpop.eup %7447  ;;  %v3402_v0 = vmul.f32 1.442695, %v3306_v52  ;;  %v11736_v6 = vunpack.c.l.bf16 %v9196_v62 }
 0x1c6   :  { %v7450_v11 = vpop.eup %7449  ;;  %v3497_v46 = vadd.f32 1.0, %v7448_v21  ;;  %v1693_v26 = vpop.f32.mrf.mxu2 }
 0x1c7   :  { %v3084_v33 = vmul.f32 1.442695, %v2987_v50  ;;  %v7452_v63 = vpop.eup %7451  ;;  %7455 = vpow2.f32 %v3402_v0  ;;  %v1694_v45 = vadd.f32 %v1693_v26, %v8709_v22  ;;  %v1862_v32 = vpop.f32.mrf.mxu3  ;;  %v11735_v50 = vunpack.c.h.bf16 %v9185_v20 }
 0x1c8   :  { %v1358_v29 = vpop.f32.mrf.mxu0  ;;  %v7454_v52 = vpop.eup %7453  ;;  %7457 = vrcp.f32 %v3497_v46  ;;  %v3178_v30 = vadd.f32 1.0, %v7452_v63  ;;  %v4648_v0 = vmul.f32 %v7450_v11, %v11736_v6  ;;  %v11315_v63 = vunpack.c.h.bf16 %v9196_v62 }
 0x1c9   :  { %v1359_v39 = vadd.f32 %v1358_v29, %v8706_v9  ;;  %v1527_v31 = vpop.f32.mrf.mxu1  ;;  %7459 = vpow2.f32 %v3084_v33  ;;  %v1863_v10 = vadd.f32 %v1862_v32, %v1694_v45  ;;  %v4521_v21 = vmul.f32 %v7454_v52, %v11735_v50  ;;  %1397 = vmatmul.bf16.gmra.mxu0 %v6862_v58  ;;  %v9217_v50 = vld [vmem:[#allocation2 + $0x80] sm:$0xff]  }
 0x1ca   :  { %7461 = vrcp.f32 %v3178_v30  ;;  %1566 = vmatmul.bf16.gmra.mxu1 %v6894_v61  ;;  %v9213_v45 = vunpack.c.l.b16 %v4584_v13  ;;  %v4712_v52 = vpack.c.bf16 %v4648_v0, %v4648_v0  ;;  %11739 = vst [vmem:[#allocation76_spill] sm:$0xff] %v9217_v50 }
 0x1cb   :  { %v1528_v51 = vadd.f32 %v1527_v31, %v1359_v39  ;;  %v3307_v26 = vsub.f32 0.0, %v1863_v10  ;;  %1735 = vmatmul.bf16.gmra.mxu2 %v6862_v58  ;;  %v4585_v46 = vpack.c.bf16 %v4521_v21, %v4521_v21 }
 0x1cc   :  { %1904 = vmatmul.bf16.gmra.mxu3 %v6894_v61  ;;  %11737 = vst [vmem:[#allocation74_spill] sm:$0xff] %v9213_v45 }
 0x1cd   :  { %v2988_v29 = vsub.f32 0.0, %v1528_v51  ;;  %v7456_v41 = vpop.eup %7455  ;;  %v3404_v33 = vmul.f32 1.442695, %v3307_v26  ;;  %v9215_v32 = vunpack.c.l.b16 %v4585_v46  ;;  %v11314_v46 = vunpack.c.l.bf16 %v9217_v50 }
 0x1ce   :  { %v7458_v6 = vpop.eup %7457  ;;  %v3498_v39 = vadd.f32 1.0, %v7456_v41  ;;  %v1696_v31 = vpop.f32.mrf.mxu2 }
 0x1cf   :  { %11738 = vst [vmem:[#allocation75_spill] sm:$0xff] %v9215_v32  ;;  %v3086_v30 = vmul.f32 1.442695, %v2988_v29  ;;  %v7460_v10 = vpop.eup %7459  ;;  %7463 = vpow2.f32 %v3404_v33  ;;  %v1697_v11 = vadd.f32 %v1696_v31, %v8709_v22  ;;  %v1865_v58 = vpop.f32.mrf.mxu3  ;;  %v4649_v13 = vmul.f32 %v7458_v6, %v11315_v63  ;;  %v9260_v32 = vld [vmem:[#allocation5 + $0x88] sm:$0xff]  }
 0x1d0   :  { %v1360_v51 = vpop.f32.mrf.mxu0  ;;  %7465 = vrcp.f32 %v3498_v39  ;;  %v3179_v21 = vadd.f32 1.0, %v7460_v10  ;;  %v7462_v29 = vpop.eup %7461  ;;  %v9226_v31 = vunpack.c.l.b16 %v4712_v52  ;;  %11749 = vst [vmem:[#allocation84_spill] sm:$0xff] %v9260_v32 }
 0x1d1   :  { %v1361_v0 = vadd.f32 %v1360_v51, %v8706_v9  ;;  %v1529_v26 = vpop.f32.mrf.mxu1  ;;  %7467 = vpow2.f32 %v3086_v30  ;;  %v1866_v41 = vadd.f32 %v1865_v58, %v1697_v11  ;;  %v4713_v33 = vpack.c.bf16 %v4649_v13, %v4649_v13 }
 0x1d2   :  { %11740 = vst [vmem:[#allocation77_spill] sm:$0xff] %v9226_v31  ;;  %7469 = vrcp.f32 %v3179_v21  ;;  %v4522_v39 = vmul.f32 %v7462_v29, %v11314_v46  ;;  %v6895_v46 = vld [vmem:[#allocation5 + $0xd0] sm:$0xff] }
 0x1d3   :  { %v1530_v20 = vadd.f32 %v1529_v26, %v1361_v0  ;;  %v3308_v61 = vsub.f32 0.0, %v1866_v41  ;;  %v9230_v62 = vunpack.c.l.b16 %v4713_v33  ;;  %v6863_v26 = vld [vmem:[#allocation2 + $0xd0] sm:$0xff] }
 0x1d4   :  { %v4586_v31 = vpack.c.bf16 %v4522_v39, %v4522_v39 }
 0x1d5   :  { %11742 = vst [vmem:[#allocation79_spill] sm:$0xff] %v9230_v62  ;;  %v2989_v6 = vsub.f32 0.0, %v1530_v20  ;;  %v7464_v10 = vpop.eup %7463  ;;  %v3406_v51 = vmul.f32 1.442695, %v3308_v61  ;;  %v11744_v62 = vunpack.c.l.bf16 %v9228_v38 }
 0x1d6   :  { %v7466_v58 = vpop.eup %7465  ;;  %v3499_v13 = vadd.f32 1.0, %v7464_v10  ;;  %v1698_v0 = vpop.f32.mrf.mxu2 }
 0x1d7   :  { %v3088_v21 = vmul.f32 1.442695, %v2989_v6  ;;  %v7468_v41 = vpop.eup %7467  ;;  %7471 = vpow2.f32 %v3406_v51  ;;  %v1699_v20 = vadd.f32 %v1698_v0, %v8709_v22  ;;  %v1867_v33 = vpop.f32.mrf.mxu3  ;;  %v11743_v6 = vunpack.c.h.bf16 %v9217_v50 }
 0x1d8   :  { %v1363_v29 = vpop.f32.mrf.mxu0  ;;  %v7470_v61 = vpop.eup %7469  ;;  %7473 = vrcp.f32 %v3499_v13  ;;  %v3180_v63 = vadd.f32 1.0, %v7468_v41  ;;  %v4650_v51 = vmul.f32 %v7466_v58, %v11744_v62  ;;  %v11325_v41 = vunpack.c.h.bf16 %v9228_v38 }
 0x1d9   :  { %v1364_v30 = vadd.f32 %v1363_v29, %v8706_v9  ;;  %v1532_v11 = vpop.f32.mrf.mxu1  ;;  %7475 = vpow2.f32 %v3088_v21  ;;  %v1868_v52 = vadd.f32 %v1867_v33, %v1699_v20  ;;  %v4523_v10 = vmul.f32 %v7470_v61, %v11743_v6  ;;  %1402 = vmatmul.bf16.gmra.mxu0 %v6863_v26  ;;  %v9249_v6 = vld [vmem:[#allocation2 + $0x88] sm:$0xff]  }
 0x1da   :  { %7477 = vrcp.f32 %v3180_v63  ;;  %1571 = vmatmul.bf16.gmra.mxu1 %v6895_v46  ;;  %v9245_v20 = vunpack.c.l.b16 %v4586_v31  ;;  %v4714_v61 = vpack.c.bf16 %v4650_v51, %v4650_v51  ;;  %11747 = vst [vmem:[#allocation82_spill] sm:$0xff] %v9249_v6 }
 0x1db   :  { %v1533_v45 = vadd.f32 %v1532_v11, %v1364_v30  ;;  %v3309_v0 = vsub.f32 0.0, %v1868_v52  ;;  %1740 = vmatmul.bf16.gmra.mxu2 %v6863_v26  ;;  %v4587_v13 = vpack.c.bf16 %v4523_v10, %v4523_v10 }
 0x1dc   :  { %1909 = vmatmul.bf16.gmra.mxu3 %v6895_v46  ;;  %11745 = vst [vmem:[#allocation80_spill] sm:$0xff] %v9245_v20 }
 0x1dd   :  { %v2990_v29 = vsub.f32 0.0, %v1533_v45  ;;  %v7472_v39 = vpop.eup %7471  ;;  %v3408_v21 = vmul.f32 1.442695, %v3309_v0  ;;  %v9247_v33 = vunpack.c.l.b16 %v4587_v13  ;;  %v11324_v13 = vunpack.c.l.bf16 %v9249_v6 }
 0x1de   :  { %v7474_v62 = vpop.eup %7473  ;;  %v3500_v30 = vadd.f32 1.0, %v7472_v39  ;;  %v1701_v11 = vpop.f32.mrf.mxu2 }
 0x1df   :  { %11746 = vst [vmem:[#allocation81_spill] sm:$0xff] %v9247_v33  ;;  %v3090_v63 = vmul.f32 1.442695, %v2990_v29  ;;  %v7476_v52 = vpop.eup %7475  ;;  %7479 = vpow2.f32 %v3408_v21  ;;  %v1702_v58 = vadd.f32 %v1701_v11, %v8709_v22  ;;  %v1870_v26 = vpop.f32.mrf.mxu3  ;;  %v4651_v31 = vmul.f32 %v7474_v62, %v11325_v41  ;;  %v6904_v33 = vld [vmem:[#allocation7 + $0x18] sm:$0xf0] }
 0x1e0   :  { %v1365_v45 = vpop.f32.mrf.mxu0  ;;  %7481 = vrcp.f32 %v3500_v30  ;;  %v3181_v10 = vadd.f32 1.0, %v7476_v52  ;;  %v7478_v29 = vpop.eup %7477  ;;  %v9258_v11 = vunpack.c.l.b16 %v4714_v61 }
 0x1e1   :  { %v1366_v51 = vadd.f32 %v1365_v45, %v8706_v9  ;;  %v1534_v0 = vpop.f32.mrf.mxu1  ;;  %7483 = vpow2.f32 %v3090_v63  ;;  %v1871_v39 = vadd.f32 %v1870_v26, %v1702_v58  ;;  %v4715_v21 = vpack.c.bf16 %v4651_v31, %v4651_v31 }
 0x1e2   :  { %11748 = vst [vmem:[#allocation83_spill] sm:$0xff] %v9258_v11  ;;  %7485 = vrcp.f32 %v3181_v10  ;;  %v4524_v30 = vmul.f32 %v7478_v29, %v11324_v13  ;;  %v6896_v13 = vld [vmem:[#allocation5 + $0xd8] sm:$0xff] }
 0x1e3   :  { %v1535_v50 = vadd.f32 %v1534_v0, %v1366_v51  ;;  %v3310_v46 = vsub.f32 0.0, %v1871_v39  ;;  %v9262_v38 = vunpack.c.l.b16 %v4715_v21  ;;  %v6864_v0 = vld [vmem:[#allocation2 + $0xd8] sm:$0xff] }
 0x1e4   :  { %v4588_v11 = vpack.c.bf16 %v4524_v30, %v4524_v30 }
 0x1e5   :  { %11750 = vst [vmem:[#allocation85_spill] sm:$0xff] %v9262_v38  ;;  %v2991_v62 = vsub.f32 0.0, %v1535_v50  ;;  %v7480_v52 = vpop.eup %7479  ;;  %v3410_v45 = vmul.f32 1.442695, %v3310_v46  ;;  %v11752_v38 = vunpack.c.l.bf16 %v9260_v32 }
 0x1e6   :  { %v7482_v26 = vpop.eup %7481  ;;  %v3501_v31 = vadd.f32 1.0, %v7480_v52  ;;  %v1703_v51 = vpop.f32.mrf.mxu2 }
 0x1e7   :  { %v3092_v10 = vmul.f32 1.442695, %v2991_v62  ;;  %v7484_v39 = vpop.eup %7483  ;;  %7487 = vpow2.f32 %v3410_v45  ;;  %v1704_v50 = vadd.f32 %v1703_v51, %v8709_v22  ;;  %v1872_v21 = vpop.f32.mrf.mxu3  ;;  %v11751_v62 = vunpack.c.h.bf16 %v9249_v6  ;;  %v6463_v51 = vld [vmem:[#allocation7 + $0x8] sm:$0xf] }
 0x1e8   :  { %v1368_v29 = vpop.f32.mrf.mxu0  ;;  %v7486_v46 = vpop.eup %7485  ;;  %7489 = vrcp.f32 %v3501_v31  ;;  %v3182_v41 = vadd.f32 1.0, %v7484_v39  ;;  %v4652_v45 = vmul.f32 %v7482_v26, %v11752_v38  ;;  %v6464_v30 = vor.u32 %v6904_v33, %v6463_v51  ;;  %v9281_v26 = vld [vmem:[#allocation2 + $0x90] sm:$0xff]  }
 0x1e9   :  { %v1369_v63 = vadd.f32 %v1368_v29, %v8706_v9  ;;  %v1537_v58 = vpop.f32.mrf.mxu1  ;;  %7491 = vpow2.f32 %v3092_v10  ;;  %v1873_v61 = vadd.f32 %v1872_v21, %v1704_v50  ;;  %v4525_v52 = vmul.f32 %v7486_v46, %v11751_v62  ;;  %1407 = vmatmul.bf16.gmra.mxu0 %v6864_v0  ;;  %v6944_v10 = vld [vmem:[#allocation7 + $0x158] sm:$0xf0]  ;;  %11755 = vst [vmem:[#allocation88_spill] sm:$0xff] %v9281_v26 }
 0x1ea   :  { %7493 = vrcp.f32 %v3182_v41  ;;  %1576 = vmatmul.bf16.gmra.mxu1 %v6896_v13  ;;  %v6624_v29 = vor.u32 %v6944_v10, %v6623_v48  ;;  %1947 = vmatpush.bf16.msrb.mxu0 %v6464_v30  ;;  %v9277_v38 = vunpack.c.l.b16 %v4588_v11  ;;  %v6902_v11 = vld [vmem:[#allocation7 + $0xc] sm:$0xf] }
 0x1eb   :  { %v1538_v20 = vadd.f32 %v1537_v58, %v1369_v63  ;;  %v3311_v39 = vsub.f32 0.0, %v1873_v61  ;;  %1745 = vmatmul.bf16.gmra.mxu2 %v6864_v0  ;;  %v4589_v50 = vpack.c.bf16 %v4525_v52, %v4525_v52  ;;  %v4716_v58 = vpack.c.bf16 %v4652_v45, %v4652_v45 }
 0x1ec   :  { %1914 = vmatmul.bf16.gmra.mxu3 %v6896_v13  ;;  %11753 = vst [vmem:[#allocation86_spill] sm:$0xff] %v9277_v38  ;;  %2116 = vmatpush.bf16.msrb.mxu1 %v6624_v29  ;;  %v11756_v52 = vunpack.c.h.bf16 %v9260_v32  ;;  %v6465_v32 = vld [vmem:[#allocation7 + $0x1c] sm:$0xf0]  ;;  %v9324_v38 = vld [vmem:[#allocation5 + $0x98] sm:$0xff]  }
 0x1ed   :  { %v2992_v21 = vsub.f32 0.0, %v1538_v20  ;;  %v7488_v46 = vpop.eup %7487  ;;  %v3412_v62 = vmul.f32 1.442695, %v3311_v39  ;;  %v9279_v63 = vunpack.c.l.b16 %v4589_v50  ;;  %11767 = vst [vmem:[#allocation96_spill] sm:$0xff] %v9324_v38 }
 0x1ee   :  { %v7490_v41 = vpop.eup %7489  ;;  %v3502_v61 = vadd.f32 1.0, %v7488_v46  ;;  %v1706_v0 = vpop.f32.mrf.mxu2  ;;  %v9290_v46 = vunpack.c.l.b16 %v4716_v58 }
 0x1ef   :  { %11754 = vst [vmem:[#allocation87_spill] sm:$0xff] %v9279_v63  ;;  %v3094_v31 = vmul.f32 1.442695, %v2992_v21  ;;  %v7492_v33 = vpop.eup %7491  ;;  %7495 = vpow2.f32 %v3412_v62  ;;  %v1707_v20 = vadd.f32 %v1706_v0, %v8709_v22  ;;  %v1875_v48 = vpop.f32.mrf.mxu3  ;;  %v4653_v51 = vmul.f32 %v7490_v41, %v11756_v52  ;;  %v9292_v62 = vld [vmem:[#allocation5 + $0x90] sm:$0xff]   ;;  %v6942_v41 = vld [vmem:[#allocation7 + $0x14c] sm:$0xf] }
 0x1f0   :  { %v1370_v13 = vpop.f32.mrf.mxu0  ;;  %7497 = vrcp.f32 %v3502_v61  ;;  %v3183_v45 = vadd.f32 1.0, %v7492_v33  ;;  %v7494_v50 = vpop.eup %7493  ;;  %11757 = vst [vmem:[#allocation89_spill] sm:$0xff] %v9290_v46  ;;  %v6468_v33 = vor.u32 %v6902_v11, %v6465_v32  ;;  %v6625_v52 = vld [vmem:[#allocation7 + $0x15c] sm:$0xf0]  ;;  %v6771_v63 = vld [vmem:[#allocation7 + $0x268] sm:$0xf] }
 0x1f1   :  { %v1371_v39 = vadd.f32 %v1370_v13, %v8706_v9  ;;  %v1539_v30 = vpop.f32.mrf.mxu1  ;;  %7499 = vpow2.f32 %v3094_v31  ;;  %v1876_v21 = vadd.f32 %v1875_v48, %v1707_v20  ;;  %v4717_v29 = vpack.c.bf16 %v4653_v51, %v4653_v51  ;;  %11758 = vst [vmem:[#allocation90_spill] sm:$0xff] %v9292_v62 }
 0x1f2   :  { %7501 = vrcp.f32 %v3183_v45  ;;  %v6628_v10 = vor.u32 %v6942_v41, %v6625_v52  ;;  %v11760_v31 = vunpack.c.l.bf16 %v9281_v26  ;;  %2285 = vmatpush.bf16.msrb.mxu2 %v6468_v33  ;;  %v6897_v33 = vld [vmem:[#allocation5 + $0xe0] sm:$0xff] }
 0x1f3   :  { %v1540_v0 = vadd.f32 %v1539_v30, %v1371_v39  ;;  %v3312_v61 = vsub.f32 0.0, %v1876_v21  ;;  %v9294_v13 = vunpack.c.l.b16 %v4717_v29  ;;  %v6865_v29 = vld [vmem:[#allocation2 + $0xe0] sm:$0xff] }
 0x1f4   :  { %v4526_v20 = vmul.f32 %v7494_v50, %v11760_v31  ;;  %2454 = vmatpush.bf16.msrb.mxu3 %v6628_v10  ;;  %v11762_v10 = vunpack.c.l.bf16 %v9292_v62 }
 0x1f5   :  { %11759 = vst [vmem:[#allocation91_spill] sm:$0xff] %v9294_v13  ;;  %v2993_v6 = vsub.f32 0.0, %v1540_v0  ;;  %v7496_v48 = vpop.eup %7495  ;;  %v3414_v58 = vmul.f32 1.442695, %v3312_v61 }
 0x1f6   :  { %v7498_v30 = vpop.eup %7497  ;;  %v3503_v32 = vadd.f32 1.0, %v7496_v48  ;;  %v1708_v21 = vpop.f32.mrf.mxu2  ;;  %v4590_v39 = vpack.c.bf16 %v4526_v20, %v4526_v20 }
 0x1f7   :  { %v3096_v11 = vmul.f32 1.442695, %v2993_v6  ;;  %v7500_v0 = vpop.eup %7499  ;;  %7503 = vpow2.f32 %v3414_v58  ;;  %v1709_v50 = vadd.f32 %v1708_v21, %v8709_v22  ;;  %v1877_v41 = vpop.f32.mrf.mxu3  ;;  %v11761_v6 = vunpack.c.h.bf16 %v9281_v26 }
 0x1f8   :  { %v1373_v61 = vpop.f32.mrf.mxu0  ;;  %v7502_v52 = vpop.eup %7501  ;;  %7505 = vrcp.f32 %v3503_v32  ;;  %v3184_v31 = vadd.f32 1.0, %v7500_v0  ;;  %v4654_v58 = vmul.f32 %v7498_v30, %v11762_v10  ;;  %v11343_v0 = vunpack.c.h.bf16 %v9292_v62 }
 0x1f9   :  { %v1374_v51 = vadd.f32 %v1373_v61, %v8706_v9  ;;  %v1542_v45 = vpop.f32.mrf.mxu1  ;;  %7507 = vpow2.f32 %v3096_v11  ;;  %v1878_v48 = vadd.f32 %v1877_v41, %v1709_v50  ;;  %v4527_v46 = vmul.f32 %v7502_v52, %v11761_v6  ;;  %1412 = vmatmul.bf16.gmra.mxu0 %v6865_v29  ;;  %v9313_v6 = vld [vmem:[#allocation2 + $0x98] sm:$0xff]  }
 0x1fa   :  { %7509 = vrcp.f32 %v3184_v31  ;;  %1581 = vmatmul.bf16.gmra.mxu1 %v6897_v33  ;;  %v9309_v50 = vunpack.c.l.b16 %v4590_v39  ;;  %v4718_v52 = vpack.c.bf16 %v4654_v58, %v4654_v58  ;;  %11765 = vst [vmem:[#allocation94_spill] sm:$0xff] %v9313_v6 }
 0x1fb   :  { %v1543_v13 = vadd.f32 %v1542_v45, %v1374_v51  ;;  %v3313_v21 = vsub.f32 0.0, %v1878_v48  ;;  %1750 = vmatmul.bf16.gmra.mxu2 %v6865_v29  ;;  %v4591_v32 = vpack.c.bf16 %v4527_v46, %v4527_v46 }
 0x1fc   :  { %1919 = vmatmul.bf16.gmra.mxu3 %v6897_v33  ;;  %11763 = vst [vmem:[#allocation92_spill] sm:$0xff] %v9309_v50 }
 0x1fd   :  { %v2994_v61 = vsub.f32 0.0, %v1543_v13  ;;  %v7504_v20 = vpop.eup %7503  ;;  %v3416_v11 = vmul.f32 1.442695, %v3313_v21  ;;  %v9311_v41 = vunpack.c.l.b16 %v4591_v32  ;;  %v11342_v32 = vunpack.c.l.bf16 %v9313_v6 }
 0x1fe   :  { %v7506_v51 = vpop.eup %7505  ;;  %v3504_v45 = vadd.f32 1.0, %v7504_v20  ;;  %v1711_v31 = vpop.f32.mrf.mxu2 }
 0x1ff   :  { %11764 = vst [vmem:[#allocation93_spill] sm:$0xff] %v9311_v41  ;;  %v3098_v30 = vmul.f32 1.442695, %v2994_v61  ;;  %v7508_v48 = vpop.eup %7507  ;;  %7511 = vpow2.f32 %v3416_v11  ;;  %v1712_v46 = vadd.f32 %v1711_v31, %v8709_v22  ;;  %v1880_v29 = vpop.f32.mrf.mxu3  ;;  %v4655_v39 = vmul.f32 %v7506_v51, %v11343_v0  ;;  %v9356_v41 = vld [vmem:[#allocation5 + $0xa0] sm:$0xff]  }
 0x200   :  { %v1375_v13 = vpop.f32.mrf.mxu0  ;;  %7513 = vrcp.f32 %v3504_v45  ;;  %v3185_v10 = vadd.f32 1.0, %v7508_v48  ;;  %v7510_v61 = vpop.eup %7509  ;;  %v9322_v31 = vunpack.c.l.b16 %v4718_v52  ;;  %11775 = vst [vmem:[#allocation102_spill] sm:$0xff] %v9356_v41 }
 0x201   :  { %v1376_v58 = vadd.f32 %v1375_v13, %v8706_v9  ;;  %v1544_v21 = vpop.f32.mrf.mxu1  ;;  %7515 = vpow2.f32 %v3098_v30  ;;  %v1881_v20 = vadd.f32 %v1880_v29, %v1712_v46  ;;  %v4719_v11 = vpack.c.bf16 %v4655_v39, %v4655_v39 }
 0x202   :  { %11766 = vst [vmem:[#allocation95_spill] sm:$0xff] %v9322_v31  ;;  %7517 = vrcp.f32 %v3185_v10  ;;  %v4528_v45 = vmul.f32 %v7510_v61, %v11342_v32  ;;  %v6898_v32 = vld [vmem:[#allocation5 + $0xe8] sm:$0xff] }
 0x203   :  { %v1545_v26 = vadd.f32 %v1544_v21, %v1376_v58  ;;  %v3314_v33 = vsub.f32 0.0, %v1881_v20  ;;  %v9326_v62 = vunpack.c.l.b16 %v4719_v11  ;;  %v6866_v21 = vld [vmem:[#allocation2 + $0xe8] sm:$0xff] }
 0x204   :  { %v4592_v31 = vpack.c.bf16 %v4528_v45, %v4528_v45 }
 0x205   :  { %11768 = vst [vmem:[#allocation97_spill] sm:$0xff] %v9326_v62  ;;  %v2995_v51 = vsub.f32 0.0, %v1545_v26  ;;  %v7512_v48 = vpop.eup %7511  ;;  %v3418_v13 = vmul.f32 1.442695, %v3314_v33  ;;  %v11770_v62 = vunpack.c.l.bf16 %v9324_v38 }
 0x206   :  { %v7514_v29 = vpop.eup %7513  ;;  %v3505_v39 = vadd.f32 1.0, %v7512_v48  ;;  %v1713_v58 = vpop.f32.mrf.mxu2 }
 0x207   :  { %v3100_v10 = vmul.f32 1.442695, %v2995_v51  ;;  %v7516_v20 = vpop.eup %7515  ;;  %7519 = vpow2.f32 %v3418_v13  ;;  %v1714_v26 = vadd.f32 %v1713_v58, %v8709_v22  ;;  %v1882_v11 = vpop.f32.mrf.mxu3  ;;  %v11769_v51 = vunpack.c.h.bf16 %v9313_v6 }
 0x208   :  { %v1378_v61 = vpop.f32.mrf.mxu0  ;;  %v7518_v33 = vpop.eup %7517  ;;  %7521 = vrcp.f32 %v3505_v39  ;;  %v3186_v0 = vadd.f32 1.0, %v7516_v20  ;;  %v4656_v13 = vmul.f32 %v7514_v29, %v11770_v62  ;;  %v11353_v20 = vunpack.c.h.bf16 %v9324_v38 }
 0x209   :  { %v1379_v30 = vadd.f32 %v1378_v61, %v8706_v9  ;;  %v1547_v46 = vpop.f32.mrf.mxu1  ;;  %7523 = vpow2.f32 %v3100_v10  ;;  %v1883_v52 = vadd.f32 %v1882_v11, %v1714_v26  ;;  %v4529_v48 = vmul.f32 %v7518_v33, %v11769_v51  ;;  %1417 = vmatmul.bf16.gmra.mxu0 %v6866_v21  ;;  %v9345_v51 = vld [vmem:[#allocation2 + $0xa0] sm:$0xff]  }
 0x20a   :  { %7525 = vrcp.f32 %v3186_v0  ;;  %1586 = vmatmul.bf16.gmra.mxu1 %v6898_v32  ;;  %v9341_v26 = vunpack.c.l.b16 %v4592_v31  ;;  %v4720_v33 = vpack.c.bf16 %v4656_v13, %v4656_v13  ;;  %11773 = vst [vmem:[#allocation100_spill] sm:$0xff] %v9345_v51 }
 0x20b   :  { %v1548_v50 = vadd.f32 %v1547_v46, %v1379_v30  ;;  %v3315_v58 = vsub.f32 0.0, %v1883_v52  ;;  %1755 = vmatmul.bf16.gmra.mxu2 %v6866_v21  ;;  %v4593_v39 = vpack.c.bf16 %v4529_v48, %v4529_v48 }
 0x20c   :  { %1924 = vmatmul.bf16.gmra.mxu3 %v6898_v32  ;;  %11771 = vst [vmem:[#allocation98_spill] sm:$0xff] %v9341_v26 }
 0x20d   :  { %v2996_v61 = vsub.f32 0.0, %v1548_v50  ;;  %v7520_v45 = vpop.eup %7519  ;;  %v3420_v10 = vmul.f32 1.442695, %v3315_v58  ;;  %v9343_v11 = vunpack.c.l.b16 %v4593_v39  ;;  %v11352_v39 = vunpack.c.l.bf16 %v9345_v51 }
 0x20e   :  { %v7522_v62 = vpop.eup %7521  ;;  %v3506_v30 = vadd.f32 1.0, %v7520_v45  ;;  %v1716_v46 = vpop.f32.mrf.mxu2 }
 0x20f   :  { %11772 = vst [vmem:[#allocation99_spill] sm:$0xff] %v9343_v11  ;;  %v3102_v0 = vmul.f32 1.442695, %v2996_v61  ;;  %v7524_v52 = vpop.eup %7523  ;;  %7527 = vpow2.f32 %v3420_v10  ;;  %v1717_v29 = vadd.f32 %v1716_v46, %v8709_v22  ;;  %v1885_v21 = vpop.f32.mrf.mxu3  ;;  %v4657_v31 = vmul.f32 %v7522_v62, %v11353_v20  ;;  %v9388_v11 = vld [vmem:[#allocation5 + $0xa8] sm:$0xff]  }
 0x210   :  { %v1380_v50 = vpop.f32.mrf.mxu0  ;;  %7529 = vrcp.f32 %v3506_v30  ;;  %v3187_v48 = vadd.f32 1.0, %v7524_v52  ;;  %v7526_v61 = vpop.eup %7525  ;;  %v9354_v46 = vunpack.c.l.b16 %v4720_v33  ;;  %11783 = vst [vmem:[#allocation108_spill] sm:$0xff] %v9388_v11 }
 0x211   :  { %v1381_v13 = vadd.f32 %v1380_v50, %v8706_v9  ;;  %v1549_v58 = vpop.f32.mrf.mxu1  ;;  %7531 = vpow2.f32 %v3102_v0  ;;  %v1886_v45 = vadd.f32 %v1885_v21, %v1717_v29  ;;  %v4721_v10 = vpack.c.bf16 %v4657_v31, %v4657_v31 }
 0x212   :  { %11774 = vst [vmem:[#allocation101_spill] sm:$0xff] %v9354_v46  ;;  %7533 = vrcp.f32 %v3187_v48  ;;  %v4530_v30 = vmul.f32 %v7526_v61, %v11352_v39  ;;  %v6899_v39 = vld [vmem:[#allocation5 + $0xf0] sm:$0xff] }
 0x213   :  { %v1550_v6 = vadd.f32 %v1549_v58, %v1381_v13  ;;  %v3316_v32 = vsub.f32 0.0, %v1886_v45  ;;  %v9358_v38 = vunpack.c.l.b16 %v4721_v10  ;;  %v6867_v58 = vld [vmem:[#allocation2 + $0xf0] sm:$0xff] }
 0x214   :  { %v4594_v46 = vpack.c.bf16 %v4530_v30, %v4530_v30 }
 0x215   :  { %11776 = vst [vmem:[#allocation103_spill] sm:$0xff] %v9358_v38  ;;  %v2997_v62 = vsub.f32 0.0, %v1550_v6  ;;  %v7528_v52 = vpop.eup %7527  ;;  %v3422_v50 = vmul.f32 1.442695, %v3316_v32  ;;  %v11778_v38 = vunpack.c.l.bf16 %v9356_v41 }
 0x216   :  { %v7530_v21 = vpop.eup %7529  ;;  %v3507_v31 = vadd.f32 1.0, %v7528_v52  ;;  %v1718_v13 = vpop.f32.mrf.mxu2 }
 0x217   :  { %v3104_v48 = vmul.f32 1.442695, %v2997_v62  ;;  %v7532_v45 = vpop.eup %7531  ;;  %7535 = vpow2.f32 %v3422_v50  ;;  %v1719_v6 = vadd.f32 %v1718_v13, %v8709_v22  ;;  %v1887_v10 = vpop.f32.mrf.mxu3  ;;  %v11777_v62 = vunpack.c.h.bf16 %v9345_v51 }
 0x218   :  { %v1383_v61 = vpop.f32.mrf.mxu0  ;;  %v7534_v32 = vpop.eup %7533  ;;  %7537 = vrcp.f32 %v3507_v31  ;;  %v3188_v20 = vadd.f32 1.0, %v7532_v45  ;;  %v4658_v50 = vmul.f32 %v7530_v21, %v11778_v38  ;;  %v11363_v45 = vunpack.c.h.bf16 %v9356_v41 }
 0x219   :  { %v1384_v0 = vadd.f32 %v1383_v61, %v8706_v9  ;;  %v1552_v29 = vpop.f32.mrf.mxu1  ;;  %7539 = vpow2.f32 %v3104_v48  ;;  %v1888_v33 = vadd.f32 %v1887_v10, %v1719_v6  ;;  %v4531_v52 = vmul.f32 %v7534_v32, %v11777_v62  ;;  %1422 = vmatmul.bf16.gmra.mxu0 %v6867_v58  ;;  %v9377_v62 = vld [vmem:[#allocation2 + $0xa8] sm:$0xff]  }
 0x21a   :  { %7541 = vrcp.f32 %v3188_v20  ;;  %1591 = vmatmul.bf16.gmra.mxu1 %v6899_v39  ;;  %v9373_v6 = vunpack.c.l.b16 %v4594_v46  ;;  %v4722_v32 = vpack.c.bf16 %v4658_v50, %v4658_v50  ;;  %11781 = vst [vmem:[#allocation106_spill] sm:$0xff] %v9377_v62 }
 0x21b   :  { %v1553_v26 = vadd.f32 %v1552_v29, %v1384_v0  ;;  %v3317_v13 = vsub.f32 0.0, %v1888_v33  ;;  %1760 = vmatmul.bf16.gmra.mxu2 %v6867_v58  ;;  %v4595_v31 = vpack.c.bf16 %v4531_v52, %v4531_v52 }
 0x21c   :  { %1929 = vmatmul.bf16.gmra.mxu3 %v6899_v39  ;;  %11779 = vst [vmem:[#allocation104_spill] sm:$0xff] %v9373_v6 }
 0x21d   :  { %v2998_v61 = vsub.f32 0.0, %v1553_v26  ;;  %v7536_v30 = vpop.eup %7535  ;;  %v3424_v48 = vmul.f32 1.442695, %v3317_v13  ;;  %v9375_v10 = vunpack.c.l.b16 %v4595_v31  ;;  %v11362_v31 = vunpack.c.l.bf16 %v9377_v62 }
 0x21e   :  { %v7538_v38 = vpop.eup %7537  ;;  %v3508_v0 = vadd.f32 1.0, %v7536_v30  ;;  %v1721_v29 = vpop.f32.mrf.mxu2 }
 0x21f   :  { %11780 = vst [vmem:[#allocation105_spill] sm:$0xff] %v9375_v10  ;;  %v3106_v20 = vmul.f32 1.442695, %v2998_v61  ;;  %v7540_v33 = vpop.eup %7539  ;;  %7543 = vpow2.f32 %v3424_v48  ;;  %v1722_v21 = vadd.f32 %v1721_v29, %v8709_v22  ;;  %v1890_v58 = vpop.f32.mrf.mxu3  ;;  %v4659_v46 = vmul.f32 %v7538_v38, %v11363_v45  ;;  %v6940_v10 = vld [vmem:[#allocation7 + $0x138] sm:$0xf0] }
 0x220   :  { %v1385_v26 = vpop.f32.mrf.mxu0  ;;  %7545 = vrcp.f32 %v3508_v0  ;;  %v3189_v52 = vadd.f32 1.0, %v7540_v33  ;;  %v7542_v61 = vpop.eup %7541  ;;  %v9386_v29 = vunpack.c.l.b16 %v4722_v32 }
 0x221   :  { %v1386_v50 = vadd.f32 %v1385_v26, %v8706_v9  ;;  %v1554_v13 = vpop.f32.mrf.mxu1  ;;  %7547 = vpow2.f32 %v3106_v20  ;;  %v1891_v30 = vadd.f32 %v1890_v58, %v1722_v21  ;;  %v4723_v48 = vpack.c.bf16 %v4659_v46, %v4659_v46 }
 0x222   :  { %11782 = vst [vmem:[#allocation107_spill] sm:$0xff] %v9386_v29  ;;  %7549 = vrcp.f32 %v3189_v52  ;;  %v4532_v0 = vmul.f32 %v7542_v61, %v11362_v31  ;;  %v6900_v31 = vld [vmem:[#allocation5 + $0xf8] sm:$0xff] }
 0x223   :  { %v1555_v51 = vadd.f32 %v1554_v13, %v1386_v50  ;;  %v3318_v39 = vsub.f32 0.0, %v1891_v30  ;;  %v9390_v41 = vunpack.c.l.b16 %v4723_v48  ;;  %v6868_v13 = vld [vmem:[#allocation2 + $0xf8] sm:$0xff] }
 0x224   :  { %v4596_v29 = vpack.c.bf16 %v4532_v0, %v4532_v0 }
 0x225   :  { %11784 = vst [vmem:[#allocation109_spill] sm:$0xff] %v9390_v41  ;;  %v2999_v38 = vsub.f32 0.0, %v1555_v51  ;;  %v7544_v33 = vpop.eup %7543  ;;  %v3426_v26 = vmul.f32 1.442695, %v3318_v39  ;;  %v11786_v41 = vunpack.c.l.bf16 %v9388_v11 }
 0x226   :  { %v7546_v58 = vpop.eup %7545  ;;  %v3509_v46 = vadd.f32 1.0, %v7544_v33  ;;  %v1723_v50 = vpop.f32.mrf.mxu2 }
 0x227   :  { %v3108_v52 = vmul.f32 1.442695, %v2999_v38  ;;  %v7548_v30 = vpop.eup %7547  ;;  %7551 = vpow2.f32 %v3426_v26  ;;  %v1724_v51 = vadd.f32 %v1723_v50, %v8709_v22  ;;  %v1892_v48 = vpop.f32.mrf.mxu3  ;;  %v11785_v38 = vunpack.c.h.bf16 %v9377_v62  ;;  %v6611_v50 = vld [vmem:[#allocation7 + $0x128] sm:$0xf]  ;;  %v9420_v62 = vld [vmem:[#allocation5 + $0xb0] sm:$0xff]  }
 0x228   :  { %v1388_v61 = vpop.f32.mrf.mxu0  ;;  %v7550_v39 = vpop.eup %7549  ;;  %7553 = vrcp.f32 %v3509_v46  ;;  %v3190_v45 = vadd.f32 1.0, %v7548_v30  ;;  %v4660_v26 = vmul.f32 %v7546_v58, %v11786_v41  ;;  %v6612_v0 = vor.u32 %v6940_v10, %v6611_v50  ;;  %v9409_v58 = vld [vmem:[#allocation2 + $0xb0] sm:$0xff]   ;;  %11792 = vst [vmem:[#allocation114_spill] sm:$0xff] %v9420_v62 }
 0x229   :  { %v1389_v20 = vadd.f32 %v1388_v61, %v8706_v9  ;;  %v1557_v21 = vpop.f32.mrf.mxu1  ;;  %7555 = vpow2.f32 %v3108_v52  ;;  %v1893_v32 = vadd.f32 %v1892_v48, %v1724_v51  ;;  %v4533_v33 = vmul.f32 %v7550_v39, %v11785_v38  ;;  %1427 = vmatmul.bf16.gmra.mxu0 %v6868_v13  ;;  %v6980_v52 = vld [vmem:[#allocation7 + $0x278] sm:$0xf0]  ;;  %11789 = vst [vmem:[#allocation112_spill] sm:$0xff] %v9409_v58 }
 0x22a   :  { %7557 = vrcp.f32 %v3190_v45  ;;  %1596 = vmatmul.bf16.gmra.mxu1 %v6900_v31  ;;  %v6772_v61 = vor.u32 %v6980_v52, %v6771_v63  ;;  %2616 = vmatpush.bf16.msra.mxu0 %v6612_v0  ;;  %v9405_v41 = vunpack.c.l.b16 %v4596_v29  ;;  %v11371_v52 = vunpack.c.l.bf16 %v9409_v58  ;;  %v6996_v29 = vld [vmem:[#allocation10 + $0x78] sm:$0xff] }
 0x22b   :  { %v1558_v6 = vadd.f32 %v1557_v21, %v1389_v20  ;;  %v3319_v30 = vsub.f32 0.0, %v1893_v32  ;;  %1765 = vmatmul.bf16.gmra.mxu2 %v6868_v13  ;;  %v4597_v51 = vpack.c.bf16 %v4533_v33, %v4533_v33  ;;  %v4724_v21 = vpack.c.bf16 %v4660_v26, %v4660_v26  ;;  %5431 = vmatpush.bf16.msra.mxu3 %v6996_v29 }
 0x22c   :  { %1934 = vmatmul.bf16.gmra.mxu3 %v6900_v31  ;;  %11787 = vst [vmem:[#allocation110_spill] sm:$0xff] %v9405_v41  ;;  %2785 = vmatpush.bf16.msra.mxu1 %v6772_v61  ;;  %v11790_v33 = vunpack.c.h.bf16 %v9388_v11  ;;  %v9452_v41 = vld [vmem:[#allocation5 + $0xb8] sm:$0xff]  }
 0x22d   :  { %v3000_v48 = vsub.f32 0.0, %v1558_v6  ;;  %v7552_v39 = vpop.eup %7551  ;;  %v3428_v38 = vmul.f32 1.442695, %v3319_v30  ;;  %v9407_v20 = vunpack.c.l.b16 %v4597_v51  ;;  %11800 = vst [vmem:[#allocation120_spill] sm:$0xff] %v9452_v41 }
 0x22e   :  { %v7554_v45 = vpop.eup %7553  ;;  %v3510_v32 = vadd.f32 1.0, %v7552_v39  ;;  %v1726_v13 = vpop.f32.mrf.mxu2  ;;  %v9418_v39 = vunpack.c.l.b16 %v4724_v21 }
 0x22f   :  { %11788 = vst [vmem:[#allocation111_spill] sm:$0xff] %v9407_v20  ;;  %v3110_v46 = vmul.f32 1.442695, %v3000_v48  ;;  %v7556_v10 = vpop.eup %7555  ;;  %7559 = vpow2.f32 %v3428_v38  ;;  %v1727_v6 = vadd.f32 %v1726_v13, %v8709_v22  ;;  %v1895_v63 = vpop.f32.mrf.mxu3  ;;  %v4661_v50 = vmul.f32 %v7554_v45, %v11790_v33  ;;  %v6988_v13 = vld [vmem:[#allocation10 + $0x38] sm:$0xff] }
 0x230   :  { %v1390_v31 = vpop.f32.mrf.mxu0  ;;  %7561 = vrcp.f32 %v3510_v32  ;;  %v3191_v26 = vadd.f32 1.0, %v7556_v10  ;;  %v7558_v51 = vpop.eup %7557  ;;  %11791 = vst [vmem:[#allocation113_spill] sm:$0xff] %v9418_v39  ;;  %5262 = vmatpush.bf16.msra.mxu2 %v6988_v13  ;;  %v11794_v33 = vunpack.c.h.bf16 %v9409_v58  ;;  %v8351_v39 = vld [vmem:[#allocation2] sm:$0xff] }
 0x231   :  { %v1391_v30 = vadd.f32 %v1390_v31, %v8706_v9  ;;  %v1559_v0 = vpop.f32.mrf.mxu1  ;;  %7563 = vpow2.f32 %v3110_v46  ;;  %v1896_v48 = vadd.f32 %v1895_v63, %v1727_v6  ;;  %v4725_v61 = vpack.c.bf16 %v4661_v50, %v4661_v50 }
 0x232   :  { %7565 = vrcp.f32 %v3191_v26  ;;  %v4534_v31 = vmul.f32 %v7558_v51, %v11371_v52 }
 0x233   :  { %v1560_v38 = vadd.f32 %v1559_v0, %v1391_v30  ;;  %v3320_v45 = vsub.f32 0.0, %v1896_v48  ;;  %v9422_v32 = vunpack.c.l.b16 %v4725_v61 }
 0x234   :  { %v4598_v21 = vpack.c.bf16 %v4534_v31, %v4534_v31 }
 0x235   :  { %11793 = vst [vmem:[#allocation115_spill] sm:$0xff] %v9422_v32  ;;  %v3001_v10 = vsub.f32 0.0, %v1560_v38  ;;  %v7560_v46 = vpop.eup %7559  ;;  %v3430_v6 = vmul.f32 1.442695, %v3320_v45  ;;  %v8352_v32 = vld [vmem:[#allocation5] sm:$0xff] }
 0x236   :  { %v7562_v50 = vpop.eup %7561  ;;  %v3511_v26 = vadd.f32 1.0, %v7560_v46  ;;  %v1728_v0 = vpop.f32.mrf.mxu2 }
 0x237   :  { %v3112_v30 = vmul.f32 1.442695, %v3001_v10  ;;  %v7564_v48 = vpop.eup %7563  ;;  %7567 = vpow2.f32 %v3430_v6  ;;  %v1729_v29 = vadd.f32 %v1728_v0, %v8709_v22  ;;  %v1897_v61 = vpop.f32.mrf.mxu3  ;;  %v11795_v10 = vunpack.c.l.bf16 %v9420_v62 }
 0x238   :  { %v1393_v38 = vpop.f32.mrf.mxu0  ;;  %v7566_v51 = vpop.eup %7565  ;;  %7569 = vrcp.f32 %v3511_v26  ;;  %v3192_v13 = vadd.f32 1.0, %v7564_v48  ;;  %v11382_v48 = vunpack.c.h.bf16 %v9420_v62 }
 0x239   :  { %v1394_v45 = vadd.f32 %v1393_v38, %v8706_v9  ;;  %v1562_v52 = vpop.f32.mrf.mxu1  ;;  %7571 = vpow2.f32 %v3112_v30  ;;  %v1898_v63 = vadd.f32 %v1897_v61, %v1729_v29  ;;  %v4535_v46 = vmul.f32 %v7566_v51, %v11794_v33  ;;  %1948 = vmatmul.bf16.vlgmr.msrb.gmra.mxu0 %v8351_v39 }
 0x23a   :  { %v4662_v11 = vmul.f32 %v7562_v50, %v11795_v10  ;;  %7573 = vrcp.f32 %v3192_v13  ;;  %2117 = vmatmul.bf16.vlgmr.msrb.gmra.mxu1 %v8352_v32  ;;  %v9437_v61 = vunpack.c.l.b16 %v4598_v21 }
 0x23b   :  { %v1563_v6 = vadd.f32 %v1562_v52, %v1394_v45  ;;  %v3321_v0 = vsub.f32 0.0, %v1898_v63  ;;  %2286 = vmatmul.bf16.vlgmr.msrb.gmra.mxu2 %v8351_v39  ;;  %v4599_v26 = vpack.c.bf16 %v4535_v46, %v4535_v46  ;;  %v9441_v52 = vld [vmem:[#allocation2 + $0xb8] sm:$0xff]  }
 0x23c   :  { %2455 = vmatmul.bf16.vlgmr.msrb.gmra.mxu3 %v8352_v32  ;;  %11796 = vst [vmem:[#allocation116_spill] sm:$0xff] %v9437_v61  ;;  %v4726_v50 = vpack.c.bf16 %v4662_v11, %v4662_v11  ;;  %v8354_v61 = vld [vmem:[#allocation5 + $0x8] sm:$0xff] }
 0x23d   :  { %v3002_v31 = vsub.f32 0.0, %v1563_v6  ;;  %v7568_v30 = vpop.eup %7567  ;;  %v3432_v29 = vmul.f32 1.442695, %v3321_v0  ;;  %v9439_v33 = vunpack.c.l.b16 %v4599_v26  ;;  %11798 = vst [vmem:[#allocation118_spill] sm:$0xff] %v9441_v52  ;;  %v11381_v26 = vunpack.c.l.bf16 %v9441_v52 }
 0x23e   :  { %v7570_v38 = vpop.eup %7569  ;;  %v3512_v51 = vadd.f32 1.0, %v7568_v30  ;;  %v1731_v13 = vpop.f32.mrf.mxu2 }
 0x23f   :  { %11797 = vst [vmem:[#allocation117_spill] sm:$0xff] %v9439_v33  ;;  %v3114_v63 = vmul.f32 1.442695, %v3002_v31  ;;  %v7572_v45 = vpop.eup %7571  ;;  %7575 = vpow2.f32 %v3432_v29  ;;  %v1732_v39 = vadd.f32 %v1731_v13, %v8709_v22  ;;  %v1900_v46 = vpop.f32.mrf.mxu3  ;;  %v4663_v21 = vmul.f32 %v7570_v38, %v11382_v48  ;;  %v9484_v33 = vld [vmem:[#allocation5 + $0xc0] sm:$0xff]  }
 0x240   :  { %v1395_v10 = vpop.f32.mrf.mxu0  ;;  %7577 = vrcp.f32 %v3512_v51  ;;  %v3193_v11 = vadd.f32 1.0, %v7572_v45  ;;  %v7574_v31 = vpop.eup %7573  ;;  %v9450_v13 = vunpack.c.l.b16 %v4726_v50  ;;  %v11802_v50 = vunpack.c.h.bf16 %v9441_v52  ;;  %11808 = vst [vmem:[#allocation126_spill] sm:$0xff] %v9484_v33 }
 0x241   :  { %v1396_v6 = vadd.f32 %v1395_v10, %v8706_v9  ;;  %v1564_v0 = vpop.f32.mrf.mxu1  ;;  %7579 = vpow2.f32 %v3114_v63  ;;  %v1901_v30 = vadd.f32 %v1900_v46, %v1732_v39  ;;  %v4727_v29 = vpack.c.bf16 %v4663_v21, %v4663_v21 }
 0x242   :  { %11799 = vst [vmem:[#allocation119_spill] sm:$0xff] %v9450_v13  ;;  %7581 = vrcp.f32 %v3193_v11  ;;  %v4536_v51 = vmul.f32 %v7574_v31, %v11381_v26 }
 0x243   :  { %v1565_v58 = vadd.f32 %v1564_v0, %v1396_v6  ;;  %v3322_v32 = vsub.f32 0.0, %v1901_v30  ;;  %v9454_v62 = vunpack.c.l.b16 %v4727_v29 }
 0x244   :  { %v4600_v63 = vpack.c.bf16 %v4536_v51, %v4536_v51 }
 0x245   :  { %11801 = vst [vmem:[#allocation121_spill] sm:$0xff] %v9454_v62  ;;  %v3003_v38 = vsub.f32 0.0, %v1565_v58  ;;  %v7576_v45 = vpop.eup %7575  ;;  %v3434_v10 = vmul.f32 1.442695, %v3322_v32  ;;  %v8353_v62 = vld [vmem:[#allocation2 + $0x8] sm:$0xff] }
 0x246   :  { %v7578_v46 = vpop.eup %7577  ;;  %v3513_v21 = vadd.f32 1.0, %v7576_v45  ;;  %v1733_v6 = vpop.f32.mrf.mxu2 }
 0x247   :  { %v3116_v11 = vmul.f32 1.442695, %v3003_v38  ;;  %v7580_v0 = vpop.eup %7579  ;;  %7583 = vpow2.f32 %v3434_v10  ;;  %v1734_v58 = vadd.f32 %v1733_v6, %v8709_v22  ;;  %v1902_v30 = vpop.f32.mrf.mxu3  ;;  %v11803_v38 = vunpack.c.l.bf16 %v9452_v41 }
 0x248   :  { %v1398_v29 = vpop.f32.mrf.mxu0  ;;  %v7582_v31 = vpop.eup %7581  ;;  %7585 = vrcp.f32 %v3513_v21  ;;  %v3194_v32 = vadd.f32 1.0, %v7580_v0  ;;  %v11392_v0 = vunpack.c.h.bf16 %v9452_v41 }
 0x249   :  { %v1399_v26 = vadd.f32 %v1398_v29, %v8706_v9  ;;  %v1567_v48 = vpop.f32.mrf.mxu1  ;;  %7587 = vpow2.f32 %v3116_v11  ;;  %v1903_v39 = vadd.f32 %v1902_v30, %v1734_v58  ;;  %v4537_v45 = vmul.f32 %v7582_v31, %v11802_v50  ;;  %1953 = vmatmul.bf16.gmra.mxu0 %v8353_v62 }
 0x24a   :  { %v4664_v13 = vmul.f32 %v7578_v46, %v11803_v38  ;;  %7589 = vrcp.f32 %v3194_v32  ;;  %2122 = vmatmul.bf16.gmra.mxu1 %v8354_v61  ;;  %v9469_v30 = vunpack.c.l.b16 %v4600_v63 }
 0x24b   :  { %v1568_v10 = vadd.f32 %v1567_v48, %v1399_v26  ;;  %v3323_v6 = vsub.f32 0.0, %v1903_v39  ;;  %2291 = vmatmul.bf16.gmra.mxu2 %v8353_v62  ;;  %v4601_v21 = vpack.c.bf16 %v4537_v45, %v4537_v45  ;;  %v9473_v48 = vld [vmem:[#allocation2 + $0xc0] sm:$0xff]  }
 0x24c   :  { %2460 = vmatmul.bf16.gmra.mxu3 %v8354_v61  ;;  %11804 = vst [vmem:[#allocation122_spill] sm:$0xff] %v9469_v30  ;;  %v4728_v46 = vpack.c.bf16 %v4664_v13, %v4664_v13  ;;  %v8356_v30 = vld [vmem:[#allocation5 + $0x10] sm:$0xff] }
 0x24d   :  { %v3004_v51 = vsub.f32 0.0, %v1568_v10  ;;  %v7584_v11 = vpop.eup %7583  ;;  %v3436_v58 = vmul.f32 1.442695, %v3323_v6  ;;  %v9471_v50 = vunpack.c.l.b16 %v4601_v21  ;;  %11806 = vst [vmem:[#allocation124_spill] sm:$0xff] %v9473_v48  ;;  %v11391_v21 = vunpack.c.l.bf16 %v9473_v48 }
 0x24e   :  { %v7586_v26 = vpop.eup %7585  ;;  %v3514_v29 = vadd.f32 1.0, %v7584_v11  ;;  %v1736_v31 = vpop.f32.mrf.mxu2 }
 0x24f   :  { %11805 = vst [vmem:[#allocation123_spill] sm:$0xff] %v9471_v50  ;;  %v3118_v39 = vmul.f32 1.442695, %v3004_v51  ;;  %v7588_v32 = vpop.eup %7587  ;;  %7591 = vpow2.f32 %v3436_v58  ;;  %v1737_v62 = vadd.f32 %v1736_v31, %v8709_v22  ;;  %v1905_v45 = vpop.f32.mrf.mxu3  ;;  %v4665_v63 = vmul.f32 %v7586_v26, %v11392_v0  ;;  %v9516_v50 = vld [vmem:[#allocation5 + $0xc8] sm:$0xff]  }
 0x250   :  { %v1400_v38 = vpop.f32.mrf.mxu0  ;;  %7593 = vrcp.f32 %v3514_v29  ;;  %v3195_v13 = vadd.f32 1.0, %v7588_v32  ;;  %v7590_v51 = vpop.eup %7589  ;;  %v9482_v31 = vunpack.c.l.b16 %v4728_v46  ;;  %v11810_v46 = vunpack.c.h.bf16 %v9473_v48  ;;  %11816 = vst [vmem:[#allocation132_spill] sm:$0xff] %v9516_v50 }
 0x251   :  { %v1401_v10 = vadd.f32 %v1400_v38, %v8706_v9  ;;  %v1569_v6 = vpop.f32.mrf.mxu1  ;;  %7595 = vpow2.f32 %v3118_v39  ;;  %v1906_v11 = vadd.f32 %v1905_v45, %v1737_v62  ;;  %v4729_v58 = vpack.c.bf16 %v4665_v63, %v4665_v63 }
 0x252   :  { %11807 = vst [vmem:[#allocation125_spill] sm:$0xff] %v9482_v31  ;;  %7597 = vrcp.f32 %v3195_v13  ;;  %v4538_v29 = vmul.f32 %v7590_v51, %v11391_v21 }
 0x253   :  { %v1570_v52 = vadd.f32 %v1569_v6, %v1401_v10  ;;  %v3324_v61 = vsub.f32 0.0, %v1906_v11  ;;  %v9486_v41 = vunpack.c.l.b16 %v4729_v58 }
 0x254   :  { %v4602_v39 = vpack.c.bf16 %v4538_v29, %v4538_v29 }
 0x255   :  { %11809 = vst [vmem:[#allocation127_spill] sm:$0xff] %v9486_v41  ;;  %v3005_v26 = vsub.f32 0.0, %v1570_v52  ;;  %v7592_v32 = vpop.eup %7591  ;;  %v3438_v38 = vmul.f32 1.442695, %v3324_v61  ;;  %v8355_v41 = vld [vmem:[#allocation2 + $0x10] sm:$0xff] }
 0x256   :  { %v7594_v45 = vpop.eup %7593  ;;  %v3515_v63 = vadd.f32 1.0, %v7592_v32  ;;  %v1738_v10 = vpop.f32.mrf.mxu2 }
 0x257   :  { %v3120_v13 = vmul.f32 1.442695, %v3005_v26  ;;  %v7596_v6 = vpop.eup %7595  ;;  %7599 = vpow2.f32 %v3438_v38  ;;  %v1739_v52 = vadd.f32 %v1738_v10, %v8709_v22  ;;  %v1907_v11 = vpop.f32.mrf.mxu3  ;;  %v11811_v26 = vunpack.c.l.bf16 %v9484_v33 }
 0x258   :  { %v1403_v58 = vpop.f32.mrf.mxu0  ;;  %v7598_v51 = vpop.eup %7597  ;;  %7601 = vrcp.f32 %v3515_v63  ;;  %v3196_v61 = vadd.f32 1.0, %v7596_v6  ;;  %v11402_v6 = vunpack.c.h.bf16 %v9484_v33 }
 0x259   :  { %v1404_v21 = vadd.f32 %v1403_v58, %v8706_v9  ;;  %v1572_v0 = vpop.f32.mrf.mxu1  ;;  %7603 = vpow2.f32 %v3120_v13  ;;  %v1908_v62 = vadd.f32 %v1907_v11, %v1739_v52  ;;  %v4539_v32 = vmul.f32 %v7598_v51, %v11810_v46  ;;  %1958 = vmatmul.bf16.gmra.mxu0 %v8355_v41 }
 0x25a   :  { %v4666_v31 = vmul.f32 %v7594_v45, %v11811_v26  ;;  %7605 = vrcp.f32 %v3196_v61  ;;  %2127 = vmatmul.bf16.gmra.mxu1 %v8356_v30  ;;  %v9501_v11 = vunpack.c.l.b16 %v4602_v39 }
 0x25b   :  { %v1573_v38 = vadd.f32 %v1572_v0, %v1404_v21  ;;  %v3325_v10 = vsub.f32 0.0, %v1908_v62  ;;  %2296 = vmatmul.bf16.gmra.mxu2 %v8355_v41  ;;  %v4603_v63 = vpack.c.bf16 %v4539_v32, %v4539_v32  ;;  %v9505_v0 = vld [vmem:[#allocation2 + $0xc8] sm:$0xff]  }
 0x25c   :  { %2465 = vmatmul.bf16.gmra.mxu3 %v8356_v30  ;;  %11812 = vst [vmem:[#allocation128_spill] sm:$0xff] %v9501_v11  ;;  %v4730_v45 = vpack.c.bf16 %v4666_v31, %v4666_v31  ;;  %v6935_v11 = vld [vmem:[#allocation7 + $0x110] sm:$0xf0] }
 0x25d   :  { %v3006_v29 = vsub.f32 0.0, %v1573_v38  ;;  %v7600_v13 = vpop.eup %7599  ;;  %v3440_v52 = vmul.f32 1.442695, %v3325_v10  ;;  %v9503_v46 = vunpack.c.l.b16 %v4603_v63  ;;  %11814 = vst [vmem:[#allocation130_spill] sm:$0xff] %v9505_v0  ;;  %v11401_v63 = vunpack.c.l.bf16 %v9505_v0 }
 0x25e   :  { %v7602_v21 = vpop.eup %7601  ;;  %v3516_v58 = vadd.f32 1.0, %v7600_v13  ;;  %v1741_v51 = vpop.f32.mrf.mxu2 }
 0x25f   :  { %11813 = vst [vmem:[#allocation129_spill] sm:$0xff] %v9503_v46  ;;  %v3122_v62 = vmul.f32 1.442695, %v3006_v29  ;;  %v7604_v61 = vpop.eup %7603  ;;  %7607 = vpow2.f32 %v3440_v52  ;;  %v1742_v41 = vadd.f32 %v1741_v51, %v8709_v22  ;;  %v1910_v32 = vpop.f32.mrf.mxu3  ;;  %v4667_v39 = vmul.f32 %v7602_v21, %v11402_v6  ;;  %v6751_v46 = vld [vmem:[#allocation7 + $0x240] sm:$0xf] }
 0x260   :  { %v1405_v26 = vpop.f32.mrf.mxu0  ;;  %7609 = vrcp.f32 %v3516_v58  ;;  %v3197_v31 = vadd.f32 1.0, %v7604_v61  ;;  %v7606_v29 = vpop.eup %7605  ;;  %v9514_v51 = vunpack.c.l.b16 %v4730_v45  ;;  %v11818_v45 = vunpack.c.h.bf16 %v9505_v0 }
 0x261   :  { %v1406_v38 = vadd.f32 %v1405_v26, %v8706_v9  ;;  %v1574_v10 = vpop.f32.mrf.mxu1  ;;  %7611 = vpow2.f32 %v3122_v62  ;;  %v1911_v13 = vadd.f32 %v1910_v32, %v1742_v41  ;;  %v4731_v52 = vpack.c.bf16 %v4667_v39, %v4667_v39 }
 0x262   :  { %11815 = vst [vmem:[#allocation131_spill] sm:$0xff] %v9514_v51  ;;  %7613 = vrcp.f32 %v3197_v31  ;;  %v4540_v58 = vmul.f32 %v7606_v29, %v11401_v63 }
 0x263   :  { %v1575_v48 = vadd.f32 %v1574_v10, %v1406_v38  ;;  %v3326_v30 = vsub.f32 0.0, %v1911_v13  ;;  %v9518_v33 = vunpack.c.l.b16 %v4731_v52 }
 0x264   :  { %v4604_v62 = vpack.c.bf16 %v4540_v58, %v4540_v58 }
 0x265   :  { %11817 = vst [vmem:[#allocation133_spill] sm:$0xff] %v9518_v33  ;;  %v3007_v21 = vsub.f32 0.0, %v1575_v48  ;;  %v7608_v61 = vpop.eup %7607  ;;  %v3442_v26 = vmul.f32 1.442695, %v3326_v30  ;;  %v8357_v33 = vld [vmem:[#allocation2 + $0x18] sm:$0xff] }
 0x266   :  { %v7610_v32 = vpop.eup %7609  ;;  %v3517_v39 = vadd.f32 1.0, %v7608_v61  ;;  %v1743_v38 = vpop.f32.mrf.mxu2 }
 0x267   :  { %v3124_v31 = vmul.f32 1.442695, %v3007_v21  ;;  %v7612_v10 = vpop.eup %7611  ;;  %7615 = vpow2.f32 %v3442_v26  ;;  %v1744_v48 = vadd.f32 %v1743_v38, %v8709_v22  ;;  %v1912_v13 = vpop.f32.mrf.mxu3  ;;  %v11819_v21 = vunpack.c.l.bf16 %v9516_v50  ;;  %v6591_v38 = vld [vmem:[#allocation7 + $0x100] sm:$0xf] }
 0x268   :  { %v1408_v52 = vpop.f32.mrf.mxu0  ;;  %v7614_v29 = vpop.eup %7613  ;;  %7617 = vrcp.f32 %v3517_v39  ;;  %v3198_v30 = vadd.f32 1.0, %v7612_v10  ;;  %v6592_v58 = vor.u32 %v6935_v11, %v6591_v38  ;;  %v9537_v39 = vld [vmem:[#allocation2 + $0xd0] sm:$0xff]   ;;  %v11823_v38 = vunpack.c.h.bf16 %v9516_v50 }
 0x269   :  { %v1409_v63 = vadd.f32 %v1408_v52, %v8706_v9  ;;  %v1577_v6 = vpop.f32.mrf.mxu1  ;;  %7619 = vpow2.f32 %v3124_v31  ;;  %v1913_v41 = vadd.f32 %v1912_v13, %v1744_v48  ;;  %v4541_v61 = vmul.f32 %v7614_v29, %v11818_v45  ;;  %1963 = vmatmul.bf16.gmra.mxu0 %v8357_v33  ;;  %v8358_v52 = vld [vmem:[#allocation5 + $0x18] sm:$0xff]  ;;  %v6975_v31 = vld [vmem:[#allocation7 + $0x250] sm:$0xf0]  ;;  %11822 = vst [vmem:[#allocation136_spill] sm:$0xff] %v9537_v39 }
 0x26a   :  { %v4668_v51 = vmul.f32 %v7610_v32, %v11819_v21  ;;  %7621 = vrcp.f32 %v3198_v30  ;;  %2132 = vmatmul.bf16.gmra.mxu1 %v8358_v52  ;;  %v6752_v13 = vor.u32 %v6975_v31, %v6751_v46  ;;  %2617 = vmatpush.bf16.msra.mxu0 %v6592_v58  ;;  %v11410_v31 = vunpack.c.l.bf16 %v9537_v39 }
 0x26b   :  { %v1578_v26 = vadd.f32 %v1577_v6, %v1409_v63  ;;  %v3327_v10 = vsub.f32 0.0, %v1913_v41  ;;  %2301 = vmatmul.bf16.gmra.mxu2 %v8357_v33  ;;  %v4605_v48 = vpack.c.bf16 %v4541_v61, %v4541_v61  ;;  %v9533_v63 = vunpack.c.l.b16 %v4604_v62  ;;  %v6995_v62 = vld [vmem:[#allocation10 + $0x70] sm:$0xff] }
 0x26c   :  { %2470 = vmatmul.bf16.gmra.mxu3 %v8358_v52  ;;  %v4732_v21 = vpack.c.bf16 %v4668_v51, %v4668_v51  ;;  %2786 = vmatpush.bf16.msra.mxu1 %v6752_v13 }
 0x26d   :  { %v3008_v45 = vsub.f32 0.0, %v1578_v26  ;;  %v7616_v32 = vpop.eup %7615  ;;  %v3444_v6 = vmul.f32 1.442695, %v3327_v10  ;;  %11820 = vst [vmem:[#allocation134_spill] sm:$0xff] %v9533_v63  ;;  %v9535_v29 = vunpack.c.l.b16 %v4605_v48  ;;  %v9548_v63 = vld [vmem:[#allocation5 + $0xd0] sm:$0xff]   ;;  %5432 = vmatpush.bf16.msra.mxu3 %v6995_v62 }
 0x26e   :  { %v7618_v41 = vpop.eup %7617  ;;  %v3518_v30 = vadd.f32 1.0, %v7616_v32  ;;  %v1746_v33 = vpop.f32.mrf.mxu2  ;;  %v9546_v32 = vunpack.c.l.b16 %v4732_v21  ;;  %11825 = vst [vmem:[#allocation138_spill] sm:$0xff] %v9548_v63 }
 0x26f   :  { %11821 = vst [vmem:[#allocation135_spill] sm:$0xff] %v9535_v29  ;;  %v3126_v0 = vmul.f32 1.442695, %v3008_v45  ;;  %v7620_v11 = vpop.eup %7619  ;;  %7623 = vpow2.f32 %v3444_v6  ;;  %v1747_v61 = vadd.f32 %v1746_v33, %v8709_v22  ;;  %v1915_v46 = vpop.f32.mrf.mxu3  ;;  %v4669_v10 = vmul.f32 %v7618_v41, %v11823_v38  ;;  %v6987_v33 = vld [vmem:[#allocation10 + $0x30] sm:$0xff] }
 0x270   :  { %v1410_v26 = vpop.f32.mrf.mxu0  ;;  %7625 = vrcp.f32 %v3518_v30  ;;  %v3199_v51 = vadd.f32 1.0, %v7620_v11  ;;  %v7622_v48 = vpop.eup %7621  ;;  %11824 = vst [vmem:[#allocation137_spill] sm:$0xff] %v9546_v32  ;;  %5263 = vmatpush.bf16.msra.mxu2 %v6987_v33  ;;  %v11827_v38 = vunpack.c.h.bf16 %v9537_v39  ;;  %v8359_v32 = vld [vmem:[#allocation2 + $0x20] sm:$0xff]  ;;  %v9580_v29 = vld [vmem:[#allocation5 + $0xd8] sm:$0xff]  }
 0x271   :  { %v1411_v52 = vadd.f32 %v1410_v26, %v8706_v9  ;;  %v1579_v58 = vpop.f32.mrf.mxu1  ;;  %7627 = vpow2.f32 %v3126_v0  ;;  %v1916_v45 = vadd.f32 %v1915_v46, %v1747_v61  ;;  %v4733_v13 = vpack.c.bf16 %v4669_v10, %v4669_v10  ;;  %11833 = vst [vmem:[#allocation144_spill] sm:$0xff] %v9580_v29 }
 0x272   :  { %7629 = vrcp.f32 %v3199_v51  ;;  %v4542_v26 = vmul.f32 %v7622_v48, %v11410_v31 }
 0x273   :  { %v1580_v6 = vadd.f32 %v1579_v58, %v1411_v52  ;;  %v3328_v41 = vsub.f32 0.0, %v1916_v45  ;;  %v9550_v30 = vunpack.c.l.b16 %v4733_v13 }
 0x274   :  { %v4606_v21 = vpack.c.bf16 %v4542_v26, %v4542_v26 }
 0x275   :  { %11826 = vst [vmem:[#allocation139_spill] sm:$0xff] %v9550_v30  ;;  %v3009_v11 = vsub.f32 0.0, %v1580_v6  ;;  %v7624_v0 = vpop.eup %7623  ;;  %v3446_v61 = vmul.f32 1.442695, %v3328_v41  ;;  %v8360_v30 = vld [vmem:[#allocation5 + $0x20] sm:$0xff] }
 0x276   :  { %v7626_v10 = vpop.eup %7625  ;;  %v3519_v51 = vadd.f32 1.0, %v7624_v0  ;;  %v1748_v58 = vpop.f32.mrf.mxu2 }
 0x277   :  { %v3128_v52 = vmul.f32 1.442695, %v3009_v11  ;;  %v7628_v45 = vpop.eup %7627  ;;  %7631 = vpow2.f32 %v3446_v61  ;;  %v1749_v62 = vadd.f32 %v1748_v58, %v8709_v22  ;;  %v1917_v13 = vpop.f32.mrf.mxu3  ;;  %v11828_v11 = vunpack.c.l.bf16 %v9548_v63 }
 0x278   :  { %v1413_v6 = vpop.f32.mrf.mxu0  ;;  %v7630_v48 = vpop.eup %7629  ;;  %7633 = vrcp.f32 %v3519_v51  ;;  %v3200_v33 = vadd.f32 1.0, %v7628_v45  ;;  %v11421_v45 = vunpack.c.h.bf16 %v9548_v63 }
 0x279   :  { %v1414_v41 = vadd.f32 %v1413_v6, %v8706_v9  ;;  %v1582_v31 = vpop.f32.mrf.mxu1  ;;  %7635 = vpow2.f32 %v3128_v52  ;;  %v1918_v46 = vadd.f32 %v1917_v13, %v1749_v62  ;;  %v4543_v0 = vmul.f32 %v7630_v48, %v11827_v38  ;;  %1968 = vmatmul.bf16.gmra.mxu0 %v8359_v32 }
 0x27a   :  { %v4670_v50 = vmul.f32 %v7626_v10, %v11828_v11  ;;  %7637 = vrcp.f32 %v3200_v33  ;;  %2137 = vmatmul.bf16.gmra.mxu1 %v8360_v30  ;;  %v9565_v13 = vunpack.c.l.b16 %v4606_v21 }
 0x27b   :  { %v1583_v61 = vadd.f32 %v1582_v31, %v1414_v41  ;;  %v3329_v58 = vsub.f32 0.0, %v1918_v46  ;;  %2306 = vmatmul.bf16.gmra.mxu2 %v8359_v32  ;;  %v4607_v51 = vpack.c.bf16 %v4543_v0, %v4543_v0  ;;  %v9569_v31 = vld [vmem:[#allocation2 + $0xd8] sm:$0xff]  }
 0x27c   :  { %2475 = vmatmul.bf16.gmra.mxu3 %v8360_v30  ;;  %11829 = vst [vmem:[#allocation140_spill] sm:$0xff] %v9565_v13  ;;  %v4734_v10 = vpack.c.bf16 %v4670_v50, %v4670_v50  ;;  %v8362_v13 = vld [vmem:[#allocation5 + $0x28] sm:$0xff] }
 0x27d   :  { %v3010_v26 = vsub.f32 0.0, %v1583_v61  ;;  %v7632_v52 = vpop.eup %7631  ;;  %v3448_v62 = vmul.f32 1.442695, %v3329_v58  ;;  %v9567_v38 = vunpack.c.l.b16 %v4607_v51  ;;  %11831 = vst [vmem:[#allocation142_spill] sm:$0xff] %v9569_v31  ;;  %v11420_v51 = vunpack.c.l.bf16 %v9569_v31 }
 0x27e   :  { %v7634_v6 = vpop.eup %7633  ;;  %v3520_v48 = vadd.f32 1.0, %v7632_v52  ;;  %v1751_v33 = vpop.f32.mrf.mxu2 }
 0x27f   :  { %11830 = vst [vmem:[#allocation141_spill] sm:$0xff] %v9567_v38  ;;  %v3130_v46 = vmul.f32 1.442695, %v3010_v26  ;;  %v7636_v41 = vpop.eup %7635  ;;  %7639 = vpow2.f32 %v3448_v62  ;;  %v1752_v32 = vadd.f32 %v1751_v33, %v8709_v22  ;;  %v1920_v0 = vpop.f32.mrf.mxu3  ;;  %v4671_v21 = vmul.f32 %v7634_v6, %v11421_v45  ;;  %v9612_v38 = vld [vmem:[#allocation5 + $0xe0] sm:$0xff]  }
 0x280   :  { %v1415_v11 = vpop.f32.mrf.mxu0  ;;  %7641 = vrcp.f32 %v3520_v48  ;;  %v3201_v50 = vadd.f32 1.0, %v7636_v41  ;;  %v7638_v26 = vpop.eup %7637  ;;  %v9578_v33 = vunpack.c.l.b16 %v4734_v10  ;;  %v11835_v10 = vunpack.c.h.bf16 %v9569_v31  ;;  %11841 = vst [vmem:[#allocation150_spill] sm:$0xff] %v9612_v38 }
 0x281   :  { %v1416_v61 = vadd.f32 %v1415_v11, %v8706_v9  ;;  %v1584_v58 = vpop.f32.mrf.mxu1  ;;  %7643 = vpow2.f32 %v3130_v46  ;;  %v1921_v52 = vadd.f32 %v1920_v0, %v1752_v32  ;;  %v4735_v62 = vpack.c.bf16 %v4671_v21, %v4671_v21 }
 0x282   :  { %11832 = vst [vmem:[#allocation143_spill] sm:$0xff] %v9578_v33  ;;  %7645 = vrcp.f32 %v3201_v50  ;;  %v4544_v48 = vmul.f32 %v7638_v26, %v11420_v51 }
 0x283   :  { %v1585_v39 = vadd.f32 %v1584_v58, %v1416_v61  ;;  %v3330_v30 = vsub.f32 0.0, %v1921_v52  ;;  %v9582_v63 = vunpack.c.l.b16 %v4735_v62 }
 0x284   :  { %v4608_v46 = vpack.c.bf16 %v4544_v48, %v4544_v48 }
 0x285   :  { %11834 = vst [vmem:[#allocation145_spill] sm:$0xff] %v9582_v63  ;;  %v3011_v6 = vsub.f32 0.0, %v1585_v39  ;;  %v7640_v41 = vpop.eup %7639  ;;  %v3450_v11 = vmul.f32 1.442695, %v3330_v30  ;;  %v8361_v63 = vld [vmem:[#allocation2 + $0x28] sm:$0xff] }
 0x286   :  { %v7642_v0 = vpop.eup %7641  ;;  %v3521_v21 = vadd.f32 1.0, %v7640_v41  ;;  %v1753_v61 = vpop.f32.mrf.mxu2 }
 0x287   :  { %v3132_v50 = vmul.f32 1.442695, %v3011_v6  ;;  %v7644_v58 = vpop.eup %7643  ;;  %7647 = vpow2.f32 %v3450_v11  ;;  %v1754_v39 = vadd.f32 %v1753_v61, %v8709_v22  ;;  %v1922_v52 = vpop.f32.mrf.mxu3  ;;  %v11836_v6 = vunpack.c.l.bf16 %v9580_v29 }
 0x288   :  { %v1418_v62 = vpop.f32.mrf.mxu0  ;;  %v7646_v26 = vpop.eup %7645  ;;  %7649 = vrcp.f32 %v3521_v21  ;;  %v3202_v30 = vadd.f32 1.0, %v7644_v58  ;;  %v11431_v58 = vunpack.c.h.bf16 %v9580_v29 }
 0x289   :  { %v1419_v51 = vadd.f32 %v1418_v62, %v8706_v9  ;;  %v1587_v45 = vpop.f32.mrf.mxu1  ;;  %7651 = vpow2.f32 %v3132_v50  ;;  %v1923_v32 = vadd.f32 %v1922_v52, %v1754_v39  ;;  %v4545_v41 = vmul.f32 %v7646_v26, %v11835_v10  ;;  %1973 = vmatmul.bf16.gmra.mxu0 %v8361_v63 }
 0x28a   :  { %v4672_v33 = vmul.f32 %v7642_v0, %v11836_v6  ;;  %7653 = vrcp.f32 %v3202_v30  ;;  %2142 = vmatmul.bf16.gmra.mxu1 %v8362_v13  ;;  %v9597_v52 = vunpack.c.l.b16 %v4608_v46 }
 0x28b   :  { %v1588_v11 = vadd.f32 %v1587_v45, %v1419_v51  ;;  %v3331_v61 = vsub.f32 0.0, %v1923_v32  ;;  %2311 = vmatmul.bf16.gmra.mxu2 %v8361_v63  ;;  %v4609_v21 = vpack.c.bf16 %v4545_v41, %v4545_v41  ;;  %v9601_v45 = vld [vmem:[#allocation2 + $0xe0] sm:$0xff]  }
 0x28c   :  { %2480 = vmatmul.bf16.gmra.mxu3 %v8362_v13  ;;  %11837 = vst [vmem:[#allocation146_spill] sm:$0xff] %v9597_v52  ;;  %v4736_v0 = vpack.c.bf16 %v4672_v33, %v4672_v33  ;;  %v8364_v52 = vld [vmem:[#allocation5 + $0x30] sm:$0xff] }
 0x28d   :  { %v3012_v48 = vsub.f32 0.0, %v1588_v11  ;;  %v7648_v50 = vpop.eup %7647  ;;  %v3452_v39 = vmul.f32 1.442695, %v3331_v61  ;;  %v9599_v10 = vunpack.c.l.b16 %v4609_v21  ;;  %11839 = vst [vmem:[#allocation148_spill] sm:$0xff] %v9601_v45  ;;  %v11430_v21 = vunpack.c.l.bf16 %v9601_v45 }
 0x28e   :  { %v7650_v51 = vpop.eup %7649  ;;  %v3522_v62 = vadd.f32 1.0, %v7648_v50  ;;  %v1756_v26 = vpop.f32.mrf.mxu2 }
 0x28f   :  { %11838 = vst [vmem:[#allocation147_spill] sm:$0xff] %v9599_v10  ;;  %v3134_v32 = vmul.f32 1.442695, %v3012_v48  ;;  %v7652_v30 = vpop.eup %7651  ;;  %7655 = vpow2.f32 %v3452_v39  ;;  %v1757_v63 = vadd.f32 %v1756_v26, %v8709_v22  ;;  %v1925_v41 = vpop.f32.mrf.mxu3  ;;  %v4673_v46 = vmul.f32 %v7650_v51, %v11431_v58 }
 0x290   :  { %v1420_v6 = vpop.f32.mrf.mxu0  ;;  %7657 = vrcp.f32 %v3522_v62  ;;  %v3203_v33 = vadd.f32 1.0, %v7652_v30  ;;  %v7654_v48 = vpop.eup %7653  ;;  %v9610_v26 = vunpack.c.l.b16 %v4736_v0  ;;  %v11843_v0 = vunpack.c.h.bf16 %v9601_v45 }
 0x291   :  { %v1421_v11 = vadd.f32 %v1420_v6, %v8706_v9  ;;  %v1589_v61 = vpop.f32.mrf.mxu1  ;;  %7659 = vpow2.f32 %v3134_v32  ;;  %v1926_v50 = vadd.f32 %v1925_v41, %v1757_v63  ;;  %v4737_v39 = vpack.c.bf16 %v4673_v46, %v4673_v46 }
 0x292   :  { %11840 = vst [vmem:[#allocation149_spill] sm:$0xff] %v9610_v26  ;;  %7661 = vrcp.f32 %v3203_v33  ;;  %v4546_v62 = vmul.f32 %v7654_v48, %v11430_v21 }
 0x293   :  { %v1590_v31 = vadd.f32 %v1589_v61, %v1421_v11  ;;  %v3332_v13 = vsub.f32 0.0, %v1926_v50  ;;  %v9614_v29 = vunpack.c.l.b16 %v4737_v39 }
 0x294   :  { %v4610_v32 = vpack.c.bf16 %v4546_v62, %v4546_v62  ;;  %v9629_v62 = vld [vmem:[#allocation2 + $0xe8] sm:$0xff]  }
 0x295   :  { %11842 = vst [vmem:[#allocation151_spill] sm:$0xff] %v9614_v29  ;;  %v3013_v51 = vsub.f32 0.0, %v1590_v31  ;;  %v7656_v30 = vpop.eup %7655  ;;  %v3454_v6 = vmul.f32 1.442695, %v3332_v13 }
 0x296   :  { %v7658_v41 = vpop.eup %7657  ;;  %v3523_v46 = vadd.f32 1.0, %v7656_v30  ;;  %v1758_v11 = vpop.f32.mrf.mxu2  ;;  %11845 = vst [vmem:[#allocation152_spill] sm:$0xff] %v9629_v62 }
 0x297   :  { %v3136_v33 = vmul.f32 1.442695, %v3013_v51  ;;  %v7660_v61 = vpop.eup %7659  ;;  %7663 = vpow2.f32 %v3454_v6  ;;  %v1759_v31 = vadd.f32 %v1758_v11, %v8709_v22  ;;  %v1927_v50 = vpop.f32.mrf.mxu3  ;;  %v11844_v51 = vunpack.c.l.bf16 %v9612_v38  ;;  %v8363_v11 = vld [vmem:[#allocation2 + $0x30] sm:$0xff] }
 0x298   :  { %v1423_v39 = vpop.f32.mrf.mxu0  ;;  %v7662_v48 = vpop.eup %7661  ;;  %7665 = vrcp.f32 %v3523_v46  ;;  %v3204_v13 = vadd.f32 1.0, %v7660_v61  ;;  %v11438_v61 = vunpack.c.h.bf16 %v9612_v38 }
 0x299   :  { %v1424_v21 = vadd.f32 %v1423_v39, %v8706_v9  ;;  %v1592_v58 = vpop.f32.mrf.mxu1  ;;  %7667 = vpow2.f32 %v3136_v33  ;;  %v1928_v63 = vadd.f32 %v1927_v50, %v1759_v31  ;;  %v4547_v30 = vmul.f32 %v7662_v48, %v11843_v0  ;;  %1978 = vmatmul.bf16.gmra.mxu0 %v8363_v11 }
 0x29a   :  { %v4674_v26 = vmul.f32 %v7658_v41, %v11844_v51  ;;  %7669 = vrcp.f32 %v3204_v13  ;;  %2147 = vmatmul.bf16.gmra.mxu1 %v8364_v52  ;;  %v9631_v50 = vunpack.c.l.b16 %v4610_v32 }
 0x29b   :  { %v1593_v6 = vadd.f32 %v1592_v58, %v1424_v21  ;;  %v3333_v29 = vsub.f32 0.0, %v1928_v63  ;;  %2316 = vmatmul.bf16.gmra.mxu2 %v8363_v11  ;;  %v4611_v46 = vpack.c.bf16 %v4547_v30, %v4547_v30 }
 0x29c   :  { %2485 = vmatmul.bf16.gmra.mxu3 %v8364_v52  ;;  %11846 = vst [vmem:[#allocation153_spill] sm:$0xff] %v9631_v50  ;;  %v4738_v58 = vpack.c.bf16 %v4674_v26, %v4674_v26  ;;  %v6731_v50 = vld [vmem:[#allocation7 + $0x218] sm:$0xf] }
 0x29d   :  { %v3014_v33 = vsub.f32 0.0, %v1593_v6  ;;  %v7664_v31 = vpop.eup %7663  ;;  %v3456_v0 = vmul.f32 1.442695, %v3333_v29  ;;  %v9633_v41 = vunpack.c.l.b16 %v4611_v46 }
 0x29e   :  { %v7666_v21 = vpop.eup %7665  ;;  %v3524_v39 = vadd.f32 1.0, %v7664_v31  ;;  %v1761_v48 = vpop.f32.mrf.mxu2 }
 0x29f   :  { %11847 = vst [vmem:[#allocation154_spill] sm:$0xff] %v9633_v41  ;;  %v3138_v63 = vmul.f32 1.442695, %v3014_v33  ;;  %v7668_v30 = vpop.eup %7667  ;;  %7671 = vpow2.f32 %v3456_v0  ;;  %v1762_v51 = vadd.f32 %v1761_v48, %v8709_v22  ;;  %v1930_v11 = vpop.f32.mrf.mxu3  ;;  %v4675_v52 = vmul.f32 %v7666_v21, %v11438_v61  ;;  %v9644_v48 = vld [vmem:[#allocation5 + $0xe8] sm:$0xff]  }
 0x2a0   :  { %v1425_v6 = vpop.f32.mrf.mxu0  ;;  %v7670_v32 = vpop.eup %7669  ;;  %7673 = vrcp.f32 %v3524_v39  ;;  %v3205_v26 = vadd.f32 1.0, %v7668_v30  ;;  %v9642_v0 = vunpack.c.l.b16 %v4738_v58  ;;  %11849 = vst [vmem:[#allocation156_spill] sm:$0xff] %v9644_v48  ;;  %v11851_v21 = vunpack.c.l.bf16 %v9629_v62  ;;  %v6986_v58 = vld [vmem:[#allocation10 + $0x28] sm:$0xff] }
 0x2a1   :  { %v1426_v46 = vadd.f32 %v1425_v6, %v8706_v9  ;;  %v1594_v33 = vpop.f32.mrf.mxu1  ;;  %7675 = vpow2.f32 %v3138_v63  ;;  %v1931_v31 = vadd.f32 %v1930_v11, %v1762_v51  ;;  %v4739_v13 = vpack.c.bf16 %v4675_v52, %v4675_v52  ;;  %v6571_v63 = vld [vmem:[#allocation7 + $0xd8] sm:$0xf]  ;;  %v6994_v41 = vld [vmem:[#allocation10 + $0x68] sm:$0xff]  ;;  %5264 = vmatpush.bf16.msra.mxu2 %v6986_v58 }
 0x2a2   :  { %11848 = vst [vmem:[#allocation155_spill] sm:$0xff] %v9642_v0  ;;  %7677 = vrcp.f32 %v3205_v26  ;;  %v4548_v61 = vmul.f32 %v7670_v32, %v11851_v21  ;;  %v6930_v0 = vld [vmem:[#allocation7 + $0xe8] sm:$0xf0]  ;;  %5433 = vmatpush.bf16.msra.mxu3 %v6994_v41  ;;  %v9665_v58 = vld [vmem:[#allocation2 + $0xf0] sm:$0xff]  }
 0x2a3   :  { %v1595_v45 = vadd.f32 %v1594_v33, %v1426_v46  ;;  %v3334_v10 = vsub.f32 0.0, %v1931_v31  ;;  %v9646_v29 = vunpack.c.l.b16 %v4739_v13  ;;  %11856 = vst [vmem:[#allocation160_spill] sm:$0xff] %v9665_v58 }
 0x2a5   :  { %11850 = vst [vmem:[#allocation157_spill] sm:$0xff] %v9646_v29  ;;  %v3015_v39 = vsub.f32 0.0, %v1595_v45  ;;  %v7672_v6 = vpop.eup %7671  ;;  %v3458_v38 = vmul.f32 1.442695, %v3334_v10  ;;  %v4612_v45 = vpack.c.bf16 %v4548_v61, %v4548_v61  ;;  %v11853_v61 = vunpack.c.h.bf16 %v9629_v62  ;;  %v8369_v62 = vld [vmem:[#allocation5 + $0x40] sm:$0xff] }
 0x2a6   :  { %v7674_v51 = vpop.eup %7673  ;;  %v3525_v11 = vadd.f32 1.0, %v7672_v6  ;;  %v1763_v26 = vpop.f32.mrf.mxu2  ;;  %v11852_v6 = vunpack.c.l.bf16 %v9644_v48 }
 0x2a7   :  { %v3140_v52 = vmul.f32 1.442695, %v3015_v39  ;;  %v7676_v46 = vpop.eup %7675  ;;  %7679 = vpow2.f32 %v3458_v38  ;;  %v1764_v13 = vadd.f32 %v1763_v26, %v8709_v22  ;;  %v1932_v33 = vpop.f32.mrf.mxu3  ;;  %v6572_v38 = vor.u32 %v6930_v0, %v6571_v63  ;;  %v6970_v26 = vld [vmem:[#allocation7 + $0x228] sm:$0xf0] }
 0x2a8   :  { %v1428_v32 = vpop.f32.mrf.mxu0  ;;  %v7678_v31 = vpop.eup %7677  ;;  %7681 = vrcp.f32 %v3525_v11  ;;  %v3206_v21 = vadd.f32 1.0, %v7676_v46  ;;  %v4676_v39 = vmul.f32 %v7674_v51, %v11852_v6  ;;  %v8365_v46 = vld [vmem:[#allocation2 + $0x38] sm:$0xff] }
 0x2a9   :  { %v1429_v10 = vadd.f32 %v1428_v32, %v8706_v9  ;;  %v1597_v30 = vpop.f32.mrf.mxu1  ;;  %7683 = vpow2.f32 %v3140_v52  ;;  %v1933_v29 = vadd.f32 %v1932_v33, %v1764_v13  ;;  %v4549_v20 = vmul.f32 %v7678_v31, %v11853_v61  ;;  %1983 = vmatmul.bf16.gmra.mxu0 %v8365_v46 }
 0x2aa   :  { %v6732_v32 = vor.u32 %v6970_v26, %v6731_v50  ;;  %7685 = vrcp.f32 %v3206_v21  ;;  %2152 = vmatmul.bf16.gmra.mxu1 %v8366_v3  ;;  %v11448_v52 = vunpack.c.h.bf16 %v9644_v48  ;;  %2618 = vmatpush.bf16.msra.mxu0 %v6572_v38  ;;  %v4740_v50 = vpack.c.bf16 %v4676_v39, %v4676_v39 }
 0x2ab   :  { %v1598_v11 = vadd.f32 %v1597_v30, %v1429_v10  ;;  %v3335_v56 = vsub.f32 0.0, %v1933_v29  ;;  %2321 = vmatmul.bf16.gmra.mxu2 %v8365_v46  ;;  %v4613_v51 = vpack.c.bf16 %v4549_v20, %v4549_v20  ;;  %v9661_v30 = vunpack.c.l.b16 %v4612_v45 }
 0x2ac   :  { %2490 = vmatmul.bf16.gmra.mxu3 %v8366_v3  ;;  %2787 = vmatpush.bf16.msra.mxu1 %v6732_v32  ;;  %v11449_v61 = vunpack.c.l.bf16 %v9665_v58 }
 0x2ad   :  { %v3016_v0 = vsub.f32 0.0, %v1598_v11  ;;  %v7680_v63 = vpop.eup %7679  ;;  %v3460_v13 = vmul.f32 1.442695, %v3335_v56  ;;  %11854 = vst [vmem:[#allocation158_spill] sm:$0xff] %v9661_v30  ;;  %v9663_v33 = vunpack.c.l.b16 %v4613_v51  ;;  %v9674_v51 = vunpack.c.l.b16 %v4740_v50 }
 0x2ae   :  { %v7682_v29 = vpop.eup %7681  ;;  %v3526_v31 = vadd.f32 1.0, %v7680_v63  ;;  %v1766_v20 = vpop.f32.mrf.mxu2  ;;  %v9676_v63 = vld [vmem:[#allocation5 + $0xf0] sm:$0xff]  }
 0x2af   :  { %11855 = vst [vmem:[#allocation159_spill] sm:$0xff] %v9663_v33  ;;  %v3142_v21 = vmul.f32 1.442695, %v3016_v0  ;;  %v7684_v10 = vpop.eup %7683  ;;  %7687 = vpow2.f32 %v3460_v13  ;;  %v1767_v3 = vadd.f32 %v1766_v20, %v8709_v22  ;;  %v1935_v6 = vpop.f32.mrf.mxu3  ;;  %v4677_v41 = vmul.f32 %v7682_v29, %v11448_v52 }
 0x2b0   :  { %v1430_v38 = vpop.f32.mrf.mxu0  ;;  %7689 = vrcp.f32 %v3526_v31  ;;  %v3207_v45 = vadd.f32 1.0, %v7684_v10  ;;  %v7686_v11 = vpop.eup %7685  ;;  %11857 = vst [vmem:[#allocation161_spill] sm:$0xff] %v9674_v51  ;;  %v8367_v31 = vld [vmem:[#allocation8] sm:$0x1f] }
 0x2b1   :  { %v1431_v39 = vadd.f32 %v1430_v38, %v8706_v9  ;;  %v1599_v26 = vpop.f32.mrf.mxu1  ;;  %7691 = vpow2.f32 %v3142_v21  ;;  %v1936_v46 = vadd.f32 %v1935_v6, %v1767_v3  ;;  %v4741_v32 = vpack.c.bf16 %v4677_v41, %v4677_v41  ;;  %11858 = vst [vmem:[#allocation162_spill] sm:$0xff] %v9676_v63 }
 0x2b2   :  { %7693 = vrcp.f32 %v3207_v45  ;;  %v9680_v10 = vperm.slane %v8367_v31, 2  ;;  %v4550_v9 = vmul.f32 %v7686_v11, %v11449_v61  ;;  %v11860_v6 = vunpack.c.h.bf16 %v9665_v58 }
 0x2b3   :  { %v1600_v0 = vadd.f32 %v1599_v26, %v1431_v39  ;;  %v3336_v13 = vsub.f32 0.0, %v1936_v46  ;;  %v9678_v20 = vunpack.c.l.b16 %v4741_v32 }
 0x2b4   :  { %v4614_v56 = vpack.c.bf16 %v4550_v9, %v4550_v9  ;;  %v11456_v9 = vunpack.c.h.bf16 %v9676_v63 }
 0x2b5   :  { %11859 = vst [vmem:[#allocation163_spill] sm:$0xff] %v9678_v20  ;;  %v3017_v29 = vsub.f32 0.0, %v1600_v0  ;;  %v7688_v38 = vpop.eup %7687  ;;  %v3462_v21 = vmul.f32 1.442695, %v3336_v13 }
 0x2b6   :  { %v7690_v41 = vpop.eup %7689  ;;  %v3527_v45 = vadd.f32 1.0, %v7688_v38  ;;  %v1768_v26 = vpop.f32.mrf.mxu2 }
 0x2b7   :  { %v3144_v39 = vmul.f32 1.442695, %v3017_v29  ;;  %v7692_v46 = vpop.eup %7691  ;;  %7695 = vpow2.f32 %v3462_v21  ;;  %v1769_v32 = vadd.f32 %v1768_v26, %v8709_v22  ;;  %v1937_v0 = vpop.f32.mrf.mxu3  ;;  %v11861_v29 = vunpack.c.l.bf16 %v9676_v63  ;;  %v8368_v22 = vld [vmem:[#allocation2 + $0x40] sm:$0xff] }
 0x2b8   :  { %v1949_v52 = vpop.f32.mrf.mxu0  ;;  %v7694_v11 = vpop.eup %7693  ;;  %7697 = vrcp.f32 %v3527_v45  ;;  %v3208_v13 = vadd.f32 1.0, %v7692_v46  ;;  %v9696_v45 = vperm.slane %v8367_v31, 3  ;;  %v9699_v46 = vunpack.c.l.b16 %v4614_v56 }
 0x2b9   :  { %v1950_v61 = vadd.f32 %v1949_v52, %v9680_v10  ;;  %v2118_v50 = vpop.f32.mrf.mxu1  ;;  %7699 = vpow2.f32 %v3144_v39  ;;  %v1938_v3 = vadd.f32 %v1937_v0, %v1769_v32  ;;  %v4551_v38 = vmul.f32 %v7694_v11, %v11860_v6  ;;  %1988 = vmatmul.bf16.gmra.mxu0 %v8368_v22  ;;  %v9703_v0 = vld [vmem:[#allocation2 + $0xf8] sm:$0xff]  }
 0x2ba   :  { %v4678_v48 = vmul.f32 %v7690_v41, %v11861_v29  ;;  %2157 = vmatmul.bf16.gmra.mxu1 %v8369_v62  ;;  %7701 = vrcp.f32 %v3208_v13  ;;  %11862 = vst [vmem:[#allocation164_spill] sm:$0xff] %v9699_v46 }
 0x2bb   :  { %v9694_v21 = vadd.f32 %v2118_v50, %v1950_v61  ;;  %v3337_v26 = vsub.f32 0.0, %v1938_v3  ;;  %2326 = vmatmul.bf16.gmra.mxu2 %v8368_v22  ;;  %v4615_v52 = vpack.c.bf16 %v4551_v38, %v4551_v38  ;;  %11864 = vst [vmem:[#allocation166_spill] sm:$0xff] %v9703_v0 }
 0x2bc   :  { %2495 = vmatmul.bf16.gmra.mxu3 %v8369_v62  ;;  %v4742_v61 = vpack.c.bf16 %v4678_v48, %v4678_v48  ;;  %v9718_v62 = vld [vmem:[#allocation5 + $0xf8] sm:$0xff]  }
 0x2bd   :  { %v7696_v39 = vpop.eup %7695  ;;  %v3464_v6 = vmul.f32 1.442695, %v3337_v26  ;;  %v9701_v41 = vunpack.c.l.b16 %v4615_v52  ;;  %11866 = vst [vmem:[#allocation168_spill] sm:$0xff] %v9718_v62 }
 0x2be   :  { %v7698_v50 = vpop.eup %7697  ;;  %v3528_v32 = vadd.f32 1.0, %v7696_v39  ;;  %v2287_v3 = vpop.f32.mrf.mxu2  ;;  %v9713_v39 = vunpack.c.l.b16 %v4742_v61  ;;  %v11463_v61 = vunpack.c.h.bf16 %v9703_v0 }
 0x2bf   :  { %11863 = vst [vmem:[#allocation165_spill] sm:$0xff] %v9701_v41  ;;  %v7700_v11 = vpop.eup %7699  ;;  %7703 = vpow2.f32 %v3464_v6  ;;  %v2288_v31 = vadd.f32 %v2287_v3, %v9696_v45  ;;  %v2456_v38 = vpop.f32.mrf.mxu3  ;;  %v4679_v56 = vmul.f32 %v7698_v50, %v11456_v9  ;;  %v11461_v6 = vunpack.c.l.bf16 %v9703_v0 }
 0x2c0   :  { %v1951_v29 = vpop.f32.mrf.mxu0  ;;  %7705 = vrcp.f32 %v3528_v32  ;;  %v3209_v13 = vadd.f32 1.0, %v7700_v11  ;;  %11865 = vst [vmem:[#allocation167_spill] sm:$0xff] %v9713_v39  ;;  %v7702_v3 = vpop.eup %7701 }
 0x2c1   :  { %v1952_v48 = vadd.f32 %v1951_v29, %v9680_v10  ;;  %v2120_v22 = vpop.f32.mrf.mxu1  ;;  %v9711_v26 = vadd.f32 %v2456_v38, %v2288_v31  ;;  %v4743_v52 = vpack.c.bf16 %v4679_v56, %v4679_v56  ;;  %v4552_v38 = vmul.f32 %v7702_v3, %v11461_v6 }
 0x2c2   :  { %7707 = vrcp.f32 %v3209_v13  ;;  %v11464_v29 = vunpack.c.l.bf16 %v9718_v62 }
 0x2c3   :  { %v9716_v58 = vadd.f32 %v2120_v22, %v1952_v48  ;;  %v9722_v32 = vunpack.c.l.b16 %v4743_v52  ;;  %v4616_v3 = vpack.c.bf16 %v4552_v38, %v4552_v38 }
 0x2c5   :  { %11867 = vst [vmem:[#allocation169_spill] sm:$0xff] %v9722_v32  ;;  %v7704_v11 = vpop.eup %7703  ;;  %v8370_v32 = vld [vmem:[#allocation2 + $0x48] sm:$0xff] }
 0x2c6   :  { %v7706_v56 = vpop.eup %7705  ;;  %v3529_v13 = vadd.f32 1.0, %v7704_v11  ;;  %v2289_v48 = vpop.f32.mrf.mxu2 }
 0x2c7   :  { %v2290_v22 = vadd.f32 %v2289_v48, %v9696_v45  ;;  %v2458_v9 = vpop.f32.mrf.mxu3  ;;  %v4680_v6 = vmul.f32 %v7706_v56, %v11464_v29  ;;  %v6551_v48 = vld [vmem:[#allocation7 + $0xb0] sm:$0xf] }
 0x2c8   :  { %v1954_v50 = vpop.f32.mrf.mxu0  ;;  %v7708_v52 = vpop.eup %7707  ;;  %7709 = vrcp.f32 %v3529_v13  ;;  %v8371_v13 = vld [vmem:[#allocation5 + $0x48] sm:$0xff] }
 0x2c9   :  { %v1955_v63 = vadd.f32 %v1954_v50, %v9680_v10  ;;  %v2123_v46 = vpop.f32.mrf.mxu1  ;;  %v9732_v31 = vadd.f32 %v2458_v9, %v2290_v22  ;;  %v4553_v39 = vmul.f32 %v7708_v52, %v11463_v61  ;;  %1993 = vmatmul.bf16.gmra.mxu0 %v8370_v32  ;;  %v11470_v9 = vunpack.c.h.bf16 %v9718_v62 }
 0x2ca   :  { %2162 = vmatmul.bf16.gmra.mxu1 %v8371_v13  ;;  %v9743_v22 = vunpack.c.l.b16 %v4616_v3  ;;  %v4744_v52 = vpack.c.bf16 %v4680_v6, %v4680_v6 }
 0x2cb   :  { %v9738_v11 = vadd.f32 %v2123_v46, %v1955_v63  ;;  %2331 = vmatmul.bf16.gmra.mxu2 %v8370_v32  ;;  %v4617_v50 = vpack.c.bf16 %v4553_v39, %v4553_v39 }
 0x2cc   :  { %2500 = vmatmul.bf16.gmra.mxu3 %v8371_v13  ;;  %11868 = vst [vmem:[#allocation170_spill] sm:$0xff] %v9743_v22  ;;  %v9755_v0 = vunpack.c.l.b16 %v4744_v52 }
 0x2cd   :  { %v9745_v38 = vunpack.c.l.b16 %v4617_v50 }
 0x2ce   :  { %v7710_v56 = vpop.eup %7709  ;;  %v2292_v63 = vpop.f32.mrf.mxu2  ;;  %11870 = vst [vmem:[#allocation172_spill] sm:$0xff] %v9755_v0 }
 0x2cf   :  { %11869 = vst [vmem:[#allocation171_spill] sm:$0xff] %v9745_v38  ;;  %v2293_v46 = vadd.f32 %v2292_v63, %v9696_v45  ;;  %v2461_v61 = vpop.f32.mrf.mxu3  ;;  %v4681_v39 = vmul.f32 %v7710_v56, %v11470_v9  ;;  %v6711_v63 = vld [vmem:[#allocation7 + $0x1f0] sm:$0xf] }
 0x2d0   :  { %v1956_v29 = vpop.f32.mrf.mxu0 }
 0x2d1   :  { %v1957_v32 = vadd.f32 %v1956_v29, %v9680_v10  ;;  %v2125_v13 = vpop.f32.mrf.mxu1  ;;  %v9753_v3 = vadd.f32 %v2461_v61, %v2293_v46  ;;  %v4745_v50 = vpack.c.bf16 %v4681_v39, %v4681_v39 }
 0x2d3   :  { %v9757_v6 = vadd.f32 %v2125_v13, %v1957_v32  ;;  %v9761_v41 = vunpack.c.l.b16 %v4745_v50  ;;  %v8372_v32 = vld [vmem:[#allocation2 + $0x50] sm:$0xff] }
 0x2d4   :  { %v8373_v50 = vld [vmem:[#allocation5 + $0x50] sm:$0xff] }
 0x2d5   :  { %11871 = vst [vmem:[#allocation173_spill] sm:$0xff] %v9761_v41  ;;  %v6965_v41 = vld [vmem:[#allocation7 + $0x200] sm:$0xf0] }
 0x2d6   :  { %v2294_v62 = vpop.f32.mrf.mxu2  ;;  %v6712_v22 = vor.u32 %v6965_v41, %v6711_v63 }
 0x2d7   :  { %v2295_v56 = vadd.f32 %v2294_v62, %v9696_v45  ;;  %v2463_v29 = vpop.f32.mrf.mxu3  ;;  %v6925_v62 = vld [vmem:[#allocation7 + $0xc0] sm:$0xf0] }
 0x2d8   :  { %v1959_v9 = vpop.f32.mrf.mxu0  ;;  %v6552_v0 = vor.u32 %v6925_v62, %v6551_v48  ;;  %2788 = vmatpush.bf16.msra.mxu1 %v6712_v22  ;;  %v6985_v48 = vld [vmem:[#allocation10 + $0x20] sm:$0xff] }
 0x2d9   :  { %v1960_v61 = vadd.f32 %v1959_v9, %v9680_v10  ;;  %v2128_v46 = vpop.f32.mrf.mxu1  ;;  %v9767_v52 = vadd.f32 %v2463_v29, %v2295_v56  ;;  %1998 = vmatmul.bf16.gmra.mxu0 %v8372_v32  ;;  %v6993_v62 = vld [vmem:[#allocation10 + $0x60] sm:$0xff]  ;;  %5265 = vmatpush.bf16.msra.mxu2 %v6985_v48 }
 0x2da   :  { %2167 = vmatmul.bf16.gmra.mxu1 %v8373_v50  ;;  %2619 = vmatpush.bf16.msra.mxu0 %v6552_v0 }
 0x2db   :  { %v9769_v39 = vadd.f32 %v2128_v46, %v1960_v61  ;;  %2336 = vmatmul.bf16.gmra.mxu2 %v8372_v32  ;;  %5434 = vmatpush.bf16.msra.mxu3 %v6993_v62 }
 0x2dc   :  { %2505 = vmatmul.bf16.gmra.mxu3 %v8373_v50 }
 0x2de   :  { %v2297_v9 = vpop.f32.mrf.mxu2 }
 0x2df   :  { %v2298_v56 = vadd.f32 %v2297_v9, %v9696_v45  ;;  %v2466_v29 = vpop.f32.mrf.mxu3 }
 0x2e0   :  { %v1961_v61 = vpop.f32.mrf.mxu0 }
 0x2e1   :  { %v1962_v46 = vadd.f32 %v1961_v61, %v9680_v10  ;;  %v2130_v38 = vpop.f32.mrf.mxu1  ;;  %v9775_v13 = vadd.f32 %v2466_v29, %v2298_v56 }
 0x2e3   :  { %v9777_v32 = vadd.f32 %v2130_v38, %v1962_v46  ;;  %v8374_v38 = vld [vmem:[#allocation2 + $0x58] sm:$0xff] }
 0x2e4   :  { %v8375_v46 = vld [vmem:[#allocation5 + $0x58] sm:$0xff] }
 0x2e5   :  { %11872 = vst [vmem:[#allocation174_spill] sm:$0xff] %v9777_v32 }
 0x2e6   :  { %v2299_v41 = vpop.f32.mrf.mxu2 }
 0x2e7   :  { %v2300_v63 = vadd.f32 %v2299_v41, %v9696_v45  ;;  %v2468_v9 = vpop.f32.mrf.mxu3 }
 0x2e8   :  { %v1964_v0 = vpop.f32.mrf.mxu0 }
 0x2e9   :  { %v1965_v61 = vadd.f32 %v1964_v0, %v9680_v10  ;;  %v2133_v51 = vpop.f32.mrf.mxu1  ;;  %v9783_v22 = vadd.f32 %v2468_v9, %v2300_v63  ;;  %2003 = vmatmul.bf16.gmra.mxu0 %v8374_v38 }
 0x2ea   :  { %2172 = vmatmul.bf16.gmra.mxu1 %v8375_v46 }
 0x2eb   :  { %11873 = vst [vmem:[#allocation175_spill] sm:$0xff] %v9783_v22  ;;  %v9785_v56 = vadd.f32 %v2133_v51, %v1965_v61  ;;  %2341 = vmatmul.bf16.gmra.mxu2 %v8374_v38 }
 0x2ec   :  { %2510 = vmatmul.bf16.gmra.mxu3 %v8375_v46 }
 0x2ed   :  { %11874 = vst [vmem:[#allocation176_spill] sm:$0xff] %v9785_v56 }
 0x2ee   :  { %v2302_v48 = vpop.f32.mrf.mxu2 }
 0x2ef   :  { %v2303_v62 = vadd.f32 %v2302_v48, %v9696_v45  ;;  %v2471_v41 = vpop.f32.mrf.mxu3 }
 0x2f0   :  { %v1966_v50 = vpop.f32.mrf.mxu0 }
 0x2f1   :  { %v1967_v0 = vadd.f32 %v1966_v50, %v9680_v10  ;;  %v2135_v63 = vpop.f32.mrf.mxu1  ;;  %v9791_v9 = vadd.f32 %v2471_v41, %v2303_v62  ;;  %v8376_v50 = vld [vmem:[#allocation2 + $0x60] sm:$0xff] }
 0x2f2   :  { %v8377_v41 = vld [vmem:[#allocation5 + $0x60] sm:$0xff] }
 0x2f3   :  { %11875 = vst [vmem:[#allocation177_spill] sm:$0xff] %v9791_v9  ;;  %v9793_v51 = vadd.f32 %v2135_v63, %v1967_v0 }
 0x2f5   :  { %11876 = vst [vmem:[#allocation178_spill] sm:$0xff] %v9793_v51 }
 0x2f6   :  { %v2304_v29 = vpop.f32.mrf.mxu2 }
 0x2f7   :  { %v2305_v20 = vadd.f32 %v2304_v29, %v9696_v45  ;;  %v2473_v38 = vpop.f32.mrf.mxu3 }
 0x2f8   :  { %v1969_v46 = vpop.f32.mrf.mxu0 }
 0x2f9   :  { %v1970_v30 = vadd.f32 %v1969_v46, %v9680_v10  ;;  %v2138_v48 = vpop.f32.mrf.mxu1  ;;  %v9799_v33 = vadd.f32 %v2473_v38, %v2305_v20  ;;  %2008 = vmatmul.bf16.gmra.mxu0 %v8376_v50 }
 0x2fa   :  { %2177 = vmatmul.bf16.gmra.mxu1 %v8377_v41 }
 0x2fb   :  { %11877 = vst [vmem:[#allocation179_spill] sm:$0xff] %v9799_v33  ;;  %v9801_v22 = vadd.f32 %v2138_v48, %v1970_v30  ;;  %2346 = vmatmul.bf16.gmra.mxu2 %v8376_v50 }
 0x2fc   :  { %2515 = vmatmul.bf16.gmra.mxu3 %v8377_v41 }
 0x2fd   :  { %11878 = vst [vmem:[#allocation180_spill] sm:$0xff] %v9801_v22 }
 0x2fe   :  { %v2307_v0 = vpop.f32.mrf.mxu2 }
 0x2ff   :  { %v2308_v29 = vadd.f32 %v2307_v0, %v9696_v45  ;;  %v2476_v63 = vpop.f32.mrf.mxu3 }
 0x300   :  { %v1971_v61 = vpop.f32.mrf.mxu0 }
 0x301   :  { %v1972_v46 = vadd.f32 %v1971_v61, %v9680_v10  ;;  %v2140_v20 = vpop.f32.mrf.mxu1  ;;  %v9807_v38 = vadd.f32 %v2476_v63, %v2308_v29  ;;  %v8378_v61 = vld [vmem:[#allocation2 + $0x68] sm:$0xff] }
 0x302   :  { %v8379_v63 = vld [vmem:[#allocation5 + $0x68] sm:$0xff] }
 0x303   :  { %11879 = vst [vmem:[#allocation181_spill] sm:$0xff] %v9807_v38  ;;  %v9809_v30 = vadd.f32 %v2140_v20, %v1972_v46 }
 0x305   :  { %11880 = vst [vmem:[#allocation182_spill] sm:$0xff] %v9809_v30 }
 0x306   :  { %v2309_v62 = vpop.f32.mrf.mxu2 }
 0x307   :  { %v2310_v33 = vadd.f32 %v2309_v62, %v9696_v45  ;;  %v2478_v50 = vpop.f32.mrf.mxu3 }
 0x308   :  { %v1974_v41 = vpop.f32.mrf.mxu0 }
 0x309   :  { %v1975_v51 = vadd.f32 %v1974_v41, %v9680_v10  ;;  %v2143_v0 = vpop.f32.mrf.mxu1  ;;  %v9815_v9 = vadd.f32 %v2478_v50, %v2310_v33  ;;  %2013 = vmatmul.bf16.gmra.mxu0 %v8378_v61 }
 0x30a   :  { %2182 = vmatmul.bf16.gmra.mxu1 %v8379_v63 }
 0x30b   :  { %11881 = vst [vmem:[#allocation183_spill] sm:$0xff] %v9815_v9  ;;  %v9817_v56 = vadd.f32 %v2143_v0, %v1975_v51  ;;  %2351 = vmatmul.bf16.gmra.mxu2 %v8378_v61 }
 0x30c   :  { %2520 = vmatmul.bf16.gmra.mxu3 %v8379_v63 }
 0x30d   :  { %11882 = vst [vmem:[#allocation184_spill] sm:$0xff] %v9817_v56 }
 0x30e   :  { %v2312_v46 = vpop.f32.mrf.mxu2 }
 0x30f   :  { %v2313_v62 = vadd.f32 %v2312_v46, %v9696_v45  ;;  %v2481_v20 = vpop.f32.mrf.mxu3 }
 0x310   :  { %v1976_v48 = vpop.f32.mrf.mxu0 }
 0x311   :  { %v1977_v41 = vadd.f32 %v1976_v48, %v9680_v10  ;;  %v2145_v33 = vpop.f32.mrf.mxu1  ;;  %v9823_v50 = vadd.f32 %v2481_v20, %v2313_v62  ;;  %v8380_v48 = vld [vmem:[#allocation2 + $0x70] sm:$0xff] }
 0x312   :  { %v8381_v20 = vld [vmem:[#allocation5 + $0x70] sm:$0xff] }
 0x313   :  { %11883 = vst [vmem:[#allocation185_spill] sm:$0xff] %v9823_v50  ;;  %v9825_v51 = vadd.f32 %v2145_v33, %v1977_v41  ;;  %v6531_v41 = vld [vmem:[#allocation7 + $0x88] sm:$0xf]  ;;  %v6960_v50 = vld [vmem:[#allocation7 + $0x1d8] sm:$0xf0] }
 0x314   :  { %v6691_v33 = vld [vmem:[#allocation7 + $0x1c8] sm:$0xf] }
 0x315   :  { %11884 = vst [vmem:[#allocation186_spill] sm:$0xff] %v9825_v51  ;;  %v6692_v56 = vor.u32 %v6960_v50, %v6691_v33 }
 0x316   :  { %v2314_v29 = vpop.f32.mrf.mxu2 }
 0x317   :  { %v2315_v9 = vadd.f32 %v2314_v29, %v9696_v45  ;;  %v2483_v61 = vpop.f32.mrf.mxu3  ;;  %v6920_v29 = vld [vmem:[#allocation7 + $0x98] sm:$0xf0]  ;;  %2789 = vmatpush.bf16.msra.mxu1 %v6692_v56 }
 0x318   :  { %v1979_v63 = vpop.f32.mrf.mxu0  ;;  %v6532_v0 = vor.u32 %v6920_v29, %v6531_v41  ;;  %v6984_v41 = vld [vmem:[#allocation10 + $0x18] sm:$0xff] }
 0x319   :  { %v1980_v30 = vadd.f32 %v1979_v63, %v9680_v10  ;;  %v2148_v46 = vpop.f32.mrf.mxu1  ;;  %v9831_v38 = vadd.f32 %v2483_v61, %v2315_v9  ;;  %2018 = vmatmul.bf16.gmra.mxu0 %v8380_v48  ;;  %v6992_v29 = vld [vmem:[#allocation10 + $0x58] sm:$0xff]  ;;  %5266 = vmatpush.bf16.msra.mxu2 %v6984_v41 }
 0x31a   :  { %2187 = vmatmul.bf16.gmra.mxu1 %v8381_v20  ;;  %2620 = vmatpush.bf16.msra.mxu0 %v6532_v0 }
 0x31b   :  { %11885 = vst [vmem:[#allocation187_spill] sm:$0xff] %v9831_v38  ;;  %v9833_v22 = vadd.f32 %v2148_v46, %v1980_v30  ;;  %2356 = vmatmul.bf16.gmra.mxu2 %v8380_v48  ;;  %5435 = vmatpush.bf16.msra.mxu3 %v6992_v29 }
 0x31c   :  { %2525 = vmatmul.bf16.gmra.mxu3 %v8381_v20 }
 0x31d   :  { %11886 = vst [vmem:[#allocation188_spill] sm:$0xff] %v9833_v22 }
 0x31e   :  { %v2317_v63 = vpop.f32.mrf.mxu2 }
 0x31f   :  { %v2318_v9 = vadd.f32 %v2317_v63, %v9696_v45  ;;  %v2486_v30 = vpop.f32.mrf.mxu3 }
 0x320   :  { %v1981_v61 = vpop.f32.mrf.mxu0 }
 0x321   :  { %v1982_v46 = vadd.f32 %v1981_v61, %v9680_v10  ;;  %v2150_v32 = vpop.f32.mrf.mxu1  ;;  %v9839_v62 = vadd.f32 %v2486_v30, %v2318_v9 }
 0x323   :  { %11887 = vst [vmem:[#allocation189_spill] sm:$0xff] %v9839_v62  ;;  %v9841_v48 = vadd.f32 %v2150_v32, %v1982_v46  ;;  %v8382_v32 = vld [vmem:[#allocation2 + $0x78] sm:$0xff] }
 0x324   :  { %v8383_v46 = vld [vmem:[#allocation5 + $0x78] sm:$0xff] }
 0x325   :  { %11888 = vst [vmem:[#allocation190_spill] sm:$0xff] %v9841_v48 }
 0x326   :  { %v2319_v50 = vpop.f32.mrf.mxu2 }
 0x327   :  { %v2320_v33 = vadd.f32 %v2319_v50, %v9696_v45  ;;  %v2488_v63 = vpop.f32.mrf.mxu3 }
 0x328   :  { %v1984_v0 = vpop.f32.mrf.mxu0 }
 0x329   :  { %v1985_v61 = vadd.f32 %v1984_v0, %v9680_v10  ;;  %v2153_v38 = vpop.f32.mrf.mxu1  ;;  %v9847_v56 = vadd.f32 %v2488_v63, %v2320_v33  ;;  %2023 = vmatmul.bf16.gmra.mxu0 %v8382_v32 }
 0x32a   :  { %2192 = vmatmul.bf16.gmra.mxu1 %v8383_v46 }
 0x32b   :  { %11889 = vst [vmem:[#allocation191_spill] sm:$0xff] %v9847_v56  ;;  %v9849_v9 = vadd.f32 %v2153_v38, %v1985_v61  ;;  %2361 = vmatmul.bf16.gmra.mxu2 %v8382_v32 }
 0x32c   :  { %2530 = vmatmul.bf16.gmra.mxu3 %v8383_v46 }
 0x32d   :  { %11890 = vst [vmem:[#allocation192_spill] sm:$0xff] %v9849_v9 }
 0x32e   :  { %v2322_v41 = vpop.f32.mrf.mxu2 }
 0x32f   :  { %v2323_v29 = vadd.f32 %v2322_v41, %v9696_v45  ;;  %v2491_v50 = vpop.f32.mrf.mxu3 }
 0x330   :  { %v1986_v20 = vpop.f32.mrf.mxu0 }
 0x331   :  { %v1987_v0 = vadd.f32 %v1986_v20, %v9680_v10  ;;  %v2155_v33 = vpop.f32.mrf.mxu1  ;;  %v9855_v63 = vadd.f32 %v2491_v50, %v2323_v29  ;;  %v8384_v20 = vld [vmem:[#allocation2 + $0x80] sm:$0xff] }
 0x332   :  { %v8385_v50 = vld [vmem:[#allocation5 + $0x80] sm:$0xff] }
 0x333   :  { %11891 = vst [vmem:[#allocation193_spill] sm:$0xff] %v9855_v63  ;;  %v9857_v38 = vadd.f32 %v2155_v33, %v1987_v0 }
 0x335   :  { %11892 = vst [vmem:[#allocation194_spill] sm:$0xff] %v9857_v38 }
 0x336   :  { %v2324_v30 = vpop.f32.mrf.mxu2 }
 0x337   :  { %v2325_v56 = vadd.f32 %v2324_v30, %v9696_v45  ;;  %v2493_v32 = vpop.f32.mrf.mxu3 }
 0x338   :  { %v1989_v46 = vpop.f32.mrf.mxu0 }
 0x339   :  { %v1990_v48 = vadd.f32 %v1989_v46, %v9680_v10  ;;  %v2158_v41 = vpop.f32.mrf.mxu1  ;;  %v9863_v62 = vadd.f32 %v2493_v32, %v2325_v56  ;;  %2028 = vmatmul.bf16.gmra.mxu0 %v8384_v20 }
 0x33a   :  { %2197 = vmatmul.bf16.gmra.mxu1 %v8385_v50 }
 0x33b   :  { %11893 = vst [vmem:[#allocation195_spill] sm:$0xff] %v9863_v62  ;;  %v9865_v22 = vadd.f32 %v2158_v41, %v1990_v48  ;;  %2366 = vmatmul.bf16.gmra.mxu2 %v8384_v20 }
 0x33c   :  { %2535 = vmatmul.bf16.gmra.mxu3 %v8385_v50 }
 0x33d   :  { %11894 = vst [vmem:[#allocation196_spill] sm:$0xff] %v9865_v22 }
 0x33e   :  { %v2327_v0 = vpop.f32.mrf.mxu2 }
 0x33f   :  { %v2328_v30 = vadd.f32 %v2327_v0, %v9696_v45  ;;  %v2496_v33 = vpop.f32.mrf.mxu3 }
 0x340   :  { %v1991_v61 = vpop.f32.mrf.mxu0 }
 0x341   :  { %v1992_v46 = vadd.f32 %v1991_v61, %v9680_v10  ;;  %v2160_v56 = vpop.f32.mrf.mxu1  ;;  %v9871_v32 = vadd.f32 %v2496_v33, %v2328_v30  ;;  %v8386_v61 = vld [vmem:[#allocation2 + $0x88] sm:$0xff] }
 0x342   :  { %v8387_v33 = vld [vmem:[#allocation5 + $0x88] sm:$0xff] }
 0x343   :  { %11895 = vst [vmem:[#allocation197_spill] sm:$0xff] %v9871_v32  ;;  %v9873_v48 = vadd.f32 %v2160_v56, %v1992_v46 }
 0x345   :  { %11896 = vst [vmem:[#allocation198_spill] sm:$0xff] %v9873_v48 }
 0x346   :  { %v2329_v29 = vpop.f32.mrf.mxu2 }
 0x347   :  { %v2330_v62 = vadd.f32 %v2329_v29, %v9696_v45  ;;  %v2498_v20 = vpop.f32.mrf.mxu3 }
 0x348   :  { %v1994_v50 = vpop.f32.mrf.mxu0 }
 0x349   :  { %v1995_v38 = vadd.f32 %v1994_v50, %v9680_v10  ;;  %v2163_v0 = vpop.f32.mrf.mxu1  ;;  %v9879_v63 = vadd.f32 %v2498_v20, %v2330_v62  ;;  %2033 = vmatmul.bf16.gmra.mxu0 %v8386_v61 }
 0x34a   :  { %2202 = vmatmul.bf16.gmra.mxu1 %v8387_v33 }
 0x34b   :  { %11897 = vst [vmem:[#allocation199_spill] sm:$0xff] %v9879_v63  ;;  %v9881_v9 = vadd.f32 %v2163_v0, %v1995_v38  ;;  %2371 = vmatmul.bf16.gmra.mxu2 %v8386_v61 }
 0x34c   :  { %2540 = vmatmul.bf16.gmra.mxu3 %v8387_v33 }
 0x34d   :  { %11898 = vst [vmem:[#allocation200_spill] sm:$0xff] %v9881_v9 }
 0x34e   :  { %v2332_v46 = vpop.f32.mrf.mxu2 }
 0x34f   :  { %v2333_v29 = vadd.f32 %v2332_v46, %v9696_v45  ;;  %v2501_v56 = vpop.f32.mrf.mxu3 }
 0x350   :  { %v1996_v41 = vpop.f32.mrf.mxu0 }
 0x351   :  { %v1997_v50 = vadd.f32 %v1996_v41, %v9680_v10  ;;  %v2165_v62 = vpop.f32.mrf.mxu1  ;;  %v9887_v20 = vadd.f32 %v2501_v56, %v2333_v29  ;;  %v8388_v41 = vld [vmem:[#allocation2 + $0x90] sm:$0xff] }
 0x352   :  { %v8389_v56 = vld [vmem:[#allocation5 + $0x90] sm:$0xff] }
 0x353   :  { %11899 = vst [vmem:[#allocation201_spill] sm:$0xff] %v9887_v20  ;;  %v9889_v38 = vadd.f32 %v2165_v62, %v1997_v50  ;;  %v6511_v50 = vld [vmem:[#allocation7 + $0x60] sm:$0xf]  ;;  %v6955_v20 = vld [vmem:[#allocation7 + $0x1b0] sm:$0xf0] }
 0x354   :  { %v6671_v62 = vld [vmem:[#allocation7 + $0x1a0] sm:$0xf] }
 0x355   :  { %11900 = vst [vmem:[#allocation202_spill] sm:$0xff] %v9889_v38  ;;  %v6672_v9 = vor.u32 %v6955_v20, %v6671_v62 }
 0x356   :  { %v2334_v30 = vpop.f32.mrf.mxu2 }
 0x357   :  { %v2335_v63 = vadd.f32 %v2334_v30, %v9696_v45  ;;  %v2503_v61 = vpop.f32.mrf.mxu3  ;;  %v6915_v30 = vld [vmem:[#allocation7 + $0x70] sm:$0xf0]  ;;  %2790 = vmatpush.bf16.msra.mxu1 %v6672_v9 }
 0x358   :  { %v1999_v33 = vpop.f32.mrf.mxu0  ;;  %v6512_v0 = vor.u32 %v6915_v30, %v6511_v50  ;;  %v6983_v50 = vld [vmem:[#allocation10 + $0x10] sm:$0xff] }
 0x359   :  { %v2000_v48 = vadd.f32 %v1999_v33, %v9680_v10  ;;  %v2168_v46 = vpop.f32.mrf.mxu1  ;;  %v9895_v32 = vadd.f32 %v2503_v61, %v2335_v63  ;;  %2038 = vmatmul.bf16.gmra.mxu0 %v8388_v41  ;;  %v6991_v30 = vld [vmem:[#allocation10 + $0x50] sm:$0xff]  ;;  %5267 = vmatpush.bf16.msra.mxu2 %v6983_v50 }
 0x35a   :  { %2207 = vmatmul.bf16.gmra.mxu1 %v8389_v56  ;;  %2621 = vmatpush.bf16.msra.mxu0 %v6512_v0 }
 0x35b   :  { %11901 = vst [vmem:[#allocation203_spill] sm:$0xff] %v9895_v32  ;;  %v9897_v22 = vadd.f32 %v2168_v46, %v2000_v48  ;;  %2376 = vmatmul.bf16.gmra.mxu2 %v8388_v41  ;;  %5436 = vmatpush.bf16.msra.mxu3 %v6991_v30 }
 0x35c   :  { %2545 = vmatmul.bf16.gmra.mxu3 %v8389_v56 }
 0x35d   :  { %11902 = vst [vmem:[#allocation204_spill] sm:$0xff] %v9897_v22 }
 0x35e   :  { %v2337_v33 = vpop.f32.mrf.mxu2 }
 0x35f   :  { %v2338_v63 = vadd.f32 %v2337_v33, %v9696_v45  ;;  %v2506_v48 = vpop.f32.mrf.mxu3 }
 0x360   :  { %v2001_v61 = vpop.f32.mrf.mxu0 }
 0x361   :  { %v2002_v46 = vadd.f32 %v2001_v61, %v9680_v10  ;;  %v2170_v51 = vpop.f32.mrf.mxu1  ;;  %v9903_v29 = vadd.f32 %v2506_v48, %v2338_v63 }
 0x363   :  { %11903 = vst [vmem:[#allocation205_spill] sm:$0xff] %v9903_v29  ;;  %v9905_v41 = vadd.f32 %v2170_v51, %v2002_v46  ;;  %v8390_v51 = vld [vmem:[#allocation2 + $0x98] sm:$0xff] }
 0x364   :  { %v8391_v46 = vld [vmem:[#allocation5 + $0x98] sm:$0xff] }
 0x365   :  { %11904 = vst [vmem:[#allocation206_spill] sm:$0xff] %v9905_v41 }
 0x366   :  { %v2339_v20 = vpop.f32.mrf.mxu2 }
 0x367   :  { %v2340_v62 = vadd.f32 %v2339_v20, %v9696_v45  ;;  %v2508_v33 = vpop.f32.mrf.mxu3 }
 0x368   :  { %v2004_v0 = vpop.f32.mrf.mxu0 }
 0x369   :  { %v2005_v61 = vadd.f32 %v2004_v0, %v9680_v10  ;;  %v2173_v32 = vpop.f32.mrf.mxu1  ;;  %v9911_v9 = vadd.f32 %v2508_v33, %v2340_v62  ;;  %2043 = vmatmul.bf16.gmra.mxu0 %v8390_v51 }
 0x36a   :  { %2212 = vmatmul.bf16.gmra.mxu1 %v8391_v46 }
 0x36b   :  { %11905 = vst [vmem:[#allocation207_spill] sm:$0xff] %v9911_v9  ;;  %v9913_v63 = vadd.f32 %v2173_v32, %v2005_v61  ;;  %2381 = vmatmul.bf16.gmra.mxu2 %v8390_v51 }
 0x36c   :  { %2550 = vmatmul.bf16.gmra.mxu3 %v8391_v46 }
 0x36d   :  { %11906 = vst [vmem:[#allocation208_spill] sm:$0xff] %v9913_v63 }
 0x36e   :  { %v2342_v50 = vpop.f32.mrf.mxu2 }
 0x36f   :  { %v2343_v30 = vadd.f32 %v2342_v50, %v9696_v45  ;;  %v2511_v20 = vpop.f32.mrf.mxu3 }
 0x370   :  { %v2006_v56 = vpop.f32.mrf.mxu0 }
 0x371   :  { %v2007_v0 = vadd.f32 %v2006_v56, %v9680_v10  ;;  %v2175_v62 = vpop.f32.mrf.mxu1  ;;  %v9919_v33 = vadd.f32 %v2511_v20, %v2343_v30  ;;  %v8392_v56 = vld [vmem:[#allocation2 + $0xa0] sm:$0xff] }
 0x372   :  { %v8393_v20 = vld [vmem:[#allocation5 + $0xa0] sm:$0xff] }
 0x373   :  { %11907 = vst [vmem:[#allocation209_spill] sm:$0xff] %v9919_v33  ;;  %v9921_v32 = vadd.f32 %v2175_v62, %v2007_v0 }
 0x375   :  { %11908 = vst [vmem:[#allocation210_spill] sm:$0xff] %v9921_v32 }
 0x376   :  { %v2344_v48 = vpop.f32.mrf.mxu2 }
 0x377   :  { %v2345_v9 = vadd.f32 %v2344_v48, %v9696_v45  ;;  %v2513_v51 = vpop.f32.mrf.mxu3 }
 0x378   :  { %v2009_v46 = vpop.f32.mrf.mxu0 }
 0x379   :  { %v2010_v41 = vadd.f32 %v2009_v46, %v9680_v10  ;;  %v2178_v50 = vpop.f32.mrf.mxu1  ;;  %v9927_v29 = vadd.f32 %v2513_v51, %v2345_v9  ;;  %2048 = vmatmul.bf16.gmra.mxu0 %v8392_v56 }
 0x37a   :  { %2217 = vmatmul.bf16.gmra.mxu1 %v8393_v20 }
 0x37b   :  { %11909 = vst [vmem:[#allocation211_spill] sm:$0xff] %v9927_v29  ;;  %v9929_v22 = vadd.f32 %v2178_v50, %v2010_v41  ;;  %2386 = vmatmul.bf16.gmra.mxu2 %v8392_v56 }
 0x37c   :  { %2555 = vmatmul.bf16.gmra.mxu3 %v8393_v20 }
 0x37d   :  { %11910 = vst [vmem:[#allocation212_spill] sm:$0xff] %v9929_v22 }
 0x37e   :  { %v2347_v0 = vpop.f32.mrf.mxu2 }
 0x37f   :  { %v2348_v48 = vadd.f32 %v2347_v0, %v9696_v45  ;;  %v2516_v62 = vpop.f32.mrf.mxu3 }
 0x380   :  { %v2011_v61 = vpop.f32.mrf.mxu0 }
 0x381   :  { %v2012_v46 = vadd.f32 %v2011_v61, %v9680_v10  ;;  %v2180_v9 = vpop.f32.mrf.mxu1  ;;  %v9935_v51 = vadd.f32 %v2516_v62, %v2348_v48  ;;  %v8394_v61 = vld [vmem:[#allocation2 + $0xa8] sm:$0xff] }
 0x382   :  { %v8395_v62 = vld [vmem:[#allocation5 + $0xa8] sm:$0xff] }
 0x383   :  { %11911 = vst [vmem:[#allocation213_spill] sm:$0xff] %v9935_v51  ;;  %v9937_v41 = vadd.f32 %v2180_v9, %v2012_v46 }
 0x385   :  { %11912 = vst [vmem:[#allocation214_spill] sm:$0xff] %v9937_v41 }
 0x386   :  { %v2349_v30 = vpop.f32.mrf.mxu2 }
 0x387   :  { %v2350_v29 = vadd.f32 %v2349_v30, %v9696_v45  ;;  %v2518_v56 = vpop.f32.mrf.mxu3 }
 0x388   :  { %v2014_v20 = vpop.f32.mrf.mxu0 }
 0x389   :  { %v2015_v32 = vadd.f32 %v2014_v20, %v9680_v10  ;;  %v2183_v0 = vpop.f32.mrf.mxu1  ;;  %v9943_v33 = vadd.f32 %v2518_v56, %v2350_v29  ;;  %2053 = vmatmul.bf16.gmra.mxu0 %v8394_v61 }
 0x38a   :  { %2222 = vmatmul.bf16.gmra.mxu1 %v8395_v62 }
 0x38b   :  { %11913 = vst [vmem:[#allocation215_spill] sm:$0xff] %v9943_v33  ;;  %v9945_v63 = vadd.f32 %v2183_v0, %v2015_v32  ;;  %2391 = vmatmul.bf16.gmra.mxu2 %v8394_v61 }
 0x38c   :  { %2560 = vmatmul.bf16.gmra.mxu3 %v8395_v62 }
 0x38d   :  { %11914 = vst [vmem:[#allocation216_spill] sm:$0xff] %v9945_v63 }
 0x38e   :  { %v2352_v46 = vpop.f32.mrf.mxu2 }
 0x38f   :  { %v2353_v30 = vadd.f32 %v2352_v46, %v9696_v45  ;;  %v2521_v9 = vpop.f32.mrf.mxu3 }
 0x390   :  { %v2016_v50 = vpop.f32.mrf.mxu0 }
 0x391   :  { %v2017_v20 = vadd.f32 %v2016_v50, %v9680_v10  ;;  %v2185_v29 = vpop.f32.mrf.mxu1  ;;  %v9951_v56 = vadd.f32 %v2521_v9, %v2353_v30  ;;  %v8396_v50 = vld [vmem:[#allocation2 + $0xb0] sm:$0xff] }
 0x392   :  { %v8397_v9 = vld [vmem:[#allocation5 + $0xb0] sm:$0xff] }
 0x393   :  { %11915 = vst [vmem:[#allocation217_spill] sm:$0xff] %v9951_v56  ;;  %v9953_v32 = vadd.f32 %v2185_v29, %v2017_v20  ;;  %v6491_v20 = vld [vmem:[#allocation7 + $0x38] sm:$0xf]  ;;  %v6950_v56 = vld [vmem:[#allocation7 + $0x188] sm:$0xf0] }
 0x394   :  { %v6651_v29 = vld [vmem:[#allocation7 + $0x178] sm:$0xf] }
 0x395   :  { %11916 = vst [vmem:[#allocation218_spill] sm:$0xff] %v9953_v32  ;;  %v6652_v63 = vor.u32 %v6950_v56, %v6651_v29 }
 0x396   :  { %v2354_v48 = vpop.f32.mrf.mxu2 }
 0x397   :  { %v2355_v33 = vadd.f32 %v2354_v48, %v9696_v45  ;;  %v2523_v61 = vpop.f32.mrf.mxu3  ;;  %v6910_v48 = vld [vmem:[#allocation7 + $0x48] sm:$0xf0]  ;;  %2791 = vmatpush.bf16.msra.mxu1 %v6652_v63 }
 0x398   :  { %v2019_v62 = vpop.f32.mrf.mxu0  ;;  %v6492_v0 = vor.u32 %v6910_v48, %v6491_v20  ;;  %v6982_v20 = vld [vmem:[#allocation10 + $0x8] sm:$0xff] }
 0x399   :  { %v2020_v41 = vadd.f32 %v2019_v62, %v9680_v10  ;;  %v2188_v46 = vpop.f32.mrf.mxu1  ;;  %v9959_v51 = vadd.f32 %v2523_v61, %v2355_v33  ;;  %2058 = vmatmul.bf16.gmra.mxu0 %v8396_v50  ;;  %v6990_v48 = vld [vmem:[#allocation10 + $0x48] sm:$0xff]  ;;  %5268 = vmatpush.bf16.msra.mxu2 %v6982_v20 }
 0x39a   :  { %2227 = vmatmul.bf16.gmra.mxu1 %v8397_v9  ;;  %2622 = vmatpush.bf16.msra.mxu0 %v6492_v0 }
 0x39b   :  { %11917 = vst [vmem:[#allocation219_spill] sm:$0xff] %v9959_v51  ;;  %v9961_v22 = vadd.f32 %v2188_v46, %v2020_v41  ;;  %2396 = vmatmul.bf16.gmra.mxu2 %v8396_v50  ;;  %5437 = vmatpush.bf16.msra.mxu3 %v6990_v48 }
 0x39c   :  { %2565 = vmatmul.bf16.gmra.mxu3 %v8397_v9 }
 0x39d   :  { %11918 = vst [vmem:[#allocation220_spill] sm:$0xff] %v9961_v22 }
 0x39e   :  { %v2357_v62 = vpop.f32.mrf.mxu2 }
 0x39f   :  { %v2358_v33 = vadd.f32 %v2357_v62, %v9696_v45  ;;  %v2526_v41 = vpop.f32.mrf.mxu3 }
 0x3a0   :  { %v2021_v61 = vpop.f32.mrf.mxu0 }
 0x3a1   :  { %v2022_v46 = vadd.f32 %v2021_v61, %v9680_v10  ;;  %v2190_v38 = vpop.f32.mrf.mxu1  ;;  %v9967_v30 = vadd.f32 %v2526_v41, %v2358_v33 }
 0x3a3   :  { %11919 = vst [vmem:[#allocation221_spill] sm:$0xff] %v9967_v30  ;;  %v9969_v50 = vadd.f32 %v2190_v38, %v2022_v46  ;;  %v8398_v38 = vld [vmem:[#allocation2 + $0xb8] sm:$0xff] }
 0x3a4   :  { %v8399_v46 = vld [vmem:[#allocation5 + $0xb8] sm:$0xff] }
 0x3a5   :  { %11920 = vst [vmem:[#allocation222_spill] sm:$0xff] %v9969_v50 }
 0x3a6   :  { %v2359_v56 = vpop.f32.mrf.mxu2 }
 0x3a7   :  { %v2360_v29 = vadd.f32 %v2359_v56, %v9696_v45  ;;  %v2528_v62 = vpop.f32.mrf.mxu3 }
 0x3a8   :  { %v2024_v0 = vpop.f32.mrf.mxu0 }
 0x3a9   :  { %v2025_v61 = vadd.f32 %v2024_v0, %v9680_v10  ;;  %v2193_v51 = vpop.f32.mrf.mxu1  ;;  %v9975_v63 = vadd.f32 %v2528_v62, %v2360_v29  ;;  %2063 = vmatmul.bf16.gmra.mxu0 %v8398_v38 }
 0x3aa   :  { %2232 = vmatmul.bf16.gmra.mxu1 %v8399_v46 }
 0x3ab   :  { %11921 = vst [vmem:[#allocation223_spill] sm:$0xff] %v9975_v63  ;;  %v9977_v33 = vadd.f32 %v2193_v51, %v2025_v61  ;;  %2401 = vmatmul.bf16.gmra.mxu2 %v8398_v38 }
 0x3ac   :  { %2570 = vmatmul.bf16.gmra.mxu3 %v8399_v46 }
 0x3ad   :  { %11922 = vst [vmem:[#allocation224_spill] sm:$0xff] %v9977_v33 }
 0x3ae   :  { %v2362_v20 = vpop.f32.mrf.mxu2 }
 0x3af   :  { %v2363_v48 = vadd.f32 %v2362_v20, %v9696_v45  ;;  %v2531_v56 = vpop.f32.mrf.mxu3 }
 0x3b0   :  { %v2026_v9 = vpop.f32.mrf.mxu0 }
 0x3b1   :  { %v2027_v0 = vadd.f32 %v2026_v9, %v9680_v10  ;;  %v2195_v29 = vpop.f32.mrf.mxu1  ;;  %v9983_v62 = vadd.f32 %v2531_v56, %v2363_v48  ;;  %v8400_v9 = vld [vmem:[#allocation2 + $0xc0] sm:$0xff] }
 0x3b2   :  { %v8401_v56 = vld [vmem:[#allocation5 + $0xc0] sm:$0xff] }
 0x3b3   :  { %11923 = vst [vmem:[#allocation225_spill] sm:$0xff] %v9983_v62  ;;  %v9985_v51 = vadd.f32 %v2195_v29, %v2027_v0 }
 0x3b5   :  { %11924 = vst [vmem:[#allocation226_spill] sm:$0xff] %v9985_v51 }
 0x3b6   :  { %v2364_v41 = vpop.f32.mrf.mxu2 }
 0x3b7   :  { %v2365_v63 = vadd.f32 %v2364_v41, %v9696_v45  ;;  %v2533_v38 = vpop.f32.mrf.mxu3 }
 0x3b8   :  { %v2029_v46 = vpop.f32.mrf.mxu0 }
 0x3b9   :  { %v2030_v50 = vadd.f32 %v2029_v46, %v9680_v10  ;;  %v2198_v20 = vpop.f32.mrf.mxu1  ;;  %v9991_v30 = vadd.f32 %v2533_v38, %v2365_v63  ;;  %2068 = vmatmul.bf16.gmra.mxu0 %v8400_v9 }
 0x3ba   :  { %2237 = vmatmul.bf16.gmra.mxu1 %v8401_v56 }
 0x3bb   :  { %11925 = vst [vmem:[#allocation227_spill] sm:$0xff] %v9991_v30  ;;  %v9993_v22 = vadd.f32 %v2198_v20, %v2030_v50  ;;  %2406 = vmatmul.bf16.gmra.mxu2 %v8400_v9 }
 0x3bc   :  { %2575 = vmatmul.bf16.gmra.mxu3 %v8401_v56 }
 0x3bd   :  { %11926 = vst [vmem:[#allocation228_spill] sm:$0xff] %v9993_v22 }
 0x3be   :  { %v2367_v0 = vpop.f32.mrf.mxu2 }
 0x3bf   :  { %v2368_v41 = vadd.f32 %v2367_v0, %v9696_v45  ;;  %v2536_v29 = vpop.f32.mrf.mxu3 }
 0x3c0   :  { %v2031_v61 = vpop.f32.mrf.mxu0 }
 0x3c1   :  { %v2032_v46 = vadd.f32 %v2031_v61, %v9680_v10  ;;  %v2200_v63 = vpop.f32.mrf.mxu1  ;;  %v9999_v38 = vadd.f32 %v2536_v29, %v2368_v41  ;;  %v8402_v61 = vld [vmem:[#allocation2 + $0xc8] sm:$0xff] }
 0x3c2   :  { %v8403_v29 = vld [vmem:[#allocation5 + $0xc8] sm:$0xff] }
 0x3c3   :  { %11927 = vst [vmem:[#allocation229_spill] sm:$0xff] %v9999_v38  ;;  %v10001_v50 = vadd.f32 %v2200_v63, %v2032_v46 }
 0x3c5   :  { %11928 = vst [vmem:[#allocation230_spill] sm:$0xff] %v10001_v50 }
 0x3c6   :  { %v2369_v48 = vpop.f32.mrf.mxu2 }
 0x3c7   :  { %v2370_v30 = vadd.f32 %v2369_v48, %v9696_v45  ;;  %v2538_v9 = vpop.f32.mrf.mxu3 }
 0x3c8   :  { %v2034_v56 = vpop.f32.mrf.mxu0 }
 0x3c9   :  { %v2035_v51 = vadd.f32 %v2034_v56, %v9680_v10  ;;  %v2203_v0 = vpop.f32.mrf.mxu1  ;;  %v10007_v62 = vadd.f32 %v2538_v9, %v2370_v30  ;;  %2073 = vmatmul.bf16.gmra.mxu0 %v8402_v61 }
 0x3ca   :  { %2242 = vmatmul.bf16.gmra.mxu1 %v8403_v29 }
 0x3cb   :  { %11929 = vst [vmem:[#allocation231_spill] sm:$0xff] %v10007_v62  ;;  %v10009_v33 = vadd.f32 %v2203_v0, %v2035_v51  ;;  %2411 = vmatmul.bf16.gmra.mxu2 %v8402_v61 }
 0x3cc   :  { %2580 = vmatmul.bf16.gmra.mxu3 %v8403_v29 }
 0x3cd   :  { %11930 = vst [vmem:[#allocation232_spill] sm:$0xff] %v10009_v33 }
 0x3ce   :  { %v2372_v46 = vpop.f32.mrf.mxu2 }
 0x3cf   :  { %v2373_v48 = vadd.f32 %v2372_v46, %v9696_v45  ;;  %v2541_v63 = vpop.f32.mrf.mxu3 }
 0x3d0   :  { %v2036_v20 = vpop.f32.mrf.mxu0 }
 0x3d1   :  { %v2037_v56 = vadd.f32 %v2036_v20, %v9680_v10  ;;  %v2205_v30 = vpop.f32.mrf.mxu1  ;;  %v10015_v9 = vadd.f32 %v2541_v63, %v2373_v48  ;;  %v8404_v20 = vld [vmem:[#allocation2 + $0xd0] sm:$0xff] }
 0x3d2   :  { %v8405_v63 = vld [vmem:[#allocation5 + $0xd0] sm:$0xff] }
 0x3d3   :  { %11931 = vst [vmem:[#allocation233_spill] sm:$0xff] %v10015_v9  ;;  %v10017_v51 = vadd.f32 %v2205_v30, %v2037_v56  ;;  %v6471_v56 = vld [vmem:[#allocation7 + $0x10] sm:$0xf]  ;;  %v6945_v9 = vld [vmem:[#allocation7 + $0x160] sm:$0xf0] }
 0x3d4   :  { %v6631_v30 = vld [vmem:[#allocation7 + $0x150] sm:$0xf] }
 0x3d5   :  { %v6632_v33 = vor.u32 %v6945_v9, %v6631_v30 }
 0x3d6   :  { %v2374_v41 = vpop.f32.mrf.mxu2 }
 0x3d7   :  { %v2375_v62 = vadd.f32 %v2374_v41, %v9696_v45  ;;  %v2543_v61 = vpop.f32.mrf.mxu3  ;;  %v6905_v41 = vld [vmem:[#allocation7 + $0x20] sm:$0xf0]  ;;  %2792 = vmatpush.bf16.msra.mxu1 %v6632_v33 }
 0x3d8   :  { %v2039_v29 = vpop.f32.mrf.mxu0  ;;  %v6472_v0 = vor.u32 %v6905_v41, %v6471_v56  ;;  %v6981_v56 = vld [vmem:[#allocation10] sm:$0xff] }
 0x3d9   :  { %v2040_v50 = vadd.f32 %v2039_v29, %v9680_v10  ;;  %v2208_v46 = vpop.f32.mrf.mxu1  ;;  %v10023_v38 = vadd.f32 %v2543_v61, %v2375_v62  ;;  %2078 = vmatmul.bf16.gmra.mxu0 %v8404_v20  ;;  %v6989_v41 = vld [vmem:[#allocation10 + $0x40] sm:$0xff]  ;;  %5269 = vmatpush.bf16.msra.mxu2 %v6981_v56 }
 0x3da   :  { %2247 = vmatmul.bf16.gmra.mxu1 %v8405_v63  ;;  %2623 = vmatpush.bf16.msra.mxu0 %v6472_v0 }
 0x3db   :  { %11932 = vst [vmem:[#allocation234_spill] sm:$0xff] %v10023_v38  ;;  %v10025_v22 = vadd.f32 %v2208_v46, %v2040_v50  ;;  %2416 = vmatmul.bf16.gmra.mxu2 %v8404_v20  ;;  %5438 = vmatpush.bf16.msra.mxu3 %v6989_v41 }
 0x3dc   :  { %2585 = vmatmul.bf16.gmra.mxu3 %v8405_v63 }
 0x3dd   :  { %11933 = vst [vmem:[#allocation235_spill] sm:$0xff] %v10025_v22 }
 0x3de   :  { %v2377_v29 = vpop.f32.mrf.mxu2 }
 0x3df   :  { %v2378_v62 = vadd.f32 %v2377_v29, %v9696_v45  ;;  %v2546_v50 = vpop.f32.mrf.mxu3 }
 0x3e0   :  { %v2041_v61 = vpop.f32.mrf.mxu0 }
 0x3e1   :  { %v2042_v46 = vadd.f32 %v2041_v61, %v9680_v10  ;;  %v2210_v32 = vpop.f32.mrf.mxu1  ;;  %v10031_v48 = vadd.f32 %v2546_v50, %v2378_v62 }
 0x3e3   :  { %11934 = vst [vmem:[#allocation236_spill] sm:$0xff] %v10031_v48  ;;  %v10033_v20 = vadd.f32 %v2210_v32, %v2042_v46  ;;  %v8406_v32 = vld [vmem:[#allocation2 + $0xd8] sm:$0xff] }
 0x3e4   :  { %v8407_v46 = vld [vmem:[#allocation5 + $0xd8] sm:$0xff] }
 0x3e5   :  { %11935 = vst [vmem:[#allocation237_spill] sm:$0xff] %v10033_v20 }
 0x3e6   :  { %v2379_v9 = vpop.f32.mrf.mxu2 }
 0x3e7   :  { %v2380_v30 = vadd.f32 %v2379_v9, %v9696_v45  ;;  %v2548_v29 = vpop.f32.mrf.mxu3 }
 0x3e8   :  { %v2044_v0 = vpop.f32.mrf.mxu0 }
 0x3e9   :  { %v2045_v61 = vadd.f32 %v2044_v0, %v9680_v10  ;;  %v2213_v38 = vpop.f32.mrf.mxu1  ;;  %v10039_v33 = vadd.f32 %v2548_v29, %v2380_v30  ;;  %2083 = vmatmul.bf16.gmra.mxu0 %v8406_v32 }
 0x3ea   :  { %2252 = vmatmul.bf16.gmra.mxu1 %v8407_v46 }
 0x3eb   :  { %11936 = vst [vmem:[#allocation238_spill] sm:$0xff] %v10039_v33  ;;  %v10041_v62 = vadd.f32 %v2213_v38, %v2045_v61  ;;  %2421 = vmatmul.bf16.gmra.mxu2 %v8406_v32 }
 0x3ec   :  { %2590 = vmatmul.bf16.gmra.mxu3 %v8407_v46 }
 0x3ed   :  { %11937 = vst [vmem:[#allocation239_spill] sm:$0xff] %v10041_v62 }
 0x3ee   :  { %v2382_v56 = vpop.f32.mrf.mxu2 }
 0x3ef   :  { %v2383_v41 = vadd.f32 %v2382_v56, %v9696_v45  ;;  %v2551_v9 = vpop.f32.mrf.mxu3 }
 0x3f0   :  { %v2046_v63 = vpop.f32.mrf.mxu0 }
 0x3f1   :  { %v2047_v0 = vadd.f32 %v2046_v63, %v9680_v10  ;;  %v2215_v30 = vpop.f32.mrf.mxu1  ;;  %v10047_v29 = vadd.f32 %v2551_v9, %v2383_v41  ;;  %v8408_v63 = vld [vmem:[#allocation2 + $0xe0] sm:$0xff] }
 0x3f2   :  { %v8409_v9 = vld [vmem:[#allocation5 + $0xe0] sm:$0xff] }
 0x3f3   :  { %11938 = vst [vmem:[#allocation240_spill] sm:$0xff] %v10047_v29  ;;  %v10049_v38 = vadd.f32 %v2215_v30, %v2047_v0 }
 0x3f5   :  { %11939 = vst [vmem:[#allocation241_spill] sm:$0xff] %v10049_v38 }
 0x3f6   :  { %v2384_v50 = vpop.f32.mrf.mxu2 }
 0x3f7   :  { %v2385_v33 = vadd.f32 %v2384_v50, %v9696_v45  ;;  %v2553_v32 = vpop.f32.mrf.mxu3 }
 0x3f8   :  { %v2049_v46 = vpop.f32.mrf.mxu0 }
 0x3f9   :  { %v2050_v20 = vadd.f32 %v2049_v46, %v9680_v10  ;;  %v2218_v56 = vpop.f32.mrf.mxu1  ;;  %v10055_v48 = vadd.f32 %v2553_v32, %v2385_v33  ;;  %2088 = vmatmul.bf16.gmra.mxu0 %v8408_v63 }
 0x3fa   :  { %2257 = vmatmul.bf16.gmra.mxu1 %v8409_v9 }
 0x3fb   :  { %11940 = vst [vmem:[#allocation242_spill] sm:$0xff] %v10055_v48  ;;  %v10057_v22 = vadd.f32 %v2218_v56, %v2050_v20  ;;  %2426 = vmatmul.bf16.gmra.mxu2 %v8408_v63 }
 0x3fc   :  { %2595 = vmatmul.bf16.gmra.mxu3 %v8409_v9 }
 0x3fd   :  { %11941 = vst [vmem:[#allocation243_spill] sm:$0xff] %v10057_v22 }
 0x3fe   :  { %v2387_v0 = vpop.f32.mrf.mxu2 }
 0x3ff   :  { %v2388_v50 = vadd.f32 %v2387_v0, %v9696_v45  ;;  %v2556_v30 = vpop.f32.mrf.mxu3 }
 0x400   :  { %v2051_v61 = vpop.f32.mrf.mxu0 }
 0x401   :  { %v2052_v46 = vadd.f32 %v2051_v61, %v9680_v10  ;;  %v2220_v33 = vpop.f32.mrf.mxu1  ;;  %v10063_v32 = vadd.f32 %v2556_v30, %v2388_v50  ;;  %v8410_v61 = vld [vmem:[#allocation2 + $0xe8] sm:$0xff] }
 0x402   :  { %v8411_v30 = vld [vmem:[#allocation5 + $0xe8] sm:$0xff] }
 0x403   :  { %11942 = vst [vmem:[#allocation244_spill] sm:$0xff] %v10063_v32  ;;  %v10065_v20 = vadd.f32 %v2220_v33, %v2052_v46 }
 0x405   :  { %11943 = vst [vmem:[#allocation245_spill] sm:$0xff] %v10065_v20 }
 0x406   :  { %v2389_v41 = vpop.f32.mrf.mxu2 }
 0x407   :  { %v2390_v48 = vadd.f32 %v2389_v41, %v9696_v45  ;;  %v2558_v63 = vpop.f32.mrf.mxu3 }
 0x408   :  { %v2054_v9 = vpop.f32.mrf.mxu0 }
 0x409   :  { %v2055_v38 = vadd.f32 %v2054_v9, %v9680_v10  ;;  %v2223_v0 = vpop.f32.mrf.mxu1  ;;  %v10071_v29 = vadd.f32 %v2558_v63, %v2390_v48  ;;  %2093 = vmatmul.bf16.gmra.mxu0 %v8410_v61 }
 0x40a   :  { %2262 = vmatmul.bf16.gmra.mxu1 %v8411_v30 }
 0x40b   :  { %11944 = vst [vmem:[#allocation246_spill] sm:$0xff] %v10071_v29  ;;  %v10073_v62 = vadd.f32 %v2223_v0, %v2055_v38  ;;  %2431 = vmatmul.bf16.gmra.mxu2 %v8410_v61 }
 0x40c   :  { %2600 = vmatmul.bf16.gmra.mxu3 %v8411_v30 }
 0x40d   :  { %11945 = vst [vmem:[#allocation247_spill] sm:$0xff] %v10073_v62 }
 0x40e   :  { %v2392_v46 = vpop.f32.mrf.mxu2 }
 0x40f   :  { %v2393_v41 = vadd.f32 %v2392_v46, %v9696_v45  ;;  %v2561_v33 = vpop.f32.mrf.mxu3 }
 0x410   :  { %v2056_v56 = vpop.f32.mrf.mxu0 }
 0x411   :  { %v2057_v9 = vadd.f32 %v2056_v56, %v9680_v10  ;;  %v2225_v48 = vpop.f32.mrf.mxu1  ;;  %v10079_v63 = vadd.f32 %v2561_v33, %v2393_v41  ;;  %v8412_v56 = vld [vmem:[#allocation2 + $0xf0] sm:$0xff] }
 0x412   :  { %v8413_v33 = vld [vmem:[#allocation5 + $0xf0] sm:$0xff] }
 0x413   :  { %11946 = vst [vmem:[#allocation248_spill] sm:$0xff] %v10079_v63  ;;  %v10081_v38 = vadd.f32 %v2225_v48, %v2057_v9 }
 0x415   :  { %11947 = vst [vmem:[#allocation249_spill] sm:$0xff] %v10081_v38 }
 0x416   :  { %v2394_v50 = vpop.f32.mrf.mxu2 }
 0x417   :  { %v2395_v29 = vadd.f32 %v2394_v50, %v9696_v45  ;;  %v2563_v61 = vpop.f32.mrf.mxu3 }
 0x418   :  { %v2059_v30 = vpop.f32.mrf.mxu0 }
 0x419   :  { %v2060_v20 = vadd.f32 %v2059_v30, %v9680_v10  ;;  %v2228_v46 = vpop.f32.mrf.mxu1  ;;  %v10087_v32 = vadd.f32 %v2563_v61, %v2395_v29  ;;  %2098 = vmatmul.bf16.gmra.mxu0 %v8412_v56 }
 0x41a   :  { %2267 = vmatmul.bf16.gmra.mxu1 %v8413_v33 }
 0x41b   :  { %11948 = vst [vmem:[#allocation250_spill] sm:$0xff] %v10087_v32  ;;  %v10089_v22 = vadd.f32 %v2228_v46, %v2060_v20  ;;  %2436 = vmatmul.bf16.gmra.mxu2 %v8412_v56 }
 0x41c   :  { %2605 = vmatmul.bf16.gmra.mxu3 %v8413_v33 }
 0x41d   :  { %11949 = vst [vmem:[#allocation251_spill] sm:$0xff] %v10089_v22 }
 0x41e   :  { %v2397_v9 = vpop.f32.mrf.mxu2 }
 0x41f   :  { %v2398_v50 = vadd.f32 %v2397_v9, %v9696_v45  ;;  %v2566_v48 = vpop.f32.mrf.mxu3 }
 0x420   :  { %v2061_v0 = vpop.f32.mrf.mxu0 }
 0x421   :  { %v2062_v30 = vadd.f32 %v2061_v0, %v9680_v10  ;;  %v2230_v29 = vpop.f32.mrf.mxu1  ;;  %v10095_v61 = vadd.f32 %v2566_v48, %v2398_v50  ;;  %v8414_v0 = vld [vmem:[#allocation2 + $0xf8] sm:$0xff] }
 0x422   :  { %v8415_v48 = vld [vmem:[#allocation5 + $0xf8] sm:$0xff] }
 0x423   :  { %11950 = vst [vmem:[#allocation252_spill] sm:$0xff] %v10095_v61  ;;  %v10097_v20 = vadd.f32 %v2230_v29, %v2062_v30 }
 0x425   :  { %11951 = vst [vmem:[#allocation253_spill] sm:$0xff] %v10097_v20 }
 0x426   :  { %v2399_v41 = vpop.f32.mrf.mxu2 }
 0x427   :  { %v2400_v32 = vadd.f32 %v2399_v41, %v9696_v45  ;;  %v2568_v56 = vpop.f32.mrf.mxu3 }
 0x428   :  { %v2064_v33 = vpop.f32.mrf.mxu0 }
 0x429   :  { %v2065_v38 = vadd.f32 %v2064_v33, %v9680_v10  ;;  %v2233_v9 = vpop.f32.mrf.mxu1  ;;  %v10103_v63 = vadd.f32 %v2568_v56, %v2400_v32  ;;  %2103 = vmatmul.bf16.gmra.mxu0 %v8414_v0 }
 0x42a   :  { %2272 = vmatmul.bf16.gmra.mxu1 %v8415_v48 }
 0x42b   :  { %11952 = vst [vmem:[#allocation254_spill] sm:$0xff] %v10103_v63  ;;  %v10105_v62 = vadd.f32 %v2233_v9, %v2065_v38  ;;  %2441 = vmatmul.bf16.gmra.mxu2 %v8414_v0 }
 0x42c   :  { %2610 = vmatmul.bf16.gmra.mxu3 %v8415_v48 }
 0x42e   :  { %v2402_v30 = vpop.f32.mrf.mxu2 }
 0x42f   :  { %v2403_v41 = vadd.f32 %v2402_v30, %v9696_v45  ;;  %v2571_v29 = vpop.f32.mrf.mxu3 }
 0x430   :  { %v2066_v46 = vpop.f32.mrf.mxu0 }
 0x431   :  { %v2067_v33 = vadd.f32 %v2066_v46, %v9680_v10  ;;  %v2235_v32 = vpop.f32.mrf.mxu1  ;;  %v10111_v56 = vadd.f32 %v2571_v29, %v2403_v41  ;;  %v8416_v46 = vld [vmem:[#allocation2] sm:$0xff] }
 0x432   :  { %v8417_v29 = vld [vmem:[#allocation5] sm:$0xff] }
 0x433   :  { %v10113_v38 = vadd.f32 %v2235_v32, %v2067_v33  ;;  %v11953_v33 = vpack.c.b16 %v8735_v43, %v8733_v42 }
 0x436   :  { %v2404_v50 = vpop.f32.mrf.mxu2 }
 0x437   :  { %v2405_v63 = vadd.f32 %v2404_v50, %v9696_v45  ;;  %v2573_v0 = vpop.f32.mrf.mxu3  ;;  %v11954_v50 = vpack.c.b16 %v8750_v7, %v8746_v1 }
 0x438   :  { %v2069_v48 = vpop.f32.mrf.mxu0 }
 0x439   :  { %v2070_v20 = vadd.f32 %v2069_v48, %v9680_v10  ;;  %v2238_v30 = vpop.f32.mrf.mxu1  ;;  %v10119_v61 = vadd.f32 %v2573_v0, %v2405_v63  ;;  %2624 = vmatmul.bf16.vlgmr.msra.gmra.mxu0 %v8416_v46 }
 0x43a   :  { %2793 = vmatmul.bf16.vlgmr.msra.gmra.mxu1 %v8417_v29 }
 0x43b   :  { %v10121_v22 = vadd.f32 %v2238_v30, %v2070_v20  ;;  %5270 = vmatmul.bf16.vlgmr.msra.gmra.mxu2 %v11953_v33 }
 0x43c   :  { %5439 = vmatmul.bf16.vlgmr.msra.gmra.mxu3 %v11954_v50 }
 0x43e   :  { %v2407_v32 = vpop.f32.mrf.mxu2 }
 0x43f   :  { %v2408_v63 = vadd.f32 %v2407_v32, %v9696_v45  ;;  %v2576_v20 = vpop.f32.mrf.mxu3 }
 0x440   :  { %v2071_v0 = vpop.f32.mrf.mxu0 }
 0x441   :  { %v2072_v48 = vadd.f32 %v2071_v0, %v9680_v10  ;;  %v2240_v30 = vpop.f32.mrf.mxu1  ;;  %v10133_v46 = vadd.f32 %v2576_v20, %v2408_v63  ;;  %v8418_v0 = vld [vmem:[#allocation2 + $0x8] sm:$0xff] }
 0x442   :  { %v8419_v20 = vld [vmem:[#allocation5 + $0x8] sm:$0xff] }
 0x443   :  { %v10135_v41 = vadd.f32 %v2240_v30, %v2072_v48  ;;  %v11955_v48 = vpack.c.b16 %v8767_v59, %v8765_v57  ;;  %v11956_v30 = vpack.c.b16 %v8782_v37, %v8778_v28 }
 0x446   :  { %v2409_v43 = vpop.f32.mrf.mxu2 }
 0x447   :  { %v2410_v29 = vadd.f32 %v2409_v43, %v9696_v45  ;;  %v2578_v1 = vpop.f32.mrf.mxu3 }
 0x448   :  { %v2074_v7 = vpop.f32.mrf.mxu0 }
 0x449   :  { %v2075_v33 = vadd.f32 %v2074_v7, %v9680_v10  ;;  %v2243_v50 = vpop.f32.mrf.mxu1  ;;  %v10141_v32 = vadd.f32 %v2578_v1, %v2410_v29  ;;  %2629 = vmatmul.bf16.gmra.mxu0 %v8418_v0 }
 0x44a   :  { %2798 = vmatmul.bf16.gmra.mxu1 %v8419_v20 }
 0x44b   :  { %v10143_v9 = vadd.f32 %v2243_v50, %v2075_v33  ;;  %5275 = vmatmul.bf16.gmra.mxu2 %v11955_v48 }
 0x44c   :  { %5444 = vmatmul.bf16.gmra.mxu3 %v11956_v30 }
 0x44e   :  { %v2412_v43 = vpop.f32.mrf.mxu2 }
 0x44f   :  { %v2413_v29 = vadd.f32 %v2412_v43, %v9696_v45  ;;  %v2581_v1 = vpop.f32.mrf.mxu3 }
 0x450   :  { %v2076_v7 = vpop.f32.mrf.mxu0 }
 0x451   :  { %v2077_v33 = vadd.f32 %v2076_v7, %v9680_v10  ;;  %v2245_v50 = vpop.f32.mrf.mxu1  ;;  %v10155_v0 = vadd.f32 %v2581_v1, %v2413_v29  ;;  %v8420_v7 = vld [vmem:[#allocation2 + $0x10] sm:$0xff] }
 0x452   :  { %v8421_v1 = vld [vmem:[#allocation5 + $0x10] sm:$0xff] }
 0x453   :  { %v10157_v63 = vadd.f32 %v2245_v50, %v2077_v33  ;;  %v11957_v33 = vpack.c.b16 %v8799_v35, %v8797_v34  ;;  %v11958_v50 = vpack.c.b16 %v8814_v23, %v8810_v12 }
 0x456   :  { %v2414_v59 = vpop.f32.mrf.mxu2 }
 0x457   :  { %v2415_v20 = vadd.f32 %v2414_v59, %v9696_v45  ;;  %v2583_v28 = vpop.f32.mrf.mxu3 }
 0x458   :  { %v2079_v37 = vpop.f32.mrf.mxu0 }
 0x459   :  { %v2080_v48 = vadd.f32 %v2079_v37, %v9680_v10  ;;  %v2248_v30 = vpop.f32.mrf.mxu1  ;;  %v10163_v43 = vadd.f32 %v2583_v28, %v2415_v20  ;;  %2634 = vmatmul.bf16.gmra.mxu0 %v8420_v7 }
 0x45a   :  { %2803 = vmatmul.bf16.gmra.mxu1 %v8421_v1 }
 0x45b   :  { %v10165_v42 = vadd.f32 %v2248_v30, %v2080_v48  ;;  %5280 = vmatmul.bf16.gmra.mxu2 %v11957_v33 }
 0x45c   :  { %5449 = vmatmul.bf16.gmra.mxu3 %v11958_v50 }
 0x45e   :  { %v2417_v59 = vpop.f32.mrf.mxu2 }
 0x45f   :  { %v2418_v20 = vadd.f32 %v2417_v59, %v9696_v45  ;;  %v2586_v28 = vpop.f32.mrf.mxu3 }
 0x460   :  { %v2081_v37 = vpop.f32.mrf.mxu0 }
 0x461   :  { %v2082_v48 = vadd.f32 %v2081_v37, %v9680_v10  ;;  %v2250_v30 = vpop.f32.mrf.mxu1  ;;  %v10177_v7 = vadd.f32 %v2586_v28, %v2418_v20  ;;  %v8422_v37 = vld [vmem:[#allocation2 + $0x18] sm:$0xff] }
 0x462   :  { %v8423_v28 = vld [vmem:[#allocation5 + $0x18] sm:$0xff] }
 0x463   :  { %v10179_v29 = vadd.f32 %v2250_v30, %v2082_v48  ;;  %v11959_v48 = vpack.c.b16 %v8831_v55, %v8829_v54  ;;  %v11960_v30 = vpack.c.b16 %v8846_v49, %v8842_v8 }
 0x466   :  { %v2419_v35 = vpop.f32.mrf.mxu2 }
 0x467   :  { %v2420_v1 = vadd.f32 %v2419_v35, %v9696_v45  ;;  %v2588_v12 = vpop.f32.mrf.mxu3 }
 0x468   :  { %v2084_v23 = vpop.f32.mrf.mxu0 }
 0x469   :  { %v2085_v33 = vadd.f32 %v2084_v23, %v9680_v10  ;;  %v2253_v50 = vpop.f32.mrf.mxu1  ;;  %v10185_v59 = vadd.f32 %v2588_v12, %v2420_v1  ;;  %2639 = vmatmul.bf16.gmra.mxu0 %v8422_v37 }
 0x46a   :  { %2808 = vmatmul.bf16.gmra.mxu1 %v8423_v28 }
 0x46b   :  { %v10187_v57 = vadd.f32 %v2253_v50, %v2085_v33  ;;  %5285 = vmatmul.bf16.gmra.mxu2 %v11959_v48 }
 0x46c   :  { %5454 = vmatmul.bf16.gmra.mxu3 %v11960_v30 }
 0x46e   :  { %v2422_v35 = vpop.f32.mrf.mxu2 }
 0x46f   :  { %v2423_v1 = vadd.f32 %v2422_v35, %v9696_v45  ;;  %v2591_v12 = vpop.f32.mrf.mxu3 }
 0x470   :  { %v2086_v23 = vpop.f32.mrf.mxu0 }
 0x471   :  { %v2087_v33 = vadd.f32 %v2086_v23, %v9680_v10  ;;  %v2255_v50 = vpop.f32.mrf.mxu1  ;;  %v10199_v37 = vadd.f32 %v2591_v12, %v2423_v1  ;;  %v8424_v23 = vld [vmem:[#allocation2 + $0x20] sm:$0xff] }
 0x472   :  { %v8425_v12 = vld [vmem:[#allocation5 + $0x20] sm:$0xff] }
 0x473   :  { %v10201_v20 = vadd.f32 %v2255_v50, %v2087_v33  ;;  %v11961_v33 = vpack.c.b16 %v8863_v44, %v8861_v36  ;;  %v11962_v50 = vpack.c.b16 %v8878_v14, %v8874_v18 }
 0x476   :  { %v2424_v55 = vpop.f32.mrf.mxu2 }
 0x477   :  { %v2425_v28 = vadd.f32 %v2424_v55, %v9696_v45  ;;  %v2593_v49 = vpop.f32.mrf.mxu3 }
 0x478   :  { %v2089_v8 = vpop.f32.mrf.mxu0 }
 0x479   :  { %v2090_v48 = vadd.f32 %v2089_v8, %v9680_v10  ;;  %v2258_v30 = vpop.f32.mrf.mxu1  ;;  %v10207_v35 = vadd.f32 %v2593_v49, %v2425_v28  ;;  %2644 = vmatmul.bf16.gmra.mxu0 %v8424_v23 }
 0x47a   :  { %2813 = vmatmul.bf16.gmra.mxu1 %v8425_v12 }
 0x47b   :  { %v10209_v34 = vadd.f32 %v2258_v30, %v2090_v48  ;;  %5290 = vmatmul.bf16.gmra.mxu2 %v11961_v33 }
 0x47c   :  { %5459 = vmatmul.bf16.gmra.mxu3 %v11962_v50 }
 0x47e   :  { %v2427_v55 = vpop.f32.mrf.mxu2 }
 0x47f   :  { %v2428_v28 = vadd.f32 %v2427_v55, %v9696_v45  ;;  %v2596_v49 = vpop.f32.mrf.mxu3 }
 0x480   :  { %v2091_v8 = vpop.f32.mrf.mxu0 }
 0x481   :  { %v2092_v48 = vadd.f32 %v2091_v8, %v9680_v10  ;;  %v2260_v30 = vpop.f32.mrf.mxu1  ;;  %v10221_v23 = vadd.f32 %v2596_v49, %v2428_v28  ;;  %v8426_v8 = vld [vmem:[#allocation2 + $0x28] sm:$0xff] }
 0x482   :  { %v8427_v49 = vld [vmem:[#allocation5 + $0x28] sm:$0xff] }
 0x483   :  { %v10223_v1 = vadd.f32 %v2260_v30, %v2092_v48  ;;  %v11963_v48 = vpack.c.b16 %v8895_v17, %v8893_v4  ;;  %v11964_v30 = vpack.c.b16 %v8910_v24, %v8906_v25 }
 0x486   :  { %v2429_v44 = vpop.f32.mrf.mxu2 }
 0x487   :  { %v2430_v12 = vadd.f32 %v2429_v44, %v9696_v45  ;;  %v2598_v14 = vpop.f32.mrf.mxu3 }
 0x488   :  { %v2094_v18 = vpop.f32.mrf.mxu0 }
 0x489   :  { %v2095_v33 = vadd.f32 %v2094_v18, %v9680_v10  ;;  %v2263_v50 = vpop.f32.mrf.mxu1  ;;  %v10229_v55 = vadd.f32 %v2598_v14, %v2430_v12  ;;  %2649 = vmatmul.bf16.gmra.mxu0 %v8426_v8 }
 0x48a   :  { %2818 = vmatmul.bf16.gmra.mxu1 %v8427_v49 }
 0x48b   :  { %v10231_v54 = vadd.f32 %v2263_v50, %v2095_v33  ;;  %5295 = vmatmul.bf16.gmra.mxu2 %v11963_v48 }
 0x48c   :  { %5464 = vmatmul.bf16.gmra.mxu3 %v11964_v30 }
 0x48e   :  { %v2432_v44 = vpop.f32.mrf.mxu2 }
 0x48f   :  { %v2433_v12 = vadd.f32 %v2432_v44, %v9696_v45  ;;  %v2601_v14 = vpop.f32.mrf.mxu3 }
 0x490   :  { %v2096_v18 = vpop.f32.mrf.mxu0 }
 0x491   :  { %v2097_v33 = vadd.f32 %v2096_v18, %v9680_v10  ;;  %v2265_v50 = vpop.f32.mrf.mxu1  ;;  %v10243_v8 = vadd.f32 %v2601_v14, %v2433_v12  ;;  %v8428_v18 = vld [vmem:[#allocation2 + $0x30] sm:$0xff] }
 0x492   :  { %v8429_v14 = vld [vmem:[#allocation5 + $0x30] sm:$0xff] }
 0x493   :  { %v10245_v28 = vadd.f32 %v2265_v50, %v2097_v33  ;;  %v11966_v33 = vpack.c.b16 %v8927_v40, %v8925_v15  ;;  %v11967_v50 = vpack.c.b16 %v8942_v5, %v8938_v2 }
 0x496   :  { %v2434_v17 = vpop.f32.mrf.mxu2 }
 0x497   :  { %v2435_v49 = vadd.f32 %v2434_v17, %v9696_v45  ;;  %v2603_v25 = vpop.f32.mrf.mxu3 }
 0x498   :  { %v2099_v24 = vpop.f32.mrf.mxu0 }
 0x499   :  { %v2100_v48 = vadd.f32 %v2099_v24, %v9680_v10  ;;  %v2268_v30 = vpop.f32.mrf.mxu1  ;;  %v10251_v44 = vadd.f32 %v2603_v25, %v2435_v49  ;;  %2654 = vmatmul.bf16.gmra.mxu0 %v8428_v18 }
 0x49a   :  { %2823 = vmatmul.bf16.gmra.mxu1 %v8429_v14 }
 0x49b   :  { %v10253_v36 = vadd.f32 %v2268_v30, %v2100_v48  ;;  %5300 = vmatmul.bf16.gmra.mxu2 %v11966_v33 }
 0x49c   :  { %5469 = vmatmul.bf16.gmra.mxu3 %v11967_v50 }
 0x49d   :  { %11965 = vst [vmem:[#allocation255_spill] sm:$0xff] %v10253_v36 }
 0x49e   :  { %v2437_v17 = vpop.f32.mrf.mxu2 }
 0x49f   :  { %v2438_v49 = vadd.f32 %v2437_v17, %v9696_v45  ;;  %v2606_v25 = vpop.f32.mrf.mxu3 }
 0x4a0   :  { %v2101_v24 = vpop.f32.mrf.mxu0 }
 0x4a1   :  { %v2102_v48 = vadd.f32 %v2101_v24, %v9680_v10  ;;  %v2270_v30 = vpop.f32.mrf.mxu1  ;;  %v10265_v18 = vadd.f32 %v2606_v25, %v2438_v49  ;;  %v8430_v24 = vld [vmem:[#allocation2 + $0x38] sm:$0xff] }
 0x4a2   :  { %v8431_v25 = vld [vmem:[#allocation5 + $0x38] sm:$0xff] }
 0x4a3   :  { %11968 = vst [vmem:[#allocation256_spill] sm:$0xff] %v10265_v18  ;;  %v10267_v12 = vadd.f32 %v2270_v30, %v2102_v48  ;;  %v11972_v48 = vpack.c.b16 %v8959_v60, %v8957_v16  ;;  %v11973_v30 = vpack.c.b16 %v8974_v53, %v8970_v19  ;;  %v8432_v60 = vld [vmem:[#allocation8] sm:$0x1f] }
 0x4a5   :  { %11969 = vst [vmem:[#allocation257_spill] sm:$0xff] %v10267_v12 }
 0x4a6   :  { %v2439_v40 = vpop.f32.mrf.mxu2 }
 0x4a7   :  { %v2440_v14 = vadd.f32 %v2439_v40, %v9696_v45  ;;  %v2608_v5 = vpop.f32.mrf.mxu3 }
 0x4a8   :  { %v2104_v2 = vpop.f32.mrf.mxu0 }
 0x4a9   :  { %v2105_v33 = vadd.f32 %v2104_v2, %v9680_v10  ;;  %v2273_v50 = vpop.f32.mrf.mxu1  ;;  %v10273_v17 = vadd.f32 %v2608_v5, %v2440_v14  ;;  %2659 = vmatmul.bf16.gmra.mxu0 %v8430_v24 }
 0x4aa   :  { %2828 = vmatmul.bf16.gmra.mxu1 %v8431_v25  ;;  %v10293_v25 = vperm.slane %v8432_v60, 4  ;;  %v11978_v60 = vmax.f32 %v9694_v21, %v9711_v26 }
 0x4ab   :  { %11970 = vst [vmem:[#allocation258_spill] sm:$0xff] %v10273_v17  ;;  %v10275_v4 = vadd.f32 %v2273_v50, %v2105_v33  ;;  %5305 = vmatmul.bf16.gmra.mxu2 %v11972_v48  ;;  %v8435_v17 = vld [vmem:[#allocation2 + $0x48] sm:$0xff] }
 0x4ac   :  { %5474 = vmatmul.bf16.gmra.mxu3 %v11973_v30 }
 0x4ad   :  { %11971 = vst [vmem:[#allocation259_spill] sm:$0xff] %v10275_v4 }
 0x4ae   :  { %v2442_v40 = vpop.f32.mrf.mxu2 }
 0x4af   :  { %v2443_v14 = vadd.f32 %v2442_v40, %v9696_v45  ;;  %v2611_v5 = vpop.f32.mrf.mxu3 }
 0x4b0   :  { %v2106_v2 = vpop.f32.mrf.mxu0 }
 0x4b1   :  { %v2107_v33 = vadd.f32 %v2106_v2, %v9680_v10  ;;  %v2275_v50 = vpop.f32.mrf.mxu1  ;;  %v10287_v24 = vadd.f32 %v2611_v5, %v2443_v14  ;;  %v8433_v5 = vld [vmem:[#allocation2 + $0x40] sm:$0xff] }
 0x4b3   :  { %11974 = vst [vmem:[#allocation260_spill] sm:$0xff] %v10287_v24  ;;  %v10289_v49 = vadd.f32 %v2275_v50, %v2107_v33  ;;  %v8434_v33 = vld [vmem:[#allocation5 + $0x40] sm:$0xff]  ;;  %v11977_v50 = vpack.c.b16 %v8991_v47, %v8989_v27 }
 0x4b5   :  { %11975 = vst [vmem:[#allocation261_spill] sm:$0xff] %v10289_v49 }
 0x4b6   :  { %v2444_v53 = vpop.f32.mrf.mxu2 }
 0x4b7   :  { %v2445_v19 = vadd.f32 %v2444_v53, %v9696_v45  ;;  %v2613_v48 = vpop.f32.mrf.mxu3  ;;  %v10307_v45 = vld [vmem:[%s11184_s5] ss:$0 sm:$0xff]  ;;  %v11979_v53 = vld [vmem:[#allocation37_spill] sm:$0xff] }
 0x4b8   :  { %v2625_v30 = vpop.f32.mrf.mxu0 }
 0x4b9   :  { %v2626_v40 = vadd.f32 %v2625_v30, %v10293_v25  ;;  %v2794_v15 = vpop.f32.mrf.mxu1  ;;  %v10297_v10 = vadd.f32 %v2613_v48, %v2445_v19  ;;  %2664 = vmatmul.bf16.gmra.mxu0 %v8433_v5  ;;  %v11980_v19 = vld [vmem:[#allocation35_spill] sm:$0xff] }
 0x4ba   :  { %2833 = vmatmul.bf16.gmra.mxu1 %v8434_v33  ;;  %v11981_v48 = vpack.c.b16 %v11979_v53, %v11980_v19 }
 0x4bb   :  { %11976 = vst [vmem:[#allocation262_spill] sm:$0xff] %v10297_v10  ;;  %v2795_v14 = vadd.f32 %v2794_v15, %v2626_v40  ;;  %5310 = vmatmul.bf16.gmra.mxu2 %v11977_v50 }
 0x4bc   :  { %5479 = vmatmul.bf16.gmra.mxu3 %v11981_v48 }
 0x4bd   :  { %v3658_v15 = vmax.f32 %v11978_v60, %v2795_v14 }
 0x4be   :  { %v5271_v27 = vpop.f32.mrf.mxu2 }
 0x4bf   :  { %v3722_v30 = vsub.f32 %v9694_v21, %v3658_v15  ;;  %v3914_v40 = vsub.f32 %v9711_v26, %v3658_v15  ;;  %v4106_v5 = vsub.f32 %v2795_v14, %v3658_v15  ;;  %v5272_v47 = vadd.f32 %v10307_v45, %v5271_v27  ;;  %v5440_v33 = vpop.f32.mrf.mxu3 }
 0x4c0   :  { %v2627_v50 = vpop.f32.mrf.mxu0  ;;  %v11982_v21 = vmax.f32 %v9716_v58, %v9732_v31 }
 0x4c1   :  { %v3786_v2 = vmul.f32 1.442695, %v3722_v30  ;;  %v3978_v16 = vmul.f32 1.442695, %v3914_v40  ;;  %v4170_v10 = vmul.f32 1.442695, %v4106_v5  ;;  %v2628_v49 = vadd.f32 %v2627_v50, %v10293_v25  ;;  %v2796_v60 = vpop.f32.mrf.mxu1 }
 0x4c2   :  { %v5441_v24 = vadd.f32 %v5440_v33, %v5272_v47  ;;  %v11983_v50 = vld [vmem:[#allocation16_spill] sm:$0xff] }
 0x4c3   :  { %7711 = vpow2.f32 %v3786_v2  ;;  %v2797_v53 = vadd.f32 %v2796_v60, %v2628_v49 }
 0x4c4   :  { %7713 = vpow2.f32 %v3978_v16 }
 0x4c5   :  { %7715 = vpow2.f32 %v4170_v10  ;;  %v3659_v26 = vmax.f32 %v11982_v21, %v2797_v53 }
 0x4c6   :  { %7717 = vtanh.f32 %v5441_v24  ;;  %v5273_v48 = vpop.f32.mrf.mxu2  ;;  %v11984_v24 = vunpack.c.l.bf16 %v11983_v50 }
 0x4c7   :  { %v3723_v14 = vsub.f32 %v9716_v58, %v3659_v26  ;;  %v3915_v15 = vsub.f32 %v9732_v31, %v3659_v26  ;;  %v4107_v19 = vsub.f32 %v2797_v53, %v3659_v26  ;;  %v5274_v30 = vadd.f32 %v10307_v45, %v5273_v48  ;;  %v5442_v40 = vpop.f32.mrf.mxu3  ;;  %v11985_v53 = vld [vmem:[#allocation17_spill] sm:$0xff] }
 0x4c8   :  { %v2630_v5 = vpop.f32.mrf.mxu0  ;;  %v11986_v26 = vunpack.c.l.bf16 %v11985_v53 }
 0x4c9   :  { %v7712_v27 = vpop.eup %7711  ;;  %v3788_v2 = vmul.f32 1.442695, %v3723_v14  ;;  %v3980_v49 = vmul.f32 1.442695, %v3915_v15  ;;  %v4172_v16 = vmul.f32 1.442695, %v4107_v19  ;;  %v2631_v10 = vadd.f32 %v2630_v5, %v10293_v25  ;;  %v2799_v47 = vpop.f32.mrf.mxu1  ;;  %2669 = vmatmul.bf16.gmra.mxu0 %v8435_v17 }
 0x4ca   :  { %v7714_v33 = vpop.eup %7713  ;;  %v5664_v60 = vmul.f32 %v7712_v27, %v11984_v24  ;;  %v5443_v58 = vadd.f32 %v5442_v40, %v5274_v30  ;;  %v8436_v15 = vld [vmem:[#allocation5 + $0x48] sm:$0xff]  ;;  %v11987_v19 = vld [vmem:[#allocation39_spill] sm:$0xff]  ;;  %v11988_v5 = vld [vmem:[#allocation38_spill] sm:$0xff]  ;;  %v11993_v17 = vmax.f32 %v9738_v11, %v9753_v3 }
 0x4cb   :  { %v7716_v21 = vpop.eup %7715  ;;  %v4298_v31 = vadd.f32 %v7714_v33, %v7712_v27  ;;  %v5728_v4 = vmul.f32 %v7714_v33, %v11986_v26  ;;  %7719 = vpow2.f32 %v3788_v2  ;;  %v2800_v48 = vadd.f32 %v2799_v47, %v2631_v10  ;;  %2838 = vmatmul.bf16.gmra.mxu1 %v8436_v15  ;;  %v11990_v40 = vld [vmem:[#allocation43_spill] sm:$0xff]  ;;  %v11991_v27 = vld [vmem:[#allocation41_spill] sm:$0xff] }
 0x4cc   :  { %v7718_v14 = vpop.eup %7717  ;;  %7721 = vpow2.f32 %v3980_v49  ;;  %v11989_v12 = vpack.c.b16 %v11987_v19, %v11988_v5  ;;  %v11992_v36 = vpack.c.b16 %v11990_v40, %v11991_v27  ;;  %v11994_v26 = vunpack.c.h.bf16 %v11983_v50 }
 0x4cd   :  { %v4362_v18 = vadd.f32 %v7716_v21, %v4298_v31  ;;  %v5792_v24 = vadd.f32 %v5728_v4, %v5664_v60  ;;  %v5856_v30 = vmul.f32 %v7718_v14, %v7716_v21  ;;  %7723 = vpow2.f32 %v4172_v16 }
 0x4ce   :  { %5315 = vmatmul.bf16.gmra.mxu2 %v11989_v12  ;;  %5484 = vmatmul.bf16.gmra.mxu3 %v11992_v36  ;;  %7725 = vtanh.f32 %v5443_v58  ;;  %v3660_v2 = vmax.f32 %v11993_v17, %v2800_v48  ;;  %v5276_v10 = vpop.f32.mrf.mxu2  ;;  %v11996_v50 = vmax.f32 %v9757_v6, %v9767_v52 }
 0x4cf   :  { %7727 = vrcp.f32 %v4362_v18  ;;  %v5920_v49 = vadd.f32 %v5856_v30, %v5792_v24  ;;  %v5277_v4 = vadd.f32 %v10307_v45, %v5276_v10  ;;  %v5445_v16 = vpop.f32.mrf.mxu3 }
 0x4d0   :  { %v3724_v47 = vsub.f32 %v9738_v11, %v3660_v2  ;;  %v3916_v12 = vsub.f32 %v9753_v3, %v3660_v2  ;;  %v4108_v33 = vsub.f32 %v2800_v48, %v3660_v2  ;;  %v2632_v60 = vpop.f32.mrf.mxu0  ;;  %v11995_v3 = vunpack.c.h.bf16 %v11985_v53 }
 0x4d1   :  { %v7720_v21 = vpop.eup %7719  ;;  %v2633_v36 = vadd.f32 %v2632_v60, %v10293_v25  ;;  %v2801_v58 = vpop.f32.mrf.mxu1  ;;  %v5446_v40 = vadd.f32 %v5445_v16, %v5277_v4 }
 0x4d2   :  { %v7722_v31 = vpop.eup %7721  ;;  %v5665_v14 = vmul.f32 %v7720_v21, %v11994_v26  ;;  %v3790_v18 = vmul.f32 1.442695, %v3724_v47  ;;  %v3982_v15 = vmul.f32 1.442695, %v3916_v12  ;;  %v4174_v19 = vmul.f32 1.442695, %v4108_v33 }
 0x4d3   :  { %v7724_v5 = vpop.eup %7723  ;;  %v4299_v11 = vadd.f32 %v7722_v31, %v7720_v21  ;;  %v5729_v48 = vmul.f32 %v7722_v31, %v11995_v3  ;;  %v2802_v24 = vadd.f32 %v2801_v58, %v2633_v36 }
 0x4d4   :  { %v7726_v30 = vpop.eup %7725  ;;  %7729 = vpow2.f32 %v3790_v18 }
 0x4d5   :  { %v7728_v27 = vpop.eup %7727  ;;  %v4363_v17 = vadd.f32 %v7724_v5, %v4299_v11  ;;  %v5793_v2 = vadd.f32 %v5729_v48, %v5665_v14  ;;  %v5857_v10 = vmul.f32 %v7726_v30, %v7724_v5  ;;  %7731 = vpow2.f32 %v3982_v15  ;;  %v11997_v5 = vld [vmem:[#allocation18_spill] sm:$0xff] }
 0x4d6   :  { %v5984_v60 = vmul.f32 %v7728_v27, %v5920_v49  ;;  %7733 = vpow2.f32 %v4174_v19  ;;  %v3661_v47 = vmax.f32 %v11996_v50, %v2802_v24  ;;  %v5278_v33 = vpop.f32.mrf.mxu2  ;;  %v11998_v11 = vunpack.c.l.bf16 %v11997_v5  ;;  %v8437_v30 = vld [vmem:[#allocation2 + $0x50] sm:$0xff]  ;;  %v12002_v50 = vld [vmem:[#allocation44_spill] sm:$0xff] }
 0x4d7   :  { %7735 = vrcp.f32 %v4363_v17  ;;  %v5921_v12 = vadd.f32 %v5857_v10, %v5793_v2  ;;  %v5447_v16 = vpop.f32.mrf.mxu3  ;;  %v5279_v58 = vadd.f32 %v10307_v45, %v5278_v33  ;;  %v8438_v2 = vld [vmem:[#allocation5 + $0x50] sm:$0xff] }
 0x4d8   :  { %7737 = vtanh.f32 %v5446_v40  ;;  %v3725_v53 = vsub.f32 %v9757_v6, %v3661_v47  ;;  %v3917_v21 = vsub.f32 %v9767_v52, %v3661_v47  ;;  %v4109_v4 = vsub.f32 %v2802_v24, %v3661_v47  ;;  %v2635_v36 = vpop.f32.mrf.mxu0  ;;  %v11999_v40 = vld [vmem:[#allocation19_spill] sm:$0xff]  ;;  %v12001_v10 = vld [vmem:[#allocation45_spill] sm:$0xff] }
 0x4d9   :  { %v2636_v49 = vadd.f32 %v2635_v36, %v10293_v25  ;;  %v2804_v31 = vpop.f32.mrf.mxu1  ;;  %v5448_v48 = vadd.f32 %v5447_v16, %v5279_v58  ;;  %2674 = vmatmul.bf16.gmra.mxu0 %v8437_v30  ;;  %v12000_v27 = vunpack.c.l.bf16 %v11999_v40  ;;  %v12003_v47 = vpack.c.b16 %v12001_v10, %v12002_v50  ;;  %v12006_v16 = vld [vmem:[#allocation47_spill] sm:$0xff] }
 0x4da   :  { %v7730_v26 = vpop.eup %7729  ;;  %v3792_v14 = vmul.f32 1.442695, %v3725_v53  ;;  %v3984_v18 = vmul.f32 1.442695, %v3917_v21  ;;  %v4176_v15 = vmul.f32 1.442695, %v4109_v4  ;;  %v12004_v53 = vmax.f32 %v9769_v39, %v9775_v13 }
 0x4db   :  { %v7732_v19 = vpop.eup %7731  ;;  %v5666_v3 = vmul.f32 %v7730_v26, %v11998_v11  ;;  %v2805_v6 = vadd.f32 %v2804_v31, %v2636_v49  ;;  %2843 = vmatmul.bf16.gmra.mxu1 %v8438_v2  ;;  %v12005_v4 = vld [vmem:[#allocation49_spill] sm:$0xff] }
 0x4dc   :  { %v7734_v52 = vpop.eup %7733  ;;  %v4300_v24 = vadd.f32 %v7732_v19, %v7730_v26  ;;  %v5730_v17 = vmul.f32 %v7732_v19, %v12000_v27  ;;  %7739 = vpow2.f32 %v3792_v14  ;;  %v12007_v36 = vpack.c.b16 %v12005_v4, %v12006_v16 }
 0x4dd   :  { %v7736_v33 = vpop.eup %7735  ;;  %7741 = vpow2.f32 %v3984_v18  ;;  %v3662_v21 = vmax.f32 %v12004_v53, %v2805_v6 }
 0x4de   :  { %5320 = vmatmul.bf16.gmra.mxu2 %v12003_v47  ;;  %5489 = vmatmul.bf16.gmra.mxu3 %v12007_v36  ;;  %v7738_v58 = vpop.eup %7737  ;;  %v5985_v49 = vmul.f32 %v7736_v33, %v5921_v12  ;;  %v4364_v31 = vadd.f32 %v7734_v52, %v4300_v24  ;;  %v5794_v26 = vadd.f32 %v5730_v17, %v5666_v3  ;;  %7743 = vpow2.f32 %v4176_v15  ;;  %v5281_v18 = vpop.f32.mrf.mxu2  ;;  %v12010_v36 = vld [vmem:[#allocation174_spill] sm:$0xff] }
 0x4df   :  { %v5858_v14 = vmul.f32 %v7738_v58, %v7734_v52  ;;  %7745 = vtanh.f32 %v5448_v48  ;;  %v3726_v19 = vsub.f32 %v9769_v39, %v3662_v21  ;;  %v3918_v11 = vsub.f32 %v9775_v13, %v3662_v21  ;;  %v5450_v10 = vpop.f32.mrf.mxu3  ;;  %v12011_v58 = vld [vmem:[#allocation175_spill] sm:$0xff] }
 0x4e0   :  { %v7000_v30 = vpack.c.bf16 %v5985_v49, %v5984_v60  ;;  %7747 = vrcp.f32 %v4364_v31  ;;  %v4110_v27 = vsub.f32 %v2805_v6, %v3662_v21  ;;  %v5282_v2 = vadd.f32 %v10307_v45, %v5281_v18  ;;  %v2637_v50 = vpop.f32.mrf.mxu0 }
 0x4e1   :  { %v5922_v47 = vadd.f32 %v5858_v14, %v5794_v26  ;;  %v3794_v53 = vmul.f32 1.442695, %v3726_v19  ;;  %v3986_v12 = vmul.f32 1.442695, %v3918_v11  ;;  %v2638_v3 = vadd.f32 %v2637_v50, %v10293_v25  ;;  %v2806_v15 = vpop.f32.mrf.mxu1 }
 0x4e2   :  { %v7740_v52 = vpop.eup %7739  ;;  %7001 = vst [vmem:[#allocation11] sm:$0xff] %v7000_v30   ;;  %v4178_v48 = vmul.f32 1.442695, %v4110_v27  ;;  %v5451_v39 = vadd.f32 %v5450_v10, %v5282_v2  ;;  %v12008_v13 = vunpack.c.h.bf16 %v11997_v5  ;;  %v12009_v21 = vunpack.c.h.bf16 %v11999_v40 }
 0x4e3   :  { %v7742_v24 = vpop.eup %7741  ;;  %7749 = vpow2.f32 %v3794_v53  ;;  %v2807_v6 = vadd.f32 %v2806_v15, %v2638_v3  ;;  %v12012_v49 = vmax.f32 %v12010_v36, %v12011_v58 }
 0x4e4   :  { %v5667_v60 = vmul.f32 %v7740_v52, %v12008_v13  ;;  %v7744_v17 = vpop.eup %7743  ;;  %v4301_v33 = vadd.f32 %v7742_v24, %v7740_v52  ;;  %v5731_v4 = vmul.f32 %v7742_v24, %v12009_v21  ;;  %7751 = vpow2.f32 %v3986_v12  ;;  %v12013_v24 = vld [vmem:[#allocation20_spill] sm:$0xff]  ;;  %v12015_v21 = vld [vmem:[#allocation21_spill] sm:$0xff] }
 0x4e5   :  { %v7746_v16 = vpop.eup %7745  ;;  %7753 = vpow2.f32 %v4178_v48  ;;  %v3663_v31 = vmax.f32 %v12012_v49, %v2807_v6  ;;  %v12014_v13 = vunpack.c.l.bf16 %v12013_v24 }
 0x4e6   :  { %v7748_v26 = vpop.eup %7747  ;;  %v4365_v14 = vadd.f32 %v7744_v17, %v4301_v33  ;;  %v5795_v19 = vadd.f32 %v5731_v4, %v5667_v60  ;;  %v5859_v11 = vmul.f32 %v7746_v16, %v7744_v17  ;;  %7755 = vtanh.f32 %v5451_v39  ;;  %v5283_v40 = vpop.f32.mrf.mxu2 }
 0x4e7   :  { %v5986_v5 = vmul.f32 %v7748_v26, %v5922_v47  ;;  %v3727_v18 = vsub.f32 %v12010_v36, %v3663_v31  ;;  %v3919_v30 = vsub.f32 %v12011_v58, %v3663_v31  ;;  %v4111_v27 = vsub.f32 %v2807_v6, %v3663_v31  ;;  %v5452_v50 = vpop.f32.mrf.mxu3  ;;  %v8439_v58 = vld [vmem:[#allocation2 + $0x58] sm:$0xff] }
 0x4e8   :  { %7757 = vrcp.f32 %v4365_v14  ;;  %v5923_v2 = vadd.f32 %v5859_v11, %v5795_v19  ;;  %v5284_v10 = vadd.f32 %v10307_v45, %v5283_v40  ;;  %v2640_v53 = vpop.f32.mrf.mxu0  ;;  %v12016_v4 = vunpack.c.l.bf16 %v12015_v21  ;;  %v8440_v31 = vld [vmem:[#allocation5 + $0x58] sm:$0xff]  ;;  %v12021_v40 = vld [vmem:[#allocation53_spill] sm:$0xff] }
 0x4e9   :  { %v7750_v12 = vpop.eup %7749  ;;  %v3796_v3 = vmul.f32 1.442695, %v3727_v18  ;;  %v3988_v15 = vmul.f32 1.442695, %v3919_v30  ;;  %v4180_v52 = vmul.f32 1.442695, %v4111_v27  ;;  %v2641_v48 = vadd.f32 %v2640_v53, %v10293_v25  ;;  %v2809_v39 = vpop.f32.mrf.mxu1  ;;  %2679 = vmatmul.bf16.gmra.mxu0 %v8439_v58 }
 0x4ea   :  { %v7752_v47 = vpop.eup %7751  ;;  %v5668_v60 = vmul.f32 %v7750_v12, %v12014_v13  ;;  %v5453_v17 = vadd.f32 %v5452_v50, %v5284_v10  ;;  %v12017_v26 = vld [vmem:[#allocation51_spill] sm:$0xff]  ;;  %v12018_v14 = vld [vmem:[#allocation50_spill] sm:$0xff]  ;;  %v12023_v53 = vld [vmem:[#allocation176_spill] sm:$0xff] }
 0x4eb   :  { %v7754_v6 = vpop.eup %7753  ;;  %v4302_v33 = vadd.f32 %v7752_v47, %v7750_v12  ;;  %v5732_v16 = vmul.f32 %v7752_v47, %v12016_v4  ;;  %7759 = vpow2.f32 %v3796_v3  ;;  %v2810_v36 = vadd.f32 %v2809_v39, %v2641_v48  ;;  %2848 = vmatmul.bf16.gmra.mxu1 %v8440_v31  ;;  %v12020_v27 = vld [vmem:[#allocation55_spill] sm:$0xff]  ;;  %v12024_v12 = vld [vmem:[#allocation177_spill] sm:$0xff] }
 0x4ec   :  { %v7756_v49 = vpop.eup %7755  ;;  %7761 = vpow2.f32 %v3988_v15  ;;  %v12019_v19 = vpack.c.b16 %v12017_v26, %v12018_v14  ;;  %v12022_v10 = vpack.c.b16 %v12020_v27, %v12021_v40  ;;  %v12025_v3 = vmax.f32 %v12023_v53, %v12024_v12 }
 0x4ed   :  { %v4366_v11 = vadd.f32 %v7754_v6, %v4302_v33  ;;  %v5796_v18 = vadd.f32 %v5732_v16, %v5668_v60  ;;  %v5860_v30 = vmul.f32 %v7756_v49, %v7754_v6  ;;  %7763 = vpow2.f32 %v4180_v52 }
 0x4ee   :  { %5325 = vmatmul.bf16.gmra.mxu2 %v12019_v19  ;;  %5494 = vmatmul.bf16.gmra.mxu3 %v12022_v10  ;;  %v7758_v50 = vpop.eup %7757  ;;  %7765 = vtanh.f32 %v5453_v17  ;;  %v3664_v15 = vmax.f32 %v12025_v3, %v2810_v36  ;;  %v5286_v47 = vpop.f32.mrf.mxu2 }
 0x4ef   :  { %v5987_v48 = vmul.f32 %v7758_v50, %v5923_v2  ;;  %7767 = vrcp.f32 %v4366_v11  ;;  %v5924_v39 = vadd.f32 %v5860_v30, %v5796_v18  ;;  %v5287_v52 = vadd.f32 %v10307_v45, %v5286_v47  ;;  %v5455_v33 = vpop.f32.mrf.mxu3 }
 0x4f0   :  { %v3728_v13 = vsub.f32 %v12023_v53, %v3664_v15  ;;  %v3920_v60 = vsub.f32 %v12024_v12, %v3664_v15  ;;  %v4112_v6 = vsub.f32 %v2810_v36, %v3664_v15  ;;  %v2642_v4 = vpop.f32.mrf.mxu0  ;;  %v12026_v2 = vunpack.c.h.bf16 %v12013_v24  ;;  %v12028_v15 = vld [vmem:[#allocation178_spill] sm:$0xff] }
 0x4f1   :  { %v7760_v16 = vpop.eup %7759  ;;  %v7005_v58 = vpack.c.bf16 %v5987_v48, %v5986_v5  ;;  %v2643_v17 = vadd.f32 %v2642_v4, %v10293_v25  ;;  %v2811_v49 = vpop.f32.mrf.mxu1  ;;  %v12027_v36 = vunpack.c.h.bf16 %v12015_v21  ;;  %v5456_v5 = vadd.f32 %v5455_v33, %v5287_v52  ;;  %v12029_v48 = vld [vmem:[#allocation179_spill] sm:$0xff] }
 0x4f2   :  { %v7762_v31 = vpop.eup %7761  ;;  %v5669_v26 = vmul.f32 %v7760_v16, %v12026_v2  ;;  %v3798_v14 = vmul.f32 1.442695, %v3728_v13  ;;  %v3990_v19 = vmul.f32 1.442695, %v3920_v60  ;;  %v4182_v11 = vmul.f32 1.442695, %v4112_v6 }
 0x4f3   :  { %v7764_v18 = vpop.eup %7763  ;;  %7157 = vst [vmem:[#allocation11 + $0x8] sm:$0xff] %v7005_v58   ;;  %v4303_v30 = vadd.f32 %v7762_v31, %v7760_v16  ;;  %v5733_v27 = vmul.f32 %v7762_v31, %v12027_v36  ;;  %v2812_v40 = vadd.f32 %v2811_v49, %v2643_v17  ;;  %v12030_v47 = vmax.f32 %v12028_v15, %v12029_v48 }
 0x4f4   :  { %v7766_v10 = vpop.eup %7765  ;;  %7769 = vpow2.f32 %v3798_v14 }
 0x4f5   :  { %v7768_v50 = vpop.eup %7767  ;;  %v4367_v53 = vadd.f32 %v7764_v18, %v4303_v30  ;;  %v5797_v12 = vadd.f32 %v5733_v27, %v5669_v26  ;;  %v5861_v3 = vmul.f32 %v7766_v10, %v7764_v18  ;;  %7771 = vpow2.f32 %v3990_v19  ;;  %v12031_v19 = vld [vmem:[#allocation22_spill] sm:$0xff]  ;;  %v8441_v27 = vld [vmem:[#allocation2 + $0x60] sm:$0xff] }
 0x4f6   :  { %v5988_v24 = vmul.f32 %v7768_v50, %v5924_v39  ;;  %7773 = vpow2.f32 %v4182_v11  ;;  %v3665_v13 = vmax.f32 %v12030_v47, %v2812_v40  ;;  %v5288_v6 = vpop.f32.mrf.mxu2  ;;  %v12032_v11 = vunpack.c.l.bf16 %v12031_v19 }
 0x4f7   :  { %7775 = vrcp.f32 %v4367_v53  ;;  %v5925_v60 = vadd.f32 %v5861_v3, %v5797_v12  ;;  %v5457_v33 = vpop.f32.mrf.mxu3  ;;  %v5289_v58 = vadd.f32 %v10307_v45, %v5288_v6  ;;  %v8442_v12 = vld [vmem:[#allocation5 + $0x60] sm:$0xff]  ;;  %v12035_v3 = vld [vmem:[#allocation57_spill] sm:$0xff] }
 0x4f8   :  { %7777 = vtanh.f32 %v5456_v5  ;;  %v3729_v21 = vsub.f32 %v12028_v15, %v3665_v13  ;;  %v3921_v4 = vsub.f32 %v12029_v48, %v3665_v13  ;;  %v4113_v52 = vsub.f32 %v2812_v40, %v3665_v13  ;;  %v2645_v16 = vpop.f32.mrf.mxu0  ;;  %v12033_v5 = vld [vmem:[#allocation23_spill] sm:$0xff]  ;;  %v12036_v15 = vld [vmem:[#allocation56_spill] sm:$0xff]  ;;  %v12039_v6 = vld [vmem:[#allocation181_spill] sm:$0xff] }
 0x4f9   :  { %v2646_v39 = vadd.f32 %v2645_v16, %v10293_v25  ;;  %v2814_v17 = vpop.f32.mrf.mxu1  ;;  %v5458_v30 = vadd.f32 %v5457_v33, %v5289_v58  ;;  %2684 = vmatmul.bf16.gmra.mxu0 %v8441_v27  ;;  %v12034_v50 = vunpack.c.l.bf16 %v12033_v5  ;;  %v12037_v48 = vpack.c.b16 %v12035_v3, %v12036_v15  ;;  %v12038_v13 = vld [vmem:[#allocation180_spill] sm:$0xff]  ;;  %v12042_v33 = vld [vmem:[#allocation59_spill] sm:$0xff] }
 0x4fa   :  { %v7770_v49 = vpop.eup %7769  ;;  %v3800_v31 = vmul.f32 1.442695, %v3729_v21  ;;  %v3992_v2 = vmul.f32 1.442695, %v3921_v4  ;;  %v4184_v26 = vmul.f32 1.442695, %v4113_v52  ;;  %v12040_v21 = vmax.f32 %v12038_v13, %v12039_v6 }
 0x4fb   :  { %v7772_v14 = vpop.eup %7771  ;;  %v5670_v18 = vmul.f32 %v7770_v49, %v12032_v11  ;;  %v2815_v36 = vadd.f32 %v2814_v17, %v2646_v39  ;;  %2853 = vmatmul.bf16.gmra.mxu1 %v8442_v12  ;;  %v12041_v52 = vld [vmem:[#allocation61_spill] sm:$0xff] }
 0x4fc   :  { %v7774_v40 = vpop.eup %7773  ;;  %v4304_v10 = vadd.f32 %v7772_v14, %v7770_v49  ;;  %v5734_v53 = vmul.f32 %v7772_v14, %v12034_v50  ;;  %7779 = vpow2.f32 %v3800_v31  ;;  %v12043_v16 = vpack.c.b16 %v12041_v52, %v12042_v33 }
 0x4fd   :  { %v7776_v47 = vpop.eup %7775  ;;  %7781 = vpow2.f32 %v3992_v2  ;;  %v3666_v4 = vmax.f32 %v12040_v21, %v2815_v36 }
 0x4fe   :  { %5330 = vmatmul.bf16.gmra.mxu2 %v12037_v48  ;;  %5499 = vmatmul.bf16.gmra.mxu3 %v12043_v16  ;;  %v7778_v58 = vpop.eup %7777  ;;  %v5989_v39 = vmul.f32 %v7776_v47, %v5925_v60  ;;  %v4368_v17 = vadd.f32 %v7774_v40, %v4304_v10  ;;  %v5798_v49 = vadd.f32 %v5734_v53, %v5670_v18  ;;  %7783 = vpow2.f32 %v4184_v26  ;;  %v5291_v2 = vpop.f32.mrf.mxu2  ;;  %v12046_v16 = vld [vmem:[#allocation182_spill] sm:$0xff] }
 0x4ff   :  { %v5862_v31 = vmul.f32 %v7778_v58, %v7774_v40  ;;  %7785 = vtanh.f32 %v5458_v30  ;;  %v3730_v14 = vsub.f32 %v12038_v13, %v3666_v4  ;;  %v3922_v11 = vsub.f32 %v12039_v6, %v3666_v4  ;;  %v5460_v3 = vpop.f32.mrf.mxu3  ;;  %v12047_v58 = vld [vmem:[#allocation183_spill] sm:$0xff] }
 0x500   :  { %v7010_v27 = vpack.c.bf16 %v5989_v39, %v5988_v24  ;;  %7787 = vrcp.f32 %v4368_v17  ;;  %v4114_v50 = vsub.f32 %v2815_v36, %v3666_v4  ;;  %v5292_v12 = vadd.f32 %v10307_v45, %v5291_v2  ;;  %v2647_v15 = vpop.f32.mrf.mxu0 }
 0x501   :  { %v5926_v48 = vadd.f32 %v5862_v31, %v5798_v49  ;;  %v3802_v21 = vmul.f32 1.442695, %v3730_v14  ;;  %v3994_v60 = vmul.f32 1.442695, %v3922_v11  ;;  %v2648_v18 = vadd.f32 %v2647_v15, %v10293_v25  ;;  %v2816_v26 = vpop.f32.mrf.mxu1 }
 0x502   :  { %v7780_v40 = vpop.eup %7779  ;;  %7158 = vst [vmem:[#allocation11 + $0x10] sm:$0xff] %v7010_v27   ;;  %v4186_v30 = vmul.f32 1.442695, %v4114_v50  ;;  %v5461_v10 = vadd.f32 %v5460_v3, %v5292_v12  ;;  %v12044_v47 = vunpack.c.h.bf16 %v12031_v19  ;;  %v12045_v4 = vunpack.c.h.bf16 %v12033_v5 }
 0x503   :  { %v7782_v53 = vpop.eup %7781  ;;  %7789 = vpow2.f32 %v3802_v21  ;;  %v2817_v36 = vadd.f32 %v2816_v26, %v2648_v18  ;;  %v12048_v39 = vmax.f32 %v12046_v16, %v12047_v58 }
 0x504   :  { %v5671_v24 = vmul.f32 %v7780_v40, %v12044_v47  ;;  %v7784_v13 = vpop.eup %7783  ;;  %v4305_v6 = vadd.f32 %v7782_v53, %v7780_v40  ;;  %v5735_v52 = vmul.f32 %v7782_v53, %v12045_v4  ;;  %7791 = vpow2.f32 %v3994_v60  ;;  %v12049_v53 = vld [vmem:[#allocation24_spill] sm:$0xff]  ;;  %v12051_v4 = vld [vmem:[#allocation25_spill] sm:$0xff] }
 0x505   :  { %v7786_v33 = vpop.eup %7785  ;;  %7793 = vpow2.f32 %v4186_v30  ;;  %v3667_v17 = vmax.f32 %v12048_v39, %v2817_v36  ;;  %v12050_v47 = vunpack.c.l.bf16 %v12049_v53 }
 0x506   :  { %v7788_v49 = vpop.eup %7787  ;;  %v4369_v31 = vadd.f32 %v7784_v13, %v4305_v6  ;;  %v5799_v14 = vadd.f32 %v5735_v52, %v5671_v24  ;;  %v5863_v11 = vmul.f32 %v7786_v33, %v7784_v13  ;;  %7795 = vtanh.f32 %v5461_v10  ;;  %v5293_v5 = vpop.f32.mrf.mxu2 }
 0x507   :  { %v5990_v19 = vmul.f32 %v7788_v49, %v5926_v48  ;;  %v3731_v2 = vsub.f32 %v12046_v16, %v3667_v17  ;;  %v3923_v27 = vsub.f32 %v12047_v58, %v3667_v17  ;;  %v4115_v50 = vsub.f32 %v2817_v36, %v3667_v17  ;;  %v5462_v15 = vpop.f32.mrf.mxu3  ;;  %v8443_v58 = vld [vmem:[#allocation2 + $0x68] sm:$0xff]  ;;  %v12053_v49 = vld [vmem:[#allocation63_spill] sm:$0xff] }
 0x508   :  { %7797 = vrcp.f32 %v4369_v31  ;;  %v5927_v12 = vadd.f32 %v5863_v11, %v5799_v14  ;;  %v5294_v3 = vadd.f32 %v10307_v45, %v5293_v5  ;;  %v2650_v21 = vpop.f32.mrf.mxu0  ;;  %v12052_v52 = vunpack.c.l.bf16 %v12051_v4  ;;  %v8444_v17 = vld [vmem:[#allocation5 + $0x68] sm:$0xff]  ;;  %v12054_v31 = vld [vmem:[#allocation62_spill] sm:$0xff] }
 0x509   :  { %v7790_v60 = vpop.eup %7789  ;;  %v3804_v18 = vmul.f32 1.442695, %v3731_v2  ;;  %v3996_v26 = vmul.f32 1.442695, %v3923_v27  ;;  %v4188_v40 = vmul.f32 1.442695, %v4115_v50  ;;  %v2651_v30 = vadd.f32 %v2650_v21, %v10293_v25  ;;  %v2819_v10 = vpop.f32.mrf.mxu1  ;;  %2689 = vmatmul.bf16.gmra.mxu0 %v8443_v58 }
 0x50a   :  { %v7792_v48 = vpop.eup %7791  ;;  %v5672_v24 = vmul.f32 %v7790_v60, %v12050_v47  ;;  %v5463_v13 = vadd.f32 %v5462_v15, %v5294_v3  ;;  %v12055_v14 = vpack.c.b16 %v12053_v49, %v12054_v31  ;;  %v12056_v50 = vld [vmem:[#allocation67_spill] sm:$0xff]  ;;  %v12057_v5 = vld [vmem:[#allocation65_spill] sm:$0xff]  ;;  %v12059_v21 = vld [vmem:[#allocation184_spill] sm:$0xff] }
 0x50b   :  { %v7794_v36 = vpop.eup %7793  ;;  %v4306_v6 = vadd.f32 %v7792_v48, %v7790_v60  ;;  %v5736_v33 = vmul.f32 %v7792_v48, %v12052_v52  ;;  %7799 = vpow2.f32 %v3804_v18  ;;  %v2820_v16 = vadd.f32 %v2819_v10, %v2651_v30  ;;  %2858 = vmatmul.bf16.gmra.mxu1 %v8444_v17  ;;  %v12060_v60 = vld [vmem:[#allocation185_spill] sm:$0xff] }
 0x50c   :  { %v7796_v39 = vpop.eup %7795  ;;  %7801 = vpow2.f32 %v3996_v26  ;;  %v12058_v3 = vpack.c.b16 %v12056_v50, %v12057_v5  ;;  %v12061_v18 = vmax.f32 %v12059_v21, %v12060_v60 }
 0x50d   :  { %v4370_v11 = vadd.f32 %v7794_v36, %v4306_v6  ;;  %v5800_v2 = vadd.f32 %v5736_v33, %v5672_v24  ;;  %v5864_v27 = vmul.f32 %v7796_v39, %v7794_v36  ;;  %7803 = vpow2.f32 %v4188_v40 }
 0x50e   :  { %5335 = vmatmul.bf16.gmra.mxu2 %v12055_v14  ;;  %5504 = vmatmul.bf16.gmra.mxu3 %v12058_v3  ;;  %v7798_v15 = vpop.eup %7797  ;;  %7805 = vtanh.f32 %v5463_v13  ;;  %v3668_v26 = vmax.f32 %v12061_v18, %v2820_v16  ;;  %v5296_v48 = vpop.f32.mrf.mxu2 }
 0x50f   :  { %v5991_v30 = vmul.f32 %v7798_v15, %v5927_v12  ;;  %7807 = vrcp.f32 %v4370_v11  ;;  %v5928_v10 = vadd.f32 %v5864_v27, %v5800_v2  ;;  %v5297_v40 = vadd.f32 %v10307_v45, %v5296_v48  ;;  %v5465_v6 = vpop.f32.mrf.mxu3 }
 0x510   :  { %v3732_v47 = vsub.f32 %v12059_v21, %v3668_v26  ;;  %v3924_v24 = vsub.f32 %v12060_v60, %v3668_v26  ;;  %v4116_v36 = vsub.f32 %v2820_v16, %v3668_v26  ;;  %v2652_v52 = vpop.f32.mrf.mxu0  ;;  %v12062_v12 = vunpack.c.h.bf16 %v12049_v53  ;;  %v12064_v26 = vld [vmem:[#allocation186_spill] sm:$0xff] }
 0x511   :  { %v7800_v33 = vpop.eup %7799  ;;  %v7015_v58 = vpack.c.bf16 %v5991_v30, %v5990_v19  ;;  %v2653_v13 = vadd.f32 %v2652_v52, %v10293_v25  ;;  %v2821_v39 = vpop.f32.mrf.mxu1  ;;  %v12063_v16 = vunpack.c.h.bf16 %v12051_v4  ;;  %v5466_v19 = vadd.f32 %v5465_v6, %v5297_v40  ;;  %v12065_v30 = vld [vmem:[#allocation187_spill] sm:$0xff] }
 0x512   :  { %v7802_v17 = vpop.eup %7801  ;;  %v5673_v49 = vmul.f32 %v7800_v33, %v12062_v12  ;;  %v3806_v31 = vmul.f32 1.442695, %v3732_v47  ;;  %v3998_v14 = vmul.f32 1.442695, %v3924_v24  ;;  %v4190_v11 = vmul.f32 1.442695, %v4116_v36 }
 0x513   :  { %v7804_v2 = vpop.eup %7803  ;;  %7159 = vst [vmem:[#allocation11 + $0x18] sm:$0xff] %v7015_v58   ;;  %v4307_v27 = vadd.f32 %v7802_v17, %v7800_v33  ;;  %v5737_v50 = vmul.f32 %v7802_v17, %v12063_v16  ;;  %v2822_v5 = vadd.f32 %v2821_v39, %v2653_v13  ;;  %v12066_v48 = vmax.f32 %v12064_v26, %v12065_v30 }
 0x514   :  { %v7806_v3 = vpop.eup %7805  ;;  %7809 = vpow2.f32 %v3806_v31 }
 0x515   :  { %v7808_v15 = vpop.eup %7807  ;;  %v4371_v21 = vadd.f32 %v7804_v2, %v4307_v27  ;;  %v5801_v60 = vadd.f32 %v5737_v50, %v5673_v49  ;;  %v5865_v18 = vmul.f32 %v7806_v3, %v7804_v2  ;;  %7811 = vpow2.f32 %v3998_v14  ;;  %v12067_v14 = vld [vmem:[#allocation26_spill] sm:$0xff] }
 0x516   :  { %v5992_v53 = vmul.f32 %v7808_v15, %v5928_v10  ;;  %7813 = vpow2.f32 %v4190_v11  ;;  %v3669_v47 = vmax.f32 %v12066_v48, %v2822_v5  ;;  %v5298_v36 = vpop.f32.mrf.mxu2  ;;  %v12068_v11 = vunpack.c.l.bf16 %v12067_v14  ;;  %v8445_v50 = vld [vmem:[#allocation2 + $0x70] sm:$0xff] }
 0x517   :  { %7815 = vrcp.f32 %v4371_v21  ;;  %v5929_v24 = vadd.f32 %v5865_v18, %v5801_v60  ;;  %v5467_v6 = vpop.f32.mrf.mxu3  ;;  %v5299_v58 = vadd.f32 %v10307_v45, %v5298_v36  ;;  %v8446_v60 = vld [vmem:[#allocation5 + $0x70] sm:$0xff] }
 0x518   :  { %7817 = vtanh.f32 %v5466_v19  ;;  %v3733_v4 = vsub.f32 %v12064_v26, %v3669_v47  ;;  %v3925_v52 = vsub.f32 %v12065_v30, %v3669_v47  ;;  %v4117_v40 = vsub.f32 %v2822_v5, %v3669_v47  ;;  %v2655_v33 = vpop.f32.mrf.mxu0  ;;  %v12069_v19 = vld [vmem:[#allocation27_spill] sm:$0xff]  ;;  %v12071_v18 = vld [vmem:[#allocation69_spill] sm:$0xff]  ;;  %v12072_v26 = vld [vmem:[#allocation68_spill] sm:$0xff] }
 0x519   :  { %v2656_v10 = vadd.f32 %v2655_v33, %v10293_v25  ;;  %v2824_v13 = vpop.f32.mrf.mxu1  ;;  %v5468_v27 = vadd.f32 %v5467_v6, %v5299_v58  ;;  %2694 = vmatmul.bf16.gmra.mxu0 %v8445_v50  ;;  %v12070_v15 = vunpack.c.l.bf16 %v12069_v19  ;;  %v12073_v30 = vpack.c.b16 %v12071_v18, %v12072_v26  ;;  %v12074_v47 = vld [vmem:[#allocation188_spill] sm:$0xff]  ;;  %v12075_v36 = vld [vmem:[#allocation189_spill] sm:$0xff]  ;;  %v12078_v6 = vld [vmem:[#allocation71_spill] sm:$0xff] }
 0x51a   :  { %v7810_v39 = vpop.eup %7809  ;;  %v3808_v17 = vmul.f32 1.442695, %v3733_v4  ;;  %v4000_v12 = vmul.f32 1.442695, %v3925_v52  ;;  %v4192_v49 = vmul.f32 1.442695, %v4117_v40  ;;  %v12076_v4 = vmax.f32 %v12074_v47, %v12075_v36 }
 0x51b   :  { %v7812_v31 = vpop.eup %7811  ;;  %v5674_v2 = vmul.f32 %v7810_v39, %v12068_v11  ;;  %v2825_v16 = vadd.f32 %v2824_v13, %v2656_v10  ;;  %2863 = vmatmul.bf16.gmra.mxu1 %v8446_v60  ;;  %v12077_v40 = vld [vmem:[#allocation73_spill] sm:$0xff] }
 0x51c   :  { %v7814_v5 = vpop.eup %7813  ;;  %v4308_v3 = vadd.f32 %v7812_v31, %v7810_v39  ;;  %v5738_v21 = vmul.f32 %v7812_v31, %v12070_v15  ;;  %7819 = vpow2.f32 %v3808_v17  ;;  %v12079_v33 = vpack.c.b16 %v12077_v40, %v12078_v6 }
 0x51d   :  { %v7816_v48 = vpop.eup %7815  ;;  %7821 = vpow2.f32 %v4000_v12  ;;  %v3670_v52 = vmax.f32 %v12076_v4, %v2825_v16 }
 0x51e   :  { %5340 = vmatmul.bf16.gmra.mxu2 %v12073_v30  ;;  %5509 = vmatmul.bf16.gmra.mxu3 %v12079_v33  ;;  %v7818_v58 = vpop.eup %7817  ;;  %v5993_v10 = vmul.f32 %v7816_v48, %v5929_v24  ;;  %v4372_v13 = vadd.f32 %v7814_v5, %v4308_v3  ;;  %v5802_v39 = vadd.f32 %v5738_v21, %v5674_v2  ;;  %7823 = vpow2.f32 %v4192_v49  ;;  %v5301_v12 = vpop.f32.mrf.mxu2  ;;  %v12082_v33 = vld [vmem:[#allocation190_spill] sm:$0xff] }
 0x51f   :  { %v5866_v17 = vmul.f32 %v7818_v58, %v7814_v5  ;;  %7825 = vtanh.f32 %v5468_v27  ;;  %v3734_v31 = vsub.f32 %v12074_v47, %v3670_v52  ;;  %v3926_v11 = vsub.f32 %v12075_v36, %v3670_v52  ;;  %v5470_v18 = vpop.f32.mrf.mxu3  ;;  %v12083_v58 = vld [vmem:[#allocation191_spill] sm:$0xff] }
 0x520   :  { %v7020_v50 = vpack.c.bf16 %v5993_v10, %v5992_v53  ;;  %7827 = vrcp.f32 %v4372_v13  ;;  %v4118_v15 = vsub.f32 %v2825_v16, %v3670_v52  ;;  %v5302_v60 = vadd.f32 %v10307_v45, %v5301_v12  ;;  %v2657_v26 = vpop.f32.mrf.mxu0 }
 0x521   :  { %v5930_v30 = vadd.f32 %v5866_v17, %v5802_v39  ;;  %v3810_v4 = vmul.f32 1.442695, %v3734_v31  ;;  %v4002_v24 = vmul.f32 1.442695, %v3926_v11  ;;  %v2658_v2 = vadd.f32 %v2657_v26, %v10293_v25  ;;  %v2826_v49 = vpop.f32.mrf.mxu1 }
 0x522   :  { %v7820_v5 = vpop.eup %7819  ;;  %7160 = vst [vmem:[#allocation11 + $0x20] sm:$0xff] %v7020_v50   ;;  %v4194_v27 = vmul.f32 1.442695, %v4118_v15  ;;  %v5471_v3 = vadd.f32 %v5470_v18, %v5302_v60  ;;  %v12080_v48 = vunpack.c.h.bf16 %v12067_v14  ;;  %v12081_v52 = vunpack.c.h.bf16 %v12069_v19 }
 0x523   :  { %v7822_v21 = vpop.eup %7821  ;;  %7829 = vpow2.f32 %v3810_v4  ;;  %v2827_v16 = vadd.f32 %v2826_v49, %v2658_v2  ;;  %v12084_v10 = vmax.f32 %v12082_v33, %v12083_v58 }
 0x524   :  { %v5675_v53 = vmul.f32 %v7820_v5, %v12080_v48  ;;  %v7824_v47 = vpop.eup %7823  ;;  %v4309_v36 = vadd.f32 %v7822_v21, %v7820_v5  ;;  %v5739_v40 = vmul.f32 %v7822_v21, %v12081_v52  ;;  %7831 = vpow2.f32 %v4002_v24  ;;  %v12085_v21 = vld [vmem:[#allocation28_spill] sm:$0xff]  ;;  %v12087_v52 = vld [vmem:[#allocation29_spill] sm:$0xff] }
 0x525   :  { %v7826_v6 = vpop.eup %7825  ;;  %7833 = vpow2.f32 %v4194_v27  ;;  %v3671_v13 = vmax.f32 %v12084_v10, %v2827_v16  ;;  %v12086_v48 = vunpack.c.l.bf16 %v12085_v21 }
 0x526   :  { %v7828_v39 = vpop.eup %7827  ;;  %v4373_v17 = vadd.f32 %v7824_v47, %v4309_v36  ;;  %v5803_v31 = vadd.f32 %v5739_v40, %v5675_v53  ;;  %v5867_v11 = vmul.f32 %v7826_v6, %v7824_v47  ;;  %7835 = vtanh.f32 %v5471_v3  ;;  %v5303_v19 = vpop.f32.mrf.mxu2 }
 0x527   :  { %v5994_v14 = vmul.f32 %v7828_v39, %v5930_v30  ;;  %v3735_v12 = vsub.f32 %v12082_v33, %v3671_v13  ;;  %v3927_v50 = vsub.f32 %v12083_v58, %v3671_v13  ;;  %v4119_v15 = vsub.f32 %v2827_v16, %v3671_v13  ;;  %v5472_v26 = vpop.f32.mrf.mxu3  ;;  %v8447_v58 = vld [vmem:[#allocation2 + $0x78] sm:$0xff] }
 0x528   :  { %7837 = vrcp.f32 %v4373_v17  ;;  %v5931_v60 = vadd.f32 %v5867_v11, %v5803_v31  ;;  %v5304_v18 = vadd.f32 %v10307_v45, %v5303_v19  ;;  %v2660_v4 = vpop.f32.mrf.mxu0  ;;  %v12088_v40 = vunpack.c.l.bf16 %v12087_v52  ;;  %v8448_v13 = vld [vmem:[#allocation5 + $0x78] sm:$0xff]  ;;  %v12093_v19 = vld [vmem:[#allocation77_spill] sm:$0xff] }
 0x529   :  { %v7830_v24 = vpop.eup %7829  ;;  %v3812_v2 = vmul.f32 1.442695, %v3735_v12  ;;  %v4004_v49 = vmul.f32 1.442695, %v3927_v50  ;;  %v4196_v5 = vmul.f32 1.442695, %v4119_v15  ;;  %v2661_v27 = vadd.f32 %v2660_v4, %v10293_v25  ;;  %v2829_v3 = vpop.f32.mrf.mxu1  ;;  %2699 = vmatmul.bf16.gmra.mxu0 %v8447_v58 }
 0x52a   :  { %v7832_v30 = vpop.eup %7831  ;;  %v5676_v53 = vmul.f32 %v7830_v24, %v12086_v48  ;;  %v5473_v47 = vadd.f32 %v5472_v26, %v5304_v18  ;;  %v12089_v39 = vld [vmem:[#allocation75_spill] sm:$0xff]  ;;  %v12090_v17 = vld [vmem:[#allocation74_spill] sm:$0xff]  ;;  %v12095_v4 = vld [vmem:[#allocation192_spill] sm:$0xff] }
 0x52b   :  { %v7834_v16 = vpop.eup %7833  ;;  %v4310_v36 = vadd.f32 %v7832_v30, %v7830_v24  ;;  %v5740_v6 = vmul.f32 %v7832_v30, %v12088_v40  ;;  %7839 = vpow2.f32 %v3812_v2  ;;  %v2830_v33 = vadd.f32 %v2829_v3, %v2661_v27  ;;  %2868 = vmatmul.bf16.gmra.mxu1 %v8448_v13  ;;  %v12092_v15 = vld [vmem:[#allocation79_spill] sm:$0xff]  ;;  %v12096_v24 = vld [vmem:[#allocation193_spill] sm:$0xff] }
 0x52c   :  { %v7836_v10 = vpop.eup %7835  ;;  %7841 = vpow2.f32 %v4004_v49  ;;  %v12091_v31 = vpack.c.b16 %v12089_v39, %v12090_v17  ;;  %v12094_v18 = vpack.c.b16 %v12092_v15, %v12093_v19  ;;  %v12097_v2 = vmax.f32 %v12095_v4, %v12096_v24 }
 0x52d   :  { %v4374_v11 = vadd.f32 %v7834_v16, %v4310_v36  ;;  %v5804_v12 = vadd.f32 %v5740_v6, %v5676_v53  ;;  %v5868_v50 = vmul.f32 %v7836_v10, %v7834_v16  ;;  %7843 = vpow2.f32 %v4196_v5 }
 0x52e   :  { %5345 = vmatmul.bf16.gmra.mxu2 %v12091_v31  ;;  %5514 = vmatmul.bf16.gmra.mxu3 %v12094_v18  ;;  %v7838_v26 = vpop.eup %7837  ;;  %7845 = vtanh.f32 %v5473_v47  ;;  %v3672_v49 = vmax.f32 %v12097_v2, %v2830_v33  ;;  %v5306_v30 = vpop.f32.mrf.mxu2  ;;  %v12100_v2 = vld [vmem:[#allocation194_spill] sm:$0xff] }
 0x52f   :  { %v5995_v27 = vmul.f32 %v7838_v26, %v5931_v60  ;;  %7847 = vrcp.f32 %v4374_v11  ;;  %v5932_v3 = vadd.f32 %v5868_v50, %v5804_v12  ;;  %v5307_v5 = vadd.f32 %v10307_v45, %v5306_v30  ;;  %v5475_v36 = vpop.f32.mrf.mxu3 }
 0x530   :  { %v3736_v48 = vsub.f32 %v12095_v4, %v3672_v49  ;;  %v3928_v53 = vsub.f32 %v12096_v24, %v3672_v49  ;;  %v4120_v16 = vsub.f32 %v2830_v33, %v3672_v49  ;;  %v2662_v40 = vpop.f32.mrf.mxu0  ;;  %v12098_v60 = vunpack.c.h.bf16 %v12085_v21  ;;  %v12101_v49 = vld [vmem:[#allocation195_spill] sm:$0xff] }
 0x531   :  { %v7840_v6 = vpop.eup %7839  ;;  %v7025_v58 = vpack.c.bf16 %v5995_v27, %v5994_v14  ;;  %v2663_v47 = vadd.f32 %v2662_v40, %v10293_v25  ;;  %v2831_v10 = vpop.f32.mrf.mxu1  ;;  %v12099_v33 = vunpack.c.h.bf16 %v12087_v52  ;;  %v5476_v14 = vadd.f32 %v5475_v36, %v5307_v5 }
 0x532   :  { %v7842_v13 = vpop.eup %7841  ;;  %v5677_v39 = vmul.f32 %v7840_v6, %v12098_v60  ;;  %v3814_v17 = vmul.f32 1.442695, %v3736_v48  ;;  %v4006_v31 = vmul.f32 1.442695, %v3928_v53  ;;  %v4198_v11 = vmul.f32 1.442695, %v4120_v16 }
 0x533   :  { %v7844_v12 = vpop.eup %7843  ;;  %7161 = vst [vmem:[#allocation11 + $0x28] sm:$0xff] %v7025_v58   ;;  %v4311_v50 = vadd.f32 %v7842_v13, %v7840_v6  ;;  %v5741_v45 = vmul.f32 %v7842_v13, %v12099_v33  ;;  %v2832_v15 = vadd.f32 %v2831_v10, %v2663_v47  ;;  %v12102_v27 = vmax.f32 %v12100_v2, %v12101_v49 }
 0x534   :  { %v7846_v19 = vpop.eup %7845  ;;  %7849 = vpow2.f32 %v3814_v17 }
 0x535   :  { %v7848_v18 = vpop.eup %7847  ;;  %v4375_v26 = vadd.f32 %v7844_v12, %v4311_v50  ;;  %v5805_v4 = vadd.f32 %v5741_v45, %v5677_v39  ;;  %v5869_v24 = vmul.f32 %v7846_v19, %v7844_v12  ;;  %7851 = vpow2.f32 %v4006_v31  ;;  %v12103_v31 = vld [vmem:[#allocation30_spill] sm:$0xff]  ;;  %v8450_v45 = vld [vmem:[#allocation2 + $0x80] sm:$0xff] }
 0x536   :  { %v5996_v21 = vmul.f32 %v7848_v18, %v5932_v3  ;;  %7853 = vpow2.f32 %v4198_v11  ;;  %v3673_v30 = vmax.f32 %v12102_v27, %v2832_v15  ;;  %v5308_v53 = vpop.f32.mrf.mxu2  ;;  %v10523_v3 = vld [vmem:[%s11184_s5] ss:$0 sm:$0xff]  ;;  %v12104_v11 = vunpack.c.l.bf16 %v12103_v31 }
 0x537   :  { %7855 = vrcp.f32 %v4375_v26  ;;  %v5933_v48 = vadd.f32 %v5869_v24, %v5805_v4  ;;  %v5477_v36 = vpop.f32.mrf.mxu3  ;;  %v5309_v6 = vadd.f32 %v10523_v3, %v5308_v53  ;;  %v8451_v4 = vld [vmem:[#allocation5 + $0x80] sm:$0xff]  ;;  %v12107_v24 = vld [vmem:[#allocation81_spill] sm:$0xff] }
 0x538   :  { %7857 = vtanh.f32 %v5476_v14  ;;  %v3737_v52 = vsub.f32 %v12100_v2, %v3673_v30  ;;  %v3929_v16 = vsub.f32 %v12101_v49, %v3673_v30  ;;  %v4121_v5 = vsub.f32 %v2832_v15, %v3673_v30  ;;  %v2665_v40 = vpop.f32.mrf.mxu0  ;;  %v12105_v14 = vld [vmem:[#allocation31_spill] sm:$0xff]  ;;  %v12108_v2 = vld [vmem:[#allocation80_spill] sm:$0xff]  ;;  %v12111_v53 = vld [vmem:[#allocation197_spill] sm:$0xff] }
 0x539   :  { %v2666_v58 = vadd.f32 %v2665_v40, %v10293_v25  ;;  %v2834_v47 = vpop.f32.mrf.mxu1  ;;  %v5478_v50 = vadd.f32 %v5477_v36, %v5309_v6  ;;  %2704 = vmatmul.bf16.gmra.mxu0 %v8450_v45  ;;  %v12106_v18 = vunpack.c.l.bf16 %v12105_v14  ;;  %v12109_v49 = vpack.c.b16 %v12107_v24, %v12108_v2  ;;  %v12110_v30 = vld [vmem:[#allocation196_spill] sm:$0xff]  ;;  %v12114_v36 = vld [vmem:[#allocation83_spill] sm:$0xff] }
 0x53a   :  { %v7850_v10 = vpop.eup %7849  ;;  %v3816_v13 = vmul.f32 1.442695, %v3737_v52  ;;  %v4008_v60 = vmul.f32 1.442695, %v3929_v16  ;;  %v4200_v39 = vmul.f32 1.442695, %v4121_v5  ;;  %v12112_v52 = vmax.f32 %v12110_v30, %v12111_v53 }
 0x53b   :  { %v7852_v17 = vpop.eup %7851  ;;  %v5678_v12 = vmul.f32 %v7850_v10, %v12104_v11  ;;  %v2835_v33 = vadd.f32 %v2834_v47, %v2666_v58  ;;  %2873 = vmatmul.bf16.gmra.mxu1 %v8451_v4  ;;  %v12113_v5 = vld [vmem:[#allocation85_spill] sm:$0xff] }
 0x53c   :  { %v7854_v15 = vpop.eup %7853  ;;  %v4312_v19 = vadd.f32 %v7852_v17, %v7850_v10  ;;  %v5742_v26 = vmul.f32 %v7852_v17, %v12106_v18  ;;  %7859 = vpow2.f32 %v3816_v13  ;;  %v12115_v40 = vpack.c.b16 %v12113_v5, %v12114_v36 }
 0x53d   :  { %v7856_v27 = vpop.eup %7855  ;;  %7861 = vpow2.f32 %v4008_v60  ;;  %v3674_v16 = vmax.f32 %v12112_v52, %v2835_v33 }
 0x53e   :  { %5350 = vmatmul.bf16.gmra.mxu2 %v12109_v49  ;;  %5519 = vmatmul.bf16.gmra.mxu3 %v12115_v40  ;;  %v7858_v6 = vpop.eup %7857  ;;  %v5997_v58 = vmul.f32 %v7856_v27, %v5933_v48  ;;  %v4376_v47 = vadd.f32 %v7854_v15, %v4312_v19  ;;  %v5806_v10 = vadd.f32 %v5742_v26, %v5678_v12  ;;  %7863 = vpow2.f32 %v4200_v39  ;;  %v5311_v60 = vpop.f32.mrf.mxu2  ;;  %v12118_v40 = vld [vmem:[#allocation198_spill] sm:$0xff] }
 0x53f   :  { %v5870_v13 = vmul.f32 %v7858_v6, %v7854_v15  ;;  %7865 = vtanh.f32 %v5478_v50  ;;  %v3738_v17 = vsub.f32 %v12110_v30, %v3674_v16  ;;  %v3930_v11 = vsub.f32 %v12111_v53, %v3674_v16  ;;  %v5480_v24 = vpop.f32.mrf.mxu3  ;;  %v12119_v6 = vld [vmem:[#allocation199_spill] sm:$0xff] }
 0x540   :  { %v7030_v45 = vpack.c.bf16 %v5997_v58, %v5996_v21  ;;  %7867 = vrcp.f32 %v4376_v47  ;;  %v4122_v18 = vsub.f32 %v2835_v33, %v3674_v16  ;;  %v5312_v4 = vadd.f32 %v10523_v3, %v5311_v60  ;;  %v2667_v2 = vpop.f32.mrf.mxu0 }
 0x541   :  { %v5934_v49 = vadd.f32 %v5870_v13, %v5806_v10  ;;  %v3818_v52 = vmul.f32 1.442695, %v3738_v17  ;;  %v4010_v48 = vmul.f32 1.442695, %v3930_v11  ;;  %v2668_v12 = vadd.f32 %v2667_v2, %v10293_v25  ;;  %v2836_v39 = vpop.f32.mrf.mxu1 }
 0x542   :  { %v7860_v15 = vpop.eup %7859  ;;  %7162 = vst [vmem:[#allocation11 + $0x30] sm:$0xff] %v7030_v45   ;;  %v4202_v50 = vmul.f32 1.442695, %v4122_v18  ;;  %v5481_v19 = vadd.f32 %v5480_v24, %v5312_v4  ;;  %v12116_v27 = vunpack.c.h.bf16 %v12103_v31  ;;  %v12117_v16 = vunpack.c.h.bf16 %v12105_v14 }
 0x543   :  { %v7862_v26 = vpop.eup %7861  ;;  %7869 = vpow2.f32 %v3818_v52  ;;  %v2837_v33 = vadd.f32 %v2836_v39, %v2668_v12  ;;  %v12120_v58 = vmax.f32 %v12118_v40, %v12119_v6 }
 0x544   :  { %v5679_v21 = vmul.f32 %v7860_v15, %v12116_v27  ;;  %v7864_v30 = vpop.eup %7863  ;;  %v4313_v53 = vadd.f32 %v7862_v26, %v7860_v15  ;;  %v5743_v5 = vmul.f32 %v7862_v26, %v12117_v16  ;;  %7871 = vpow2.f32 %v4010_v48  ;;  %v12121_v26 = vld [vmem:[#allocation32_spill] sm:$0xff]  ;;  %v12123_v16 = vld [vmem:[#allocation33_spill] sm:$0xff] }
 0x545   :  { %v7866_v36 = vpop.eup %7865  ;;  %7873 = vpow2.f32 %v4202_v50  ;;  %v3675_v47 = vmax.f32 %v12120_v58, %v2837_v33  ;;  %v12122_v27 = vunpack.c.l.bf16 %v12121_v26 }
 0x546   :  { %v7868_v10 = vpop.eup %7867  ;;  %v4377_v13 = vadd.f32 %v7864_v30, %v4313_v53  ;;  %v5807_v17 = vadd.f32 %v5743_v5, %v5679_v21  ;;  %v5871_v11 = vmul.f32 %v7866_v36, %v7864_v30  ;;  %7875 = vtanh.f32 %v5481_v19  ;;  %v5313_v14 = vpop.f32.mrf.mxu2 }
 0x547   :  { %v5998_v31 = vmul.f32 %v7868_v10, %v5934_v49  ;;  %v3739_v60 = vsub.f32 %v12118_v40, %v3675_v47  ;;  %v3931_v45 = vsub.f32 %v12119_v6, %v3675_v47  ;;  %v4123_v18 = vsub.f32 %v2837_v33, %v3675_v47  ;;  %v5482_v2 = vpop.f32.mrf.mxu3  ;;  %v8452_v6 = vld [vmem:[#allocation2 + $0x88] sm:$0xff]  ;;  %v12125_v10 = vld [vmem:[#allocation87_spill] sm:$0xff] }
 0x548   :  { %7877 = vrcp.f32 %v4377_v13  ;;  %v5935_v4 = vadd.f32 %v5871_v11, %v5807_v17  ;;  %v5314_v24 = vadd.f32 %v10523_v3, %v5313_v14  ;;  %v2670_v52 = vpop.f32.mrf.mxu0  ;;  %v12124_v5 = vunpack.c.l.bf16 %v12123_v16  ;;  %v8453_v47 = vld [vmem:[#allocation5 + $0x88] sm:$0xff]  ;;  %v12126_v13 = vld [vmem:[#allocation86_spill] sm:$0xff] }
 0x549   :  { %v7870_v48 = vpop.eup %7869  ;;  %v3820_v12 = vmul.f32 1.442695, %v3739_v60  ;;  %v4012_v39 = vmul.f32 1.442695, %v3931_v45  ;;  %v4204_v15 = vmul.f32 1.442695, %v4123_v18  ;;  %v2671_v50 = vadd.f32 %v2670_v52, %v10293_v25  ;;  %v2839_v19 = vpop.f32.mrf.mxu1  ;;  %2709 = vmatmul.bf16.gmra.mxu0 %v8452_v6 }
 0x54a   :  { %v7872_v49 = vpop.eup %7871  ;;  %v5680_v21 = vmul.f32 %v7870_v48, %v12122_v27  ;;  %v5483_v30 = vadd.f32 %v5482_v2, %v5314_v24  ;;  %v12127_v17 = vpack.c.b16 %v12125_v10, %v12126_v13  ;;  %v12128_v18 = vld [vmem:[#allocation91_spill] sm:$0xff]  ;;  %v12129_v14 = vld [vmem:[#allocation89_spill] sm:$0xff]  ;;  %v12131_v52 = vld [vmem:[#allocation200_spill] sm:$0xff] }
 0x54b   :  { %v7874_v33 = vpop.eup %7873  ;;  %v4314_v53 = vadd.f32 %v7872_v49, %v7870_v48  ;;  %v5744_v36 = vmul.f32 %v7872_v49, %v12124_v5  ;;  %7879 = vpow2.f32 %v3820_v12  ;;  %v2840_v40 = vadd.f32 %v2839_v19, %v2671_v50  ;;  %2878 = vmatmul.bf16.gmra.mxu1 %v8453_v47  ;;  %v12132_v48 = vld [vmem:[#allocation201_spill] sm:$0xff] }
 0x54c   :  { %v7876_v58 = vpop.eup %7875  ;;  %7881 = vpow2.f32 %v4012_v39  ;;  %v12130_v24 = vpack.c.b16 %v12128_v18, %v12129_v14  ;;  %v12133_v12 = vmax.f32 %v12131_v52, %v12132_v48 }
 0x54d   :  { %v4378_v11 = vadd.f32 %v7874_v33, %v4314_v53  ;;  %v5808_v60 = vadd.f32 %v5744_v36, %v5680_v21  ;;  %v5872_v45 = vmul.f32 %v7876_v58, %v7874_v33  ;;  %7883 = vpow2.f32 %v4204_v15 }
 0x54e   :  { %5355 = vmatmul.bf16.gmra.mxu2 %v12127_v17  ;;  %5524 = vmatmul.bf16.gmra.mxu3 %v12130_v24  ;;  %v7878_v2 = vpop.eup %7877  ;;  %7885 = vtanh.f32 %v5483_v30  ;;  %v3676_v39 = vmax.f32 %v12133_v12, %v2840_v40 }
 0x54f   :  { %v5999_v50 = vmul.f32 %v7878_v2, %v5935_v4  ;;  %7887 = vrcp.f32 %v4378_v11  ;;  %v5936_v19 = vadd.f32 %v5872_v45, %v5808_v60  ;;  %v12134_v4 = vunpack.c.h.bf16 %v12121_v26 }
 0x550   :  { %v3740_v27 = vsub.f32 %v12131_v52, %v3676_v39  ;;  %v3932_v21 = vsub.f32 %v12132_v48, %v3676_v39  ;;  %v4124_v33 = vsub.f32 %v2840_v40, %v3676_v39  ;;  %v2672_v5 = vpop.f32.mrf.mxu0  ;;  %v12135_v40 = vunpack.c.h.bf16 %v12123_v16  ;;  %v12136_v39 = vld [vmem:[#allocation202_spill] sm:$0xff] }
 0x551   :  { %v5316_v49 = vpop.f32.mrf.mxu2  ;;  %v5485_v53 = vpop.f32.mrf.mxu3  ;;  %v7035_v6 = vpack.c.bf16 %v5999_v50, %v5998_v31  ;;  %v2673_v30 = vadd.f32 %v2672_v5, %v10293_v25  ;;  %v12137_v50 = vld [vmem:[#allocation203_spill] sm:$0xff] }
 0x552   :  { %v5317_v15 = vadd.f32 %v10523_v3, %v5316_v49  ;;  %v7880_v36 = vpop.eup %7879  ;;  %v2841_v58 = vpop.f32.mrf.mxu1  ;;  %v3822_v13 = vmul.f32 1.442695, %v3740_v27  ;;  %v4014_v17 = vmul.f32 1.442695, %v3932_v21  ;;  %v4206_v11 = vmul.f32 1.442695, %v4124_v33 }
 0x553   :  { %v7882_v47 = vpop.eup %7881  ;;  %v5681_v10 = vmul.f32 %v7880_v36, %v12134_v4  ;;  %7163 = vst [vmem:[#allocation11 + $0x38] sm:$0xff] %v7035_v6   ;;  %v2842_v14 = vadd.f32 %v2841_v58, %v2673_v30  ;;  %v12138_v49 = vmax.f32 %v12136_v39, %v12137_v50 }
 0x554   :  { %v7884_v60 = vpop.eup %7883  ;;  %v4315_v45 = vadd.f32 %v7882_v47, %v7880_v36  ;;  %v5745_v18 = vmul.f32 %v7882_v47, %v12135_v40  ;;  %7889 = vpow2.f32 %v3822_v13  ;;  %v5486_v31 = vadd.f32 %v5485_v53, %v5317_v15 }
 0x555   :  { %v7886_v24 = vpop.eup %7885  ;;  %7891 = vpow2.f32 %v4014_v17  ;;  %v3677_v27 = vmax.f32 %v12138_v49, %v2842_v14  ;;  %v12139_v17 = vld [vmem:[#allocation34_spill] sm:$0xff] }
 0x556   :  { %v7888_v2 = vpop.eup %7887  ;;  %v4379_v52 = vadd.f32 %v7884_v60, %v4315_v45  ;;  %v5809_v48 = vadd.f32 %v5745_v18, %v5681_v10  ;;  %v5873_v12 = vmul.f32 %v7886_v24, %v7884_v60  ;;  %7893 = vpow2.f32 %v4206_v11  ;;  %v8454_v18 = vld [vmem:[#allocation2 + $0x90] sm:$0xff] }
 0x557   :  { %v6000_v26 = vmul.f32 %v7888_v2, %v5936_v19  ;;  %v3741_v16 = vsub.f32 %v12136_v39, %v3677_v27  ;;  %v3933_v5 = vsub.f32 %v12137_v50, %v3677_v27  ;;  %v4125_v15 = vsub.f32 %v2842_v14, %v3677_v27  ;;  %v12144_v39 = vld [vmem:[#allocation92_spill] sm:$0xff] }
 0x558   :  { %7895 = vrcp.f32 %v4379_v52  ;;  %v5937_v21 = vadd.f32 %v5873_v12, %v5809_v48  ;;  %v2675_v36 = vpop.f32.mrf.mxu0  ;;  %v12140_v11 = vunpack.c.l.bf16 %v12139_v17  ;;  %v8455_v48 = vld [vmem:[#allocation5 + $0x90] sm:$0xff]  ;;  %v12146_v27 = vld [vmem:[#allocation204_spill] sm:$0xff] }
 0x559   :  { %v5318_v33 = vpop.f32.mrf.mxu2  ;;  %7897 = vtanh.f32 %v5486_v31  ;;  %v5487_v53 = vpop.f32.mrf.mxu3  ;;  %v2676_v19 = vadd.f32 %v2675_v36, %v10293_v25  ;;  %v3824_v47 = vmul.f32 1.442695, %v3741_v16  ;;  %v4016_v4 = vmul.f32 1.442695, %v3933_v5  ;;  %2714 = vmatmul.bf16.gmra.mxu0 %v8454_v18  ;;  %v12141_v31 = vld [vmem:[#allocation36_spill] sm:$0xff]  ;;  %v12143_v12 = vld [vmem:[#allocation93_spill] sm:$0xff] }
 0x55a   :  { %v5319_v6 = vadd.f32 %v10523_v3, %v5318_v33  ;;  %v2844_v30 = vpop.f32.mrf.mxu1  ;;  %v7890_v58 = vpop.eup %7889  ;;  %v4208_v10 = vmul.f32 1.442695, %v4125_v15  ;;  %v12142_v2 = vunpack.c.l.bf16 %v12141_v31  ;;  %v12145_v50 = vpack.c.b16 %v12143_v12, %v12144_v39  ;;  %v12147_v33 = vld [vmem:[#allocation205_spill] sm:$0xff] }
 0x55b   :  { %v7892_v13 = vpop.eup %7891  ;;  %v5682_v60 = vmul.f32 %v7890_v58, %v12140_v11  ;;  %v2845_v40 = vadd.f32 %v2844_v30, %v2676_v19  ;;  %7899 = vpow2.f32 %v3824_v47  ;;  %2883 = vmatmul.bf16.gmra.mxu1 %v8455_v48  ;;  %v12148_v16 = vmax.f32 %v12146_v27, %v12147_v33  ;;  %v12149_v15 = vld [vmem:[#allocation97_spill] sm:$0xff] }
 0x55c   :  { %v5488_v45 = vadd.f32 %v5487_v53, %v5319_v6  ;;  %v7894_v14 = vpop.eup %7893  ;;  %v4316_v24 = vadd.f32 %v7892_v13, %v7890_v58  ;;  %v5746_v52 = vmul.f32 %v7892_v13, %v12142_v2  ;;  %7901 = vpow2.f32 %v4016_v4  ;;  %v12150_v53 = vld [vmem:[#allocation95_spill] sm:$0xff] }
 0x55d   :  { %v3678_v5 = vmax.f32 %v12148_v16, %v2845_v40  ;;  %v12151_v36 = vpack.c.b16 %v12149_v15, %v12150_v53  ;;  %7903 = vpow2.f32 %v4208_v10 }
 0x55e   :  { %5360 = vmatmul.bf16.gmra.mxu2 %v12145_v50  ;;  %v7896_v49 = vpop.eup %7895  ;;  %v4380_v30 = vadd.f32 %v7894_v14, %v4316_v24  ;;  %v5810_v58 = vadd.f32 %v5746_v52, %v5682_v60  ;;  %7905 = vtanh.f32 %v5488_v45 }
 0x55f   :  { %5529 = vmatmul.bf16.gmra.mxu3 %v12151_v36  ;;  %v7898_v6 = vpop.eup %7897  ;;  %v6001_v19 = vmul.f32 %v7896_v49, %v5937_v21  ;;  %v3742_v13 = vsub.f32 %v12146_v27, %v3678_v5  ;;  %v3934_v11 = vsub.f32 %v12147_v33, %v3678_v5  ;;  %v4126_v2 = vsub.f32 %v2845_v40, %v3678_v5  ;;  %v12154_v36 = vld [vmem:[#allocation206_spill] sm:$0xff] }
 0x560   :  { %v5874_v47 = vmul.f32 %v7898_v6, %v7894_v14  ;;  %7907 = vrcp.f32 %v4380_v30  ;;  %v2677_v39 = vpop.f32.mrf.mxu0  ;;  %v12152_v49 = vunpack.c.h.bf16 %v12139_v17  ;;  %v12153_v5 = vunpack.c.h.bf16 %v12141_v31  ;;  %v12155_v6 = vld [vmem:[#allocation207_spill] sm:$0xff] }
 0x561   :  { %v5321_v4 = vpop.f32.mrf.mxu2  ;;  %v7040_v18 = vpack.c.bf16 %v6001_v19, %v6000_v26  ;;  %v5490_v12 = vpop.f32.mrf.mxu3  ;;  %v3826_v16 = vmul.f32 1.442695, %v3742_v13  ;;  %v4018_v21 = vmul.f32 1.442695, %v3934_v11  ;;  %v2678_v60 = vadd.f32 %v2677_v39, %v10293_v25 }
 0x562   :  { %v5322_v48 = vadd.f32 %v10523_v3, %v5321_v4  ;;  %v5938_v50 = vadd.f32 %v5874_v47, %v5810_v58  ;;  %v2846_v10 = vpop.f32.mrf.mxu1  ;;  %v7900_v14 = vpop.eup %7899  ;;  %v4210_v45 = vmul.f32 1.442695, %v4126_v2  ;;  %v12156_v19 = vmax.f32 %v12154_v36, %v12155_v6 }
 0x563   :  { %7164 = vst [vmem:[#allocation11 + $0x40] sm:$0xff] %v7040_v18   ;;  %v7902_v52 = vpop.eup %7901  ;;  %v5683_v26 = vmul.f32 %v7900_v14, %v12152_v49  ;;  %7909 = vpow2.f32 %v3826_v16  ;;  %v2847_v40 = vadd.f32 %v2846_v10, %v2678_v60 }
 0x564   :  { %v5491_v24 = vadd.f32 %v5490_v12, %v5322_v48  ;;  %v7904_v27 = vpop.eup %7903  ;;  %v4317_v33 = vadd.f32 %v7902_v52, %v7900_v14  ;;  %v5747_v15 = vmul.f32 %v7902_v52, %v12153_v5  ;;  %7911 = vpow2.f32 %v4018_v21  ;;  %v12157_v52 = vld [vmem:[#allocation40_spill] sm:$0xff]  ;;  %v12159_v5 = vld [vmem:[#allocation42_spill] sm:$0xff] }
 0x565   :  { %v7906_v53 = vpop.eup %7905  ;;  %7913 = vpow2.f32 %v4210_v45  ;;  %v3679_v30 = vmax.f32 %v12156_v19, %v2847_v40  ;;  %v12158_v49 = vunpack.c.l.bf16 %v12157_v52 }
 0x566   :  { %v7908_v58 = vpop.eup %7907  ;;  %v4381_v47 = vadd.f32 %v7904_v27, %v4317_v33  ;;  %v5811_v13 = vadd.f32 %v5747_v15, %v5683_v26  ;;  %v5875_v11 = vmul.f32 %v7906_v53, %v7904_v27  ;;  %7915 = vtanh.f32 %v5491_v24 }
 0x567   :  { %v6002_v17 = vmul.f32 %v7908_v58, %v5938_v50  ;;  %v3743_v4 = vsub.f32 %v12154_v36, %v3679_v30  ;;  %v3935_v18 = vsub.f32 %v12155_v6, %v3679_v30  ;;  %v4127_v2 = vsub.f32 %v2847_v40, %v3679_v30  ;;  %v8456_v6 = vld [vmem:[#allocation2 + $0x98] sm:$0xff] }
 0x568   :  { %7917 = vrcp.f32 %v4381_v47  ;;  %v5939_v48 = vadd.f32 %v5875_v11, %v5811_v13  ;;  %v2680_v16 = vpop.f32.mrf.mxu0  ;;  %v12160_v15 = vunpack.c.l.bf16 %v12159_v5  ;;  %v8457_v30 = vld [vmem:[#allocation5 + $0x98] sm:$0xff] }
 0x569   :  { %v5323_v31 = vpop.f32.mrf.mxu2  ;;  %v5492_v39 = vpop.f32.mrf.mxu3  ;;  %v3828_v60 = vmul.f32 1.442695, %v3743_v4  ;;  %v4020_v10 = vmul.f32 1.442695, %v3935_v18  ;;  %v4212_v14 = vmul.f32 1.442695, %v4127_v2  ;;  %v2681_v45 = vadd.f32 %v2680_v16, %v10293_v25  ;;  %2719 = vmatmul.bf16.gmra.mxu0 %v8456_v6 }
 0x56a   :  { %v5324_v12 = vadd.f32 %v10523_v3, %v5323_v31  ;;  %v7910_v21 = vpop.eup %7909  ;;  %v2849_v24 = vpop.f32.mrf.mxu1  ;;  %v12161_v58 = vld [vmem:[#allocation99_spill] sm:$0xff]  ;;  %v12162_v47 = vld [vmem:[#allocation98_spill] sm:$0xff]  ;;  %v12165_v31 = vld [vmem:[#allocation101_spill] sm:$0xff] }
 0x56b   :  { %v7912_v50 = vpop.eup %7911  ;;  %v5684_v26 = vmul.f32 %v7910_v21, %v12158_v49  ;;  %7919 = vpow2.f32 %v3828_v60  ;;  %v2850_v36 = vadd.f32 %v2849_v24, %v2681_v45  ;;  %2888 = vmatmul.bf16.gmra.mxu1 %v8457_v30  ;;  %v12163_v13 = vpack.c.b16 %v12161_v58, %v12162_v47  ;;  %v12164_v2 = vld [vmem:[#allocation103_spill] sm:$0xff]  ;;  %v12167_v16 = vld [vmem:[#allocation208_spill] sm:$0xff] }
 0x56c   :  { %v5493_v27 = vadd.f32 %v5492_v39, %v5324_v12  ;;  %v7914_v40 = vpop.eup %7913  ;;  %v4318_v33 = vadd.f32 %v7912_v50, %v7910_v21  ;;  %v5748_v53 = vmul.f32 %v7912_v50, %v12160_v15  ;;  %7921 = vpow2.f32 %v4020_v10  ;;  %v12168_v21 = vld [vmem:[#allocation209_spill] sm:$0xff] }
 0x56d   :  { %v7916_v19 = vpop.eup %7915  ;;  %7923 = vpow2.f32 %v4212_v14  ;;  %v12166_v12 = vpack.c.b16 %v12164_v2, %v12165_v31  ;;  %v12169_v60 = vmax.f32 %v12167_v16, %v12168_v21 }
 0x56e   :  { %5365 = vmatmul.bf16.gmra.mxu2 %v12163_v13  ;;  %v4382_v11 = vadd.f32 %v7914_v40, %v4318_v33  ;;  %v5812_v4 = vadd.f32 %v5748_v53, %v5684_v26  ;;  %v5876_v18 = vmul.f32 %v7916_v19, %v7914_v40  ;;  %v7918_v39 = vpop.eup %7917  ;;  %7925 = vtanh.f32 %v5493_v27 }
 0x56f   :  { %5534 = vmatmul.bf16.gmra.mxu3 %v12166_v12  ;;  %v3680_v10 = vmax.f32 %v12169_v60, %v2850_v36  ;;  %v6003_v45 = vmul.f32 %v7918_v39, %v5939_v48  ;;  %v12170_v48 = vunpack.c.h.bf16 %v12157_v52 }
 0x570   :  { %7927 = vrcp.f32 %v4382_v11  ;;  %v5940_v24 = vadd.f32 %v5876_v18, %v5812_v4  ;;  %v2682_v15 = vpop.f32.mrf.mxu0 }
 0x571   :  { %v5326_v50 = vpop.f32.mrf.mxu2  ;;  %v3744_v49 = vsub.f32 %v12167_v16, %v3680_v10  ;;  %v3936_v26 = vsub.f32 %v12168_v21, %v3680_v10  ;;  %v4128_v40 = vsub.f32 %v2850_v36, %v3680_v10  ;;  %v5495_v33 = vpop.f32.mrf.mxu3  ;;  %v7045_v6 = vpack.c.bf16 %v6003_v45, %v6002_v17  ;;  %v12172_v10 = vld [vmem:[#allocation210_spill] sm:$0xff]  ;;  %v12173_v45 = vld [vmem:[#allocation211_spill] sm:$0xff] }
 0x572   :  { %v5327_v14 = vadd.f32 %v10523_v3, %v5326_v50  ;;  %v7920_v53 = vpop.eup %7919  ;;  %v2683_v27 = vadd.f32 %v2682_v15, %v10293_v25  ;;  %v2851_v19 = vpop.f32.mrf.mxu1  ;;  %v12171_v36 = vunpack.c.h.bf16 %v12159_v5  ;;  %v12174_v50 = vmax.f32 %v12172_v10, %v12173_v45 }
 0x573   :  { %v7922_v30 = vpop.eup %7921  ;;  %v5685_v58 = vmul.f32 %v7920_v53, %v12170_v48  ;;  %v3830_v47 = vmul.f32 1.442695, %v3744_v49  ;;  %v4022_v13 = vmul.f32 1.442695, %v3936_v26  ;;  %v4214_v11 = vmul.f32 1.442695, %v4128_v40 }
 0x574   :  { %v7924_v4 = vpop.eup %7923  ;;  %7165 = vst [vmem:[#allocation11 + $0x48] sm:$0xff] %v7045_v6   ;;  %v4319_v18 = vadd.f32 %v7922_v30, %v7920_v53  ;;  %v5749_v2 = vmul.f32 %v7922_v30, %v12171_v36  ;;  %v2852_v31 = vadd.f32 %v2851_v19, %v2683_v27  ;;  %v5496_v17 = vadd.f32 %v5495_v33, %v5327_v14 }
 0x575   :  { %v7926_v12 = vpop.eup %7925  ;;  %7929 = vpow2.f32 %v3830_v47 }
 0x576   :  { %v7928_v39 = vpop.eup %7927  ;;  %v4383_v16 = vadd.f32 %v7924_v4, %v4319_v18  ;;  %v5813_v21 = vadd.f32 %v5749_v2, %v5685_v58  ;;  %v5877_v60 = vmul.f32 %v7926_v12, %v7924_v4  ;;  %7931 = vpow2.f32 %v4022_v13  ;;  %v12175_v13 = vld [vmem:[#allocation46_spill] sm:$0xff]  ;;  %v8458_v2 = vld [vmem:[#allocation2 + $0xa0] sm:$0xff] }
 0x577   :  { %v6004_v52 = vmul.f32 %v7928_v39, %v5940_v24  ;;  %7933 = vpow2.f32 %v4214_v11  ;;  %v3681_v49 = vmax.f32 %v12174_v50, %v2852_v31  ;;  %v12176_v11 = vunpack.c.l.bf16 %v12175_v13 }
 0x578   :  { %7935 = vrcp.f32 %v4383_v16  ;;  %v5941_v26 = vadd.f32 %v5877_v60, %v5813_v21  ;;  %v2685_v53 = vpop.f32.mrf.mxu0  ;;  %v8459_v21 = vld [vmem:[#allocation5 + $0xa0] sm:$0xff]  ;;  %v12179_v60 = vld [vmem:[#allocation105_spill] sm:$0xff] }
 0x579   :  { %v5328_v40 = vpop.f32.mrf.mxu2  ;;  %7937 = vtanh.f32 %v5496_v17  ;;  %v3745_v5 = vsub.f32 %v12172_v10, %v3681_v49  ;;  %v3937_v15 = vsub.f32 %v12173_v45, %v3681_v49  ;;  %v4129_v14 = vsub.f32 %v2852_v31, %v3681_v49  ;;  %v5497_v33 = vpop.f32.mrf.mxu3  ;;  %2724 = vmatmul.bf16.gmra.mxu0 %v8458_v2  ;;  %v12177_v17 = vld [vmem:[#allocation48_spill] sm:$0xff] }
 0x57a   :  { %v5329_v6 = vadd.f32 %v10523_v3, %v5328_v40  ;;  %v2686_v24 = vadd.f32 %v2685_v53, %v10293_v25  ;;  %v2854_v27 = vpop.f32.mrf.mxu1  ;;  %v12178_v39 = vunpack.c.l.bf16 %v12177_v17  ;;  %v12180_v10 = vld [vmem:[#allocation104_spill] sm:$0xff]  ;;  %v12183_v40 = vld [vmem:[#allocation213_spill] sm:$0xff] }
 0x57b   :  { %v7930_v19 = vpop.eup %7929  ;;  %v3832_v30 = vmul.f32 1.442695, %v3745_v5  ;;  %v4024_v48 = vmul.f32 1.442695, %v3937_v15  ;;  %v4216_v58 = vmul.f32 1.442695, %v4129_v14  ;;  %2893 = vmatmul.bf16.gmra.mxu1 %v8459_v21  ;;  %v12181_v45 = vpack.c.b16 %v12179_v60, %v12180_v10 }
 0x57c   :  { %v7932_v47 = vpop.eup %7931  ;;  %v5686_v4 = vmul.f32 %v7930_v19, %v12176_v11  ;;  %v5498_v18 = vadd.f32 %v5497_v33, %v5329_v6  ;;  %v2855_v36 = vadd.f32 %v2854_v27, %v2686_v24  ;;  %v12182_v49 = vld [vmem:[#allocation212_spill] sm:$0xff]  ;;  %v12185_v14 = vld [vmem:[#allocation109_spill] sm:$0xff]  ;;  %v12186_v33 = vld [vmem:[#allocation107_spill] sm:$0xff] }
 0x57d   :  { %v7934_v31 = vpop.eup %7933  ;;  %v4320_v12 = vadd.f32 %v7932_v47, %v7930_v19  ;;  %v5750_v16 = vmul.f32 %v7932_v47, %v12178_v39  ;;  %7939 = vpow2.f32 %v3832_v30  ;;  %v12184_v5 = vmax.f32 %v12182_v49, %v12183_v40 }
 0x57e   :  { %5370 = vmatmul.bf16.gmra.mxu2 %v12181_v45  ;;  %v7936_v50 = vpop.eup %7935  ;;  %7941 = vpow2.f32 %v4024_v48  ;;  %v12187_v53 = vpack.c.b16 %v12185_v14, %v12186_v33 }
 0x57f   :  { %v3682_v15 = vmax.f32 %v12184_v5, %v2855_v36  ;;  %v7938_v6 = vpop.eup %7937  ;;  %v6005_v24 = vmul.f32 %v7936_v50, %v5941_v26  ;;  %v4384_v27 = vadd.f32 %v7934_v31, %v4320_v12  ;;  %v5814_v19 = vadd.f32 %v5750_v16, %v5686_v4 }
 0x580   :  { %5539 = vmatmul.bf16.gmra.mxu3 %v12187_v53  ;;  %7943 = vpow2.f32 %v4216_v58  ;;  %v5878_v30 = vmul.f32 %v7938_v6, %v7934_v31  ;;  %v2687_v10 = vpop.f32.mrf.mxu0  ;;  %v12188_v50 = vunpack.c.h.bf16 %v12175_v13  ;;  %v12190_v53 = vld [vmem:[#allocation214_spill] sm:$0xff]  ;;  %v12191_v6 = vld [vmem:[#allocation215_spill] sm:$0xff] }
 0x581   :  { %7945 = vtanh.f32 %v5498_v18  ;;  %v3746_v47 = vsub.f32 %v12182_v49, %v3682_v15  ;;  %v3938_v11 = vsub.f32 %v12183_v40, %v3682_v15  ;;  %v5331_v48 = vpop.f32.mrf.mxu2  ;;  %v7050_v2 = vpack.c.bf16 %v6005_v24, %v6004_v52  ;;  %v5500_v60 = vpop.f32.mrf.mxu3 }
 0x582   :  { %7947 = vrcp.f32 %v4384_v27  ;;  %v4130_v39 = vsub.f32 %v2855_v36, %v3682_v15  ;;  %v5332_v21 = vadd.f32 %v10523_v3, %v5331_v48  ;;  %v5942_v45 = vadd.f32 %v5878_v30, %v5814_v19  ;;  %v2856_v58 = vpop.f32.mrf.mxu1 }
 0x583   :  { %v3834_v5 = vmul.f32 1.442695, %v3746_v47  ;;  %v4026_v26 = vmul.f32 1.442695, %v3938_v11  ;;  %v2688_v4 = vadd.f32 %v2687_v10, %v10293_v25  ;;  %v7940_v31 = vpop.eup %7939  ;;  %7166 = vst [vmem:[#allocation11 + $0x50] sm:$0xff] %v7050_v2   ;;  %v12189_v15 = vunpack.c.h.bf16 %v12177_v17 }
 0x584   :  { %v4218_v18 = vmul.f32 1.442695, %v4130_v39  ;;  %v5501_v12 = vadd.f32 %v5500_v60, %v5332_v21  ;;  %v7942_v16 = vpop.eup %7941  ;;  %v5687_v52 = vmul.f32 %v7940_v31, %v12188_v50  ;;  %v12192_v24 = vmax.f32 %v12190_v53, %v12191_v6 }
 0x585   :  { %7949 = vpow2.f32 %v3834_v5  ;;  %v2857_v36 = vadd.f32 %v2856_v58, %v2688_v4  ;;  %v4321_v40 = vadd.f32 %v7942_v16, %v7940_v31  ;;  %v5751_v14 = vmul.f32 %v7942_v16, %v12189_v15  ;;  %v12193_v16 = vld [vmem:[#allocation52_spill] sm:$0xff]  ;;  %v12195_v15 = vld [vmem:[#allocation54_spill] sm:$0xff] }
 0x586   :  { %v7944_v49 = vpop.eup %7943  ;;  %7951 = vpow2.f32 %v4026_v26  ;;  %v12194_v50 = vunpack.c.l.bf16 %v12193_v16 }
 0x587   :  { %v7946_v33 = vpop.eup %7945  ;;  %7953 = vpow2.f32 %v4218_v18  ;;  %v3683_v27 = vmax.f32 %v12192_v24, %v2857_v36  ;;  %v4385_v30 = vadd.f32 %v7944_v49, %v4321_v40  ;;  %v5815_v47 = vadd.f32 %v5751_v14, %v5687_v52 }
 0x588   :  { %v7948_v19 = vpop.eup %7947  ;;  %v5879_v11 = vmul.f32 %v7946_v33, %v7944_v49  ;;  %7955 = vtanh.f32 %v5501_v12  ;;  %v2690_v5 = vpop.f32.mrf.mxu0  ;;  %v12196_v14 = vunpack.c.l.bf16 %v12195_v15 }
 0x589   :  { %v6006_v13 = vmul.f32 %v7948_v19, %v5942_v45  ;;  %v3747_v48 = vsub.f32 %v12190_v53, %v3683_v27  ;;  %v3939_v2 = vsub.f32 %v12191_v6, %v3683_v27  ;;  %v4131_v39 = vsub.f32 %v2857_v36, %v3683_v27  ;;  %v5333_v17 = vpop.f32.mrf.mxu2  ;;  %v5502_v10 = vpop.f32.mrf.mxu3  ;;  %v8460_v6 = vld [vmem:[#allocation2 + $0xa8] sm:$0xff]  ;;  %v12197_v19 = vld [vmem:[#allocation111_spill] sm:$0xff] }
 0x58a   :  { %7957 = vrcp.f32 %v4385_v30  ;;  %v5943_v21 = vadd.f32 %v5879_v11, %v5815_v47  ;;  %v5334_v60 = vadd.f32 %v10523_v3, %v5333_v17  ;;  %v2691_v18 = vadd.f32 %v2690_v5, %v10293_v25  ;;  %v2859_v12 = vpop.f32.mrf.mxu1  ;;  %2729 = vmatmul.bf16.gmra.mxu0 %v8460_v6  ;;  %v8461_v27 = vld [vmem:[#allocation5 + $0xa8] sm:$0xff]  ;;  %v12198_v30 = vld [vmem:[#allocation110_spill] sm:$0xff] }
 0x58b   :  { %v7950_v26 = vpop.eup %7949  ;;  %v3836_v4 = vmul.f32 1.442695, %v3747_v48  ;;  %v4028_v58 = vmul.f32 1.442695, %v3939_v2  ;;  %v4220_v31 = vmul.f32 1.442695, %v4131_v39  ;;  %2898 = vmatmul.bf16.gmra.mxu1 %v8461_v27  ;;  %v12199_v47 = vpack.c.b16 %v12197_v19, %v12198_v30 }
 0x58c   :  { %v7952_v45 = vpop.eup %7951  ;;  %v5688_v52 = vmul.f32 %v7950_v26, %v12194_v50  ;;  %v5503_v49 = vadd.f32 %v5502_v10, %v5334_v60  ;;  %v2860_v53 = vadd.f32 %v2859_v12, %v2691_v18  ;;  %v12200_v39 = vld [vmem:[#allocation115_spill] sm:$0xff]  ;;  %v12201_v17 = vld [vmem:[#allocation113_spill] sm:$0xff]  ;;  %v12203_v5 = vld [vmem:[#allocation216_spill] sm:$0xff] }
 0x58d   :  { %v7954_v36 = vpop.eup %7953  ;;  %v4322_v40 = vadd.f32 %v7952_v45, %v7950_v26  ;;  %v5752_v33 = vmul.f32 %v7952_v45, %v12196_v14  ;;  %7959 = vpow2.f32 %v3836_v4  ;;  %v12202_v60 = vpack.c.b16 %v12200_v39, %v12201_v17  ;;  %v12204_v26 = vld [vmem:[#allocation217_spill] sm:$0xff] }
 0x58e   :  { %v7956_v24 = vpop.eup %7955  ;;  %7961 = vpow2.f32 %v4028_v58  ;;  %5375 = vmatmul.bf16.gmra.mxu2 %v12199_v47  ;;  %v12205_v4 = vmax.f32 %v12203_v5, %v12204_v26 }
 0x58f   :  { %v4386_v11 = vadd.f32 %v7954_v36, %v4322_v40  ;;  %v5816_v48 = vadd.f32 %v5752_v33, %v5688_v52  ;;  %v5880_v2 = vmul.f32 %v7956_v24, %v7954_v36  ;;  %7963 = vpow2.f32 %v4220_v31 }
 0x590   :  { %5544 = vmatmul.bf16.gmra.mxu3 %v12202_v60  ;;  %v7958_v10 = vpop.eup %7957  ;;  %7965 = vtanh.f32 %v5503_v49  ;;  %v3684_v58 = vmax.f32 %v12205_v4, %v2860_v53  ;;  %v2692_v14 = vpop.f32.mrf.mxu0 }
 0x591   :  { %v6007_v18 = vmul.f32 %v7958_v10, %v5943_v21  ;;  %7967 = vrcp.f32 %v4386_v11  ;;  %v5944_v12 = vadd.f32 %v5880_v2, %v5816_v48  ;;  %v5336_v45 = vpop.f32.mrf.mxu2  ;;  %v5505_v40 = vpop.f32.mrf.mxu3  ;;  %v2693_v49 = vadd.f32 %v2692_v14, %v10293_v25 }
 0x592   :  { %v3748_v50 = vsub.f32 %v12203_v5, %v3684_v58  ;;  %v3940_v52 = vsub.f32 %v12204_v26, %v3684_v58  ;;  %v4132_v36 = vsub.f32 %v2860_v53, %v3684_v58  ;;  %v5337_v31 = vadd.f32 %v10523_v3, %v5336_v45  ;;  %v2861_v24 = vpop.f32.mrf.mxu1  ;;  %v12208_v58 = vld [vmem:[#allocation218_spill] sm:$0xff] }
 0x593   :  { %v7960_v33 = vpop.eup %7959  ;;  %v7055_v6 = vpack.c.bf16 %v6007_v18, %v6006_v13  ;;  %v12206_v21 = vunpack.c.h.bf16 %v12193_v16  ;;  %v12207_v53 = vunpack.c.h.bf16 %v12195_v15  ;;  %v2862_v17 = vadd.f32 %v2861_v24, %v2693_v49  ;;  %v12209_v18 = vld [vmem:[#allocation219_spill] sm:$0xff] }
 0x594   :  { %v7962_v27 = vpop.eup %7961  ;;  %v3838_v30 = vmul.f32 1.442695, %v3748_v50  ;;  %v4030_v47 = vmul.f32 1.442695, %v3940_v52  ;;  %v4222_v11 = vmul.f32 1.442695, %v4132_v36  ;;  %v5506_v13 = vadd.f32 %v5505_v40, %v5337_v31 }
 0x595   :  { %v5689_v19 = vmul.f32 %v7960_v33, %v12206_v21  ;;  %v7964_v48 = vpop.eup %7963  ;;  %7167 = vst [vmem:[#allocation11 + $0x58] sm:$0xff] %v7055_v6   ;;  %v4323_v2 = vadd.f32 %v7962_v27, %v7960_v33  ;;  %v5753_v39 = vmul.f32 %v7962_v27, %v12207_v53  ;;  %v12210_v45 = vmax.f32 %v12208_v58, %v12209_v18 }
 0x596   :  { %v7966_v60 = vpop.eup %7965  ;;  %7969 = vpow2.f32 %v3838_v30 }
 0x597   :  { %v7968_v10 = vpop.eup %7967  ;;  %v4387_v5 = vadd.f32 %v7964_v48, %v4323_v2  ;;  %v5817_v26 = vadd.f32 %v5753_v39, %v5689_v19  ;;  %v5881_v4 = vmul.f32 %v7966_v60, %v7964_v48  ;;  %7971 = vpow2.f32 %v4030_v47  ;;  %v12211_v47 = vld [vmem:[#allocation58_spill] sm:$0xff] }
 0x598   :  { %v6008_v16 = vmul.f32 %v7968_v10, %v5944_v12  ;;  %7973 = vpow2.f32 %v4222_v11  ;;  %v3685_v50 = vmax.f32 %v12210_v45, %v2862_v17  ;;  %v2695_v33 = vpop.f32.mrf.mxu0  ;;  %v12212_v11 = vunpack.c.l.bf16 %v12211_v47  ;;  %v8462_v39 = vld [vmem:[#allocation2 + $0xb0] sm:$0xff] }
 0x599   :  { %7975 = vrcp.f32 %v4387_v5  ;;  %v5945_v52 = vadd.f32 %v5881_v4, %v5817_v26  ;;  %v5338_v36 = vpop.f32.mrf.mxu2  ;;  %v5507_v40 = vpop.f32.mrf.mxu3  ;;  %v2696_v12 = vadd.f32 %v2695_v33, %v10293_v25  ;;  %v8463_v26 = vld [vmem:[#allocation5 + $0xb0] sm:$0xff] }
 0x59a   :  { %7977 = vtanh.f32 %v5506_v13  ;;  %v3749_v15 = vsub.f32 %v12208_v58, %v3685_v50  ;;  %v3941_v14 = vsub.f32 %v12209_v18, %v3685_v50  ;;  %v4133_v31 = vsub.f32 %v2862_v17, %v3685_v50  ;;  %v2864_v49 = vpop.f32.mrf.mxu1  ;;  %2734 = vmatmul.bf16.gmra.mxu0 %v8462_v39  ;;  %v12213_v13 = vld [vmem:[#allocation60_spill] sm:$0xff]  ;;  %v12215_v4 = vld [vmem:[#allocation117_spill] sm:$0xff] }
 0x59b   :  { %v5339_v6 = vadd.f32 %v10523_v3, %v5338_v36  ;;  %v2865_v53 = vadd.f32 %v2864_v49, %v2696_v12  ;;  %v12214_v10 = vunpack.c.l.bf16 %v12213_v13  ;;  %2903 = vmatmul.bf16.gmra.mxu1 %v8463_v26  ;;  %v12216_v58 = vld [vmem:[#allocation116_spill] sm:$0xff]  ;;  %v12219_v36 = vld [vmem:[#allocation221_spill] sm:$0xff] }
 0x59c   :  { %v7970_v24 = vpop.eup %7969  ;;  %v3840_v27 = vmul.f32 1.442695, %v3749_v15  ;;  %v4032_v21 = vmul.f32 1.442695, %v3941_v14  ;;  %v4224_v19 = vmul.f32 1.442695, %v4133_v31  ;;  %v12217_v18 = vpack.c.b16 %v12215_v4, %v12216_v58 }
 0x59d   :  { %v7972_v30 = vpop.eup %7971  ;;  %v5690_v48 = vmul.f32 %v7970_v24, %v12212_v11  ;;  %v5508_v2 = vadd.f32 %v5507_v40, %v5339_v6  ;;  %v12218_v50 = vld [vmem:[#allocation220_spill] sm:$0xff]  ;;  %v12221_v31 = vld [vmem:[#allocation121_spill] sm:$0xff]  ;;  %v12222_v40 = vld [vmem:[#allocation119_spill] sm:$0xff] }
 0x59e   :  { %v7974_v17 = vpop.eup %7973  ;;  %v4324_v60 = vadd.f32 %v7972_v30, %v7970_v24  ;;  %v5754_v5 = vmul.f32 %v7972_v30, %v12214_v10  ;;  %7979 = vpow2.f32 %v3840_v27  ;;  %5380 = vmatmul.bf16.gmra.mxu2 %v12217_v18  ;;  %v12220_v15 = vmax.f32 %v12218_v50, %v12219_v36 }
 0x59f   :  { %v7976_v45 = vpop.eup %7975  ;;  %7981 = vpow2.f32 %v4032_v21  ;;  %v12223_v33 = vpack.c.b16 %v12221_v31, %v12222_v40 }
 0x5a0   :  { %v3686_v14 = vmax.f32 %v12220_v15, %v2865_v53  ;;  %v7978_v6 = vpop.eup %7977  ;;  %v6009_v12 = vmul.f32 %v7976_v45, %v5945_v52  ;;  %v4388_v49 = vadd.f32 %v7974_v17, %v4324_v60  ;;  %v5818_v24 = vadd.f32 %v5754_v5, %v5690_v48  ;;  %v2697_v58 = vpop.f32.mrf.mxu0 }
 0x5a1   :  { %5549 = vmatmul.bf16.gmra.mxu3 %v12223_v33  ;;  %7983 = vpow2.f32 %v4224_v19  ;;  %v5882_v27 = vmul.f32 %v7978_v6, %v7974_v17  ;;  %v5341_v21 = vpop.f32.mrf.mxu2  ;;  %v5510_v4 = vpop.f32.mrf.mxu3  ;;  %v2698_v48 = vadd.f32 %v2697_v58, %v10293_v25  ;;  %v12224_v45 = vunpack.c.h.bf16 %v12211_v47  ;;  %v12226_v33 = vld [vmem:[#allocation222_spill] sm:$0xff]  ;;  %v12227_v6 = vld [vmem:[#allocation223_spill] sm:$0xff] }
 0x5a2   :  { %7985 = vtanh.f32 %v5508_v2  ;;  %v3750_v30 = vsub.f32 %v12218_v50, %v3686_v14  ;;  %v3942_v11 = vsub.f32 %v12219_v36, %v3686_v14  ;;  %v7060_v39 = vpack.c.bf16 %v6009_v12, %v6008_v16  ;;  %v2866_v19 = vpop.f32.mrf.mxu1 }
 0x5a3   :  { %7987 = vrcp.f32 %v4388_v49  ;;  %v4134_v10 = vsub.f32 %v2865_v53, %v3686_v14  ;;  %v5342_v26 = vadd.f32 %v10523_v3, %v5341_v21  ;;  %v5946_v18 = vadd.f32 %v5882_v27, %v5818_v24 }
 0x5a4   :  { %v3842_v15 = vmul.f32 1.442695, %v3750_v30  ;;  %v4034_v52 = vmul.f32 1.442695, %v3942_v11  ;;  %v7980_v17 = vpop.eup %7979  ;;  %7168 = vst [vmem:[#allocation11 + $0x60] sm:$0xff] %v7060_v39   ;;  %v2867_v53 = vadd.f32 %v2866_v19, %v2698_v48  ;;  %v12225_v14 = vunpack.c.h.bf16 %v12213_v13 }
 0x5a5   :  { %v4226_v2 = vmul.f32 1.442695, %v4134_v10  ;;  %v5511_v60 = vadd.f32 %v5510_v4, %v5342_v26  ;;  %v7982_v5 = vpop.eup %7981  ;;  %v5691_v16 = vmul.f32 %v7980_v17, %v12224_v45  ;;  %v12228_v12 = vmax.f32 %v12226_v33, %v12227_v6 }
 0x5a6   :  { %7989 = vpow2.f32 %v3842_v15  ;;  %v4325_v36 = vadd.f32 %v7982_v5, %v7980_v17  ;;  %v5755_v31 = vmul.f32 %v7982_v5, %v12225_v14  ;;  %v12229_v5 = vld [vmem:[#allocation64_spill] sm:$0xff]  ;;  %v12231_v14 = vld [vmem:[#allocation66_spill] sm:$0xff] }
 0x5a7   :  { %v7984_v50 = vpop.eup %7983  ;;  %7991 = vpow2.f32 %v4034_v52  ;;  %v3687_v49 = vmax.f32 %v12228_v12, %v2867_v53  ;;  %v12230_v45 = vunpack.c.l.bf16 %v12229_v5  ;;  %v8465_v12 = vld [vmem:[#allocation5 + $0xb8] sm:$0xff] }
 0x5a8   :  { %v7986_v40 = vpop.eup %7985  ;;  %7993 = vpow2.f32 %v4226_v2  ;;  %v4389_v27 = vadd.f32 %v7984_v50, %v4325_v36  ;;  %v5819_v30 = vadd.f32 %v5755_v31, %v5691_v16  ;;  %v2700_v15 = vpop.f32.mrf.mxu0  ;;  %v12232_v31 = vunpack.c.l.bf16 %v12231_v14 }
 0x5a9   :  { %v7988_v24 = vpop.eup %7987  ;;  %v5883_v11 = vmul.f32 %v7986_v40, %v7984_v50  ;;  %7995 = vtanh.f32 %v5511_v60  ;;  %v3751_v21 = vsub.f32 %v12226_v33, %v3687_v49  ;;  %v3943_v39 = vsub.f32 %v12227_v6, %v3687_v49  ;;  %v5343_v13 = vpop.f32.mrf.mxu2  ;;  %v8464_v33 = vld [vmem:[#allocation2 + $0xb8] sm:$0xff] }
 0x5aa   :  { %v6010_v47 = vmul.f32 %v7988_v24, %v5946_v18  ;;  %v4135_v10 = vsub.f32 %v2867_v53, %v3687_v49  ;;  %7997 = vrcp.f32 %v4389_v27  ;;  %v5344_v4 = vadd.f32 %v10523_v3, %v5343_v13  ;;  %v5512_v58 = vpop.f32.mrf.mxu3  ;;  %v2869_v60 = vpop.f32.mrf.mxu1  ;;  %2739 = vmatmul.bf16.gmra.mxu0 %v8464_v33  ;;  %v12233_v49 = vld [vmem:[#allocation123_spill] sm:$0xff]  ;;  %v12234_v24 = vld [vmem:[#allocation122_spill] sm:$0xff] }
 0x5ab   :  { %v5947_v26 = vadd.f32 %v5883_v11, %v5819_v30  ;;  %v3844_v48 = vmul.f32 1.442695, %v3751_v21  ;;  %v4036_v19 = vmul.f32 1.442695, %v3943_v39  ;;  %v2701_v2 = vadd.f32 %v2700_v15, %v10293_v25  ;;  %2908 = vmatmul.bf16.gmra.mxu1 %v8465_v12  ;;  %v12236_v39 = vld [vmem:[#allocation127_spill] sm:$0xff]  ;;  %v12240_v15 = vld [vmem:[#allocation225_spill] sm:$0xff] }
 0x5ac   :  { %v7990_v52 = vpop.eup %7989  ;;  %v4228_v17 = vmul.f32 1.442695, %v4135_v10  ;;  %v5513_v50 = vadd.f32 %v5512_v58, %v5344_v4  ;;  %v12235_v27 = vpack.c.b16 %v12233_v49, %v12234_v24  ;;  %v12237_v10 = vld [vmem:[#allocation125_spill] sm:$0xff]  ;;  %v12239_v58 = vld [vmem:[#allocation224_spill] sm:$0xff]  ;;  %v12242_v12 = vunpack.c.h.bf16 %v12229_v5 }
 0x5ad   :  { %v7992_v18 = vpop.eup %7991  ;;  %v5692_v16 = vmul.f32 %v7990_v52, %v12230_v45  ;;  %7999 = vpow2.f32 %v3844_v48  ;;  %v2870_v3 = vadd.f32 %v2869_v60, %v2701_v2  ;;  %v12238_v13 = vpack.c.b16 %v12236_v39, %v12237_v10 }
 0x5ae   :  { %v7994_v53 = vpop.eup %7993  ;;  %v4326_v36 = vadd.f32 %v7992_v18, %v7990_v52  ;;  %v5756_v40 = vmul.f32 %v7992_v18, %v12232_v31  ;;  %8001 = vpow2.f32 %v4036_v19  ;;  %5385 = vmatmul.bf16.gmra.mxu2 %v12235_v27  ;;  %v12241_v52 = vmax.f32 %v12239_v58, %v12240_v15 }
 0x5af   :  { %v7996_v6 = vpop.eup %7995  ;;  %8003 = vpow2.f32 %v4228_v17  ;;  %v10741_v17 = vld [vmem:[%s11184_s5] ss:$0 sm:$0xff] }
 0x5b0   :  { %v4390_v30 = vadd.f32 %v7994_v53, %v4326_v36  ;;  %v5820_v11 = vadd.f32 %v5756_v40, %v5692_v16  ;;  %v5884_v21 = vmul.f32 %v7996_v6, %v7994_v53  ;;  %v7998_v4 = vpop.eup %7997  ;;  %8005 = vtanh.f32 %v5513_v50  ;;  %v2702_v36 = vpop.f32.mrf.mxu0 }
 0x5b1   :  { %5554 = vmatmul.bf16.gmra.mxu3 %v12238_v13  ;;  %v3688_v48 = vmax.f32 %v12241_v52, %v2870_v3  ;;  %v6011_v19 = vmul.f32 %v7998_v4, %v5947_v26  ;;  %v5346_v60 = vpop.f32.mrf.mxu2  ;;  %v2703_v26 = vadd.f32 %v2702_v36, %v10293_v25 }
 0x5b2   :  { %8007 = vrcp.f32 %v4390_v30  ;;  %v5948_v2 = vadd.f32 %v5884_v21, %v5820_v11  ;;  %v5347_v50 = vadd.f32 %v10741_v17, %v5346_v60  ;;  %v5515_v53 = vpop.f32.mrf.mxu3  ;;  %v2871_v33 = vpop.f32.mrf.mxu1  ;;  %v12243_v21 = vunpack.c.h.bf16 %v12231_v14 }
 0x5b3   :  { %v3752_v18 = vsub.f32 %v12239_v58, %v3688_v48  ;;  %v3944_v45 = vsub.f32 %v12240_v15, %v3688_v48  ;;  %v4136_v16 = vsub.f32 %v2870_v3, %v3688_v48  ;;  %v8000_v31 = vpop.eup %7999  ;;  %v7065_v40 = vpack.c.bf16 %v6011_v19, %v6010_v47  ;;  %v12244_v48 = vld [vmem:[#allocation226_spill] sm:$0xff]  ;;  %v12245_v19 = vld [vmem:[#allocation227_spill] sm:$0xff] }
 0x5b4   :  { %v8002_v6 = vpop.eup %8001  ;;  %v5693_v49 = vmul.f32 %v8000_v31, %v12242_v12  ;;  %v2872_v10 = vadd.f32 %v2871_v33, %v2703_v26  ;;  %v5516_v47 = vadd.f32 %v5515_v53, %v5347_v50  ;;  %v12246_v60 = vmax.f32 %v12244_v48, %v12245_v19 }
 0x5b5   :  { %v3846_v24 = vmul.f32 1.442695, %v3752_v18  ;;  %v4038_v3 = vmul.f32 1.442695, %v3944_v45  ;;  %v4230_v27 = vmul.f32 1.442695, %v4136_v16  ;;  %v8004_v30 = vpop.eup %8003  ;;  %v4327_v11 = vadd.f32 %v8002_v6, %v8000_v31 }
 0x5b6   :  { %7169 = vst [vmem:[#allocation11 + $0x68] sm:$0xff] %v7065_v40   ;;  %v5757_v39 = vmul.f32 %v8002_v6, %v12243_v21  ;;  %v8006_v13 = vpop.eup %8005  ;;  %v3689_v18 = vmax.f32 %v12246_v60, %v2872_v10 }
 0x5b7   :  { %8009 = vpow2.f32 %v3846_v24  ;;  %v4391_v58 = vadd.f32 %v8004_v30, %v4327_v11  ;;  %v5885_v52 = vmul.f32 %v8006_v13, %v8004_v30 }
 0x5b8   :  { %v8008_v4 = vpop.eup %8007  ;;  %v5821_v15 = vadd.f32 %v5757_v39, %v5693_v49  ;;  %8011 = vpow2.f32 %v4038_v3  ;;  %v3753_v14 = vsub.f32 %v12244_v48, %v3689_v18  ;;  %v3945_v36 = vsub.f32 %v12245_v19, %v3689_v18  ;;  %v2705_v31 = vpop.f32.mrf.mxu0  ;;  %v12247_v3 = vld [vmem:[#allocation70_spill] sm:$0xff]  ;;  %v8467_v39 = vld [vmem:[#allocation2 + $0xc0] sm:$0xff] }
 0x5b9   :  { %v6012_v5 = vmul.f32 %v8008_v4, %v5948_v2  ;;  %8013 = vpow2.f32 %v4230_v27  ;;  %v5348_v16 = vpop.f32.mrf.mxu2  ;;  %v4137_v50 = vsub.f32 %v2872_v10, %v3689_v18  ;;  %v2706_v2 = vadd.f32 %v2705_v31, %v10293_v25  ;;  %v12252_v48 = vld [vmem:[#allocation128_spill] sm:$0xff] }
 0x5ba   :  { %8015 = vrcp.f32 %v4391_v58  ;;  %v5949_v45 = vadd.f32 %v5885_v52, %v5821_v15  ;;  %v5517_v53 = vpop.f32.mrf.mxu3  ;;  %v5349_v40 = vadd.f32 %v10741_v17, %v5348_v16  ;;  %v2874_v26 = vpop.f32.mrf.mxu1  ;;  %v3848_v6 = vmul.f32 1.442695, %v3753_v14  ;;  %2744 = vmatmul.bf16.gmra.mxu0 %v8467_v39  ;;  %v8468_v15 = vld [vmem:[#allocation5 + $0xc0] sm:$0xff]  ;;  %v12251_v52 = vld [vmem:[#allocation129_spill] sm:$0xff] }
 0x5bb   :  { %8017 = vtanh.f32 %v5516_v47  ;;  %v4040_v12 = vmul.f32 1.442695, %v3945_v36  ;;  %v4232_v49 = vmul.f32 1.442695, %v4137_v50  ;;  %v12248_v27 = vunpack.c.l.bf16 %v12247_v3  ;;  %v12249_v47 = vld [vmem:[#allocation72_spill] sm:$0xff]  ;;  %2913 = vmatmul.bf16.gmra.mxu1 %v8468_v15  ;;  %v12255_v16 = vld [vmem:[#allocation229_spill] sm:$0xff] }
 0x5bc   :  { %v5518_v11 = vadd.f32 %v5517_v53, %v5349_v40  ;;  %v2875_v21 = vadd.f32 %v2874_v26, %v2706_v2  ;;  %v12250_v4 = vunpack.c.l.bf16 %v12249_v47  ;;  %8019 = vpow2.f32 %v3848_v6  ;;  %v12254_v18 = vld [vmem:[#allocation228_spill] sm:$0xff]  ;;  %v12257_v50 = vld [vmem:[#allocation133_spill] sm:$0xff]  ;;  %v12258_v53 = vld [vmem:[#allocation131_spill] sm:$0xff] }
 0x5bd   :  { %v8010_v33 = vpop.eup %8009  ;;  %v12253_v19 = vpack.c.b16 %v12251_v52, %v12252_v48  ;;  %8021 = vpow2.f32 %v4040_v12  ;;  %v12256_v14 = vmax.f32 %v12254_v18, %v12255_v16  ;;  %v12259_v31 = vpack.c.b16 %v12257_v50, %v12258_v53 }
 0x5be   :  { %v8012_v24 = vpop.eup %8011  ;;  %v5694_v30 = vmul.f32 %v8010_v33, %v12248_v27  ;;  %8023 = vpow2.f32 %v4232_v49 }
 0x5bf   :  { %v8014_v10 = vpop.eup %8013  ;;  %v4328_v13 = vadd.f32 %v8012_v24, %v8010_v33  ;;  %v5758_v58 = vmul.f32 %v8012_v24, %v12250_v4  ;;  %5390 = vmatmul.bf16.gmra.mxu2 %v12253_v19  ;;  %v3690_v36 = vmax.f32 %v12256_v14, %v2875_v21  ;;  %8025 = vtanh.f32 %v5518_v11 }
 0x5c0   :  { %v8016_v60 = vpop.eup %8015  ;;  %v2707_v48 = vpop.f32.mrf.mxu0 }
 0x5c1   :  { %5559 = vmatmul.bf16.gmra.mxu3 %v12259_v31  ;;  %v8018_v40 = vpop.eup %8017  ;;  %v6013_v2 = vmul.f32 %v8016_v60, %v5949_v45  ;;  %v4392_v26 = vadd.f32 %v8014_v10, %v4328_v13  ;;  %v5822_v33 = vadd.f32 %v5758_v58, %v5694_v30  ;;  %v3754_v24 = vsub.f32 %v12254_v18, %v3690_v36  ;;  %v5351_v12 = vpop.f32.mrf.mxu2  ;;  %v12262_v31 = vld [vmem:[#allocation230_spill] sm:$0xff] }
 0x5c2   :  { %v5886_v6 = vmul.f32 %v8018_v40, %v8014_v10  ;;  %v3946_v27 = vsub.f32 %v12255_v16, %v3690_v36  ;;  %v4138_v4 = vsub.f32 %v2875_v21, %v3690_v36  ;;  %v5352_v15 = vadd.f32 %v10741_v17, %v5351_v12  ;;  %v5520_v52 = vpop.f32.mrf.mxu3  ;;  %v2876_v49 = vpop.f32.mrf.mxu1  ;;  %v12263_v40 = vld [vmem:[#allocation231_spill] sm:$0xff] }
 0x5c3   :  { %v7070_v39 = vpack.c.bf16 %v6013_v2, %v6012_v5  ;;  %8027 = vrcp.f32 %v4392_v26  ;;  %v3850_v14 = vmul.f32 1.442695, %v3754_v24  ;;  %v2708_v30 = vadd.f32 %v2707_v48, %v10293_v25  ;;  %v8020_v10 = vpop.eup %8019 }
 0x5c4   :  { %v5950_v19 = vadd.f32 %v5886_v6, %v5822_v33  ;;  %v4042_v45 = vmul.f32 1.442695, %v3946_v27  ;;  %v4234_v11 = vmul.f32 1.442695, %v4138_v4  ;;  %v5521_v13 = vadd.f32 %v5520_v52, %v5352_v15  ;;  %v8022_v58 = vpop.eup %8021 }
 0x5c5   :  { %7170 = vst [vmem:[#allocation11 + $0x70] sm:$0xff] %v7070_v39   ;;  %v12260_v60 = vunpack.c.h.bf16 %v12247_v3  ;;  %8029 = vpow2.f32 %v3850_v14  ;;  %v2877_v21 = vadd.f32 %v2876_v49, %v2708_v30  ;;  %v8024_v18 = vpop.eup %8023  ;;  %v4329_v16 = vadd.f32 %v8022_v58, %v8020_v10 }
 0x5c6   :  { %v12261_v36 = vunpack.c.h.bf16 %v12249_v47  ;;  %8031 = vpow2.f32 %v4042_v45  ;;  %v8026_v53 = vpop.eup %8025  ;;  %v12264_v2 = vmax.f32 %v12262_v31, %v12263_v40 }
 0x5c7   :  { %v5695_v5 = vmul.f32 %v8020_v10, %v12260_v60  ;;  %8033 = vpow2.f32 %v4234_v11  ;;  %v4393_v6 = vadd.f32 %v8024_v18, %v4329_v16  ;;  %v5887_v27 = vmul.f32 %v8026_v53, %v8024_v18 }
 0x5c8   :  { %v5759_v50 = vmul.f32 %v8022_v58, %v12261_v36  ;;  %v3691_v26 = vmax.f32 %v12264_v2, %v2877_v21  ;;  %8035 = vtanh.f32 %v5521_v13  ;;  %v2710_v14 = vpop.f32.mrf.mxu0  ;;  %v12265_v58 = vld [vmem:[#allocation76_spill] sm:$0xff]  ;;  %v12267_v36 = vld [vmem:[#allocation78_spill] sm:$0xff] }
 0x5c9   :  { %v8028_v33 = vpop.eup %8027  ;;  %v5353_v47 = vpop.f32.mrf.mxu2  ;;  %8037 = vrcp.f32 %v4393_v6  ;;  %v2711_v11 = vadd.f32 %v2710_v14, %v10293_v25  ;;  %v12266_v60 = vunpack.c.l.bf16 %v12265_v58  ;;  %v12270_v6 = vld [vmem:[#allocation134_spill] sm:$0xff]  ;;  %v12275_v14 = vld [vmem:[#allocation232_spill] sm:$0xff] }
 0x5ca   :  { %v5823_v24 = vadd.f32 %v5759_v50, %v5695_v5  ;;  %v6014_v3 = vmul.f32 %v8028_v33, %v5950_v19  ;;  %v3755_v12 = vsub.f32 %v12262_v31, %v3691_v26  ;;  %v3947_v39 = vsub.f32 %v12263_v40, %v3691_v26  ;;  %v5522_v48 = vpop.f32.mrf.mxu3  ;;  %v2879_v13 = vpop.f32.mrf.mxu1  ;;  %v8469_v40 = vld [vmem:[#allocation2 + $0xc8] sm:$0xff]  ;;  %v12269_v33 = vld [vmem:[#allocation135_spill] sm:$0xff] }
 0x5cb   :  { %v4139_v4 = vsub.f32 %v2877_v21, %v3691_v26  ;;  %v5354_v52 = vadd.f32 %v10741_v17, %v5353_v47  ;;  %v8030_v45 = vpop.eup %8029  ;;  %v12268_v50 = vunpack.c.l.bf16 %v12267_v36  ;;  %v2880_v31 = vadd.f32 %v2879_v13, %v2711_v11  ;;  %2749 = vmatmul.bf16.gmra.mxu0 %v8469_v40  ;;  %v8470_v26 = vld [vmem:[#allocation5 + $0xc8] sm:$0xff] }
 0x5cc   :  { %v5951_v15 = vadd.f32 %v5887_v27, %v5823_v24  ;;  %v3852_v30 = vmul.f32 1.442695, %v3755_v12  ;;  %v4044_v49 = vmul.f32 1.442695, %v3947_v39  ;;  %v8032_v19 = vpop.eup %8031  ;;  %v5696_v5 = vmul.f32 %v8030_v45, %v12266_v60  ;;  %2918 = vmatmul.bf16.gmra.mxu1 %v8470_v26  ;;  %v12273_v47 = vld [vmem:[#allocation137_spill] sm:$0xff] }
 0x5cd   :  { %v4236_v10 = vmul.f32 1.442695, %v4139_v4  ;;  %v5523_v18 = vadd.f32 %v5522_v48, %v5354_v52  ;;  %v8034_v21 = vpop.eup %8033  ;;  %v4330_v16 = vadd.f32 %v8032_v19, %v8030_v45  ;;  %v5760_v53 = vmul.f32 %v8032_v19, %v12268_v50  ;;  %v12272_v4 = vld [vmem:[#allocation139_spill] sm:$0xff]  ;;  %v12276_v45 = vld [vmem:[#allocation233_spill] sm:$0xff] }
 0x5ce   :  { %8039 = vpow2.f32 %v3852_v30  ;;  %v8036_v2 = vpop.eup %8035  ;;  %v12271_v24 = vpack.c.b16 %v12269_v33, %v12270_v6  ;;  %v12274_v52 = vpack.c.b16 %v12272_v4, %v12273_v47  ;;  %v12277_v30 = vmax.f32 %v12275_v14, %v12276_v45 }
 0x5cf   :  { %8041 = vpow2.f32 %v4044_v49  ;;  %v4394_v27 = vadd.f32 %v8034_v21, %v4330_v16  ;;  %v5824_v12 = vadd.f32 %v5760_v53, %v5696_v5  ;;  %v5888_v39 = vmul.f32 %v8036_v2, %v8034_v21  ;;  %v8038_v48 = vpop.eup %8037 }
 0x5d0   :  { %5395 = vmatmul.bf16.gmra.mxu2 %v12271_v24  ;;  %8043 = vpow2.f32 %v4236_v10  ;;  %v3692_v49 = vmax.f32 %v12277_v30, %v2880_v31  ;;  %v6015_v11 = vmul.f32 %v8038_v48, %v5951_v15  ;;  %v2712_v50 = vpop.f32.mrf.mxu0  ;;  %v12278_v15 = vunpack.c.h.bf16 %v12265_v58 }
 0x5d1   :  { %5564 = vmatmul.bf16.gmra.mxu3 %v12274_v52  ;;  %8045 = vtanh.f32 %v5523_v18  ;;  %v5952_v13 = vadd.f32 %v5888_v39, %v5824_v12  ;;  %v5356_v19 = vpop.f32.mrf.mxu2  ;;  %v2713_v18 = vadd.f32 %v2712_v50, %v10293_v25 }
 0x5d2   :  { %8047 = vrcp.f32 %v4394_v27  ;;  %v3756_v60 = vsub.f32 %v12275_v14, %v3692_v49  ;;  %v3948_v5 = vsub.f32 %v12276_v45, %v3692_v49  ;;  %v4140_v21 = vsub.f32 %v2880_v31, %v3692_v49  ;;  %v5525_v16 = vpop.f32.mrf.mxu3  ;;  %v2881_v2 = vpop.f32.mrf.mxu1  ;;  %v12280_v49 = vld [vmem:[#allocation234_spill] sm:$0xff] }
 0x5d3   :  { %v5357_v10 = vadd.f32 %v10741_v17, %v5356_v19  ;;  %v7075_v40 = vpack.c.bf16 %v6015_v11, %v6014_v3  ;;  %v12279_v31 = vunpack.c.h.bf16 %v12267_v36  ;;  %v2882_v47 = vadd.f32 %v2881_v2, %v2713_v18 }
 0x5d4   :  { %v8040_v53 = vpop.eup %8039  ;;  %v3854_v6 = vmul.f32 1.442695, %v3756_v60  ;;  %v4046_v24 = vmul.f32 1.442695, %v3948_v5  ;;  %v4238_v27 = vmul.f32 1.442695, %v4140_v21  ;;  %v12281_v11 = vmax.f32 %v10017_v51, %v12280_v49 }
 0x5d5   :  { %v8042_v26 = vpop.eup %8041  ;;  %v5697_v33 = vmul.f32 %v8040_v53, %v12278_v15  ;;  %7171 = vst [vmem:[#allocation11 + $0x78] sm:$0xff] %v7075_v40   ;;  %v5526_v3 = vadd.f32 %v5525_v16, %v5357_v10 }
 0x5d6   :  { %v8044_v12 = vpop.eup %8043  ;;  %v4331_v39 = vadd.f32 %v8042_v26, %v8040_v53  ;;  %v5761_v4 = vmul.f32 %v8042_v26, %v12279_v31  ;;  %8049 = vpow2.f32 %v3854_v6  ;;  %v3693_v19 = vmax.f32 %v12281_v11, %v2882_v47  ;;  %v12282_v6 = vld [vmem:[#allocation82_spill] sm:$0xff]  ;;  %v12289_v11 = vld [vmem:[#allocation235_spill] sm:$0xff] }
 0x5d7   :  { %v8046_v52 = vpop.eup %8045  ;;  %8051 = vpow2.f32 %v4046_v24  ;;  %v12283_v24 = vunpack.c.l.bf16 %v12282_v6 }
 0x5d8   :  { %v8048_v48 = vpop.eup %8047  ;;  %v4395_v14 = vadd.f32 %v8044_v12, %v4331_v39  ;;  %v5825_v45 = vadd.f32 %v5761_v4, %v5697_v33  ;;  %v5889_v30 = vmul.f32 %v8046_v52, %v8044_v12  ;;  %8053 = vpow2.f32 %v4238_v27  ;;  %v2715_v50 = vpop.f32.mrf.mxu0  ;;  %v8471_v39 = vld [vmem:[#allocation2 + $0xd0] sm:$0xff] }
 0x5d9   :  { %v6016_v58 = vmul.f32 %v8048_v48, %v5952_v13  ;;  %v5358_v5 = vpop.f32.mrf.mxu2  ;;  %v3757_v36 = vsub.f32 %v10017_v51, %v3693_v19  ;;  %v3949_v21 = vsub.f32 %v12280_v49, %v3693_v19  ;;  %v4141_v10 = vsub.f32 %v2882_v47, %v3693_v19  ;;  %v12284_v47 = vld [vmem:[#allocation84_spill] sm:$0xff]  ;;  %v8472_v48 = vld [vmem:[#allocation5 + $0xd0] sm:$0xff] }
 0x5da   :  { %8055 = vrcp.f32 %v4395_v14  ;;  %v5953_v60 = vadd.f32 %v5889_v30, %v5825_v45  ;;  %v5527_v16 = vpop.f32.mrf.mxu3  ;;  %v5359_v53 = vadd.f32 %v10741_v17, %v5358_v5  ;;  %v2716_v13 = vadd.f32 %v2715_v50, %v10293_v25  ;;  %v2884_v40 = vpop.f32.mrf.mxu1  ;;  %v12286_v14 = vld [vmem:[#allocation141_spill] sm:$0xff]  ;;  %v12287_v45 = vld [vmem:[#allocation140_spill] sm:$0xff] }
 0x5db   :  { %8057 = vtanh.f32 %v5526_v3  ;;  %v3856_v2 = vmul.f32 1.442695, %v3757_v36  ;;  %v4048_v26 = vmul.f32 1.442695, %v3949_v21  ;;  %v4240_v15 = vmul.f32 1.442695, %v4141_v10  ;;  %2754 = vmatmul.bf16.gmra.mxu0 %v8471_v39 }
 0x5dc   :  { %v8050_v18 = vpop.eup %8049  ;;  %v5528_v12 = vadd.f32 %v5527_v16, %v5359_v53  ;;  %v2885_v51 = vadd.f32 %v2884_v40, %v2716_v13  ;;  %v12285_v52 = vunpack.c.l.bf16 %v12284_v47  ;;  %2923 = vmatmul.bf16.gmra.mxu1 %v8472_v48  ;;  %v12288_v30 = vpack.c.b16 %v12286_v14, %v12287_v45  ;;  %v12290_v19 = vld [vmem:[#allocation236_spill] sm:$0xff]  ;;  %v12292_v21 = vld [vmem:[#allocation145_spill] sm:$0xff]  ;;  %v12293_v10 = vld [vmem:[#allocation143_spill] sm:$0xff] }
 0x5dd   :  { %v8052_v33 = vpop.eup %8051  ;;  %v5698_v27 = vmul.f32 %v8050_v18, %v12283_v24  ;;  %8059 = vpow2.f32 %v3856_v2  ;;  %v12291_v5 = vmax.f32 %v12289_v11, %v12290_v19  ;;  %v12294_v16 = vpack.c.b16 %v12292_v21, %v12293_v10  ;;  %v12297_v10 = vld [vmem:[#allocation237_spill] sm:$0xff] }
 0x5de   :  { %v8054_v31 = vpop.eup %8053  ;;  %v4332_v4 = vadd.f32 %v8052_v33, %v8050_v18  ;;  %v5762_v3 = vmul.f32 %v8052_v33, %v12285_v52  ;;  %8061 = vpow2.f32 %v4048_v26 }
 0x5df   :  { %v3694_v36 = vmax.f32 %v12291_v5, %v2885_v51  ;;  %8063 = vpow2.f32 %v4240_v15  ;;  %v12296_v5 = vunpack.c.h.bf16 %v12284_v47 }
 0x5e0   :  { %5400 = vmatmul.bf16.gmra.mxu2 %v12288_v30  ;;  %v8056_v49 = vpop.eup %8055  ;;  %v4396_v13 = vadd.f32 %v8054_v31, %v4332_v4  ;;  %v5826_v40 = vadd.f32 %v5762_v3, %v5698_v27  ;;  %8065 = vtanh.f32 %v5528_v12  ;;  %v2717_v14 = vpop.f32.mrf.mxu0 }
 0x5e1   :  { %5569 = vmatmul.bf16.gmra.mxu3 %v12294_v16  ;;  %v8058_v50 = vpop.eup %8057  ;;  %v6017_v53 = vmul.f32 %v8056_v49, %v5953_v60  ;;  %v3758_v2 = vsub.f32 %v12289_v11, %v3694_v36  ;;  %v3950_v33 = vsub.f32 %v12290_v19, %v3694_v36  ;;  %v5361_v26 = vpop.f32.mrf.mxu2  ;;  %v4142_v39 = vsub.f32 %v2885_v51, %v3694_v36  ;;  %v12298_v16 = vld [vmem:[#allocation238_spill] sm:$0xff] }
 0x5e2   :  { %v5890_v18 = vmul.f32 %v8058_v50, %v8054_v31  ;;  %8067 = vrcp.f32 %v4396_v13  ;;  %v5362_v52 = vadd.f32 %v10741_v17, %v5361_v26  ;;  %v5530_v48 = vpop.f32.mrf.mxu3  ;;  %v2718_v27 = vadd.f32 %v2717_v14, %v10293_v25  ;;  %v2886_v15 = vpop.f32.mrf.mxu1 }
 0x5e3   :  { %v7080_v24 = vpack.c.bf16 %v6017_v53, %v6016_v58  ;;  %v3858_v30 = vmul.f32 1.442695, %v3758_v2  ;;  %v4050_v60 = vmul.f32 1.442695, %v3950_v33  ;;  %v8060_v31 = vpop.eup %8059  ;;  %v4242_v12 = vmul.f32 1.442695, %v4142_v39 }
 0x5e4   :  { %v5954_v45 = vadd.f32 %v5890_v18, %v5826_v40  ;;  %v5531_v4 = vadd.f32 %v5530_v48, %v5362_v52  ;;  %v8062_v3 = vpop.eup %8061  ;;  %v12295_v49 = vunpack.c.h.bf16 %v12282_v6  ;;  %v2887_v51 = vadd.f32 %v2886_v15, %v2718_v27 }
 0x5e5   :  { %7172 = vst [vmem:[#allocation11 + $0x80] sm:$0xff] %v7080_v24   ;;  %8069 = vpow2.f32 %v3858_v30  ;;  %v8064_v11 = vpop.eup %8063  ;;  %v4333_v19 = vadd.f32 %v8062_v3, %v8060_v31  ;;  %v5763_v36 = vmul.f32 %v8062_v3, %v12296_v5  ;;  %v12299_v50 = vmax.f32 %v12297_v10, %v12298_v16 }
 0x5e6   :  { %v5699_v58 = vmul.f32 %v8060_v31, %v12295_v49  ;;  %8071 = vpow2.f32 %v4050_v60  ;;  %v8066_v21 = vpop.eup %8065 }
 0x5e7   :  { %8073 = vpow2.f32 %v4242_v12  ;;  %v3695_v53 = vmax.f32 %v12299_v50, %v2887_v51  ;;  %v4397_v40 = vadd.f32 %v8064_v11, %v4333_v19  ;;  %v5891_v2 = vmul.f32 %v8066_v21, %v8064_v11  ;;  %v12302_v19 = vld [vmem:[#allocation90_spill] sm:$0xff] }
 0x5e8   :  { %v8068_v13 = vpop.eup %8067  ;;  %v5827_v18 = vadd.f32 %v5763_v36, %v5699_v58  ;;  %8075 = vtanh.f32 %v5531_v4  ;;  %v2720_v14 = vpop.f32.mrf.mxu0  ;;  %v12300_v4 = vld [vmem:[#allocation88_spill] sm:$0xff]  ;;  %v12303_v5 = vunpack.c.l.bf16 %v12302_v19  ;;  %v8474_v50 = vld [vmem:[#allocation5 + $0xd8] sm:$0xff] }
 0x5e9   :  { %v6018_v6 = vmul.f32 %v8068_v13, %v5954_v45  ;;  %v3759_v33 = vsub.f32 %v12297_v10, %v3695_v53  ;;  %v3951_v26 = vsub.f32 %v12298_v16, %v3695_v53  ;;  %v4143_v24 = vsub.f32 %v2887_v51, %v3695_v53  ;;  %v5363_v47 = vpop.f32.mrf.mxu2  ;;  %v8473_v10 = vld [vmem:[#allocation2 + $0xd8] sm:$0xff] }
 0x5ea   :  { %8077 = vrcp.f32 %v4397_v40  ;;  %v5955_v39 = vadd.f32 %v5891_v2, %v5827_v18  ;;  %v5364_v52 = vadd.f32 %v10741_v17, %v5363_v47  ;;  %v5532_v48 = vpop.f32.mrf.mxu3  ;;  %v2721_v31 = vadd.f32 %v2720_v14, %v10293_v25  ;;  %v2889_v12 = vpop.f32.mrf.mxu1  ;;  %v12304_v53 = vld [vmem:[#allocation147_spill] sm:$0xff]  ;;  %v12305_v13 = vld [vmem:[#allocation146_spill] sm:$0xff]  ;;  %v12311_v14 = vld [vmem:[#allocation240_spill] sm:$0xff] }
 0x5eb   :  { %v8070_v30 = vpop.eup %8069  ;;  %v3860_v60 = vmul.f32 1.442695, %v3759_v33  ;;  %v4052_v27 = vmul.f32 1.442695, %v3951_v26  ;;  %v4244_v15 = vmul.f32 1.442695, %v4143_v24  ;;  %v12301_v3 = vunpack.c.l.bf16 %v12300_v4  ;;  %2759 = vmatmul.bf16.gmra.mxu0 %v8473_v10 }
 0x5ec   :  { %v8072_v45 = vpop.eup %8071  ;;  %v5533_v58 = vadd.f32 %v5532_v48, %v5364_v52  ;;  %v2890_v21 = vadd.f32 %v2889_v12, %v2721_v31  ;;  %2928 = vmatmul.bf16.gmra.mxu1 %v8474_v50  ;;  %v12306_v40 = vpack.c.b16 %v12304_v53, %v12305_v13  ;;  %v12307_v26 = vld [vmem:[#allocation151_spill] sm:$0xff]  ;;  %v12308_v24 = vld [vmem:[#allocation149_spill] sm:$0xff] }
 0x5ed   :  { %v5700_v49 = vmul.f32 %v8070_v30, %v12301_v3  ;;  %v8074_v51 = vpop.eup %8073  ;;  %v4334_v11 = vadd.f32 %v8072_v45, %v8070_v30  ;;  %v5764_v36 = vmul.f32 %v8072_v45, %v12303_v5  ;;  %8079 = vpow2.f32 %v3860_v60  ;;  %v12310_v48 = vld [vmem:[#allocation239_spill] sm:$0xff] }
 0x5ee   :  { %v8076_v16 = vpop.eup %8075  ;;  %8081 = vpow2.f32 %v4052_v27  ;;  %v12309_v47 = vpack.c.b16 %v12307_v26, %v12308_v24  ;;  %v12312_v30 = vmax.f32 %v12310_v48, %v12311_v14 }
 0x5ef   :  { %v4398_v18 = vadd.f32 %v8074_v51, %v4334_v11  ;;  %v5828_v2 = vadd.f32 %v5764_v36, %v5700_v49  ;;  %v5892_v33 = vmul.f32 %v8076_v16, %v8074_v51  ;;  %8083 = vpow2.f32 %v4244_v15 }
 0x5f0   :  { %5405 = vmatmul.bf16.gmra.mxu2 %v12306_v40  ;;  %v8078_v52 = vpop.eup %8077  ;;  %8085 = vtanh.f32 %v5533_v58  ;;  %v3696_v60 = vmax.f32 %v12312_v30, %v2890_v21  ;;  %v2722_v11 = vpop.f32.mrf.mxu0  ;;  %v12315_v30 = vld [vmem:[#allocation241_spill] sm:$0xff] }
 0x5f1   :  { %5574 = vmatmul.bf16.gmra.mxu3 %v12309_v47  ;;  %v6019_v27 = vmul.f32 %v8078_v52, %v5955_v39  ;;  %8087 = vrcp.f32 %v4398_v18  ;;  %v5956_v31 = vadd.f32 %v5892_v33, %v5828_v2  ;;  %v5366_v12 = vpop.f32.mrf.mxu2  ;;  %v2723_v58 = vadd.f32 %v2722_v11, %v10293_v25 }
 0x5f2   :  { %v3760_v45 = vsub.f32 %v12310_v48, %v3696_v60  ;;  %v3952_v3 = vsub.f32 %v12311_v14, %v3696_v60  ;;  %v4144_v49 = vsub.f32 %v2890_v21, %v3696_v60  ;;  %v5367_v15 = vadd.f32 %v10741_v17, %v5366_v12  ;;  %v5535_v51 = vpop.f32.mrf.mxu3  ;;  %v2891_v10 = vpop.f32.mrf.mxu1  ;;  %v12316_v60 = vld [vmem:[#allocation242_spill] sm:$0xff] }
 0x5f3   :  { %v8080_v5 = vpop.eup %8079  ;;  %v7085_v36 = vpack.c.bf16 %v6019_v27, %v6018_v6  ;;  %v12313_v39 = vunpack.c.h.bf16 %v12300_v4  ;;  %v12314_v21 = vunpack.c.h.bf16 %v12302_v19  ;;  %v2892_v26 = vadd.f32 %v2891_v10, %v2723_v58 }
 0x5f4   :  { %v8082_v16 = vpop.eup %8081  ;;  %v3862_v53 = vmul.f32 1.442695, %v3760_v45  ;;  %v4054_v13 = vmul.f32 1.442695, %v3952_v3  ;;  %v4246_v40 = vmul.f32 1.442695, %v4144_v49  ;;  %v5536_v6 = vadd.f32 %v5535_v51, %v5367_v15 }
 0x5f5   :  { %v5701_v50 = vmul.f32 %v8080_v5, %v12313_v39  ;;  %v8084_v18 = vpop.eup %8083  ;;  %7173 = vst [vmem:[#allocation11 + $0x88] sm:$0xff] %v7085_v36   ;;  %v4335_v2 = vadd.f32 %v8082_v16, %v8080_v5  ;;  %v5765_v33 = vmul.f32 %v8082_v16, %v12314_v21  ;;  %v12317_v27 = vmax.f32 %v12315_v30, %v12316_v60  ;;  %v8475_v21 = vld [vmem:[#allocation2 + $0xe0] sm:$0xff] }
 0x5f6   :  { %v8086_v24 = vpop.eup %8085  ;;  %8089 = vpow2.f32 %v3862_v53  ;;  %v12318_v53 = vld [vmem:[#allocation94_spill] sm:$0xff] }
 0x5f7   :  { %v8088_v47 = vpop.eup %8087  ;;  %v4399_v52 = vadd.f32 %v8084_v18, %v4335_v2  ;;  %v5829_v48 = vadd.f32 %v5765_v33, %v5701_v50  ;;  %v5893_v14 = vmul.f32 %v8086_v24, %v8084_v18  ;;  %8091 = vpow2.f32 %v4054_v13  ;;  %v12320_v24 = vld [vmem:[#allocation96_spill] sm:$0xff] }
 0x5f8   :  { %v6020_v4 = vmul.f32 %v8088_v47, %v5956_v31  ;;  %8093 = vpow2.f32 %v4246_v40  ;;  %v3697_v12 = vmax.f32 %v12317_v27, %v2892_v26  ;;  %v2725_v11 = vpop.f32.mrf.mxu0  ;;  %v12319_v13 = vunpack.c.l.bf16 %v12318_v53  ;;  %v12325_v27 = vld [vmem:[#allocation243_spill] sm:$0xff] }
 0x5f9   :  { %8095 = vrcp.f32 %v4399_v52  ;;  %v5957_v45 = vadd.f32 %v5893_v14, %v5829_v48  ;;  %v5368_v3 = vpop.f32.mrf.mxu2  ;;  %v2726_v31 = vadd.f32 %v2725_v11, %v10293_v25  ;;  %v8476_v52 = vld [vmem:[#allocation5 + $0xe0] sm:$0xff]  ;;  %v12322_v48 = vld [vmem:[#allocation154_spill] sm:$0xff]  ;;  %v12323_v14 = vld [vmem:[#allocation153_spill] sm:$0xff] }
 0x5fa   :  { %8097 = vtanh.f32 %v5536_v6  ;;  %v3761_v19 = vsub.f32 %v12315_v30, %v3697_v12  ;;  %v3953_v49 = vsub.f32 %v12316_v60, %v3697_v12  ;;  %v4145_v15 = vsub.f32 %v2892_v26, %v3697_v12  ;;  %v5537_v51 = vpop.f32.mrf.mxu3  ;;  %v2894_v36 = vpop.f32.mrf.mxu1  ;;  %v12326_v12 = vld [vmem:[#allocation244_spill] sm:$0xff] }
 0x5fb   :  { %v5369_v5 = vadd.f32 %v10741_v17, %v5368_v3  ;;  %v2895_v2 = vadd.f32 %v2894_v36, %v2726_v31  ;;  %2764 = vmatmul.bf16.gmra.mxu0 %v8475_v21  ;;  %v12321_v6 = vunpack.c.l.bf16 %v12320_v24  ;;  %v12324_v30 = vpack.c.b16 %v12322_v48, %v12323_v14 }
 0x5fc   :  { %v8090_v58 = vpop.eup %8089  ;;  %v3864_v10 = vmul.f32 1.442695, %v3761_v19  ;;  %v4056_v16 = vmul.f32 1.442695, %v3953_v49  ;;  %v4248_v39 = vmul.f32 1.442695, %v4145_v15  ;;  %2933 = vmatmul.bf16.gmra.mxu1 %v8476_v52  ;;  %v12327_v3 = vmax.f32 %v12325_v27, %v12326_v12 }
 0x5fd   :  { %v8092_v50 = vpop.eup %8091  ;;  %v5702_v40 = vmul.f32 %v8090_v58, %v12319_v13  ;;  %v5538_v18 = vadd.f32 %v5537_v51, %v5369_v5  ;;  %v12328_v49 = vld [vmem:[#allocation157_spill] sm:$0xff]  ;;  %v12329_v15 = vld [vmem:[#allocation155_spill] sm:$0xff] }
 0x5fe   :  { %v8094_v33 = vpop.eup %8093  ;;  %v4336_v26 = vadd.f32 %v8092_v50, %v8090_v58  ;;  %v5766_v47 = vmul.f32 %v8092_v50, %v12321_v6  ;;  %8099 = vpow2.f32 %v3864_v10  ;;  %v3698_v19 = vmax.f32 %v12327_v3, %v2895_v2 }
 0x5ff   :  { %v8096_v60 = vpop.eup %8095  ;;  %8101 = vpow2.f32 %v4056_v16  ;;  %v12330_v51 = vpack.c.b16 %v12328_v49, %v12329_v15  ;;  %v12332_v3 = vunpack.c.h.bf16 %v12320_v24  ;;  %v12333_v15 = vld [vmem:[#allocation245_spill] sm:$0xff] }
 0x600   :  { %5410 = vmatmul.bf16.gmra.mxu2 %v12324_v30  ;;  %v8098_v11 = vpop.eup %8097  ;;  %v6021_v5 = vmul.f32 %v8096_v60, %v5957_v45  ;;  %v4400_v31 = vadd.f32 %v8094_v33, %v4336_v26  ;;  %v5830_v36 = vadd.f32 %v5766_v47, %v5702_v40  ;;  %8103 = vpow2.f32 %v4248_v39  ;;  %v2727_v48 = vpop.f32.mrf.mxu0 }
 0x601   :  { %5579 = vmatmul.bf16.gmra.mxu3 %v12330_v51  ;;  %v5894_v58 = vmul.f32 %v8098_v11, %v8094_v33  ;;  %8105 = vtanh.f32 %v5538_v18  ;;  %v3762_v10 = vsub.f32 %v12325_v27, %v3698_v19  ;;  %v3954_v50 = vsub.f32 %v12326_v12, %v3698_v19  ;;  %v5371_v16 = vpop.f32.mrf.mxu2  ;;  %v12334_v51 = vld [vmem:[#allocation246_spill] sm:$0xff] }
 0x602   :  { %v7090_v13 = vpack.c.bf16 %v6021_v5, %v6020_v4  ;;  %8107 = vrcp.f32 %v4400_v31  ;;  %v4146_v21 = vsub.f32 %v2895_v2, %v3698_v19  ;;  %v5372_v6 = vadd.f32 %v10741_v17, %v5371_v16  ;;  %v2896_v39 = vpop.f32.mrf.mxu1 }
 0x603   :  { %v5540_v52 = vpop.f32.mrf.mxu3  ;;  %v5958_v14 = vadd.f32 %v5894_v58, %v5830_v36  ;;  %v3866_v30 = vmul.f32 1.442695, %v3762_v10  ;;  %v4058_v45 = vmul.f32 1.442695, %v3954_v50  ;;  %v2728_v40 = vadd.f32 %v2727_v48, %v10293_v25 }
 0x604   :  { %v8100_v33 = vpop.eup %8099  ;;  %7174 = vst [vmem:[#allocation11 + $0x90] sm:$0xff] %v7090_v13   ;;  %v4250_v18 = vmul.f32 1.442695, %v4146_v21  ;;  %v5541_v26 = vadd.f32 %v5540_v52, %v5372_v6  ;;  %v12331_v60 = vunpack.c.h.bf16 %v12318_v53  ;;  %v12335_v11 = vmax.f32 %v12333_v15, %v12334_v51 }
 0x605   :  { %v8102_v47 = vpop.eup %8101  ;;  %8109 = vpow2.f32 %v3866_v30  ;;  %v2897_v2 = vadd.f32 %v2896_v39, %v2728_v40 }
 0x606   :  { %v5703_v4 = vmul.f32 %v8100_v33, %v12331_v60  ;;  %v8104_v27 = vpop.eup %8103  ;;  %v4337_v12 = vadd.f32 %v8102_v47, %v8100_v33  ;;  %v5767_v19 = vmul.f32 %v8102_v47, %v12332_v3  ;;  %8111 = vpow2.f32 %v4058_v45 }
 0x607   :  { %v8106_v49 = vpop.eup %8105  ;;  %8113 = vpow2.f32 %v4250_v18  ;;  %v3699_v5 = vmax.f32 %v12335_v11, %v2897_v2  ;;  %v8478_v11 = vld [vmem:[#allocation5 + $0xe8] sm:$0xff] }
 0x608   :  { %v8108_v31 = vpop.eup %8107  ;;  %v4401_v36 = vadd.f32 %v8104_v27, %v4337_v12  ;;  %v5831_v58 = vadd.f32 %v5767_v19, %v5703_v4  ;;  %v5895_v10 = vmul.f32 %v8106_v49, %v8104_v27  ;;  %8115 = vtanh.f32 %v5541_v26  ;;  %v2730_v48 = vpop.f32.mrf.mxu0  ;;  %v12336_v26 = vld [vmem:[#allocation100_spill] sm:$0xff]  ;;  %v12338_v12 = vld [vmem:[#allocation102_spill] sm:$0xff] }
 0x609   :  { %v6022_v53 = vmul.f32 %v8108_v31, %v5958_v14  ;;  %v3763_v50 = vsub.f32 %v12333_v15, %v3699_v5  ;;  %v3955_v16 = vsub.f32 %v12334_v51, %v3699_v5  ;;  %v4147_v13 = vsub.f32 %v2897_v2, %v3699_v5  ;;  %v5373_v24 = vpop.f32.mrf.mxu2  ;;  %v8477_v15 = vld [vmem:[#allocation2 + $0xe8] sm:$0xff]  ;;  %v12340_v5 = vld [vmem:[#allocation159_spill] sm:$0xff]  ;;  %v12341_v31 = vld [vmem:[#allocation158_spill] sm:$0xff] }
 0x60a   :  { %8117 = vrcp.f32 %v4401_v36  ;;  %v5959_v21 = vadd.f32 %v5895_v10, %v5831_v58  ;;  %v5374_v6 = vadd.f32 %v10741_v17, %v5373_v24  ;;  %v2731_v33 = vadd.f32 %v2730_v48, %v10293_v25  ;;  %v2899_v18 = vpop.f32.mrf.mxu1  ;;  %v12347_v48 = vld [vmem:[#allocation248_spill] sm:$0xff] }
 0x60b   :  { %v5542_v52 = vpop.f32.mrf.mxu3  ;;  %v8110_v30 = vpop.eup %8109  ;;  %v3868_v45 = vmul.f32 1.442695, %v3763_v50  ;;  %v4060_v40 = vmul.f32 1.442695, %v3955_v16  ;;  %v4252_v39 = vmul.f32 1.442695, %v4147_v13  ;;  %v12337_v47 = vunpack.c.l.bf16 %v12336_v26  ;;  %2769 = vmatmul.bf16.gmra.mxu0 %v8477_v15 }
 0x60c   :  { %v8112_v14 = vpop.eup %8111  ;;  %v5543_v4 = vadd.f32 %v5542_v52, %v5374_v6  ;;  %v12339_v3 = vunpack.c.l.bf16 %v12338_v12  ;;  %v2900_v49 = vadd.f32 %v2899_v18, %v2731_v33  ;;  %2938 = vmatmul.bf16.gmra.mxu1 %v8478_v11  ;;  %v12342_v36 = vpack.c.b16 %v12340_v5, %v12341_v31  ;;  %v12343_v16 = vld [vmem:[#allocation163_spill] sm:$0xff]  ;;  %v12344_v13 = vld [vmem:[#allocation161_spill] sm:$0xff] }
 0x60d   :  { %v5704_v60 = vmul.f32 %v8110_v30, %v12337_v47  ;;  %v8114_v2 = vpop.eup %8113  ;;  %v4338_v27 = vadd.f32 %v8112_v14, %v8110_v30  ;;  %8119 = vpow2.f32 %v3868_v45  ;;  %v12345_v24 = vpack.c.b16 %v12343_v16, %v12344_v13  ;;  %v12346_v52 = vld [vmem:[#allocation247_spill] sm:$0xff] }
 0x60e   :  { %v5768_v19 = vmul.f32 %v8112_v14, %v12339_v3  ;;  %v8116_v51 = vpop.eup %8115  ;;  %8121 = vpow2.f32 %v4060_v40  ;;  %v12348_v30 = vmax.f32 %v12346_v52, %v12347_v48 }
 0x60f   :  { %v4402_v58 = vadd.f32 %v8114_v2, %v4338_v27  ;;  %v5896_v50 = vmul.f32 %v8116_v51, %v8114_v2  ;;  %8123 = vpow2.f32 %v4252_v39 }
 0x610   :  { %5415 = vmatmul.bf16.gmra.mxu2 %v12342_v36  ;;  %v5832_v10 = vadd.f32 %v5768_v19, %v5704_v60  ;;  %v8118_v6 = vpop.eup %8117  ;;  %8125 = vtanh.f32 %v5543_v4  ;;  %v3700_v45 = vmax.f32 %v12348_v30, %v2900_v49  ;;  %v2732_v27 = vpop.f32.mrf.mxu0  ;;  %v12351_v30 = vld [vmem:[#allocation249_spill] sm:$0xff] }
 0x611   :  { %5584 = vmatmul.bf16.gmra.mxu3 %v12345_v24  ;;  %v6023_v40 = vmul.f32 %v8118_v6, %v5959_v21  ;;  %8127 = vrcp.f32 %v4402_v58  ;;  %v5376_v18 = vpop.f32.mrf.mxu2  ;;  %v2733_v4 = vadd.f32 %v2732_v27, %v10293_v25  ;;  %v12349_v21 = vunpack.c.h.bf16 %v12336_v26 }
 0x612   :  { %v5960_v33 = vadd.f32 %v5896_v50, %v5832_v10  ;;  %v3764_v14 = vsub.f32 %v12346_v52, %v3700_v45  ;;  %v3956_v47 = vsub.f32 %v12347_v48, %v3700_v45  ;;  %v4148_v60 = vsub.f32 %v2900_v49, %v3700_v45  ;;  %v2901_v15 = vpop.f32.mrf.mxu1  ;;  %v12352_v45 = vld [vmem:[#allocation250_spill] sm:$0xff] }
 0x613   :  { %v5377_v39 = vadd.f32 %v10741_v17, %v5376_v18  ;;  %v5545_v2 = vpop.f32.mrf.mxu3  ;;  %v8120_v3 = vpop.eup %8119  ;;  %v7095_v19 = vpack.c.bf16 %v6023_v40, %v6022_v53  ;;  %v12350_v49 = vunpack.c.h.bf16 %v12338_v12  ;;  %v2902_v16 = vadd.f32 %v2901_v15, %v2733_v4 }
 0x614   :  { %v8122_v51 = vpop.eup %8121  ;;  %v5705_v11 = vmul.f32 %v8120_v3, %v12349_v21  ;;  %v3870_v5 = vmul.f32 1.442695, %v3764_v14  ;;  %v4062_v31 = vmul.f32 1.442695, %v3956_v47  ;;  %v4254_v36 = vmul.f32 1.442695, %v4148_v60 }
 0x615   :  { %v8124_v58 = vpop.eup %8123  ;;  %7175 = vst [vmem:[#allocation11 + $0x98] sm:$0xff] %v7095_v19   ;;  %v4339_v10 = vadd.f32 %v8122_v51, %v8120_v3  ;;  %v5769_v50 = vmul.f32 %v8122_v51, %v12350_v49  ;;  %v5546_v53 = vadd.f32 %v5545_v2, %v5377_v39  ;;  %v12353_v40 = vmax.f32 %v12351_v30, %v12352_v45  ;;  %v8479_v49 = vld [vmem:[#allocation2 + $0xf0] sm:$0xff] }
 0x616   :  { %v8126_v13 = vpop.eup %8125  ;;  %8129 = vpow2.f32 %v3870_v5  ;;  %v12354_v5 = vld [vmem:[#allocation106_spill] sm:$0xff] }
 0x617   :  { %v8128_v24 = vpop.eup %8127  ;;  %v4403_v6 = vadd.f32 %v8124_v58, %v4339_v10  ;;  %v5833_v52 = vadd.f32 %v5769_v50, %v5705_v11  ;;  %v5897_v48 = vmul.f32 %v8126_v13, %v8124_v58  ;;  %8131 = vpow2.f32 %v4062_v31  ;;  %v12356_v13 = vld [vmem:[#allocation108_spill] sm:$0xff] }
 0x618   :  { %v6024_v26 = vmul.f32 %v8128_v24, %v5960_v33  ;;  %8133 = vpow2.f32 %v4254_v36  ;;  %v3701_v18 = vmax.f32 %v12353_v40, %v2902_v16  ;;  %v2735_v27 = vpop.f32.mrf.mxu0  ;;  %v12355_v31 = vunpack.c.l.bf16 %v12354_v5  ;;  %v12361_v40 = vld [vmem:[#allocation251_spill] sm:$0xff] }
 0x619   :  { %8135 = vrcp.f32 %v4403_v6  ;;  %v5961_v14 = vadd.f32 %v5897_v48, %v5833_v52  ;;  %v5378_v47 = vpop.f32.mrf.mxu2  ;;  %v2736_v33 = vadd.f32 %v2735_v27, %v10293_v25  ;;  %v8480_v6 = vld [vmem:[#allocation5 + $0xf0] sm:$0xff]  ;;  %v12359_v48 = vld [vmem:[#allocation164_spill] sm:$0xff] }
 0x61a   :  { %8137 = vtanh.f32 %v5546_v53  ;;  %v3765_v12 = vsub.f32 %v12351_v30, %v3701_v18  ;;  %v3957_v60 = vsub.f32 %v12352_v45, %v3701_v18  ;;  %v4149_v39 = vsub.f32 %v2902_v16, %v3701_v18  ;;  %v2904_v19 = vpop.f32.mrf.mxu1  ;;  %v12358_v52 = vld [vmem:[#allocation165_spill] sm:$0xff]  ;;  %v12362_v18 = vld [vmem:[#allocation252_spill] sm:$0xff] }
 0x61b   :  { %v5547_v2 = vpop.f32.mrf.mxu3  ;;  %v5379_v3 = vadd.f32 %v10741_v17, %v5378_v47  ;;  %v2905_v10 = vadd.f32 %v2904_v19, %v2736_v33  ;;  %2774 = vmatmul.bf16.gmra.mxu0 %v8479_v49  ;;  %v12357_v53 = vunpack.c.l.bf16 %v12356_v13  ;;  %v12360_v30 = vpack.c.b16 %v12358_v52, %v12359_v48 }
 0x61c   :  { %v8130_v4 = vpop.eup %8129  ;;  %v3872_v15 = vmul.f32 1.442695, %v3765_v12  ;;  %v4064_v51 = vmul.f32 1.442695, %v3957_v60  ;;  %v4256_v21 = vmul.f32 1.442695, %v4149_v39  ;;  %2943 = vmatmul.bf16.gmra.mxu1 %v8480_v6  ;;  %v12363_v47 = vmax.f32 %v12361_v40, %v12362_v18 }
 0x61d   :  { %v8132_v11 = vpop.eup %8131  ;;  %v5706_v36 = vmul.f32 %v8130_v4, %v12355_v31  ;;  %v5548_v58 = vadd.f32 %v5547_v2, %v5379_v3  ;;  %v12364_v60 = vld [vmem:[#allocation169_spill] sm:$0xff]  ;;  %v12365_v39 = vld [vmem:[#allocation167_spill] sm:$0xff] }
 0x61e   :  { %v8134_v50 = vpop.eup %8133  ;;  %v4340_v16 = vadd.f32 %v8132_v11, %v8130_v4  ;;  %v5770_v24 = vmul.f32 %v8132_v11, %v12357_v53  ;;  %8139 = vpow2.f32 %v3872_v15  ;;  %v3702_v12 = vmax.f32 %v12363_v47, %v2905_v10 }
 0x61f   :  { %v8136_v45 = vpop.eup %8135  ;;  %8141 = vpow2.f32 %v4064_v51  ;;  %v12366_v2 = vpack.c.b16 %v12364_v60, %v12365_v39  ;;  %v12369_v60 = vld [vmem:[#allocation253_spill] sm:$0xff]  ;;  %v12370_v39 = vld [vmem:[#allocation254_spill] sm:$0xff] }
 0x620   :  { %5420 = vmatmul.bf16.gmra.mxu2 %v12360_v30  ;;  %v8138_v27 = vpop.eup %8137  ;;  %v6025_v3 = vmul.f32 %v8136_v45, %v5961_v14  ;;  %v4404_v33 = vadd.f32 %v8134_v50, %v4340_v16  ;;  %v5834_v19 = vadd.f32 %v5770_v24, %v5706_v36  ;;  %8143 = vpow2.f32 %v4256_v21  ;;  %v2737_v52 = vpop.f32.mrf.mxu0 }
 0x621   :  { %5589 = vmatmul.bf16.gmra.mxu3 %v12366_v2  ;;  %v5898_v4 = vmul.f32 %v8138_v27, %v8134_v50  ;;  %8145 = vtanh.f32 %v5548_v58  ;;  %v3766_v15 = vsub.f32 %v12361_v40, %v3702_v12  ;;  %v3958_v11 = vsub.f32 %v12362_v18, %v3702_v12  ;;  %v5381_v51 = vpop.f32.mrf.mxu2 }
 0x622   :  { %v7100_v31 = vpack.c.bf16 %v6025_v3, %v6024_v26  ;;  %8147 = vrcp.f32 %v4404_v33  ;;  %v4150_v49 = vsub.f32 %v2905_v10, %v3702_v12  ;;  %v5382_v53 = vadd.f32 %v10741_v17, %v5381_v51  ;;  %v2906_v21 = vpop.f32.mrf.mxu1 }
 0x623   :  { %v5962_v48 = vadd.f32 %v5898_v4, %v5834_v19  ;;  %v3874_v30 = vmul.f32 1.442695, %v3766_v15  ;;  %v4066_v14 = vmul.f32 1.442695, %v3958_v11  ;;  %v2738_v36 = vadd.f32 %v2737_v52, %v10293_v25 }
 0x624   :  { %v5550_v6 = vpop.f32.mrf.mxu3  ;;  %v8140_v50 = vpop.eup %8139  ;;  %7176 = vst [vmem:[#allocation11 + $0xa0] sm:$0xff] %v7100_v31   ;;  %v4258_v58 = vmul.f32 1.442695, %v4150_v49  ;;  %v12367_v45 = vunpack.c.h.bf16 %v12354_v5  ;;  %v12368_v18 = vunpack.c.h.bf16 %v12356_v13  ;;  %v12371_v2 = vmax.f32 %v12369_v60, %v12370_v39  ;;  %v10953_v49 = vld [vmem:[%s11184_s5] ss:$0 sm:$0xff] }
 0x625   :  { %v5551_v16 = vadd.f32 %v5550_v6, %v5382_v53  ;;  %v8142_v24 = vpop.eup %8141  ;;  %8149 = vpow2.f32 %v3874_v30  ;;  %v2907_v10 = vadd.f32 %v2906_v21, %v2738_v36 }
 0x626   :  { %v5707_v26 = vmul.f32 %v8140_v50, %v12367_v45  ;;  %v8144_v40 = vpop.eup %8143  ;;  %v4341_v17 = vadd.f32 %v8142_v24, %v8140_v50  ;;  %v5771_v47 = vmul.f32 %v8142_v24, %v12368_v18  ;;  %8151 = vpow2.f32 %v4066_v14 }
 0x627   :  { %v8146_v12 = vpop.eup %8145  ;;  %8153 = vpow2.f32 %v4258_v58  ;;  %v3703_v27 = vmax.f32 %v12371_v2, %v2907_v10  ;;  %v8483_v2 = vld [vmem:[#allocation5 + $0xf8] sm:$0xff] }
 0x628   :  { %v8148_v3 = vpop.eup %8147  ;;  %v4405_v33 = vadd.f32 %v8144_v40, %v4341_v17  ;;  %v5835_v19 = vadd.f32 %v5771_v47, %v5707_v26  ;;  %v5899_v4 = vmul.f32 %v8146_v12, %v8144_v40  ;;  %8155 = vtanh.f32 %v5551_v16  ;;  %v2740_v52 = vpop.f32.mrf.mxu0  ;;  %v12372_v16 = vld [vmem:[#allocation112_spill] sm:$0xff]  ;;  %v12374_v17 = vld [vmem:[#allocation114_spill] sm:$0xff] }
 0x629   :  { %v6026_v5 = vmul.f32 %v8148_v3, %v5962_v48  ;;  %v3767_v15 = vsub.f32 %v12369_v60, %v3703_v27  ;;  %v3959_v11 = vsub.f32 %v12370_v39, %v3703_v27  ;;  %v4151_v51 = vsub.f32 %v2907_v10, %v3703_v27  ;;  %v5383_v13 = vpop.f32.mrf.mxu2  ;;  %v8482_v60 = vld [vmem:[#allocation2 + $0xf8] sm:$0xff] }
 0x62a   :  { %8157 = vrcp.f32 %v4405_v33  ;;  %v5963_v31 = vadd.f32 %v5899_v4, %v5835_v19  ;;  %v5384_v53 = vadd.f32 %v10953_v49, %v5383_v13  ;;  %v2741_v21 = vadd.f32 %v2740_v52, %v10293_v25  ;;  %v2909_v50 = vpop.f32.mrf.mxu1  ;;  %v12376_v27 = vld [vmem:[#allocation171_spill] sm:$0xff]  ;;  %v12377_v3 = vld [vmem:[#allocation170_spill] sm:$0xff] }
 0x62b   :  { %v8150_v30 = vpop.eup %8149  ;;  %v3876_v14 = vmul.f32 1.442695, %v3767_v15  ;;  %v4068_v48 = vmul.f32 1.442695, %v3959_v11  ;;  %v4260_v36 = vmul.f32 1.442695, %v4151_v51  ;;  %v12373_v24 = vunpack.c.l.bf16 %v12372_v16  ;;  %2779 = vmatmul.bf16.gmra.mxu0 %v8482_v60 }
 0x62c   :  { %v5552_v6 = vpop.f32.mrf.mxu3  ;;  %v8152_v58 = vpop.eup %8151  ;;  %v12375_v18 = vunpack.c.l.bf16 %v12374_v17  ;;  %v2910_v12 = vadd.f32 %v2909_v50, %v2741_v21  ;;  %2948 = vmatmul.bf16.gmra.mxu1 %v8483_v2  ;;  %v12378_v33 = vpack.c.b16 %v12376_v27, %v12377_v3  ;;  %v12379_v11 = vld [vmem:[#allocation173_spill] sm:$0xff]  ;;  %v12380_v51 = vld [vmem:[#allocation172_spill] sm:$0xff] }
 0x62d   :  { %v5708_v45 = vmul.f32 %v8150_v30, %v12373_v24  ;;  %v5553_v26 = vadd.f32 %v5552_v6, %v5384_v53  ;;  %v8154_v10 = vpop.eup %8153  ;;  %v4342_v40 = vadd.f32 %v8152_v58, %v8150_v30  ;;  %8159 = vpow2.f32 %v3876_v14 }
 0x62e   :  { %v5772_v47 = vmul.f32 %v8152_v58, %v12375_v18  ;;  %v8156_v39 = vpop.eup %8155  ;;  %8161 = vpow2.f32 %v4068_v48  ;;  %v12381_v13 = vpack.c.b16 %v12379_v11, %v12380_v51  ;;  %v12382_v6 = vmax.f32 %v10105_v62, %v10111_v56 }
 0x62f   :  { %v4406_v19 = vadd.f32 %v8154_v10, %v4342_v40  ;;  %v5900_v15 = vmul.f32 %v8156_v39, %v8154_v10  ;;  %8163 = vpow2.f32 %v4260_v36 }
 0x630   :  { %5425 = vmatmul.bf16.gmra.mxu2 %v12378_v33  ;;  %v5836_v4 = vadd.f32 %v5772_v47, %v5708_v45  ;;  %v8158_v53 = vpop.eup %8157  ;;  %8165 = vtanh.f32 %v5553_v26  ;;  %v3704_v52 = vmax.f32 %v12382_v6, %v2910_v12  ;;  %v2742_v45 = vpop.f32.mrf.mxu0 }
 0x631   :  { %5594 = vmatmul.bf16.gmra.mxu3 %v12381_v13  ;;  %v6027_v30 = vmul.f32 %v8158_v53, %v5963_v31  ;;  %8167 = vrcp.f32 %v4406_v19  ;;  %v5386_v48 = vpop.f32.mrf.mxu2  ;;  %v2743_v26 = vadd.f32 %v2742_v45, %v10293_v25  ;;  %v12383_v31 = vunpack.c.h.bf16 %v12372_v16 }
 0x632   :  { %v5964_v14 = vadd.f32 %v5900_v15, %v5836_v4  ;;  %v3768_v21 = vsub.f32 %v10105_v62, %v3704_v52  ;;  %v3960_v50 = vsub.f32 %v10111_v56, %v3704_v52  ;;  %v4152_v58 = vsub.f32 %v2910_v12, %v3704_v52  ;;  %v2911_v18 = vpop.f32.mrf.mxu1 }
 0x633   :  { %v5387_v36 = vadd.f32 %v10953_v49, %v5386_v48  ;;  %v8160_v10 = vpop.eup %8159  ;;  %v7105_v40 = vpack.c.bf16 %v6027_v30, %v6026_v5  ;;  %v12384_v12 = vunpack.c.h.bf16 %v12374_v17  ;;  %v2912_v33 = vadd.f32 %v2911_v18, %v2743_v26  ;;  %v12386_v18 = vld [vmem:[#allocation118_spill] sm:$0xff] }
 0x634   :  { %v5555_v24 = vpop.f32.mrf.mxu3  ;;  %v8162_v47 = vpop.eup %8161  ;;  %v5709_v60 = vmul.f32 %v8160_v10, %v12383_v31  ;;  %v3878_v39 = vmul.f32 1.442695, %v3768_v21  ;;  %v4070_v2 = vmul.f32 1.442695, %v3960_v50  ;;  %v4262_v27 = vmul.f32 1.442695, %v4152_v58 }
 0x635   :  { %v8164_v62 = vpop.eup %8163  ;;  %7177 = vst [vmem:[#allocation11 + $0xa8] sm:$0xff] %v7105_v40   ;;  %v4343_v56 = vadd.f32 %v8162_v47, %v8160_v10  ;;  %v5773_v3 = vmul.f32 %v8162_v47, %v12384_v12  ;;  %v5556_v5 = vadd.f32 %v5555_v24, %v5387_v36  ;;  %v12385_v13 = vmax.f32 %v10113_v38, %v10119_v61 }
 0x636   :  { %v8166_v19 = vpop.eup %8165  ;;  %8169 = vpow2.f32 %v3878_v39  ;;  %v12387_v47 = vunpack.c.l.bf16 %v12386_v18  ;;  %v12390_v12 = vmax.f32 %v10121_v22, %v10133_v46 }
 0x637   :  { %v8168_v4 = vpop.eup %8167  ;;  %v4407_v15 = vadd.f32 %v8164_v62, %v4343_v56  ;;  %v5837_v11 = vadd.f32 %v5773_v3, %v5709_v60  ;;  %v5901_v51 = vmul.f32 %v8166_v19, %v8164_v62  ;;  %8171 = vpow2.f32 %v4070_v2  ;;  %v12388_v2 = vld [vmem:[#allocation120_spill] sm:$0xff] }
 0x638   :  { %v6028_v16 = vmul.f32 %v8168_v4, %v5964_v14  ;;  %8173 = vpow2.f32 %v4262_v27  ;;  %v3705_v53 = vmax.f32 %v12385_v13, %v2912_v33  ;;  %v2745_v50 = vpop.f32.mrf.mxu0  ;;  %v12389_v27 = vunpack.c.l.bf16 %v12388_v2 }
 0x639   :  { %8175 = vrcp.f32 %v4407_v15  ;;  %v5965_v6 = vadd.f32 %v5901_v51, %v5837_v11  ;;  %v5388_v52 = vpop.f32.mrf.mxu2  ;;  %v2746_v14 = vadd.f32 %v2745_v50, %v10293_v25 }
 0x63a   :  { %8177 = vtanh.f32 %v5556_v5  ;;  %v3769_v17 = vsub.f32 %v10113_v38, %v3705_v53  ;;  %v3961_v30 = vsub.f32 %v10119_v61, %v3705_v53  ;;  %v4153_v48 = vsub.f32 %v2912_v33, %v3705_v53  ;;  %v2914_v36 = vpop.f32.mrf.mxu1 }
 0x63b   :  { %v5389_v58 = vadd.f32 %v10953_v49, %v5388_v52  ;;  %v2915_v38 = vadd.f32 %v2914_v36, %v2746_v14 }
 0x63c   :  { %v5557_v21 = vpop.f32.mrf.mxu3  ;;  %v8170_v24 = vpop.eup %8169  ;;  %v3880_v45 = vmul.f32 1.442695, %v3769_v17  ;;  %v4072_v10 = vmul.f32 1.442695, %v3961_v30  ;;  %v4264_v40 = vmul.f32 1.442695, %v4153_v48 }
 0x63d   :  { %v8172_v26 = vpop.eup %8171  ;;  %v5710_v31 = vmul.f32 %v8170_v24, %v12387_v47  ;;  %v5558_v60 = vadd.f32 %v5557_v21, %v5389_v58  ;;  %v3706_v3 = vmax.f32 %v12390_v12, %v2915_v38  ;;  %v12392_v47 = vunpack.c.h.bf16 %v12388_v2 }
 0x63e   :  { %v8174_v39 = vpop.eup %8173  ;;  %v4344_v61 = vadd.f32 %v8172_v26, %v8170_v24  ;;  %v5774_v62 = vmul.f32 %v8172_v26, %v12389_v27  ;;  %8179 = vpow2.f32 %v3880_v45 }
 0x63f   :  { %v8176_v56 = vpop.eup %8175  ;;  %8181 = vpow2.f32 %v4072_v10  ;;  %v3770_v11 = vsub.f32 %v10121_v22, %v3706_v3  ;;  %v3962_v51 = vsub.f32 %v10133_v46, %v3706_v3  ;;  %v4154_v52 = vsub.f32 %v2915_v38, %v3706_v3 }
 0x640   :  { %v8178_v33 = vpop.eup %8177  ;;  %v6029_v19 = vmul.f32 %v8176_v56, %v5965_v6  ;;  %v4408_v5 = vadd.f32 %v8174_v39, %v4344_v61  ;;  %v5838_v4 = vadd.f32 %v5774_v62, %v5710_v31  ;;  %8183 = vpow2.f32 %v4264_v40  ;;  %v2747_v48 = vpop.f32.mrf.mxu0 }
 0x641   :  { %v5902_v15 = vmul.f32 %v8178_v33, %v8174_v39  ;;  %8185 = vtanh.f32 %v5558_v60  ;;  %v3882_v50 = vmul.f32 1.442695, %v3770_v11  ;;  %v4074_v6 = vmul.f32 1.442695, %v3962_v51 }
 0x642   :  { %v5391_v13 = vpop.f32.mrf.mxu2  ;;  %v7110_v53 = vpack.c.bf16 %v6029_v19, %v6028_v16  ;;  %8187 = vrcp.f32 %v4408_v5  ;;  %v2748_v58 = vadd.f32 %v2747_v48, %v10293_v25  ;;  %v2916_v14 = vpop.f32.mrf.mxu1  ;;  %v4266_v24 = vmul.f32 1.442695, %v4154_v52  ;;  %v12394_v48 = vld [vmem:[#allocation124_spill] sm:$0xff] }
 0x643   :  { %v5392_v17 = vadd.f32 %v10953_v49, %v5391_v13  ;;  %v5966_v21 = vadd.f32 %v5902_v15, %v5838_v4  ;;  %v12391_v46 = vunpack.c.h.bf16 %v12386_v18  ;;  %8189 = vpow2.f32 %v3882_v50 }
 0x644   :  { %v5560_v30 = vpop.f32.mrf.mxu3  ;;  %v8180_v36 = vpop.eup %8179  ;;  %7178 = vst [vmem:[#allocation11 + $0xb0] sm:$0xff] %v7110_v53   ;;  %v2917_v10 = vadd.f32 %v2916_v14, %v2748_v58  ;;  %8191 = vpow2.f32 %v4074_v6  ;;  %v12393_v38 = vmax.f32 %v10135_v41, %v10141_v32  ;;  %v12396_v58 = vld [vmem:[#allocation126_spill] sm:$0xff] }
 0x645   :  { %v5561_v22 = vadd.f32 %v5560_v30, %v5392_v17  ;;  %v8182_v45 = vpop.eup %8181  ;;  %v5711_v16 = vmul.f32 %v8180_v36, %v12391_v46  ;;  %8193 = vpow2.f32 %v4266_v24  ;;  %v12397_v14 = vunpack.c.l.bf16 %v12396_v58 }
 0x646   :  { %v8184_v40 = vpop.eup %8183  ;;  %v4345_v26 = vadd.f32 %v8182_v45, %v8180_v36  ;;  %v5775_v31 = vmul.f32 %v8182_v45, %v12392_v47  ;;  %v3707_v39 = vmax.f32 %v12393_v38, %v2917_v10 }
 0x647   :  { %v8186_v60 = vpop.eup %8185  ;;  %8195 = vtanh.f32 %v5561_v22 }
 0x648   :  { %v8188_v61 = vpop.eup %8187  ;;  %v4409_v27 = vadd.f32 %v8184_v40, %v4345_v26  ;;  %v5839_v62 = vadd.f32 %v5775_v31, %v5711_v16  ;;  %v5903_v56 = vmul.f32 %v8186_v60, %v8184_v40  ;;  %v3771_v12 = vsub.f32 %v10135_v41, %v3707_v39  ;;  %v2750_v15 = vpop.f32.mrf.mxu0 }
 0x649   :  { %v6030_v18 = vmul.f32 %v8188_v61, %v5966_v21  ;;  %v3963_v3 = vsub.f32 %v10141_v32, %v3707_v39  ;;  %v4155_v33 = vsub.f32 %v2917_v10, %v3707_v39  ;;  %v8190_v11 = vpop.eup %8189  ;;  %v2751_v52 = vadd.f32 %v2750_v15, %v10293_v25 }
 0x64a   :  { %v5393_v2 = vpop.f32.mrf.mxu2  ;;  %8197 = vrcp.f32 %v4409_v27  ;;  %v5967_v19 = vadd.f32 %v5903_v56, %v5839_v62  ;;  %v3884_v51 = vmul.f32 1.442695, %v3771_v12  ;;  %v2919_v17 = vpop.f32.mrf.mxu1  ;;  %v12395_v41 = vunpack.c.l.bf16 %v12394_v48 }
 0x64b   :  { %v5394_v5 = vadd.f32 %v10953_v49, %v5393_v2  ;;  %v4076_v13 = vmul.f32 1.442695, %v3963_v3  ;;  %v4268_v53 = vmul.f32 1.442695, %v4155_v33  ;;  %v8192_v30 = vpop.eup %8191  ;;  %v2920_v24 = vadd.f32 %v2919_v17, %v2751_v52 }
 0x64c   :  { %v5562_v4 = vpop.f32.mrf.mxu3  ;;  %v5712_v21 = vmul.f32 %v8190_v11, %v12395_v41  ;;  %v8194_v50 = vpop.eup %8193  ;;  %v4346_v6 = vadd.f32 %v8192_v30, %v8190_v11  ;;  %v5776_v36 = vmul.f32 %v8192_v30, %v12397_v14  ;;  %8199 = vpow2.f32 %v3884_v51 }
 0x64d   :  { %v5563_v32 = vadd.f32 %v5562_v4, %v5394_v5  ;;  %v8196_v22 = vpop.eup %8195  ;;  %8201 = vpow2.f32 %v4076_v13  ;;  %v12398_v40 = vmax.f32 %v10143_v9, %v10155_v0  ;;  %v12400_v13 = vunpack.c.h.bf16 %v12396_v58 }
 0x64e   :  { %v4410_v45 = vadd.f32 %v8194_v50, %v4346_v6  ;;  %v5840_v46 = vadd.f32 %v5776_v36, %v5712_v21  ;;  %v5904_v16 = vmul.f32 %v8196_v22, %v8194_v50  ;;  %8203 = vpow2.f32 %v4268_v53 }
 0x64f   :  { %8205 = vtanh.f32 %v5563_v32  ;;  %v3708_v26 = vmax.f32 %v12398_v40, %v2920_v24  ;;  %v12401_v50 = vmax.f32 %v10157_v63, %v10163_v43 }
 0x650   :  { %v8198_v10 = vpop.eup %8197  ;;  %8207 = vrcp.f32 %v4410_v45  ;;  %v5968_v31 = vadd.f32 %v5904_v16, %v5840_v46  ;;  %v2752_v56 = vpop.f32.mrf.mxu0 }
 0x651   :  { %v6031_v47 = vmul.f32 %v8198_v10, %v5967_v19  ;;  %v3772_v38 = vsub.f32 %v10143_v9, %v3708_v26  ;;  %v3964_v39 = vsub.f32 %v10155_v0, %v3708_v26  ;;  %v4156_v61 = vsub.f32 %v2920_v24, %v3708_v26 }
 0x652   :  { %v8200_v12 = vpop.eup %8199  ;;  %v2753_v33 = vadd.f32 %v2752_v56, %v10293_v25  ;;  %v2921_v2 = vpop.f32.mrf.mxu1  ;;  %v12399_v19 = vunpack.c.h.bf16 %v12394_v48 }
 0x653   :  { %v5396_v60 = vpop.f32.mrf.mxu2  ;;  %v7115_v3 = vpack.c.bf16 %v6031_v47, %v6030_v18  ;;  %v8202_v5 = vpop.eup %8201  ;;  %v3886_v15 = vmul.f32 1.442695, %v3772_v38  ;;  %v4078_v11 = vmul.f32 1.442695, %v3964_v39  ;;  %v4270_v51 = vmul.f32 1.442695, %v4156_v61 }
 0x654   :  { %v5397_v27 = vadd.f32 %v10953_v49, %v5396_v60  ;;  %v5565_v62 = vpop.f32.mrf.mxu3  ;;  %v5713_v4 = vmul.f32 %v8200_v12, %v12399_v19  ;;  %v8204_v9 = vpop.eup %8203  ;;  %v4347_v0 = vadd.f32 %v8202_v5, %v8200_v12  ;;  %v5777_v53 = vmul.f32 %v8202_v5, %v12400_v13  ;;  %v12402_v39 = vld [vmem:[#allocation130_spill] sm:$0xff]  ;;  %v12404_v12 = vld [vmem:[#allocation132_spill] sm:$0xff] }
 0x655   :  { %7179 = vst [vmem:[#allocation11 + $0xb8] sm:$0xff] %v7115_v3   ;;  %v2922_v52 = vadd.f32 %v2921_v2, %v2753_v33  ;;  %v8206_v17 = vpop.eup %8205  ;;  %8209 = vpow2.f32 %v3886_v15  ;;  %v12403_v61 = vunpack.c.l.bf16 %v12402_v39  ;;  %v12405_v3 = vunpack.c.l.bf16 %v12404_v12 }
 0x656   :  { %v5566_v18 = vadd.f32 %v5565_v62, %v5397_v27  ;;  %v8208_v30 = vpop.eup %8207  ;;  %v4411_v41 = vadd.f32 %v8204_v9, %v4347_v0  ;;  %v5841_v21 = vadd.f32 %v5777_v53, %v5713_v4  ;;  %v5905_v32 = vmul.f32 %v8206_v17, %v8204_v9 }
 0x657   :  { %8211 = vpow2.f32 %v4078_v11  ;;  %v6032_v48 = vmul.f32 %v8208_v30, %v5968_v31  ;;  %v3709_v6 = vmax.f32 %v12401_v50, %v2922_v52  ;;  %v12406_v5 = vmax.f32 %v10165_v42, %v10177_v7 }
 0x658   :  { %8213 = vpow2.f32 %v4270_v51  ;;  %v5969_v14 = vadd.f32 %v5905_v32, %v5841_v21  ;;  %v2755_v46 = vpop.f32.mrf.mxu0 }
 0x659   :  { %8215 = vrcp.f32 %v4411_v41  ;;  %v3773_v58 = vsub.f32 %v10157_v63, %v3709_v6  ;;  %v3965_v24 = vsub.f32 %v10163_v43, %v3709_v6  ;;  %v4157_v22 = vsub.f32 %v2922_v52, %v3709_v6 }
 0x65a   :  { %8217 = vtanh.f32 %v5566_v18  ;;  %v2756_v10 = vadd.f32 %v2755_v46, %v10293_v25  ;;  %v2924_v40 = vpop.f32.mrf.mxu1 }
 0x65b   :  { %v5398_v36 = vpop.f32.mrf.mxu2  ;;  %v8210_v26 = vpop.eup %8209  ;;  %v3888_v47 = vmul.f32 1.442695, %v3773_v58  ;;  %v4080_v31 = vmul.f32 1.442695, %v3965_v24  ;;  %v4272_v60 = vmul.f32 1.442695, %v4157_v22 }
 0x65c   :  { %v5567_v45 = vpop.f32.mrf.mxu3  ;;  %v5399_v16 = vadd.f32 %v10953_v49, %v5398_v36  ;;  %v5714_v27 = vmul.f32 %v8210_v26, %v12403_v61  ;;  %v2925_v63 = vadd.f32 %v2924_v40, %v2756_v10 }
 0x65d   :  { %v8212_v38 = vpop.eup %8211  ;;  %8219 = vpow2.f32 %v3888_v47 }
 0x65e   :  { %v5568_v62 = vadd.f32 %v5567_v45, %v5399_v16  ;;  %v8214_v56 = vpop.eup %8213  ;;  %v4348_v43 = vadd.f32 %v8212_v38, %v8210_v26  ;;  %v5778_v33 = vmul.f32 %v8212_v38, %v12405_v3  ;;  %8221 = vpow2.f32 %v4080_v31 }
 0x65f   :  { %v8216_v2 = vpop.eup %8215  ;;  %v3710_v19 = vmax.f32 %v12406_v5, %v2925_v63  ;;  %8223 = vpow2.f32 %v4272_v60  ;;  %v12408_v16 = vunpack.c.h.bf16 %v12404_v12  ;;  %v12409_v26 = vmax.f32 %v10179_v29, %v10185_v59 }
 0x660   :  { %v8218_v4 = vpop.eup %8217  ;;  %v6033_v15 = vmul.f32 %v8216_v2, %v5969_v14  ;;  %v4412_v11 = vadd.f32 %v8214_v56, %v4348_v43  ;;  %v5842_v51 = vadd.f32 %v5778_v33, %v5714_v27  ;;  %8225 = vtanh.f32 %v5568_v62  ;;  %v2757_v41 = vpop.f32.mrf.mxu0 }
 0x661   :  { %v5906_v9 = vmul.f32 %v8218_v4, %v8214_v56  ;;  %v3774_v0 = vsub.f32 %v10165_v42, %v3710_v19  ;;  %v3966_v13 = vsub.f32 %v10177_v7, %v3710_v19  ;;  %v4158_v17 = vsub.f32 %v2925_v63, %v3710_v19 }
 0x662   :  { %v7120_v52 = vpack.c.bf16 %v6033_v15, %v6032_v48  ;;  %8227 = vrcp.f32 %v4412_v11  ;;  %v2758_v6 = vadd.f32 %v2757_v41, %v10293_v25  ;;  %v2926_v14 = vpop.f32.mrf.mxu1  ;;  %v12407_v7 = vunpack.c.h.bf16 %v12402_v39 }
 0x663   :  { %v5401_v53 = vpop.f32.mrf.mxu2  ;;  %v5970_v21 = vadd.f32 %v5906_v9, %v5842_v51  ;;  %v3890_v32 = vmul.f32 1.442695, %v3774_v0  ;;  %v4082_v50 = vmul.f32 1.442695, %v3966_v13  ;;  %v8220_v36 = vpop.eup %8219  ;;  %v4274_v58 = vmul.f32 1.442695, %v4158_v17 }
 0x664   :  { %v5402_v18 = vadd.f32 %v10953_v49, %v5401_v53  ;;  %v5570_v30 = vpop.f32.mrf.mxu3  ;;  %7180 = vst [vmem:[#allocation11 + $0xc0] sm:$0xff] %v7120_v52   ;;  %v8222_v24 = vpop.eup %8221  ;;  %v5715_v48 = vmul.f32 %v8220_v36, %v12407_v7  ;;  %v2927_v22 = vadd.f32 %v2926_v14, %v2758_v6  ;;  %v12410_v9 = vld [vmem:[#allocation136_spill] sm:$0xff]  ;;  %v12412_v52 = vld [vmem:[#allocation138_spill] sm:$0xff]  ;;  %v12414_v14 = vmax.f32 %v10187_v57, %v10199_v37 }
 0x665   :  { %8229 = vpow2.f32 %v3890_v32  ;;  %v8224_v45 = vpop.eup %8223  ;;  %v4349_v46 = vadd.f32 %v8222_v24, %v8220_v36  ;;  %v5779_v10 = vmul.f32 %v8222_v24, %v12408_v16  ;;  %v12413_v17 = vunpack.c.l.bf16 %v12412_v52 }
 0x666   :  { %v5571_v42 = vadd.f32 %v5570_v30, %v5402_v18  ;;  %8231 = vpow2.f32 %v4082_v50  ;;  %v8226_v40 = vpop.eup %8225  ;;  %v3711_v47 = vmax.f32 %v12409_v26, %v2927_v22 }
 0x667   :  { %8233 = vpow2.f32 %v4274_v58  ;;  %v4413_v60 = vadd.f32 %v8224_v45, %v4349_v46  ;;  %v5843_v38 = vadd.f32 %v5779_v10, %v5715_v48  ;;  %v5907_v61 = vmul.f32 %v8226_v40, %v8224_v45 }
 0x668   :  { %v8228_v31 = vpop.eup %8227  ;;  %8235 = vtanh.f32 %v5571_v42  ;;  %v3775_v27 = vsub.f32 %v10179_v29, %v3711_v47  ;;  %v3967_v62 = vsub.f32 %v10185_v59, %v3711_v47  ;;  %v4159_v63 = vsub.f32 %v2927_v22, %v3711_v47  ;;  %v2760_v33 = vpop.f32.mrf.mxu0 }
 0x669   :  { %v6034_v39 = vmul.f32 %v8228_v31, %v5970_v21  ;;  %8237 = vrcp.f32 %v4413_v60  ;;  %v5971_v43 = vadd.f32 %v5907_v61, %v5843_v38  ;;  %v2761_v15 = vadd.f32 %v2760_v33, %v10293_v25 }
 0x66a   :  { %v3892_v5 = vmul.f32 1.442695, %v3775_v27  ;;  %v4084_v19 = vmul.f32 1.442695, %v3967_v62  ;;  %v4276_v4 = vmul.f32 1.442695, %v4159_v63  ;;  %v2929_v11 = vpop.f32.mrf.mxu1  ;;  %v12411_v29 = vunpack.c.l.bf16 %v12410_v9 }
 0x66b   :  { %v5403_v56 = vpop.f32.mrf.mxu2  ;;  %v8230_v2 = vpop.eup %8229  ;;  %v2930_v30 = vadd.f32 %v2929_v11, %v2761_v15  ;;  %v12415_v60 = vunpack.c.h.bf16 %v12410_v9  ;;  %v12416_v63 = vunpack.c.h.bf16 %v12412_v52 }
 0x66c   :  { %v5404_v12 = vadd.f32 %v10953_v49, %v5403_v56  ;;  %v5572_v3 = vpop.f32.mrf.mxu3  ;;  %v8232_v51 = vpop.eup %8231  ;;  %v5716_v0 = vmul.f32 %v8230_v2, %v12411_v29  ;;  %8239 = vpow2.f32 %v3892_v5 }
 0x66d   :  { %v8234_v13 = vpop.eup %8233  ;;  %v4350_v53 = vadd.f32 %v8232_v51, %v8230_v2  ;;  %v5780_v18 = vmul.f32 %v8232_v51, %v12413_v17  ;;  %8241 = vpow2.f32 %v4084_v19  ;;  %v3712_v36 = vmax.f32 %v12414_v14, %v2930_v30 }
 0x66e   :  { %v5573_v59 = vadd.f32 %v5572_v3, %v5404_v12  ;;  %v8236_v41 = vpop.eup %8235  ;;  %8243 = vpow2.f32 %v4276_v4  ;;  %v12417_v4 = vmax.f32 %v10201_v20, %v10207_v35 }
 0x66f   :  { %v4414_v21 = vadd.f32 %v8234_v13, %v4350_v53  ;;  %v5844_v32 = vadd.f32 %v5780_v18, %v5716_v0  ;;  %v5908_v50 = vmul.f32 %v8236_v41, %v8234_v13  ;;  %v8238_v6 = vpop.eup %8237  ;;  %v3776_v7 = vsub.f32 %v10187_v57, %v3712_v36 }
 0x670   :  { %8245 = vtanh.f32 %v5573_v59  ;;  %v6035_v58 = vmul.f32 %v8238_v6, %v5971_v43  ;;  %v3968_v48 = vsub.f32 %v10199_v37, %v3712_v36  ;;  %v4160_v22 = vsub.f32 %v2930_v30, %v3712_v36  ;;  %v2762_v16 = vpop.f32.mrf.mxu0 }
 0x671   :  { %8247 = vrcp.f32 %v4414_v21  ;;  %v5972_v42 = vadd.f32 %v5908_v50, %v5844_v32  ;;  %v2763_v26 = vadd.f32 %v2762_v16, %v10293_v25  ;;  %v3894_v61 = vmul.f32 1.442695, %v3776_v7  ;;  %v12418_v50 = vld [vmem:[#allocation142_spill] sm:$0xff] }
 0x672   :  { %v8240_v10 = vpop.eup %8239  ;;  %v7125_v40 = vpack.c.bf16 %v6035_v58, %v6034_v39  ;;  %v2931_v47 = vpop.f32.mrf.mxu1  ;;  %v4086_v27 = vmul.f32 1.442695, %v3968_v48  ;;  %v4278_v62 = vmul.f32 1.442695, %v4160_v22  ;;  %v12419_v6 = vunpack.c.l.bf16 %v12418_v50 }
 0x673   :  { %v5406_v24 = vpop.f32.mrf.mxu2  ;;  %v8242_v31 = vpop.eup %8241  ;;  %v5717_v38 = vmul.f32 %v8240_v10, %v12415_v60  ;;  %v2932_v43 = vadd.f32 %v2931_v47, %v2763_v26  ;;  %8249 = vpow2.f32 %v3894_v61  ;;  %v12422_v22 = vmax.f32 %v10209_v34, %v10221_v23 }
 0x674   :  { %v5407_v45 = vadd.f32 %v10953_v49, %v5406_v24  ;;  %v5575_v46 = vpop.f32.mrf.mxu3  ;;  %v8244_v57 = vpop.eup %8243  ;;  %7181 = vst [vmem:[#allocation11 + $0xc8] sm:$0xff] %v7125_v40   ;;  %v4351_v37 = vadd.f32 %v8242_v31, %v8240_v10  ;;  %v5781_v56 = vmul.f32 %v8242_v31, %v12416_v63  ;;  %8251 = vpow2.f32 %v4086_v27 }
 0x675   :  { %8253 = vpow2.f32 %v4278_v62  ;;  %v3713_v15 = vmax.f32 %v12417_v4, %v2932_v43 }
 0x676   :  { %v8246_v12 = vpop.eup %8245  ;;  %v5576_v39 = vadd.f32 %v5575_v46, %v5407_v45  ;;  %v4415_v33 = vadd.f32 %v8244_v57, %v4351_v37  ;;  %v5845_v2 = vadd.f32 %v5781_v56, %v5717_v38 }
 0x677   :  { %v8248_v3 = vpop.eup %8247  ;;  %v5909_v5 = vmul.f32 %v8246_v12, %v8244_v57  ;;  %v3777_v9 = vsub.f32 %v10201_v20, %v3713_v15  ;;  %v3969_v29 = vsub.f32 %v10207_v35, %v3713_v15  ;;  %v4161_v0 = vsub.f32 %v2932_v43, %v3713_v15 }
 0x678   :  { %v6036_v19 = vmul.f32 %v8248_v3, %v5972_v42  ;;  %8255 = vrcp.f32 %v4415_v33  ;;  %v2765_v13 = vpop.f32.mrf.mxu0  ;;  %v12420_v42 = vld [vmem:[#allocation144_spill] sm:$0xff] }
 0x679   :  { %v5973_v11 = vadd.f32 %v5909_v5, %v5845_v2  ;;  %8257 = vtanh.f32 %v5576_v39  ;;  %v2766_v52 = vadd.f32 %v2765_v13, %v10293_v25  ;;  %v8250_v18 = vpop.eup %8249  ;;  %v3896_v30 = vmul.f32 1.442695, %v3777_v9 }
 0x67a   :  { %v2934_v17 = vpop.f32.mrf.mxu1  ;;  %v4088_v41 = vmul.f32 1.442695, %v3969_v29  ;;  %v4280_v21 = vmul.f32 1.442695, %v4161_v0  ;;  %v8252_v32 = vpop.eup %8251  ;;  %v5718_v14 = vmul.f32 %v8250_v18, %v12419_v6  ;;  %v12421_v24 = vunpack.c.l.bf16 %v12420_v42 }
 0x67b   :  { %v5408_v51 = vpop.f32.mrf.mxu2  ;;  %v2935_v20 = vadd.f32 %v2934_v17, %v2766_v52  ;;  %v8254_v58 = vpop.eup %8253  ;;  %v4352_v35 = vadd.f32 %v8252_v32, %v8250_v18  ;;  %8259 = vpow2.f32 %v3896_v30  ;;  %v12424_v15 = vunpack.c.h.bf16 %v12420_v42 }
 0x67c   :  { %v5577_v59 = vpop.f32.mrf.mxu3  ;;  %v5409_v53 = vadd.f32 %v10953_v49, %v5408_v51  ;;  %v5782_v7 = vmul.f32 %v8252_v32, %v12421_v24  ;;  %8261 = vpow2.f32 %v4088_v41  ;;  %v12425_v9 = vmax.f32 %v10223_v1, %v10229_v55 }
 0x67d   :  { %v3714_v45 = vmax.f32 %v12422_v22, %v2935_v20  ;;  %v4416_v10 = vadd.f32 %v8254_v58, %v4352_v35  ;;  %8263 = vpow2.f32 %v4280_v21 }
 0x67e   :  { %v5578_v36 = vadd.f32 %v5577_v59, %v5409_v53  ;;  %v8256_v48 = vpop.eup %8255  ;;  %v5846_v40 = vadd.f32 %v5782_v7, %v5718_v14  ;;  %v12426_v7 = vld [vmem:[#allocation148_spill] sm:$0xff] }
 0x67f   :  { %v8258_v46 = vpop.eup %8257  ;;  %v6037_v16 = vmul.f32 %v8256_v48, %v5973_v11  ;;  %v3778_v47 = vsub.f32 %v10209_v34, %v3714_v45  ;;  %v3970_v31 = vsub.f32 %v10221_v23, %v3714_v45  ;;  %v4162_v61 = vsub.f32 %v2935_v20, %v3714_v45 }
 0x680   :  { %v5910_v26 = vmul.f32 %v8258_v46, %v8254_v58  ;;  %8265 = vtanh.f32 %v5578_v36  ;;  %v2767_v57 = vpop.f32.mrf.mxu0  ;;  %v12423_v23 = vunpack.c.h.bf16 %v12418_v50  ;;  %v12428_v46 = vld [vmem:[#allocation150_spill] sm:$0xff] }
 0x681   :  { %v7130_v38 = vpack.c.bf16 %v6037_v16, %v6036_v19  ;;  %8267 = vrcp.f32 %v4416_v10  ;;  %v3898_v63 = vmul.f32 1.442695, %v3778_v47  ;;  %v4090_v56 = vmul.f32 1.442695, %v3970_v31  ;;  %v8260_v39 = vpop.eup %8259 }
 0x682   :  { %v5974_v37 = vadd.f32 %v5910_v26, %v5846_v40  ;;  %v2768_v43 = vadd.f32 %v2767_v57, %v10293_v25  ;;  %v2936_v12 = vpop.f32.mrf.mxu1  ;;  %v4282_v3 = vmul.f32 1.442695, %v4162_v61  ;;  %v8262_v33 = vpop.eup %8261  ;;  %v5719_v2 = vmul.f32 %v8260_v39, %v12423_v23 }
 0x683   :  { %v5411_v60 = vpop.f32.mrf.mxu2  ;;  %7182 = vst [vmem:[#allocation11 + $0xd0] sm:$0xff] %v7130_v38   ;;  %8269 = vpow2.f32 %v3898_v63  ;;  %v8264_v19 = vpop.eup %8263  ;;  %v4353_v4 = vadd.f32 %v8262_v33, %v8260_v39  ;;  %v5783_v11 = vmul.f32 %v8262_v33, %v12424_v15  ;;  %v12429_v16 = vunpack.c.l.bf16 %v12428_v46 }
 0x684   :  { %v5412_v27 = vadd.f32 %v10953_v49, %v5411_v60  ;;  %v5580_v62 = vpop.f32.mrf.mxu3  ;;  %v2937_v5 = vadd.f32 %v2936_v12, %v2768_v43  ;;  %8271 = vpow2.f32 %v4090_v56  ;;  %v12430_v61 = vmax.f32 %v10231_v54, %v10243_v8 }
 0x685   :  { %8273 = vpow2.f32 %v4282_v3  ;;  %v4417_v59 = vadd.f32 %v8264_v19, %v4353_v4  ;;  %v5847_v13 = vadd.f32 %v5783_v11, %v5719_v2 }
 0x686   :  { %v5581_v34 = vadd.f32 %v5580_v62, %v5412_v27  ;;  %v8266_v51 = vpop.eup %8265  ;;  %v3715_v29 = vmax.f32 %v12425_v9, %v2937_v5  ;;  %v12432_v9 = vunpack.c.h.bf16 %v12428_v46 }
 0x687   :  { %v8268_v0 = vpop.eup %8267  ;;  %v5911_v53 = vmul.f32 %v8266_v51, %v8264_v19  ;;  %v12431_v19 = vunpack.c.h.bf16 %v12426_v7 }
 0x688   :  { %8275 = vtanh.f32 %v5581_v34  ;;  %v6038_v52 = vmul.f32 %v8268_v0, %v5974_v37  ;;  %v3779_v17 = vsub.f32 %v10223_v1, %v3715_v29  ;;  %v3971_v18 = vsub.f32 %v10229_v55, %v3715_v29  ;;  %v2770_v6 = vpop.f32.mrf.mxu0 }
 0x689   :  { %v4163_v30 = vsub.f32 %v2937_v5, %v3715_v29  ;;  %8277 = vrcp.f32 %v4417_v59  ;;  %v5975_v21 = vadd.f32 %v5911_v53, %v5847_v13  ;;  %v8270_v14 = vpop.eup %8269  ;;  %v2771_v35 = vadd.f32 %v2770_v6, %v10293_v25 }
 0x68a   :  { %v3900_v36 = vmul.f32 1.442695, %v3779_v17  ;;  %v4092_v20 = vmul.f32 1.442695, %v3971_v18  ;;  %v2939_v42 = vpop.f32.mrf.mxu1  ;;  %v8272_v24 = vpop.eup %8271  ;;  %v12427_v1 = vunpack.c.l.bf16 %v12426_v7 }
 0x68b   :  { %v5413_v41 = vpop.f32.mrf.mxu2  ;;  %v4284_v58 = vmul.f32 1.442695, %v4163_v30  ;;  %v8274_v22 = vpop.eup %8273  ;;  %v4354_v45 = vadd.f32 %v8272_v24, %v8270_v14  ;;  %v5784_v10 = vmul.f32 %v8272_v24, %v12429_v16  ;;  %v2940_v40 = vadd.f32 %v2939_v42, %v2771_v35 }
 0x68c   :  { %v5414_v32 = vadd.f32 %v10953_v49, %v5413_v41  ;;  %v5582_v50 = vpop.f32.mrf.mxu3  ;;  %v5720_v48 = vmul.f32 %v8270_v14, %v12427_v1  ;;  %8279 = vpow2.f32 %v3900_v36  ;;  %v12433_v41 = vmax.f32 %v10245_v28, %v10251_v44 }
 0x68d   :  { %8281 = vpow2.f32 %v4092_v20  ;;  %v4418_v47 = vadd.f32 %v8274_v22, %v4354_v45  ;;  %v3716_v27 = vmax.f32 %v12430_v61, %v2940_v40  ;;  %v12434_v45 = vld [vmem:[#allocation152_spill] sm:$0xff] }
 0x68e   :  { %v5583_v55 = vadd.f32 %v5582_v50, %v5414_v32  ;;  %v8276_v26 = vpop.eup %8275  ;;  %v5848_v31 = vadd.f32 %v5784_v10, %v5720_v48  ;;  %8283 = vpow2.f32 %v4284_v58  ;;  %v12435_v46 = vunpack.c.l.bf16 %v12434_v45 }
 0x68f   :  { %v5912_v60 = vmul.f32 %v8276_v26, %v8274_v22  ;;  %v8278_v38 = vpop.eup %8277  ;;  %v3780_v63 = vsub.f32 %v10231_v54, %v3716_v27  ;;  %v3972_v56 = vsub.f32 %v10243_v8, %v3716_v27  ;;  %v4164_v43 = vsub.f32 %v2940_v40, %v3716_v27  ;;  %v12436_v26 = vld [vmem:[#allocation156_spill] sm:$0xff] }
 0x690   :  { %8285 = vtanh.f32 %v5583_v55  ;;  %v6039_v62 = vmul.f32 %v8278_v38, %v5975_v21  ;;  %v2772_v3 = vpop.f32.mrf.mxu0  ;;  %v12439_v38 = vld [vmem:[#allocation256_spill] sm:$0xff] }
 0x691   :  { %8287 = vrcp.f32 %v4418_v47  ;;  %v5976_v57 = vadd.f32 %v5912_v60, %v5848_v31  ;;  %v2773_v23 = vadd.f32 %v2772_v3, %v10293_v25  ;;  %v3902_v15 = vmul.f32 1.442695, %v3780_v63  ;;  %v12438_v60 = vld [vmem:[#allocation255_spill] sm:$0xff] }
 0x692   :  { %v8280_v34 = vpop.eup %8279  ;;  %v7135_v33 = vpack.c.bf16 %v6039_v62, %v6038_v52  ;;  %v2941_v2 = vpop.f32.mrf.mxu1  ;;  %v4094_v11 = vmul.f32 1.442695, %v3972_v56  ;;  %v4286_v51 = vmul.f32 1.442695, %v4164_v43  ;;  %v12437_v47 = vunpack.c.l.bf16 %v12436_v26 }
 0x693   :  { %v5416_v37 = vpop.f32.mrf.mxu2  ;;  %v8282_v5 = vpop.eup %8281  ;;  %v5721_v4 = vmul.f32 %v8280_v34, %v12431_v19  ;;  %v2942_v0 = vadd.f32 %v2941_v2, %v2773_v23  ;;  %8289 = vpow2.f32 %v3902_v15  ;;  %v12440_v61 = vmax.f32 %v12438_v60, %v12439_v38 }
 0x694   :  { %v5417_v12 = vadd.f32 %v10953_v49, %v5416_v37  ;;  %v5585_v39 = vpop.f32.mrf.mxu3  ;;  %v8284_v54 = vpop.eup %8283  ;;  %7183 = vst [vmem:[#allocation11 + $0xd8] sm:$0xff] %v7135_v33   ;;  %v4355_v8 = vadd.f32 %v8282_v5, %v8280_v34  ;;  %v5785_v29 = vmul.f32 %v8282_v5, %v12432_v9  ;;  %8291 = vpow2.f32 %v4094_v11  ;;  %v11129_v33 = vld [vmem:[%s11184_s5] ss:$0 sm:$0xff]  ;;  %s8646_s5 = smov [#allocation11]  }
 0x695   :  { %8293 = vpow2.f32 %v4286_v51  ;;  %v3717_v21 = vmax.f32 %v12433_v41, %v2942_v0  ;;  %v12443_v41 = vld [vmem:[#allocation257_spill] sm:$0xff]  ;;  %s6180_s9 = sshll.u32 %s8646_s5, 4  ;;  %s6181_s9 = int_to_ptr.vmem [resolvable:$true] %s6180_s9 }
 0x696   :  { %v8286_v59 = vpop.eup %8285  ;;  %v5586_v13 = vadd.f32 %v5585_v39, %v5417_v12  ;;  %v4419_v52 = vadd.f32 %v8284_v54, %v4355_v8  ;;  %v5849_v17 = vadd.f32 %v5785_v29, %v5721_v4 }
 0x697   :  { %v8288_v53 = vpop.eup %8287  ;;  %v5913_v18 = vmul.f32 %v8286_v59, %v8284_v54  ;;  %v3781_v6 = vsub.f32 %v10245_v28, %v3717_v21  ;;  %v3973_v14 = vsub.f32 %v10251_v44, %v3717_v21  ;;  %v4165_v36 = vsub.f32 %v2942_v0, %v3717_v21  ;;  %v12444_v21 = vld [vmem:[#allocation258_spill] sm:$0xff] }
 0x698   :  { %v6040_v30 = vmul.f32 %v8288_v53, %v5976_v57  ;;  %8295 = vrcp.f32 %v4419_v52  ;;  %v2775_v58 = vpop.f32.mrf.mxu0  ;;  %v12441_v0 = vunpack.c.h.bf16 %v12434_v45 }
 0x699   :  { %v5977_v32 = vadd.f32 %v5913_v18, %v5849_v17  ;;  %8297 = vtanh.f32 %v5586_v13  ;;  %v2776_v42 = vadd.f32 %v2775_v58, %v10293_v25  ;;  %v8290_v7 = vpop.eup %8289  ;;  %v3904_v1 = vmul.f32 1.442695, %v3781_v6 }
 0x69a   :  { %v2944_v24 = vpop.f32.mrf.mxu1  ;;  %v4096_v48 = vmul.f32 1.442695, %v3973_v14  ;;  %v4288_v55 = vmul.f32 1.442695, %v4165_v36  ;;  %v8292_v22 = vpop.eup %8291  ;;  %v5722_v16 = vmul.f32 %v8290_v7, %v12435_v46  ;;  %v12442_v17 = vunpack.c.h.bf16 %v12436_v26  ;;  %v12446_v26 = vld [vmem:[#allocation160_spill] sm:$0xff] }
 0x69b   :  { %v5418_v50 = vpop.f32.mrf.mxu2  ;;  %v2945_v28 = vadd.f32 %v2944_v24, %v2776_v42  ;;  %v8294_v40 = vpop.eup %8293  ;;  %v4356_v44 = vadd.f32 %v8292_v22, %v8290_v7  ;;  %v5786_v31 = vmul.f32 %v8292_v22, %v12437_v47  ;;  %8299 = vpow2.f32 %v3904_v1 }
 0x69c   :  { %v5587_v20 = vpop.f32.mrf.mxu3  ;;  %v5419_v35 = vadd.f32 %v10953_v49, %v5418_v50  ;;  %8301 = vpow2.f32 %v4096_v48  ;;  %v12447_v47 = vunpack.c.l.bf16 %v12446_v26 }
 0x69d   :  { %v3718_v27 = vmax.f32 %v12440_v61, %v2945_v28  ;;  %v4420_v37 = vadd.f32 %v8294_v40, %v4356_v44  ;;  %v5850_v63 = vadd.f32 %v5786_v31, %v5722_v16  ;;  %8303 = vpow2.f32 %v4288_v55  ;;  %v12448_v61 = vld [vmem:[#allocation162_spill] sm:$0xff] }
 0x69e   :  { %v5588_v10 = vadd.f32 %v5587_v20, %v5419_v35  ;;  %v8296_v49 = vpop.eup %8295 }
 0x69f   :  { %v8298_v62 = vpop.eup %8297  ;;  %v6041_v57 = vmul.f32 %v8296_v49, %v5977_v32  ;;  %v3782_v43 = vsub.f32 %v12438_v60, %v3718_v27  ;;  %v3974_v12 = vsub.f32 %v12439_v38, %v3718_v27  ;;  %v4166_v34 = vsub.f32 %v2945_v28, %v3718_v27 }
 0x6a0   :  { %v5914_v56 = vmul.f32 %v8298_v62, %v8294_v40  ;;  %8305 = vtanh.f32 %v5588_v10  ;;  %v2777_v5 = vpop.f32.mrf.mxu0  ;;  %v12445_v32 = vmax.f32 %v12443_v41, %v12444_v21  ;;  %v12449_v27 = vunpack.c.l.bf16 %v12448_v61 }
 0x6a1   :  { %v7140_v3 = vpack.c.bf16 %v6041_v57, %v6040_v30  ;;  %8307 = vrcp.f32 %v4420_v37  ;;  %v3906_v4 = vmul.f32 1.442695, %v3782_v43  ;;  %v4098_v15 = vmul.f32 1.442695, %v3974_v12  ;;  %v8300_v54 = vpop.eup %8299 }
 0x6a2   :  { %v5978_v19 = vadd.f32 %v5914_v56, %v5850_v63  ;;  %v2778_v11 = vadd.f32 %v2777_v5, %v10293_v25  ;;  %v2946_v51 = vpop.f32.mrf.mxu1  ;;  %v4290_v8 = vmul.f32 1.442695, %v4166_v34  ;;  %v8302_v29 = vpop.eup %8301  ;;  %v5723_v59 = vmul.f32 %v8300_v54, %v12441_v0 }
 0x6a3   :  { %v5421_v39 = vpop.f32.mrf.mxu2  ;;  %7184 = vst [vmem:[#allocation11 + $0xe0] sm:$0xff] %v7140_v3   ;;  %8309 = vpow2.f32 %v3906_v4  ;;  %v8304_v53 = vpop.eup %8303  ;;  %v4357_v52 = vadd.f32 %v8302_v29, %v8300_v54  ;;  %v5787_v18 = vmul.f32 %v8302_v29, %v12442_v17  ;;  %v12451_v3 = vld [vmem:[#allocation260_spill] sm:$0xff] }
 0x6a4   :  { %v5422_v23 = vadd.f32 %v11129_v33, %v5421_v39  ;;  %v5590_v2 = vpop.f32.mrf.mxu3  ;;  %v2947_v13 = vadd.f32 %v2946_v51, %v2778_v11  ;;  %8311 = vpow2.f32 %v4098_v15  ;;  %v12450_v39 = vld [vmem:[#allocation259_spill] sm:$0xff] }
 0x6a5   :  { %8313 = vpow2.f32 %v4290_v8  ;;  %v4421_v14 = vadd.f32 %v8304_v53, %v4357_v52  ;;  %v5851_v36 = vadd.f32 %v5787_v18, %v5723_v59  ;;  %v12452_v34 = vmax.f32 %v12450_v39, %v12451_v3 }
 0x6a6   :  { %v5591_v9 = vadd.f32 %v5590_v2, %v5422_v23  ;;  %v8306_v30 = vpop.eup %8305  ;;  %v3719_v50 = vmax.f32 %v12445_v32, %v2947_v13  ;;  %v12454_v32 = vunpack.c.h.bf16 %v12448_v61 }
 0x6a7   :  { %v8308_v6 = vpop.eup %8307  ;;  %v5915_v20 = vmul.f32 %v8306_v30, %v8304_v53 }
 0x6a8   :  { %8315 = vtanh.f32 %v5591_v9  ;;  %v6042_v58 = vmul.f32 %v8308_v6, %v5978_v19  ;;  %v3783_v35 = vsub.f32 %v12443_v41, %v3719_v50  ;;  %v3975_v42 = vsub.f32 %v12444_v21, %v3719_v50  ;;  %v2780_v22 = vpop.f32.mrf.mxu0 }
 0x6a9   :  { %v4167_v24 = vsub.f32 %v2947_v13, %v3719_v50  ;;  %8317 = vrcp.f32 %v4421_v14  ;;  %v5979_v1 = vadd.f32 %v5915_v20, %v5851_v36  ;;  %v8310_v45 = vpop.eup %8309  ;;  %v2781_v28 = vadd.f32 %v2780_v22, %v10293_v25 }
 0x6aa   :  { %v3908_v46 = vmul.f32 1.442695, %v3783_v35  ;;  %v4100_v16 = vmul.f32 1.442695, %v3975_v42  ;;  %v2949_v40 = vpop.f32.mrf.mxu1  ;;  %v8312_v44 = vpop.eup %8311  ;;  %v5724_v31 = vmul.f32 %v8310_v45, %v12447_v47  ;;  %v12453_v13 = vunpack.c.h.bf16 %v12446_v26 }
 0x6ab   :  { %v5423_v7 = vpop.f32.mrf.mxu2  ;;  %v4292_v10 = vmul.f32 1.442695, %v4167_v24  ;;  %v8314_v60 = vpop.eup %8313  ;;  %v4358_v38 = vadd.f32 %v8312_v44, %v8310_v45  ;;  %v5788_v62 = vmul.f32 %v8312_v44, %v12449_v27  ;;  %v2950_v57 = vadd.f32 %v2949_v40, %v2781_v28  ;;  %v12455_v24 = vld [vmem:[#allocation261_spill] sm:$0xff] }
 0x6ac   :  { %v5424_v48 = vadd.f32 %v11129_v33, %v5423_v7  ;;  %v5592_v55 = vpop.f32.mrf.mxu3  ;;  %8319 = vpow2.f32 %v3908_v46  ;;  %v12456_v7 = vld [vmem:[#allocation262_spill] sm:$0xff] }
 0x6ad   :  { %8321 = vpow2.f32 %v4100_v16  ;;  %v4422_v63 = vadd.f32 %v8314_v60, %v4358_v38  ;;  %v5852_v56 = vadd.f32 %v5788_v62, %v5724_v31  ;;  %v3720_v23 = vmax.f32 %v12452_v34, %v2950_v57 }
 0x6ae   :  { %v5593_v49 = vadd.f32 %v5592_v55, %v5424_v48  ;;  %v8316_v37 = vpop.eup %8315  ;;  %8323 = vpow2.f32 %v4292_v10 }
 0x6af   :  { %v5916_v43 = vmul.f32 %v8316_v37, %v8314_v60  ;;  %v8318_v12 = vpop.eup %8317  ;;  %v3784_v4 = vsub.f32 %v12450_v39, %v3720_v23  ;;  %v3976_v15 = vsub.f32 %v12451_v3, %v3720_v23  ;;  %v4168_v11 = vsub.f32 %v2950_v57, %v3720_v23  ;;  %v12460_v57 = vld [vmem:[#allocation168_spill] sm:$0xff] }
 0x6b0   :  { %8325 = vtanh.f32 %v5593_v49  ;;  %v6043_v2 = vmul.f32 %v8318_v12, %v5979_v1  ;;  %v2782_v8 = vpop.f32.mrf.mxu0  ;;  %v12457_v1 = vmax.f32 %v12455_v24, %v12456_v7  ;;  %v12458_v49 = vld [vmem:[#allocation166_spill] sm:$0xff]  ;;  %v12461_v37 = vunpack.c.l.bf16 %v12460_v57 }
 0x6b1   :  { %8327 = vrcp.f32 %v4422_v63  ;;  %v5980_v5 = vadd.f32 %v5916_v43, %v5852_v56  ;;  %v2783_v0 = vadd.f32 %v2782_v8, %v10293_v25  ;;  %v3910_v52 = vmul.f32 1.442695, %v3784_v4 }
 0x6b2   :  { %v8320_v9 = vpop.eup %8319  ;;  %v7145_v29 = vpack.c.bf16 %v6043_v2, %v6042_v58  ;;  %v4102_v17 = vmul.f32 1.442695, %v3976_v15  ;;  %v4294_v18 = vmul.f32 1.442695, %v4168_v11  ;;  %v2951_v30 = vpop.f32.mrf.mxu1  ;;  %v12459_v60 = vunpack.c.l.bf16 %v12458_v49 }
 0x6b3   :  { %v5426_v19 = vpop.f32.mrf.mxu2  ;;  %v8322_v59 = vpop.eup %8321  ;;  %v5725_v53 = vmul.f32 %v8320_v9, %v12453_v13  ;;  %v2952_v6 = vadd.f32 %v2951_v30, %v2783_v0  ;;  %8329 = vpow2.f32 %v3910_v52 }
 0x6b4   :  { %v5427_v51 = vadd.f32 %v11129_v33, %v5426_v19  ;;  %v5595_v54 = vpop.f32.mrf.mxu3  ;;  %v8324_v41 = vpop.eup %8323  ;;  %7185 = vst [vmem:[#allocation11 + $0xe8] sm:$0xff] %v7145_v29   ;;  %v4359_v21 = vadd.f32 %v8322_v59, %v8320_v9  ;;  %v5789_v50 = vmul.f32 %v8322_v59, %v12454_v32  ;;  %8331 = vpow2.f32 %v4102_v17 }
 0x6b5   :  { %8333 = vpow2.f32 %v4294_v18  ;;  %v3721_v48 = vmax.f32 %v12457_v1, %v2952_v6  ;;  %v12462_v19 = vunpack.c.h.bf16 %v12458_v49 }
 0x6b6   :  { %v8326_v14 = vpop.eup %8325  ;;  %v5596_v36 = vadd.f32 %v5595_v54, %v5427_v51  ;;  %v4423_v25 = vadd.f32 %v8324_v41, %v4359_v21  ;;  %v5853_v58 = vadd.f32 %v5789_v50, %v5725_v53  ;;  %v12463_v51 = vunpack.c.h.bf16 %v12460_v57 }
 0x6b7   :  { %v8328_v20 = vpop.eup %8327  ;;  %v5917_v35 = vmul.f32 %v8326_v14, %v8324_v41  ;;  %v3785_v45 = vsub.f32 %v12455_v24, %v3721_v48  ;;  %v3977_v46 = vsub.f32 %v12456_v7, %v3721_v48  ;;  %v4169_v16 = vsub.f32 %v2952_v6, %v3721_v48 }
 0x6b8   :  { %v6044_v42 = vmul.f32 %v8328_v20, %v5980_v5  ;;  %8335 = vrcp.f32 %v4423_v25 }
 0x6b9   :  { %v5981_v55 = vadd.f32 %v5917_v35, %v5853_v58  ;;  %8337 = vtanh.f32 %v5596_v36  ;;  %v8330_v28 = vpop.eup %8329  ;;  %v3912_v40 = vmul.f32 1.442695, %v3785_v45  ;;  %v4104_v44 = vmul.f32 1.442695, %v3977_v46 }
 0x6ba   :  { %v4296_v26 = vmul.f32 1.442695, %v4169_v16  ;;  %v8332_v31 = vpop.eup %8331  ;;  %v5726_v38 = vmul.f32 %v8330_v28, %v12459_v60 }
 0x6bb   :  { %v5428_v22 = vpop.f32.mrf.mxu2  ;;  %v8334_v27 = vpop.eup %8333  ;;  %v4360_v62 = vadd.f32 %v8332_v31, %v8330_v28  ;;  %v5790_v63 = vmul.f32 %v8332_v31, %v12461_v37  ;;  %8339 = vpow2.f32 %v3912_v40 }
 0x6bc   :  { %v5429_v10 = vadd.f32 %v11129_v33, %v5428_v22  ;;  %v5597_v47 = vpop.f32.mrf.mxu3  ;;  %8341 = vpow2.f32 %v4104_v44 }
 0x6bd   :  { %v4424_v12 = vadd.f32 %v8334_v27, %v4360_v62  ;;  %v5854_v39 = vadd.f32 %v5790_v63, %v5726_v38  ;;  %8343 = vpow2.f32 %v4296_v26 }
 0x6be   :  { %v5598_v61 = vadd.f32 %v5597_v47, %v5429_v10  ;;  %v8336_v56 = vpop.eup %8335 }
 0x6bf   :  { %v8338_v43 = vpop.eup %8337  ;;  %v6045_v33 = vmul.f32 %v8336_v56, %v5981_v55 }
 0x6c0   :  { %v5918_v3 = vmul.f32 %v8338_v43, %v8334_v27  ;;  %8345 = vtanh.f32 %v5598_v61 }
 0x6c1   :  { %v7150_v34 = vpack.c.bf16 %v6045_v33, %v6044_v42  ;;  %8347 = vrcp.f32 %v4424_v12  ;;  %v8340_v2 = vpop.eup %8339 }
 0x6c2   :  { %v5982_v23 = vadd.f32 %v5918_v3, %v5854_v39  ;;  %v8342_v5 = vpop.eup %8341  ;;  %v5727_v4 = vmul.f32 %v8340_v2, %v12462_v19 }
 0x6c3   :  { %7186 = vst [vmem:[#allocation11 + $0xf0] sm:$0xff] %v7150_v34   ;;  %v8344_v15 = vpop.eup %8343  ;;  %v4361_v11 = vadd.f32 %v8342_v5, %v8340_v2  ;;  %v5791_v54 = vmul.f32 %v8342_v5, %v12463_v51 }
 0x6c5   :  { %v4425_v29 = vadd.f32 %v8344_v15, %v4361_v11  ;;  %v5855_v0 = vadd.f32 %v5791_v54, %v5727_v4 }
 0x6c6   :  { %v8346_v8 = vpop.eup %8345 }
 0x6c7   :  { %v8348_v9 = vpop.eup %8347  ;;  %v5919_v59 = vmul.f32 %v8346_v8, %v8344_v15  ;;  %8349 = vrcp.f32 %v4425_v29 }
 0x6c8   :  { %v6046_v13 = vmul.f32 %v8348_v9, %v5982_v23 }
 0x6c9   :  { %v5983_v53 = vadd.f32 %v5919_v59, %v5855_v0 }
 0x6cd   :  { %v8350_v52 = vpop.eup %8349 }
 0x6ce   :  { %v6047_v17 = vmul.f32 %v8350_v52, %v5983_v53 }
 0x6d0   :  { %v7155_v18 = vpack.c.bf16 %v6047_v17, %v6046_v13 }
 0x6d2   :  { %7187 = vst [vmem:[#allocation11 + $0xf8] sm:$0xff] %v7155_v18  }
 0x6d3   :  { %6188 = dma.vmem_to_hbm [thread:$0]  %s6181_s9, 4096, %s6183_s11, [#allocation4], %s8638_s29, %s8638_s29, %s8639_s30  }
 0x6d4   :  { %8635 = dma.done.wait [#allocation4], 4096  }
 0x6d5   :  { %8636 = vsyncadd [#allocation4], 4294963200 }
 0x6d6   :  { %6193 = vsyncpa [#allocation3], 1 }
 0x6d7   :  { %6194 = vsyncpa [#allocation6], 1 }
 0x6d8   :  { %6195 = vsyncpa [#allocation9], 1 }
 0x6d9   :  { %6196 = vsyncpa [#allocation4], 1 }

</bundles_post_ra>
